<compile_context>
chip_gen: v7x
topology: tpu7x:2x2x1
jax: 0.10.0
libtpu: 0.0.40
codegen_flags: <defaults>
</compile_context>

<pallas_src>
import math
from functools import partial

import jax
import jax.numpy as jnp
import numpy as np
from jax.experimental import pallas as pl
from jax.experimental.pallas import tpu as pltpu

_LN_EPS = 1e-6                       # timm/DINO ViT LayerNorm eps
_VMEM_LIMIT = 32 * 1024 * 1024       # explicit scoped-VMEM budget (safe on v5e/v6e/v7x)
_INV_SQRT2 = 1.0 / math.sqrt(2.0)


# ----------------------------- in-kernel math helpers -----------------------------

def _erf(x):
    # Abramowitz & Stegun 7.1.26 rational approximation, |err| <= 1.5e-7 (f32-exact
    # for our purposes).  Uses only VPU ops + one EUP exp.
    a1, a2, a3, a4, a5 = 0.254829592, -0.284496736, 1.421413741, -1.453152027, 1.061405429
    p = 0.3275911
    sgn = jnp.where(x >= 0.0, 1.0, -1.0)
    ax = jnp.abs(x)
    t = 1.0 / (1.0 + p * ax)
    poly = ((((a5 * t + a4) * t + a3) * t + a2) * t + a1) * t
    return sgn * (1.0 - poly * jnp.exp(-ax * ax))


def _gelu_exact(x):
    # nn.GELU() default = exact (erf) GELU.
    return 0.5 * x * (1.0 + _erf(x * _INV_SQRT2))


def _layernorm(x, g, b):
    # Single-pass variance: E[x^2] - E[x]^2 (perf-review item), biased, eps=1e-6.
    m = jnp.mean(x, axis=-1, keepdims=True)
    v = jnp.maximum(jnp.mean(x * x, axis=-1, keepdims=True) - m * m, 0.0)
    return (x - m) * jax.lax.rsqrt(v + _LN_EPS) * g + b


# ---------------------------------- Pallas kernels ---------------------------------

def _prepare_tokens_kernel(patches_ref, w_ref, b_ref, cls_ref, pos_ref, out_ref):
    # patches_ref: (Np, C*P*P) im2col'd patches of one sample (leading batch dim squeezed)
    # w_ref: (C*P*P, D) patch-embed conv weight as a flat matmul; b_ref/cls_ref: (1, D)
    # pos_ref: (Ntok, D); out_ref: (Ntok, D)
    emb = jnp.dot(patches_ref[...], w_ref[...],
                  preferred_element_type=jnp.float32) + b_ref[...]        # (Np, D)
    out_ref[0:1, :] = cls_ref[...] + pos_ref[0:1, :]                      # CLS token row
    out_ref[1:, :] = emb + pos_ref[1:, :]                                 # patch tokens


def _vit_block_kernel(x_ref, ln1g_ref, ln1b_ref, wqkv_ref, bqkv_ref,
                      wproj_ref, bproj_ref, ln2g_ref, ln2b_ref,
                      wfc1_ref, bfc1_ref, wfc2_ref, bfc2_ref,
                      out_ref, *, num_heads):
    # One pre-norm ViT block (MHSA + MLP, residuals), fully fused for one sample.
    x = x_ref[...]                                    # (Ntok, D)
    n_tok, dim = x.shape
    head_dim = dim // num_heads
    scale = 1.0 / math.sqrt(head_dim)

    # --- multi-head self-attention ---
    h = _layernorm(x, ln1g_ref[...], ln1b_ref[...])
    qkv = jnp.dot(h, wqkv_ref[...], preferred_element_type=jnp.float32) + bqkv_ref[...]

    attn_out = None
    for hi in range(num_heads):                       # static unroll; head_dim=128 keeps
        lo = hi * head_dim                            # every lane slice vreg-aligned
        qh = qkv[:, lo:lo + head_dim]
        kh = qkv[:, dim + lo:dim + lo + head_dim]
        vh = qkv[:, 2 * dim + lo:2 * dim + lo + head_dim]
        s = jnp.einsum('qd,kd->qk', qh, kh, preferred_element_type=jnp.float32) * scale
        s = s - jnp.max(s, axis=-1, keepdims=True)
        e = jnp.exp(s)
        a = e / jnp.sum(e, axis=-1, keepdims=True)
        o_h = jnp.dot(a, vh, preferred_element_type=jnp.float32)          # (Ntok, hd)
        # fold the output projection per head (row slice of Wproj) -> no lane concat
        contrib = jnp.dot(o_h, wproj_ref[lo:lo + head_dim, :],
                          preferred_element_type=jnp.float32)
        attn_out = contrib if attn_out is None else attn_out + contrib
    x = x + attn_out + bproj_ref[...]

    # --- MLP ---
    h2 = _layernorm(x, ln2g_ref[...], ln2b_ref[...])
    m = jnp.dot(h2, wfc1_ref[...], preferred_element_type=jnp.float32) + bfc1_ref[...]
    m = _gelu_exact(m)
    x = x + jnp.dot(m, wfc2_ref[...], preferred_element_type=jnp.float32) + bfc2_ref[...]

    out_ref[...] = x


def _final_norm_kernel(x_ref, g_ref, b_ref, out_ref):
    # contrastive_branch.norm applied to the CLS token only (LayerNorm is per-token,
    # and the eval forward returns co_embedding[:, 0]).
    cls = x_ref[...][0:1, :]                          # (1, D)
    out_ref[...] = _layernorm(cls, g_ref[...], b_ref[...])


# ------------------------------- pallas_call wrappers -------------------------------

def _cparams():
    return pltpu.CompilerParams(dimension_semantics=("parallel",),
                                vmem_limit_bytes=_VMEM_LIMIT)


def _rep_spec(shape):
    """Replicated (VMEM-resident) parameter block: constant index_map."""
    zeros = (0,) * len(shape)
    return pl.BlockSpec(tuple(shape), lambda b: zeros)


def _per_sample_spec(shape):
    """(B, ...) array tiled per grid step with the batch dim squeezed out."""
    rest = tuple(shape[1:])
    return pl.BlockSpec((None,) + rest, lambda b: (b,) + (0,) * len(rest))


def _prepare_tokens_call(patches, params):
    B, n_patch, cpp = patches.shape
    dim = params['patch_w'].shape[1]
    n_tok = params['pos'].shape[0]
    return pl.pallas_call(
        _prepare_tokens_kernel,
        out_shape=jax.ShapeDtypeStruct((B, n_tok, dim), jnp.float32),
        grid_spec=pltpu.PrefetchScalarGridSpec(
            num_scalar_prefetch=0, grid=(B,),
            in_specs=[_per_sample_spec(patches.shape),
                      _rep_spec(params['patch_w'].shape),
                      _rep_spec(params['patch_b'].shape),
                      _rep_spec(params['cls'].shape),
                      _rep_spec(params['pos'].shape)],
            out_specs=pl.BlockSpec((None, n_tok, dim), lambda b: (b, 0, 0))),
        compiler_params=_cparams(),
    )(patches, params['patch_w'], params['patch_b'], params['cls'], params['pos'])


def _vit_block_call(x, blk, *, num_heads):
    B, n_tok, dim = x.shape
    args = (x, blk['ln1_g'], blk['ln1_b'], blk['wqkv'], blk['bqkv'],
            blk['wproj'], blk['bproj'], blk['ln2_g'], blk['ln2_b'],
            blk['wfc1'], blk['bfc1'], blk['wfc2'], blk['bfc2'])
    in_specs = [_per_sample_spec(x.shape)] + [_rep_spec(a.shape) for a in args[1:]]
    return pl.pallas_call(
        partial(_vit_block_kernel, num_heads=num_heads),
        out_shape=jax.ShapeDtypeStruct((B, n_tok, dim), jnp.float32),
        grid_spec=pltpu.PrefetchScalarGridSpec(
            num_scalar_prefetch=0, grid=(B,),
            in_specs=in_specs,
            out_specs=pl.BlockSpec((None, n_tok, dim), lambda b: (b, 0, 0))),
        compiler_params=_cparams(),
    )(*args)


def _final_norm_call(x, params):
    B, n_tok, dim = x.shape
    out = pl.pallas_call(
        _final_norm_kernel,
        out_shape=jax.ShapeDtypeStruct((B, 1, dim), jnp.float32),
        grid_spec=pltpu.PrefetchScalarGridSpec(
            num_scalar_prefetch=0, grid=(B,),
            in_specs=[_per_sample_spec(x.shape),
                      _rep_spec(params['ln_f_g'].shape),
                      _rep_spec(params['ln_f_b'].shape)],
            out_specs=pl.BlockSpec((None, 1, dim), lambda b: (b, 0, 0))),
        compiler_params=_cparams(),
    )(x, params['ln_f_g'], params['ln_f_b'])
    return out[:, 0, :]                               # (B, D) lane-dense output


# ----------------------------------- forward pass -----------------------------------

def _extract_patches(x, patch):
    """Im2col for the non-overlapping PxP patch-embed conv: (B,C,H,W) -> (B, Np, C*P*P).

    Pure layout plumbing (one-time, matches Conv2d weight.reshape(D,-1) ordering and
    timm's .flatten(2).transpose(1,2)); the matmul itself runs in the Pallas kernel.
    """
    B, C, H, W = x.shape
    x = x.reshape(B, C, H // patch, patch, W // patch, patch)
    x = jnp.transpose(x, (0, 2, 4, 1, 3, 5))          # (B, H/P, W/P, C, P, P)
    return x.reshape(B, (H // patch) * (W // patch), C * patch * patch)


def attribute_transformer13_forward(params, x, *, patch, num_heads):
    """Eval-mode AttributeTransformer13 forward: returns co_embedding_out = LN(x)[:, 0]."""
    patches = _extract_patches(x, patch)
    tokens = _prepare_tokens_call(patches, params)    # prepare_tokens (cls + pos_embed)
    # bottom blocks (frozen feature_extractor) followed by top blocks (contrastive
    # branch): the grad_from_block split only changes which params are trainable,
    # the forward math is simply sequential blocks.
    for blk in params['blocks']:
        tokens = _vit_block_call(tokens, blk, num_heads=num_heads)
    return _final_norm_call(tokens, params)


# -------------------------- pure-JAX reference (correctness) ------------------------

def _reference_forward(params, x, *, patch, num_heads):
    B = x.shape[0]
    dim = params['patch_w'].shape[1]
    hd = dim // num_heads
    scale = 1.0 / math.sqrt(hd)

    patches = _extract_patches(x, patch)
    emb = patches @ params['patch_w'] + params['patch_b']
    cls = jnp.broadcast_to(params['cls'][None], (B, 1, dim))
    t = jnp.concatenate([cls, emb], axis=1) + params['pos'][None]

    def ln(z, g, b):
        m = jnp.mean(z, axis=-1, keepdims=True)
        v = jnp.mean((z - m) ** 2, axis=-1, keepdims=True)
        return (z - m) / jnp.sqrt(v + _LN_EPS) * g + b

    def heads(z):
        return z.reshape(B, -1, num_heads, hd).transpose(0, 2, 1, 3)

    for blk in params['blocks']:
        h = ln(t, blk['ln1_g'], blk['ln1_b'])
        qkv = h @ blk['wqkv'] + blk['bqkv']
        q, k, v = jnp.split(qkv, 3, axis=-1)
        qh, kh, vh = heads(q), heads(k), heads(v)
        att = jax.nn.softmax(jnp.einsum('bhqd,bhkd->bhqk', qh, kh) * scale, axis=-1)
        o = jnp.einsum('bhqk,bhkd->bhqd', att, vh).transpose(0, 2, 1, 3).reshape(B, -1, dim)
        t = t + o @ blk['wproj'] + blk['bproj']
        h2 = ln(t, blk['ln2_g'], blk['ln2_b'])
        m = jax.nn.gelu(h2 @ blk['wfc1'] + blk['bfc1'], approximate=False)
        t = t + m @ blk['wfc2'] + blk['bfc2']
    t = ln(t, params['ln_f_g'], params['ln_f_b'])
    return t[:, 0]


# -------------------------------- synthetic parameters ------------------------------

def init_params(key, *, in_chans, img, patch, dim, depth, mlp_hidden):
    n_patches = (img // patch) ** 2
    n_tokens = n_patches + 1
    cpp = in_chans * patch * patch
    keys = jax.random.split(key, 6 + depth)

    def nrm(k, shape, scale):
        return scale * jax.random.normal(k, shape, jnp.float32)

    params = {
        # patch_embed Conv2d(in_chans, dim, P, P) weight stored as (C*P*P, D) = w.reshape(D,-1).T
        'patch_w': nrm(keys[0], (cpp, dim), 1.0 / math.sqrt(cpp)),
        'patch_b': nrm(keys[1], (1, dim), 0.02),
        'cls':     nrm(keys[2], (1, dim), 0.02),
        'pos':     nrm(keys[3], (n_tokens, dim), 0.02),
        'ln_f_g':  1.0 + nrm(keys[4], (1, dim), 0.02),
        'ln_f_b':  nrm(keys[5], (1, dim), 0.02),
        'blocks':  [],
    }
    for i in range(depth):
        bk = jax.random.split(keys[6 + i], 12)
        params['blocks'].append({
            'ln1_g': 1.0 + nrm(bk[0], (1, dim), 0.02),
            'ln1_b': nrm(bk[1], (1, dim), 0.02),
            'wqkv':  nrm(bk[2], (dim, 3 * dim), 1.0 / math.sqrt(dim)),
            'bqkv':  nrm(bk[3], (1, 3 * dim), 0.02),
            'wproj': nrm(bk[4], (dim, dim), 1.0 / math.sqrt(dim)),
            'bproj': nrm(bk[5], (1, dim), 0.02),
            'ln2_g': 1.0 + nrm(bk[6], (1, dim), 0.02),
            'ln2_b': nrm(bk[7], (1, dim), 0.02),
            'wfc1':  nrm(bk[8], (dim, mlp_hidden), 1.0 / math.sqrt(dim)),
            'bfc1':  nrm(bk[9], (1, mlp_hidden), 0.02),
            'wfc2':  nrm(bk[10], (mlp_hidden, dim), 1.0 / math.sqrt(mlp_hidden)),
            'bfc2':  nrm(bk[11], (1, dim), 0.02),
        })
    return params


# ----------------------------------------- main --------------------------------------

if __name__ == "__main__":
    B, IN_CHANS, IMG = 2, 3, 32
    PATCH = 16                        # -> 4 patches + 1 CLS = 5 tokens (no pos interp.)
    DIM = 256                         # lane-dense embed dim (multiple of 128)
    NUM_HEADS = 2                     # head_dim = 128 -> vreg-aligned head slices
    MLP_HIDDEN = 4 * DIM
    DEPTH_BOTTOM, DEPTH_TOP = 2, 1    # grad_from_block split (bottom frozen / top blocks)

    key = jax.random.PRNGKey(0)
    kx, kp = jax.random.split(key)
    x = jax.random.normal(kx, (B, IN_CHANS, IMG, IMG), jnp.float32)   # (B, 3, H, W) image
    params = init_params(kp, in_chans=IN_CHANS, img=IMG, patch=PATCH, dim=DIM,
                         depth=DEPTH_BOTTOM + DEPTH_TOP, mlp_hidden=MLP_HIDDEN)

    fwd = jax.jit(partial(attribute_transformer13_forward,
                          patch=PATCH, num_heads=NUM_HEADS))
    out = jax.block_until_ready(fwd(params, x))

    ref = jax.block_until_ready(
        _reference_forward(params, x, patch=PATCH, num_heads=NUM_HEADS))
    assert out.shape == (B, DIM)
    np.testing.assert_allclose(np.asarray(out), np.asarray(ref), atol=2e-3, rtol=2e-3)

    print("KERNEL_OK")
</pallas_src>

<mosaic_0001>
module attributes {stable_mosaic.version = 11 : i64} {
  func.func @_prepare_tokens_kernel(%arg0: i32, %arg1: memref<1x4x768xf32, #tpu.memory_space<vmem>>, %arg2: memref<768x256xf32, #tpu.memory_space<vmem>>, %arg3: memref<1x256xf32, #tpu.memory_space<vmem>>, %arg4: memref<1x256xf32, #tpu.memory_space<vmem>>, %arg5: memref<5x256xf32, #tpu.memory_space<vmem>>, %arg6: memref<1x5x256xf32, #tpu.memory_space<vmem>>) attributes {dimension_semantics = [#tpu.dimension_semantics<parallel>], iteration_bounds = array<i64: 2>, scalar_prefetch = 0 : i64, scratch_operands = 0 : i64, tpu.core_type = #tpu.core_type<tc>, window_params = [{transform_indices = @transform_0, window_bounds = array<i64: 1, 4, 768>}, {pipeline_mode = #tpu.pipeline_mode<synchronous>, transform_indices = @transform_1, window_bounds = array<i64: 768, 256>}, {pipeline_mode = #tpu.pipeline_mode<synchronous>, transform_indices = @transform_2, window_bounds = array<i64: 1, 256>}, {pipeline_mode = #tpu.pipeline_mode<synchronous>, transform_indices = @transform_3, window_bounds = array<i64: 1, 256>}, {pipeline_mode = #tpu.pipeline_mode<synchronous>, transform_indices = @transform_4, window_bounds = array<i64: 5, 256>}, {transform_indices = @transform_5, window_bounds = array<i64: 1, 5, 256>}]} {
    %c0 = arith.constant 0 : index
    %c0_0 = arith.constant 0 : index
    %c0_1 = arith.constant 0 : index
    %0 = vector.load %arg1[%c0, %c0_0, %c0_1] : memref<1x4x768xf32, #tpu.memory_space<vmem>>, vector<1x4x768xf32>
    %1 = vector.shape_cast %0 : vector<1x4x768xf32> to vector<4x768xf32>
    %c0_2 = arith.constant 0 : index
    %c0_3 = arith.constant 0 : index
    %2 = vector.load %arg2[%c0_2, %c0_3] : memref<768x256xf32, #tpu.memory_space<vmem>>, vector<768x256xf32>
    %cst = arith.constant dense<0.000000e+00> : vector<4x256xf32>
    %3 = tpu.matmul %1, %2, %cst {dimension_numbers = #tpu.dot_dimension_numbers<[1], [0], [0], [1], [0, 0, 1, 1], [], []>} : vector<4x768xf32>, vector<768x256xf32>, vector<4x256xf32> -> vector<4x256xf32>
    %c0_4 = arith.constant 0 : index
    %c0_5 = arith.constant 0 : index
    %4 = vector.load %arg3[%c0_4, %c0_5] : memref<1x256xf32, #tpu.memory_space<vmem>>, vector<1x256xf32>
    %5 = vector.broadcast %4 : vector<1x256xf32> to vector<4x256xf32>
    %6 = arith.addf %3, %5 : vector<4x256xf32>
    %c0_6 = arith.constant 0 : index
    %c0_7 = arith.constant 0 : index
    %7 = vector.load %arg4[%c0_6, %c0_7] : memref<1x256xf32, #tpu.memory_space<vmem>>, vector<1x256xf32>
    %c0_8 = arith.constant 0 : index
    %c0_9 = arith.constant 0 : index
    %8 = vector.load %arg5[%c0_8, %c0_9] : memref<5x256xf32, #tpu.memory_space<vmem>>, vector<1x256xf32>
    %9 = arith.addf %7, %8 : vector<1x256xf32>
    %c0_10 = arith.constant 0 : index
    %c0_11 = arith.constant 0 : index
    %c0_12 = arith.constant 0 : index
    %10 = vector.load %arg6[%c0_10, %c0_11, %c0_12] : memref<1x5x256xf32, #tpu.memory_space<vmem>>, vector<1x1x256xf32>
    %11 = vector.shape_cast %10 : vector<1x1x256xf32> to vector<1x256xf32>
    %12 = vector.shape_cast %9 : vector<1x256xf32> to vector<1x1x256xf32>
    tpu.vector_store %arg6[%c0_10, %c0_11, %c0_12], %12 {strides = array<i32>} : memref<1x5x256xf32, #tpu.memory_space<vmem>>, vector<1x1x256xf32>,
    %c1 = arith.constant 1 : index
    %c0_13 = arith.constant 0 : index
    %13 = vector.load %arg5[%c1, %c0_13] : memref<5x256xf32, #tpu.memory_space<vmem>>, vector<4x256xf32>
    %14 = arith.addf %6, %13 : vector<4x256xf32>
    %c0_14 = arith.constant 0 : index
    %c1_15 = arith.constant 1 : index
    %c0_16 = arith.constant 0 : index
    %15 = vector.load %arg6[%c0_14, %c1_15, %c0_16] : memref<1x5x256xf32, #tpu.memory_space<vmem>>, vector<1x4x256xf32>
    %16 = vector.shape_cast %15 : vector<1x4x256xf32> to vector<4x256xf32>
    %17 = vector.shape_cast %14 : vector<4x256xf32> to vector<1x4x256xf32>
    tpu.vector_store %arg6[%c0_14, %c1_15, %c0_16], %17 {strides = array<i32>} : memref<1x5x256xf32, #tpu.memory_space<vmem>>, vector<1x4x256xf32>,
    return
  }
  func.func @transform_0(%arg0: i32) -> (i32, i32, i32) {
    %c0_i32 = arith.constant 0 : i32
    %c0_i32_0 = arith.constant 0 : i32
    %c0_i32_1 = arith.constant 0 : i32
    return %arg0, %c0_i32, %c0_i32_0 : i32, i32, i32
  }
  func.func @transform_1(%arg0: i32) -> (i32, i32) {
    %c0_i32 = arith.constant 0 : i32
    %c0_i32_0 = arith.constant 0 : i32
    %c0_i32_1 = arith.constant 0 : i32
    return %c0_i32, %c0_i32_0 : i32, i32
  }
  func.func @transform_2(%arg0: i32) -> (i32, i32) {
    %c0_i32 = arith.constant 0 : i32
    %c0_i32_0 = arith.constant 0 : i32
    %c0_i32_1 = arith.constant 0 : i32
    return %c0_i32, %c0_i32_0 : i32, i32
  }
  func.func @transform_3(%arg0: i32) -> (i32, i32) {
    %c0_i32 = arith.constant 0 : i32
    %c0_i32_0 = arith.constant 0 : i32
    %c0_i32_1 = arith.constant 0 : i32
    return %c0_i32, %c0_i32_0 : i32, i32
  }
  func.func @transform_4(%arg0: i32) -> (i32, i32) {
    %c0_i32 = arith.constant 0 : i32
    %c0_i32_0 = arith.constant 0 : i32
    %c0_i32_1 = arith.constant 0 : i32
    return %c0_i32, %c0_i32_0 : i32, i32
  }
  func.func @transform_5(%arg0: i32) -> (i32, i32, i32) {
    %c0_i32 = arith.constant 0 : i32
    %c0_i32_0 = arith.constant 0 : i32
    %c0_i32_1 = arith.constant 0 : i32
    return %arg0, %c0_i32, %c0_i32_0 : i32, i32, i32
  }
}

module attributes {stable_mosaic.version = 11 : i64} {
  func.func @_vit_block_kernel(%arg0: i32, %arg1: memref<1x5x256xf32, #tpu.memory_space<vmem>>, %arg2: memref<1x256xf32, #tpu.memory_space<vmem>>, %arg3: memref<1x256xf32, #tpu.memory_space<vmem>>, %arg4: memref<256x768xf32, #tpu.memory_space<vmem>>, %arg5: memref<1x768xf32, #tpu.memory_space<vmem>>, %arg6: memref<256x256xf32, #tpu.memory_space<vmem>>, %arg7: memref<1x256xf32, #tpu.memory_space<vmem>>, %arg8: memref<1x256xf32, #tpu.memory_space<vmem>>, %arg9: memref<1x256xf32, #tpu.memory_space<vmem>>, %arg10: memref<256x1024xf32, #tpu.memory_space<vmem>>, %arg11: memref<1x1024xf32, #tpu.memory_space<vmem>>, %arg12: memref<1024x256xf32, #tpu.memory_space<vmem>>, %arg13: memref<1x256xf32, #tpu.memory_space<vmem>>, %arg14: memref<1x5x256xf32, #tpu.memory_space<vmem>>) attributes {dimension_semantics = [#tpu.dimension_semantics<parallel>], iteration_bounds = array<i64: 2>, scalar_prefetch = 0 : i64, scratch_operands = 0 : i64, tpu.core_type = #tpu.core_type<tc>, window_params = [{transform_indices = @transform_0, window_bounds = array<i64: 1, 5, 256>}, {pipeline_mode = #tpu.pipeline_mode<synchronous>, transform_indices = @transform_1, window_bounds = array<i64: 1, 256>}, {pipeline_mode = #tpu.pipeline_mode<synchronous>, transform_indices = @transform_2, window_bounds = array<i64: 1, 256>}, {pipeline_mode = #tpu.pipeline_mode<synchronous>, transform_indices = @transform_3, window_bounds = array<i64: 256, 768>}, {pipeline_mode = #tpu.pipeline_mode<synchronous>, transform_indices = @transform_4, window_bounds = array<i64: 1, 768>}, {pipeline_mode = #tpu.pipeline_mode<synchronous>, transform_indices = @transform_5, window_bounds = array<i64: 256, 256>}, {pipeline_mode = #tpu.pipeline_mode<synchronous>, transform_indices = @transform_6, window_bounds = array<i64: 1, 256>}, {pipeline_mode = #tpu.pipeline_mode<synchronous>, transform_indices = @transform_7, window_bounds = array<i64: 1, 256>}, {pipeline_mode = #tpu.pipeline_mode<synchronous>, transform_indices = @transform_8, window_bounds = array<i64: 1, 256>}, {pipeline_mode = #tpu.pipeline_mode<synchronous>, transform_indices = @transform_9, window_bounds = array<i64: 256, 1024>}, {pipeline_mode = #tpu.pipeline_mode<synchronous>, transform_indices = @transform_10, window_bounds = array<i64: 1, 1024>}, {pipeline_mode = #tpu.pipeline_mode<synchronous>, transform_indices = @transform_11, window_bounds = array<i64: 1024, 256>}, {pipeline_mode = #tpu.pipeline_mode<synchronous>, transform_indices = @transform_12, window_bounds = array<i64: 1, 256>}, {transform_indices = @transform_13, window_bounds = array<i64: 1, 5, 256>}]} {
    %c0 = arith.constant 0 : index
    %c0_0 = arith.constant 0 : index
    %c0_1 = arith.constant 0 : index
    %0 = vector.load %arg1[%c0, %c0_0, %c0_1] : memref<1x5x256xf32, #tpu.memory_space<vmem>>, vector<1x5x256xf32>
    %1 = vector.shape_cast %0 : vector<1x5x256xf32> to vector<5x256xf32>
    %c0_2 = arith.constant 0 : index
    %c0_3 = arith.constant 0 : index
    %2 = vector.load %arg2[%c0_2, %c0_3] : memref<1x256xf32, #tpu.memory_space<vmem>>, vector<1x256xf32>
    %c0_4 = arith.constant 0 : index
    %c0_5 = arith.constant 0 : index
    %3 = vector.load %arg3[%c0_4, %c0_5] : memref<1x256xf32, #tpu.memory_space<vmem>>, vector<1x256xf32>
    %cst = arith.constant dense<0.000000e+00> : vector<5xf32>
    %4 = vector.multi_reduction <add>, %1, %cst [1] : vector<5x256xf32> to vector<5xf32>
    %5 = vector.shape_cast %4 : vector<5xf32> to vector<5x1xf32>
    %cst_6 = arith.constant 2.560000e+02 : f32
    %6 = vector.broadcast %cst_6 : f32 to vector<5x1xf32>
    %7 = arith.divf %5, %6 : vector<5x1xf32>
    %8 = arith.mulf %1, %1 : vector<5x256xf32>
    %cst_7 = arith.constant dense<0.000000e+00> : vector<5xf32>
    %9 = vector.multi_reduction <add>, %8, %cst_7 [1] : vector<5x256xf32> to vector<5xf32>
    %10 = vector.shape_cast %9 : vector<5xf32> to vector<5x1xf32>
    %cst_8 = arith.constant 2.560000e+02 : f32
    %11 = vector.broadcast %cst_8 : f32 to vector<5x1xf32>
    %12 = arith.divf %10, %11 : vector<5x1xf32>
    %13 = arith.mulf %7, %7 : vector<5x1xf32>
    %14 = arith.subf %12, %13 : vector<5x1xf32>
    %cst_9 = arith.constant 0.000000e+00 : f32
    %15 = vector.broadcast %cst_9 : f32 to vector<5x1xf32>
    %16 = arith.maximumf %14, %15 : vector<5x1xf32>
    %17 = vector.broadcast %7 : vector<5x1xf32> to vector<5x256xf32>
    %18 = arith.subf %1, %17 : vector<5x256xf32>
    %cst_10 = arith.constant 9.99999997E-7 : f32
    %19 = vector.broadcast %cst_10 : f32 to vector<5x1xf32>
    %20 = arith.addf %16, %19 : vector<5x1xf32>
    %21 = math.rsqrt %20 : vector<5x1xf32>
    %22 = vector.broadcast %21 : vector<5x1xf32> to vector<5x256xf32>
    %23 = arith.mulf %18, %22 : vector<5x256xf32>
    %24 = vector.broadcast %2 : vector<1x256xf32> to vector<5x256xf32>
    %25 = arith.mulf %23, %24 : vector<5x256xf32>
    %26 = vector.broadcast %3 : vector<1x256xf32> to vector<5x256xf32>
    %27 = arith.addf %25, %26 : vector<5x256xf32>
    %c0_11 = arith.constant 0 : index
    %c0_12 = arith.constant 0 : index
    %28 = vector.load %arg4[%c0_11, %c0_12] : memref<256x768xf32, #tpu.memory_space<vmem>>, vector<256x768xf32>
    %cst_13 = arith.constant dense<0.000000e+00> : vector<5x768xf32>
    %29 = tpu.matmul %27, %28, %cst_13 {dimension_numbers = #tpu.dot_dimension_numbers<[1], [0], [0], [1], [0, 0, 1, 1], [], []>} : vector<5x256xf32>, vector<256x768xf32>, vector<5x768xf32> -> vector<5x768xf32>
    %c0_14 = arith.constant 0 : index
    %c0_15 = arith.constant 0 : index
    %30 = vector.load %arg5[%c0_14, %c0_15] : memref<1x768xf32, #tpu.memory_space<vmem>>, vector<1x768xf32>
    %31 = vector.broadcast %30 : vector<1x768xf32> to vector<5x768xf32>
    %32 = arith.addf %29, %31 : vector<5x768xf32>
    %33 = vector.extract_strided_slice %32 {offsets = [0, 0], sizes = [5, 128], strides = [1, 1]} : vector<5x768xf32> to vector<5x128xf32>
    %34 = vector.extract_strided_slice %32 {offsets = [0, 256], sizes = [5, 128], strides = [1, 1]} : vector<5x768xf32> to vector<5x128xf32>
    %35 = vector.extract_strided_slice %32 {offsets = [0, 512], sizes = [5, 128], strides = [1, 1]} : vector<5x768xf32> to vector<5x128xf32>
    "tpu.trace_start"() <{level = 10 : i32, message = "qd,kd->qk"}> : () -> ()
    %cst_16 = arith.constant dense<0.000000e+00> : vector<5x5xf32>
    %36 = tpu.matmul %33, %34, %cst_16 {dimension_numbers = #tpu.dot_dimension_numbers<[1], [1], [0], [0], [0, 0, 1, 0], [], []>} : vector<5x128xf32>, vector<5x128xf32>, vector<5x5xf32> -> vector<5x5xf32>
    "tpu.trace_stop"() : () -> ()
    %cst_17 = arith.constant 0.0883883461 : f32
    %37 = vector.broadcast %cst_17 : f32 to vector<5x5xf32>
    %38 = arith.mulf %36, %37 : vector<5x5xf32>
    %cst_18 = arith.constant dense<0xFF800000> : vector<5xf32>
    %39 = vector.multi_reduction <maximumf>, %38, %cst_18 [1] : vector<5x5xf32> to vector<5xf32>
    %40 = vector.shape_cast %39 : vector<5xf32> to vector<5x1xf32>
    %41 = vector.broadcast %40 : vector<5x1xf32> to vector<5x5xf32>
    %42 = arith.subf %38, %41 : vector<5x5xf32>
    %43 = math.exp %42 : vector<5x5xf32>
    %cst_19 = arith.constant dense<0.000000e+00> : vector<5xf32>
    %44 = vector.multi_reduction <add>, %43, %cst_19 [1] : vector<5x5xf32> to vector<5xf32>
    %45 = vector.shape_cast %44 : vector<5xf32> to vector<5x1xf32>
    %46 = vector.broadcast %45 : vector<5x1xf32> to vector<5x5xf32>
    %47 = arith.divf %43, %46 : vector<5x5xf32>
    %cst_20 = arith.constant dense<0.000000e+00> : vector<5x128xf32>
    %48 = tpu.matmul %47, %35, %cst_20 {dimension_numbers = #tpu.dot_dimension_numbers<[1], [0], [0], [1], [0, 0, 1, 1], [], []>} : vector<5x5xf32>, vector<5x128xf32>, vector<5x128xf32> -> vector<5x128xf32>
    %c0_21 = arith.constant 0 : index
    %c0_22 = arith.constant 0 : index
    %49 = vector.load %arg6[%c0_21, %c0_22] : memref<256x256xf32, #tpu.memory_space<vmem>>, vector<128x256xf32>
    %cst_23 = arith.constant dense<0.000000e+00> : vector<5x256xf32>
    %50 = tpu.matmul %48, %49, %cst_23 {dimension_numbers = #tpu.dot_dimension_numbers<[1], [0], [0], [1], [0, 0, 1, 1], [], []>} : vector<5x128xf32>, vector<128x256xf32>, vector<5x256xf32> -> vector<5x256xf32>
    %51 = vector.extract_strided_slice %32 {offsets = [0, 128], sizes = [5, 128], strides = [1, 1]} : vector<5x768xf32> to vector<5x128xf32>
    %52 = vector.extract_strided_slice %32 {offsets = [0, 384], sizes = [5, 128], strides = [1, 1]} : vector<5x768xf32> to vector<5x128xf32>
    %53 = vector.extract_strided_slice %32 {offsets = [0, 640], sizes = [5, 128], strides = [1, 1]} : vector<5x768xf32> to vector<5x128xf32>
    "tpu.trace_start"() <{level = 10 : i32, message = "qd,kd->qk"}> : () -> ()
    %cst_24 = arith.constant dense<0.000000e+00> : vector<5x5xf32>
    %54 = tpu.matmul %51, %52, %cst_24 {dimension_numbers = #tpu.dot_dimension_numbers<[1], [1], [0], [0], [0, 0, 1, 0], [], []>} : vector<5x128xf32>, vector<5x128xf32>, vector<5x5xf32> -> vector<5x5xf32>
    "tpu.trace_stop"() : () -> ()
    %cst_25 = arith.constant 0.0883883461 : f32
    %55 = vector.broadcast %cst_25 : f32 to vector<5x5xf32>
    %56 = arith.mulf %54, %55 : vector<5x5xf32>
    %cst_26 = arith.constant dense<0xFF800000> : vector<5xf32>
    %57 = vector.multi_reduction <maximumf>, %56, %cst_26 [1] : vector<5x5xf32> to vector<5xf32>
    %58 = vector.shape_cast %57 : vector<5xf32> to vector<5x1xf32>
    %59 = vector.broadcast %58 : vector<5x1xf32> to vector<5x5xf32>
    %60 = arith.subf %56, %59 : vector<5x5xf32>
    %61 = math.exp %60 : vector<5x5xf32>
    %cst_27 = arith.constant dense<0.000000e+00> : vector<5xf32>
    %62 = vector.multi_reduction <add>, %61, %cst_27 [1] : vector<5x5xf32> to vector<5xf32>
    %63 = vector.shape_cast %62 : vector<5xf32> to vector<5x1xf32>
    %64 = vector.broadcast %63 : vector<5x1xf32> to vector<5x5xf32>
    %65 = arith.divf %61, %64 : vector<5x5xf32>
    %cst_28 = arith.constant dense<0.000000e+00> : vector<5x128xf32>
    %66 = tpu.matmul %65, %53, %cst_28 {dimension_numbers = #tpu.dot_dimension_numbers<[1], [0], [0], [1], [0, 0, 1, 1], [], []>} : vector<5x5xf32>, vector<5x128xf32>, vector<5x128xf32> -> vector<5x128xf32>
    %c128 = arith.constant 128 : index
    %c0_29 = arith.constant 0 : index
    %67 = vector.load %arg6[%c128, %c0_29] : memref<256x256xf32, #tpu.memory_space<vmem>>, vector<128x256xf32>
    %cst_30 = arith.constant dense<0.000000e+00> : vector<5x256xf32>
    %68 = tpu.matmul %66, %67, %cst_30 {dimension_numbers = #tpu.dot_dimension_numbers<[1], [0], [0], [1], [0, 0, 1, 1], [], []>} : vector<5x128xf32>, vector<128x256xf32>, vector<5x256xf32> -> vector<5x256xf32>
    %69 = arith.addf %50, %68 : vector<5x256xf32>
    %70 = arith.addf %1, %69 : vector<5x256xf32>
    %c0_31 = arith.constant 0 : index
    %c0_32 = arith.constant 0 : index
    %71 = vector.load %arg7[%c0_31, %c0_32] : memref<1x256xf32, #tpu.memory_space<vmem>>, vector<1x256xf32>
    %72 = vector.broadcast %71 : vector<1x256xf32> to vector<5x256xf32>
    %73 = arith.addf %70, %72 : vector<5x256xf32>
    %c0_33 = arith.constant 0 : index
    %c0_34 = arith.constant 0 : index
    %74 = vector.load %arg8[%c0_33, %c0_34] : memref<1x256xf32, #tpu.memory_space<vmem>>, vector<1x256xf32>
    %c0_35 = arith.constant 0 : index
    %c0_36 = arith.constant 0 : index
    %75 = vector.load %arg9[%c0_35, %c0_36] : memref<1x256xf32, #tpu.memory_space<vmem>>, vector<1x256xf32>
    %cst_37 = arith.constant dense<0.000000e+00> : vector<5xf32>
    %76 = vector.multi_reduction <add>, %73, %cst_37 [1] : vector<5x256xf32> to vector<5xf32>
    %77 = vector.shape_cast %76 : vector<5xf32> to vector<5x1xf32>
    %cst_38 = arith.constant 2.560000e+02 : f32
    %78 = vector.broadcast %cst_38 : f32 to vector<5x1xf32>
    %79 = arith.divf %77, %78 : vector<5x1xf32>
    %80 = arith.mulf %73, %73 : vector<5x256xf32>
    %cst_39 = arith.constant dense<0.000000e+00> : vector<5xf32>
    %81 = vector.multi_reduction <add>, %80, %cst_39 [1] : vector<5x256xf32> to vector<5xf32>
    %82 = vector.shape_cast %81 : vector<5xf32> to vector<5x1xf32>
    %cst_40 = arith.constant 2.560000e+02 : f32
    %83 = vector.broadcast %cst_40 : f32 to vector<5x1xf32>
    %84 = arith.divf %82, %83 : vector<5x1xf32>
    %85 = arith.mulf %79, %79 : vector<5x1xf32>
    %86 = arith.subf %84, %85 : vector<5x1xf32>
    %cst_41 = arith.constant 0.000000e+00 : f32
    %87 = vector.broadcast %cst_41 : f32 to vector<5x1xf32>
    %88 = arith.maximumf %86, %87 : vector<5x1xf32>
    %89 = vector.broadcast %79 : vector<5x1xf32> to vector<5x256xf32>
    %90 = arith.subf %73, %89 : vector<5x256xf32>
    %cst_42 = arith.constant 9.99999997E-7 : f32
    %91 = vector.broadcast %cst_42 : f32 to vector<5x1xf32>
    %92 = arith.addf %88, %91 : vector<5x1xf32>
    %93 = math.rsqrt %92 : vector<5x1xf32>
    %94 = vector.broadcast %93 : vector<5x1xf32> to vector<5x256xf32>
    %95 = arith.mulf %90, %94 : vector<5x256xf32>
    %96 = vector.broadcast %74 : vector<1x256xf32> to vector<5x256xf32>
    %97 = arith.mulf %95, %96 : vector<5x256xf32>
    %98 = vector.broadcast %75 : vector<1x256xf32> to vector<5x256xf32>
    %99 = arith.addf %97, %98 : vector<5x256xf32>
    %c0_43 = arith.constant 0 : index
    %c0_44 = arith.constant 0 : index
    %100 = vector.load %arg10[%c0_43, %c0_44] : memref<256x1024xf32, #tpu.memory_space<vmem>>, vector<256x1024xf32>
    %cst_45 = arith.constant dense<0.000000e+00> : vector<5x1024xf32>
    %101 = tpu.matmul %99, %100, %cst_45 {dimension_numbers = #tpu.dot_dimension_numbers<[1], [0], [0], [1], [0, 0, 1, 1], [], []>} : vector<5x256xf32>, vector<256x1024xf32>, vector<5x1024xf32> -> vector<5x1024xf32>
    %c0_46 = arith.constant 0 : index
    %c0_47 = arith.constant 0 : index
    %102 = vector.load %arg11[%c0_46, %c0_47] : memref<1x1024xf32, #tpu.memory_space<vmem>>, vector<1x1024xf32>
    %103 = vector.broadcast %102 : vector<1x1024xf32> to vector<5x1024xf32>
    %104 = arith.addf %101, %103 : vector<5x1024xf32>
    %cst_48 = arith.constant 5.000000e-01 : f32
    %105 = vector.broadcast %cst_48 : f32 to vector<5x1024xf32>
    %106 = arith.mulf %105, %104 : vector<5x1024xf32>
    %cst_49 = arith.constant 0.707106769 : f32
    %107 = vector.broadcast %cst_49 : f32 to vector<5x1024xf32>
    %108 = arith.mulf %104, %107 : vector<5x1024xf32>
    %cst_50 = arith.constant 0.000000e+00 : f32
    %109 = vector.broadcast %cst_50 : f32 to vector<5x1024xf32>
    %110 = arith.cmpf oge, %108, %109 : vector<5x1024xf32>
    %cst_51 = arith.constant 1.000000e+00 : f32
    %cst_52 = arith.constant -1.000000e+00 : f32
    %111 = vector.broadcast %cst_51 : f32 to vector<5x1024xf32>
    %112 = vector.broadcast %cst_52 : f32 to vector<5x1024xf32>
    %113 = arith.select %110, %111, %112 : vector<5x1024xi1>, vector<5x1024xf32>
    %114 = math.absf %108 : vector<5x1024xf32>
    %cst_53 = arith.constant 0.327591091 : f32
    %115 = vector.broadcast %cst_53 : f32 to vector<5x1024xf32>
    %116 = arith.mulf %115, %114 : vector<5x1024xf32>
    %cst_54 = arith.constant 1.000000e+00 : f32
    %117 = vector.broadcast %cst_54 : f32 to vector<5x1024xf32>
    %118 = arith.addf %117, %116 : vector<5x1024xf32>
    %cst_55 = arith.constant 1.000000e+00 : f32
    %119 = vector.broadcast %cst_55 : f32 to vector<5x1024xf32>
    %120 = arith.divf %119, %118 : vector<5x1024xf32>
    %cst_56 = arith.constant 1.06140542 : f32
    %121 = vector.broadcast %cst_56 : f32 to vector<5x1024xf32>
    %122 = arith.mulf %121, %120 : vector<5x1024xf32>
    %cst_57 = arith.constant -1.45315206 : f32
    %123 = vector.broadcast %cst_57 : f32 to vector<5x1024xf32>
    %124 = arith.addf %122, %123 : vector<5x1024xf32>
    %125 = arith.mulf %124, %120 : vector<5x1024xf32>
    %cst_58 = arith.constant 1.42141378 : f32
    %126 = vector.broadcast %cst_58 : f32 to vector<5x1024xf32>
    %127 = arith.addf %125, %126 : vector<5x1024xf32>
    %128 = arith.mulf %127, %120 : vector<5x1024xf32>
    %cst_59 = arith.constant -0.284496725 : f32
    %129 = vector.broadcast %cst_59 : f32 to vector<5x1024xf32>
    %130 = arith.addf %128, %129 : vector<5x1024xf32>
    %131 = arith.mulf %130, %120 : vector<5x1024xf32>
    %cst_60 = arith.constant 0.254829586 : f32
    %132 = vector.broadcast %cst_60 : f32 to vector<5x1024xf32>
    %133 = arith.addf %131, %132 : vector<5x1024xf32>
    %134 = arith.mulf %133, %120 : vector<5x1024xf32>
    %cst_61 = arith.constant 0.000000e+00 : f32
    %135 = vector.broadcast %cst_61 : f32 to vector<5x1024xf32>
    %136 = arith.subf %135, %114 : vector<5x1024xf32>
    %137 = arith.mulf %136, %114 : vector<5x1024xf32>
    %138 = math.exp %137 : vector<5x1024xf32>
    %139 = arith.mulf %134, %138 : vector<5x1024xf32>
    %cst_62 = arith.constant 1.000000e+00 : f32
    %140 = vector.broadcast %cst_62 : f32 to vector<5x1024xf32>
    %141 = arith.subf %140, %139 : vector<5x1024xf32>
    %142 = arith.mulf %113, %141 : vector<5x1024xf32>
    %cst_63 = arith.constant 1.000000e+00 : f32
    %143 = vector.broadcast %cst_63 : f32 to vector<5x1024xf32>
    %144 = arith.addf %143, %142 : vector<5x1024xf32>
    %145 = arith.mulf %106, %144 : vector<5x1024xf32>
    %c0_64 = arith.constant 0 : index
    %c0_65 = arith.constant 0 : index
    %146 = vector.load %arg12[%c0_64, %c0_65] : memref<1024x256xf32, #tpu.memory_space<vmem>>, vector<1024x256xf32>
    %cst_66 = arith.constant dense<0.000000e+00> : vector<5x256xf32>
    %147 = tpu.matmul %145, %146, %cst_66 {dimension_numbers = #tpu.dot_dimension_numbers<[1], [0], [0], [1], [0, 0, 1, 1], [], []>} : vector<5x1024xf32>, vector<1024x256xf32>, vector<5x256xf32> -> vector<5x256xf32>
    %148 = arith.addf %73, %147 : vector<5x256xf32>
    %c0_67 = arith.constant 0 : index
    %c0_68 = arith.constant 0 : index
    %149 = vector.load %arg13[%c0_67, %c0_68] : memref<1x256xf32, #tpu.memory_space<vmem>>, vector<1x256xf32>
    %150 = vector.broadcast %149 : vector<1x256xf32> to vector<5x256xf32>
    %151 = arith.addf %148, %150 : vector<5x256xf32>
    %c0_69 = arith.constant 0 : index
    %c0_70 = arith.constant 0 : index
    %c0_71 = arith.constant 0 : index
    %152 = vector.load %arg14[%c0_69, %c0_70, %c0_71] : memref<1x5x256xf32, #tpu.memory_space<vmem>>, vector<1x5x256xf32>
    %153 = vector.shape_cast %152 : vector<1x5x256xf32> to vector<5x256xf32>
    %154 = vector.shape_cast %151 : vector<5x256xf32> to vector<1x5x256xf32>
    tpu.vector_store %arg14[%c0_69, %c0_70, %c0_71], %154 {strides = array<i32>} : memref<1x5x256xf32, #tpu.memory_space<vmem>>, vector<1x5x256xf32>,
    return
  }
  func.func @transform_0(%arg0: i32) -> (i32, i32, i32) {
    %c0_i32 = arith.constant 0 : i32
    %c0_i32_0 = arith.constant 0 : i32
    %c0_i32_1 = arith.constant 0 : i32
    return %arg0, %c0_i32, %c0_i32_0 : i32, i32, i32
  }
  func.func @transform_1(%arg0: i32) -> (i32, i32) {
    %c0_i32 = arith.constant 0 : i32
    %c0_i32_0 = arith.constant 0 : i32
    %c0_i32_1 = arith.constant 0 : i32
    return %c0_i32, %c0_i32_0 : i32, i32
  }
  func.func @transform_2(%arg0: i32) -> (i32, i32) {
    %c0_i32 = arith.constant 0 : i32
    %c0_i32_0 = arith.constant 0 : i32
    %c0_i32_1 = arith.constant 0 : i32
    return %c0_i32, %c0_i32_0 : i32, i32
  }
  func.func @transform_3(%arg0: i32) -> (i32, i32) {
    %c0_i32 = arith.constant 0 : i32
    %c0_i32_0 = arith.constant 0 : i32
    %c0_i32_1 = arith.constant 0 : i32
    return %c0_i32, %c0_i32_0 : i32, i32
  }
  func.func @transform_4(%arg0: i32) -> (i32, i32) {
    %c0_i32 = arith.constant 0 : i32
    %c0_i32_0 = arith.constant 0 : i32
    %c0_i32_1 = arith.constant 0 : i32
    return %c0_i32, %c0_i32_0 : i32, i32
  }
  func.func @transform_5(%arg0: i32) -> (i32, i32) {
    %c0_i32 = arith.constant 0 : i32
    %c0_i32_0 = arith.constant 0 : i32
    %c0_i32_1 = arith.constant 0 : i32
    return %c0_i32, %c0_i32_0 : i32, i32
  }
  func.func @transform_6(%arg0: i32) -> (i32, i32) {
    %c0_i32 = arith.constant 0 : i32
    %c0_i32_0 = arith.constant 0 : i32
    %c0_i32_1 = arith.constant 0 : i32
    return %c0_i32, %c0_i32_0 : i32, i32
  }
  func.func @transform_7(%arg0: i32) -> (i32, i32) {
    %c0_i32 = arith.constant 0 : i32
    %c0_i32_0 = arith.constant 0 : i32
    %c0_i32_1 = arith.constant 0 : i32
    return %c0_i32, %c0_i32_0 : i32, i32
  }
  func.func @transform_8(%arg0: i32) -> (i32, i32) {
    %c0_i32 = arith.constant 0 : i32
    %c0_i32_0 = arith.constant 0 : i32
    %c0_i32_1 = arith.constant 0 : i32
    return %c0_i32, %c0_i32_0 : i32, i32
  }
  func.func @transform_9(%arg0: i32) -> (i32, i32) {
    %c0_i32 = arith.constant 0 : i32
    %c0_i32_0 = arith.constant 0 : i32
    %c0_i32_1 = arith.constant 0 : i32
    return %c0_i32, %c0_i32_0 : i32, i32
  }
  func.func @transform_10(%arg0: i32) -> (i32, i32) {
    %c0_i32 = arith.constant 0 : i32
    %c0_i32_0 = arith.constant 0 : i32
    %c0_i32_1 = arith.constant 0 : i32
    return %c0_i32, %c0_i32_0 : i32, i32
  }
  func.func @transform_11(%arg0: i32) -> (i32, i32) {
    %c0_i32 = arith.constant 0 : i32
    %c0_i32_0 = arith.constant 0 : i32
    %c0_i32_1 = arith.constant 0 : i32
    return %c0_i32, %c0_i32_0 : i32, i32
  }
  func.func @transform_12(%arg0: i32) -> (i32, i32) {
    %c0_i32 = arith.constant 0 : i32
    %c0_i32_0 = arith.constant 0 : i32
    %c0_i32_1 = arith.constant 0 : i32
    return %c0_i32, %c0_i32_0 : i32, i32
  }
  func.func @transform_13(%arg0: i32) -> (i32, i32, i32) {
    %c0_i32 = arith.constant 0 : i32
    %c0_i32_0 = arith.constant 0 : i32
    %c0_i32_1 = arith.constant 0 : i32
    return %arg0, %c0_i32, %c0_i32_0 : i32, i32, i32
  }
}

module attributes {stable_mosaic.version = 11 : i64} {
  func.func @_vit_block_kernel(%arg0: i32, %arg1: memref<1x5x256xf32, #tpu.memory_space<vmem>>, %arg2: memref<1x256xf32, #tpu.memory_space<vmem>>, %arg3: memref<1x256xf32, #tpu.memory_space<vmem>>, %arg4: memref<256x768xf32, #tpu.memory_space<vmem>>, %arg5: memref<1x768xf32, #tpu.memory_space<vmem>>, %arg6: memref<256x256xf32, #tpu.memory_space<vmem>>, %arg7: memref<1x256xf32, #tpu.memory_space<vmem>>, %arg8: memref<1x256xf32, #tpu.memory_space<vmem>>, %arg9: memref<1x256xf32, #tpu.memory_space<vmem>>, %arg10: memref<256x1024xf32, #tpu.memory_space<vmem>>, %arg11: memref<1x1024xf32, #tpu.memory_space<vmem>>, %arg12: memref<1024x256xf32, #tpu.memory_space<vmem>>, %arg13: memref<1x256xf32, #tpu.memory_space<vmem>>, %arg14: memref<1x5x256xf32, #tpu.memory_space<vmem>>) attributes {dimension_semantics = [#tpu.dimension_semantics<parallel>], iteration_bounds = array<i64: 2>, scalar_prefetch = 0 : i64, scratch_operands = 0 : i64, tpu.core_type = #tpu.core_type<tc>, window_params = [{transform_indices = @transform_0, window_bounds = array<i64: 1, 5, 256>}, {pipeline_mode = #tpu.pipeline_mode<synchronous>, transform_indices = @transform_1, window_bounds = array<i64: 1, 256>}, {pipeline_mode = #tpu.pipeline_mode<synchronous>, transform_indices = @transform_2, window_bounds = array<i64: 1, 256>}, {pipeline_mode = #tpu.pipeline_mode<synchronous>, transform_indices = @transform_3, window_bounds = array<i64: 256, 768>}, {pipeline_mode = #tpu.pipeline_mode<synchronous>, transform_indices = @transform_4, window_bounds = array<i64: 1, 768>}, {pipeline_mode = #tpu.pipeline_mode<synchronous>, transform_indices = @transform_5, window_bounds = array<i64: 256, 256>}, {pipeline_mode = #tpu.pipeline_mode<synchronous>, transform_indices = @transform_6, window_bounds = array<i64: 1, 256>}, {pipeline_mode = #tpu.pipeline_mode<synchronous>, transform_indices = @transform_7, window_bounds = array<i64: 1, 256>}, {pipeline_mode = #tpu.pipeline_mode<synchronous>, transform_indices = @transform_8, window_bounds = array<i64: 1, 256>}, {pipeline_mode = #tpu.pipeline_mode<synchronous>, transform_indices = @transform_9, window_bounds = array<i64: 256, 1024>}, {pipeline_mode = #tpu.pipeline_mode<synchronous>, transform_indices = @transform_10, window_bounds = array<i64: 1, 1024>}, {pipeline_mode = #tpu.pipeline_mode<synchronous>, transform_indices = @transform_11, window_bounds = array<i64: 1024, 256>}, {pipeline_mode = #tpu.pipeline_mode<synchronous>, transform_indices = @transform_12, window_bounds = array<i64: 1, 256>}, {transform_indices = @transform_13, window_bounds = array<i64: 1, 5, 256>}]} {
    %c0 = arith.constant 0 : index
    %c0_0 = arith.constant 0 : index
    %c0_1 = arith.constant 0 : index
    %0 = vector.load %arg1[%c0, %c0_0, %c0_1] : memref<1x5x256xf32, #tpu.memory_space<vmem>>, vector<1x5x256xf32>
    %1 = vector.shape_cast %0 : vector<1x5x256xf32> to vector<5x256xf32>
    %c0_2 = arith.constant 0 : index
    %c0_3 = arith.constant 0 : index
    %2 = vector.load %arg2[%c0_2, %c0_3] : memref<1x256xf32, #tpu.memory_space<vmem>>, vector<1x256xf32>
    %c0_4 = arith.constant 0 : index
    %c0_5 = arith.constant 0 : index
    %3 = vector.load %arg3[%c0_4, %c0_5] : memref<1x256xf32, #tpu.memory_space<vmem>>, vector<1x256xf32>
    %cst = arith.constant dense<0.000000e+00> : vector<5xf32>
    %4 = vector.multi_reduction <add>, %1, %cst [1] : vector<5x256xf32> to vector<5xf32>
    %5 = vector.shape_cast %4 : vector<5xf32> to vector<5x1xf32>
    %cst_6 = arith.constant 2.560000e+02 : f32
    %6 = vector.broadcast %cst_6 : f32 to vector<5x1xf32>
    %7 = arith.divf %5, %6 : vector<5x1xf32>
    %8 = arith.mulf %1, %1 : vector<5x256xf32>
    %cst_7 = arith.constant dense<0.000000e+00> : vector<5xf32>
    %9 = vector.multi_reduction <add>, %8, %cst_7 [1] : vector<5x256xf32> to vector<5xf32>
    %10 = vector.shape_cast %9 : vector<5xf32> to vector<5x1xf32>
    %cst_8 = arith.constant 2.560000e+02 : f32
    %11 = vector.broadcast %cst_8 : f32 to vector<5x1xf32>
    %12 = arith.divf %10, %11 : vector<5x1xf32>
    %13 = arith.mulf %7, %7 : vector<5x1xf32>
    %14 = arith.subf %12, %13 : vector<5x1xf32>
    %cst_9 = arith.constant 0.000000e+00 : f32
    %15 = vector.broadcast %cst_9 : f32 to vector<5x1xf32>
    %16 = arith.maximumf %14, %15 : vector<5x1xf32>
    %17 = vector.broadcast %7 : vector<5x1xf32> to vector<5x256xf32>
    %18 = arith.subf %1, %17 : vector<5x256xf32>
    %cst_10 = arith.constant 9.99999997E-7 : f32
    %19 = vector.broadcast %cst_10 : f32 to vector<5x1xf32>
    %20 = arith.addf %16, %19 : vector<5x1xf32>
    %21 = math.rsqrt %20 : vector<5x1xf32>
    %22 = vector.broadcast %21 : vector<5x1xf32> to vector<5x256xf32>
    %23 = arith.mulf %18, %22 : vector<5x256xf32>
    %24 = vector.broadcast %2 : vector<1x256xf32> to vector<5x256xf32>
    %25 = arith.mulf %23, %24 : vector<5x256xf32>
    %26 = vector.broadcast %3 : vector<1x256xf32> to vector<5x256xf32>
    %27 = arith.addf %25, %26 : vector<5x256xf32>
    %c0_11 = arith.constant 0 : index
    %c0_12 = arith.constant 0 : index
    %28 = vector.load %arg4[%c0_11, %c0_12] : memref<256x768xf32, #tpu.memory_space<vmem>>, vector<256x768xf32>
    %cst_13 = arith.constant dense<0.000000e+00> : vector<5x768xf32>
    %29 = tpu.matmul %27, %28, %cst_13 {dimension_numbers = #tpu.dot_dimension_numbers<[1], [0], [0], [1], [0, 0, 1, 1], [], []>} : vector<5x256xf32>, vector<256x768xf32>, vector<5x768xf32> -> vector<5x768xf32>
    %c0_14 = arith.constant 0 : index
    %c0_15 = arith.constant 0 : index
    %30 = vector.load %arg5[%c0_14, %c0_15] : memref<1x768xf32, #tpu.memory_space<vmem>>, vector<1x768xf32>
    %31 = vector.broadcast %30 : vector<1x768xf32> to vector<5x768xf32>
    %32 = arith.addf %29, %31 : vector<5x768xf32>
    %33 = vector.extract_strided_slice %32 {offsets = [0, 0], sizes = [5, 128], strides = [1, 1]} : vector<5x768xf32> to vector<5x128xf32>
    %34 = vector.extract_strided_slice %32 {offsets = [0, 256], sizes = [5, 128], strides = [1, 1]} : vector<5x768xf32> to vector<5x128xf32>
    %35 = vector.extract_strided_slice %32 {offsets = [0, 512], sizes = [5, 128], strides = [1, 1]} : vector<5x768xf32> to vector<5x128xf32>
    "tpu.trace_start"() <{level = 10 : i32, message = "qd,kd->qk"}> : () -> ()
    %cst_16 = arith.constant dense<0.000000e+00> : vector<5x5xf32>
    %36 = tpu.matmul %33, %34, %cst_16 {dimension_numbers = #tpu.dot_dimension_numbers<[1], [1], [0], [0], [0, 0, 1, 0], [], []>} : vector<5x128xf32>, vector<5x128xf32>, vector<5x5xf32> -> vector<5x5xf32>
    "tpu.trace_stop"() : () -> ()
    %cst_17 = arith.constant 0.0883883461 : f32
    %37 = vector.broadcast %cst_17 : f32 to vector<5x5xf32>
    %38 = arith.mulf %36, %37 : vector<5x5xf32>
    %cst_18 = arith.constant dense<0xFF800000> : vector<5xf32>
    %39 = vector.multi_reduction <maximumf>, %38, %cst_18 [1] : vector<5x5xf32> to vector<5xf32>
    %40 = vector.shape_cast %39 : vector<5xf32> to vector<5x1xf32>
    %41 = vector.broadcast %40 : vector<5x1xf32> to vector<5x5xf32>
    %42 = arith.subf %38, %41 : vector<5x5xf32>
    %43 = math.exp %42 : vector<5x5xf32>
    %cst_19 = arith.constant dense<0.000000e+00> : vector<5xf32>
    %44 = vector.multi_reduction <add>, %43, %cst_19 [1] : vector<5x5xf32> to vector<5xf32>
    %45 = vector.shape_cast %44 : vector<5xf32> to vector<5x1xf32>
    %46 = vector.broadcast %45 : vector<5x1xf32> to vector<5x5xf32>
    %47 = arith.divf %43, %46 : vector<5x5xf32>
    %cst_20 = arith.constant dense<0.000000e+00> : vector<5x128xf32>
    %48 = tpu.matmul %47, %35, %cst_20 {dimension_numbers = #tpu.dot_dimension_numbers<[1], [0], [0], [1], [0, 0, 1, 1], [], []>} : vector<5x5xf32>, vector<5x128xf32>, vector<5x128xf32> -> vector<5x128xf32>
    %c0_21 = arith.constant 0 : index
    %c0_22 = arith.constant 0 : index
    %49 = vector.load %arg6[%c0_21, %c0_22] : memref<256x256xf32, #tpu.memory_space<vmem>>, vector<128x256xf32>
    %cst_23 = arith.constant dense<0.000000e+00> : vector<5x256xf32>
    %50 = tpu.matmul %48, %49, %cst_23 {dimension_numbers = #tpu.dot_dimension_numbers<[1], [0], [0], [1], [0, 0, 1, 1], [], []>} : vector<5x128xf32>, vector<128x256xf32>, vector<5x256xf32> -> vector<5x256xf32>
    %51 = vector.extract_strided_slice %32 {offsets = [0, 128], sizes = [5, 128], strides = [1, 1]} : vector<5x768xf32> to vector<5x128xf32>
    %52 = vector.extract_strided_slice %32 {offsets = [0, 384], sizes = [5, 128], strides = [1, 1]} : vector<5x768xf32> to vector<5x128xf32>
    %53 = vector.extract_strided_slice %32 {offsets = [0, 640], sizes = [5, 128], strides = [1, 1]} : vector<5x768xf32> to vector<5x128xf32>
    "tpu.trace_start"() <{level = 10 : i32, message = "qd,kd->qk"}> : () -> ()
    %cst_24 = arith.constant dense<0.000000e+00> : vector<5x5xf32>
    %54 = tpu.matmul %51, %52, %cst_24 {dimension_numbers = #tpu.dot_dimension_numbers<[1], [1], [0], [0], [0, 0, 1, 0], [], []>} : vector<5x128xf32>, vector<5x128xf32>, vector<5x5xf32> -> vector<5x5xf32>
    "tpu.trace_stop"() : () -> ()
    %cst_25 = arith.constant 0.0883883461 : f32
    %55 = vector.broadcast %cst_25 : f32 to vector<5x5xf32>
    %56 = arith.mulf %54, %55 : vector<5x5xf32>
    %cst_26 = arith.constant dense<0xFF800000> : vector<5xf32>
    %57 = vector.multi_reduction <maximumf>, %56, %cst_26 [1] : vector<5x5xf32> to vector<5xf32>
    %58 = vector.shape_cast %57 : vector<5xf32> to vector<5x1xf32>
    %59 = vector.broadcast %58 : vector<5x1xf32> to vector<5x5xf32>
    %60 = arith.subf %56, %59 : vector<5x5xf32>
    %61 = math.exp %60 : vector<5x5xf32>
    %cst_27 = arith.constant dense<0.000000e+00> : vector<5xf32>
    %62 = vector.multi_reduction <add>, %61, %cst_27 [1] : vector<5x5xf32> to vector<5xf32>
    %63 = vector.shape_cast %62 : vector<5xf32> to vector<5x1xf32>
    %64 = vector.broadcast %63 : vector<5x1xf32> to vector<5x5xf32>
    %65 = arith.divf %61, %64 : vector<5x5xf32>
    %cst_28 = arith.constant dense<0.000000e+00> : vector<5x128xf32>
    %66 = tpu.matmul %65, %53, %cst_28 {dimension_numbers = #tpu.dot_dimension_numbers<[1], [0], [0], [1], [0, 0, 1, 1], [], []>} : vector<5x5xf32>, vector<5x128xf32>, vector<5x128xf32> -> vector<5x128xf32>
    %c128 = arith.constant 128 : index
    %c0_29 = arith.constant 0 : index
    %67 = vector.load %arg6[%c128, %c0_29] : memref<256x256xf32, #tpu.memory_space<vmem>>, vector<128x256xf32>
    %cst_30 = arith.constant dense<0.000000e+00> : vector<5x256xf32>
    %68 = tpu.matmul %66, %67, %cst_30 {dimension_numbers = #tpu.dot_dimension_numbers<[1], [0], [0], [1], [0, 0, 1, 1], [], []>} : vector<5x128xf32>, vector<128x256xf32>, vector<5x256xf32> -> vector<5x256xf32>
    %69 = arith.addf %50, %68 : vector<5x256xf32>
    %70 = arith.addf %1, %69 : vector<5x256xf32>
    %c0_31 = arith.constant 0 : index
    %c0_32 = arith.constant 0 : index
    %71 = vector.load %arg7[%c0_31, %c0_32] : memref<1x256xf32, #tpu.memory_space<vmem>>, vector<1x256xf32>
    %72 = vector.broadcast %71 : vector<1x256xf32> to vector<5x256xf32>
    %73 = arith.addf %70, %72 : vector<5x256xf32>
    %c0_33 = arith.constant 0 : index
    %c0_34 = arith.constant 0 : index
    %74 = vector.load %arg8[%c0_33, %c0_34] : memref<1x256xf32, #tpu.memory_space<vmem>>, vector<1x256xf32>
    %c0_35 = arith.constant 0 : index
    %c0_36 = arith.constant 0 : index
    %75 = vector.load %arg9[%c0_35, %c0_36] : memref<1x256xf32, #tpu.memory_space<vmem>>, vector<1x256xf32>
    %cst_37 = arith.constant dense<0.000000e+00> : vector<5xf32>
    %76 = vector.multi_reduction <add>, %73, %cst_37 [1] : vector<5x256xf32> to vector<5xf32>
    %77 = vector.shape_cast %76 : vector<5xf32> to vector<5x1xf32>
    %cst_38 = arith.constant 2.560000e+02 : f32
    %78 = vector.broadcast %cst_38 : f32 to vector<5x1xf32>
    %79 = arith.divf %77, %78 : vector<5x1xf32>
    %80 = arith.mulf %73, %73 : vector<5x256xf32>
    %cst_39 = arith.constant dense<0.000000e+00> : vector<5xf32>
    %81 = vector.multi_reduction <add>, %80, %cst_39 [1] : vector<5x256xf32> to vector<5xf32>
    %82 = vector.shape_cast %81 : vector<5xf32> to vector<5x1xf32>
    %cst_40 = arith.constant 2.560000e+02 : f32
    %83 = vector.broadcast %cst_40 : f32 to vector<5x1xf32>
    %84 = arith.divf %82, %83 : vector<5x1xf32>
    %85 = arith.mulf %79, %79 : vector<5x1xf32>
    %86 = arith.subf %84, %85 : vector<5x1xf32>
    %cst_41 = arith.constant 0.000000e+00 : f32
    %87 = vector.broadcast %cst_41 : f32 to vector<5x1xf32>
    %88 = arith.maximumf %86, %87 : vector<5x1xf32>
    %89 = vector.broadcast %79 : vector<5x1xf32> to vector<5x256xf32>
    %90 = arith.subf %73, %89 : vector<5x256xf32>
    %cst_42 = arith.constant 9.99999997E-7 : f32
    %91 = vector.broadcast %cst_42 : f32 to vector<5x1xf32>
    %92 = arith.addf %88, %91 : vector<5x1xf32>
    %93 = math.rsqrt %92 : vector<5x1xf32>
    %94 = vector.broadcast %93 : vector<5x1xf32> to vector<5x256xf32>
    %95 = arith.mulf %90, %94 : vector<5x256xf32>
    %96 = vector.broadcast %74 : vector<1x256xf32> to vector<5x256xf32>
    %97 = arith.mulf %95, %96 : vector<5x256xf32>
    %98 = vector.broadcast %75 : vector<1x256xf32> to vector<5x256xf32>
    %99 = arith.addf %97, %98 : vector<5x256xf32>
    %c0_43 = arith.constant 0 : index
    %c0_44 = arith.constant 0 : index
    %100 = vector.load %arg10[%c0_43, %c0_44] : memref<256x1024xf32, #tpu.memory_space<vmem>>, vector<256x1024xf32>
    %cst_45 = arith.constant dense<0.000000e+00> : vector<5x1024xf32>
    %101 = tpu.matmul %99, %100, %cst_45 {dimension_numbers = #tpu.dot_dimension_numbers<[1], [0], [0], [1], [0, 0, 1, 1], [], []>} : vector<5x256xf32>, vector<256x1024xf32>, vector<5x1024xf32> -> vector<5x1024xf32>
    %c0_46 = arith.constant 0 : index
    %c0_47 = arith.constant 0 : index
    %102 = vector.load %arg11[%c0_46, %c0_47] : memref<1x1024xf32, #tpu.memory_space<vmem>>, vector<1x1024xf32>
    %103 = vector.broadcast %102 : vector<1x1024xf32> to vector<5x1024xf32>
    %104 = arith.addf %101, %103 : vector<5x1024xf32>
    %cst_48 = arith.constant 5.000000e-01 : f32
    %105 = vector.broadcast %cst_48 : f32 to vector<5x1024xf32>
    %106 = arith.mulf %105, %104 : vector<5x1024xf32>
    %cst_49 = arith.constant 0.707106769 : f32
    %107 = vector.broadcast %cst_49 : f32 to vector<5x1024xf32>
    %108 = arith.mulf %104, %107 : vector<5x1024xf32>
    %cst_50 = arith.constant 0.000000e+00 : f32
    %109 = vector.broadcast %cst_50 : f32 to vector<5x1024xf32>
    %110 = arith.cmpf oge, %108, %109 : vector<5x1024xf32>
    %cst_51 = arith.constant 1.000000e+00 : f32
    %cst_52 = arith.constant -1.000000e+00 : f32
    %111 = vector.broadcast %cst_51 : f32 to vector<5x1024xf32>
    %112 = vector.broadcast %cst_52 : f32 to vector<5x1024xf32>
    %113 = arith.select %110, %111, %112 : vector<5x1024xi1>, vector<5x1024xf32>
    %114 = math.absf %108 : vector<5x1024xf32>
    %cst_53 = arith.constant 0.327591091 : f32
    %115 = vector.broadcast %cst_53 : f32 to vector<5x1024xf32>
    %116 = arith.mulf %115, %114 : vector<5x1024xf32>
    %cst_54 = arith.constant 1.000000e+00 : f32
    %117 = vector.broadcast %cst_54 : f32 to vector<5x1024xf32>
    %118 = arith.addf %117, %116 : vector<5x1024xf32>
    %cst_55 = arith.constant 1.000000e+00 : f32
    %119 = vector.broadcast %cst_55 : f32 to vector<5x1024xf32>
    %120 = arith.divf %119, %118 : vector<5x1024xf32>
    %cst_56 = arith.constant 1.06140542 : f32
    %121 = vector.broadcast %cst_56 : f32 to vector<5x1024xf32>
    %122 = arith.mulf %121, %120 : vector<5x1024xf32>
    %cst_57 = arith.constant -1.45315206 : f32
    %123 = vector.broadcast %cst_57 : f32 to vector<5x1024xf32>
    %124 = arith.addf %122, %123 : vector<5x1024xf32>
    %125 = arith.mulf %124, %120 : vector<5x1024xf32>
    %cst_58 = arith.constant 1.42141378 : f32
    %126 = vector.broadcast %cst_58 : f32 to vector<5x1024xf32>
    %127 = arith.addf %125, %126 : vector<5x1024xf32>
    %128 = arith.mulf %127, %120 : vector<5x1024xf32>
    %cst_59 = arith.constant -0.284496725 : f32
    %129 = vector.broadcast %cst_59 : f32 to vector<5x1024xf32>
    %130 = arith.addf %128, %129 : vector<5x1024xf32>
    %131 = arith.mulf %130, %120 : vector<5x1024xf32>
    %cst_60 = arith.constant 0.254829586 : f32
    %132 = vector.broadcast %cst_60 : f32 to vector<5x1024xf32>
    %133 = arith.addf %131, %132 : vector<5x1024xf32>
    %134 = arith.mulf %133, %120 : vector<5x1024xf32>
    %cst_61 = arith.constant 0.000000e+00 : f32
    %135 = vector.broadcast %cst_61 : f32 to vector<5x1024xf32>
    %136 = arith.subf %135, %114 : vector<5x1024xf32>
    %137 = arith.mulf %136, %114 : vector<5x1024xf32>
    %138 = math.exp %137 : vector<5x1024xf32>
    %139 = arith.mulf %134, %138 : vector<5x1024xf32>
    %cst_62 = arith.constant 1.000000e+00 : f32
    %140 = vector.broadcast %cst_62 : f32 to vector<5x1024xf32>
    %141 = arith.subf %140, %139 : vector<5x1024xf32>
    %142 = arith.mulf %113, %141 : vector<5x1024xf32>
    %cst_63 = arith.constant 1.000000e+00 : f32
    %143 = vector.broadcast %cst_63 : f32 to vector<5x1024xf32>
    %144 = arith.addf %143, %142 : vector<5x1024xf32>
    %145 = arith.mulf %106, %144 : vector<5x1024xf32>
    %c0_64 = arith.constant 0 : index
    %c0_65 = arith.constant 0 : index
    %146 = vector.load %arg12[%c0_64, %c0_65] : memref<1024x256xf32, #tpu.memory_space<vmem>>, vector<1024x256xf32>
    %cst_66 = arith.constant dense<0.000000e+00> : vector<5x256xf32>
    %147 = tpu.matmul %145, %146, %cst_66 {dimension_numbers = #tpu.dot_dimension_numbers<[1], [0], [0], [1], [0, 0, 1, 1], [], []>} : vector<5x1024xf32>, vector<1024x256xf32>, vector<5x256xf32> -> vector<5x256xf32>
    %148 = arith.addf %73, %147 : vector<5x256xf32>
    %c0_67 = arith.constant 0 : index
    %c0_68 = arith.constant 0 : index
    %149 = vector.load %arg13[%c0_67, %c0_68] : memref<1x256xf32, #tpu.memory_space<vmem>>, vector<1x256xf32>
    %150 = vector.broadcast %149 : vector<1x256xf32> to vector<5x256xf32>
    %151 = arith.addf %148, %150 : vector<5x256xf32>
    %c0_69 = arith.constant 0 : index
    %c0_70 = arith.constant 0 : index
    %c0_71 = arith.constant 0 : index
    %152 = vector.load %arg14[%c0_69, %c0_70, %c0_71] : memref<1x5x256xf32, #tpu.memory_space<vmem>>, vector<1x5x256xf32>
    %153 = vector.shape_cast %152 : vector<1x5x256xf32> to vector<5x256xf32>
    %154 = vector.shape_cast %151 : vector<5x256xf32> to vector<1x5x256xf32>
    tpu.vector_store %arg14[%c0_69, %c0_70, %c0_71], %154 {strides = array<i32>} : memref<1x5x256xf32, #tpu.memory_space<vmem>>, vector<1x5x256xf32>,
    return
  }
  func.func @transform_0(%arg0: i32) -> (i32, i32, i32) {
    %c0_i32 = arith.constant 0 : i32
    %c0_i32_0 = arith.constant 0 : i32
    %c0_i32_1 = arith.constant 0 : i32
    return %arg0, %c0_i32, %c0_i32_0 : i32, i32, i32
  }
  func.func @transform_1(%arg0: i32) -> (i32, i32) {
    %c0_i32 = arith.constant 0 : i32
    %c0_i32_0 = arith.constant 0 : i32
    %c0_i32_1 = arith.constant 0 : i32
    return %c0_i32, %c0_i32_0 : i32, i32
  }
  func.func @transform_2(%arg0: i32) -> (i32, i32) {
    %c0_i32 = arith.constant 0 : i32
    %c0_i32_0 = arith.constant 0 : i32
    %c0_i32_1 = arith.constant 0 : i32
    return %c0_i32, %c0_i32_0 : i32, i32
  }
  func.func @transform_3(%arg0: i32) -> (i32, i32) {
    %c0_i32 = arith.constant 0 : i32
    %c0_i32_0 = arith.constant 0 : i32
    %c0_i32_1 = arith.constant 0 : i32
    return %c0_i32, %c0_i32_0 : i32, i32
  }
  func.func @transform_4(%arg0: i32) -> (i32, i32) {
    %c0_i32 = arith.constant 0 : i32
    %c0_i32_0 = arith.constant 0 : i32
    %c0_i32_1 = arith.constant 0 : i32
    return %c0_i32, %c0_i32_0 : i32, i32
  }
  func.func @transform_5(%arg0: i32) -> (i32, i32) {
    %c0_i32 = arith.constant 0 : i32
    %c0_i32_0 = arith.constant 0 : i32
    %c0_i32_1 = arith.constant 0 : i32
    return %c0_i32, %c0_i32_0 : i32, i32
  }
  func.func @transform_6(%arg0: i32) -> (i32, i32) {
    %c0_i32 = arith.constant 0 : i32
    %c0_i32_0 = arith.constant 0 : i32
    %c0_i32_1 = arith.constant 0 : i32
    return %c0_i32, %c0_i32_0 : i32, i32
  }
  func.func @transform_7(%arg0: i32) -> (i32, i32) {
    %c0_i32 = arith.constant 0 : i32
    %c0_i32_0 = arith.constant 0 : i32
    %c0_i32_1 = arith.constant 0 : i32
    return %c0_i32, %c0_i32_0 : i32, i32
  }
  func.func @transform_8(%arg0: i32) -> (i32, i32) {
    %c0_i32 = arith.constant 0 : i32
    %c0_i32_0 = arith.constant 0 : i32
    %c0_i32_1 = arith.constant 0 : i32
    return %c0_i32, %c0_i32_0 : i32, i32
  }
  func.func @transform_9(%arg0: i32) -> (i32, i32) {
    %c0_i32 = arith.constant 0 : i32
    %c0_i32_0 = arith.constant 0 : i32
    %c0_i32_1 = arith.constant 0 : i32
    return %c0_i32, %c0_i32_0 : i32, i32
  }
  func.func @transform_10(%arg0: i32) -> (i32, i32) {
    %c0_i32 = arith.constant 0 : i32
    %c0_i32_0 = arith.constant 0 : i32
    %c0_i32_1 = arith.constant 0 : i32
    return %c0_i32, %c0_i32_0 : i32, i32
  }
  func.func @transform_11(%arg0: i32) -> (i32, i32) {
    %c0_i32 = arith.constant 0 : i32
    %c0_i32_0 = arith.constant 0 : i32
    %c0_i32_1 = arith.constant 0 : i32
    return %c0_i32, %c0_i32_0 : i32, i32
  }
  func.func @transform_12(%arg0: i32) -> (i32, i32) {
    %c0_i32 = arith.constant 0 : i32
    %c0_i32_0 = arith.constant 0 : i32
    %c0_i32_1 = arith.constant 0 : i32
    return %c0_i32, %c0_i32_0 : i32, i32
  }
  func.func @transform_13(%arg0: i32) -> (i32, i32, i32) {
    %c0_i32 = arith.constant 0 : i32
    %c0_i32_0 = arith.constant 0 : i32
    %c0_i32_1 = arith.constant 0 : i32
    return %arg0, %c0_i32, %c0_i32_0 : i32, i32, i32
  }
}

module attributes {stable_mosaic.version = 11 : i64} {
  func.func @_final_norm_kernel(%arg0: i32, %arg1: memref<1x5x256xf32, #tpu.memory_space<vmem>>, %arg2: memref<1x256xf32, #tpu.memory_space<vmem>>, %arg3: memref<1x256xf32, #tpu.memory_space<vmem>>, %arg4: memref<1x1x256xf32, #tpu.memory_space<vmem>>) attributes {dimension_semantics = [#tpu.dimension_semantics<parallel>], iteration_bounds = array<i64: 2>, scalar_prefetch = 0 : i64, scratch_operands = 0 : i64, tpu.core_type = #tpu.core_type<tc>, window_params = [{transform_indices = @transform_0, window_bounds = array<i64: 1, 5, 256>}, {pipeline_mode = #tpu.pipeline_mode<synchronous>, transform_indices = @transform_1, window_bounds = array<i64: 1, 256>}, {pipeline_mode = #tpu.pipeline_mode<synchronous>, transform_indices = @transform_2, window_bounds = array<i64: 1, 256>}, {transform_indices = @transform_3, window_bounds = array<i64: 1, 1, 256>}]} {
    %c0 = arith.constant 0 : index
    %c0_0 = arith.constant 0 : index
    %c0_1 = arith.constant 0 : index
    %0 = vector.load %arg1[%c0, %c0_0, %c0_1] : memref<1x5x256xf32, #tpu.memory_space<vmem>>, vector<1x5x256xf32>
    %1 = vector.shape_cast %0 : vector<1x5x256xf32> to vector<5x256xf32>
    %2 = vector.extract_strided_slice %1 {offsets = [0, 0], sizes = [1, 256], strides = [1, 1]} : vector<5x256xf32> to vector<1x256xf32>
    %c0_2 = arith.constant 0 : index
    %c0_3 = arith.constant 0 : index
    %3 = vector.load %arg2[%c0_2, %c0_3] : memref<1x256xf32, #tpu.memory_space<vmem>>, vector<1x256xf32>
    %c0_4 = arith.constant 0 : index
    %c0_5 = arith.constant 0 : index
    %4 = vector.load %arg3[%c0_4, %c0_5] : memref<1x256xf32, #tpu.memory_space<vmem>>, vector<1x256xf32>
    %cst = arith.constant dense<0.000000e+00> : vector<1xf32>
    %5 = vector.multi_reduction <add>, %2, %cst [1] : vector<1x256xf32> to vector<1xf32>
    %6 = vector.shape_cast %5 : vector<1xf32> to vector<1x1xf32>
    %cst_6 = arith.constant 2.560000e+02 : f32
    %7 = vector.broadcast %cst_6 : f32 to vector<1x1xf32>
    %8 = arith.divf %6, %7 : vector<1x1xf32>
    %9 = arith.mulf %2, %2 : vector<1x256xf32>
    %cst_7 = arith.constant dense<0.000000e+00> : vector<1xf32>
    %10 = vector.multi_reduction <add>, %9, %cst_7 [1] : vector<1x256xf32> to vector<1xf32>
    %11 = vector.shape_cast %10 : vector<1xf32> to vector<1x1xf32>
    %cst_8 = arith.constant 2.560000e+02 : f32
    %12 = vector.broadcast %cst_8 : f32 to vector<1x1xf32>
    %13 = arith.divf %11, %12 : vector<1x1xf32>
    %14 = arith.mulf %8, %8 : vector<1x1xf32>
    %15 = arith.subf %13, %14 : vector<1x1xf32>
    %cst_9 = arith.constant 0.000000e+00 : f32
    %16 = vector.broadcast %cst_9 : f32 to vector<1x1xf32>
    %17 = arith.maximumf %15, %16 : vector<1x1xf32>
    %18 = vector.broadcast %8 : vector<1x1xf32> to vector<1x256xf32>
    %19 = arith.subf %2, %18 : vector<1x256xf32>
    %cst_10 = arith.constant 9.99999997E-7 : f32
    %20 = vector.broadcast %cst_10 : f32 to vector<1x1xf32>
    %21 = arith.addf %17, %20 : vector<1x1xf32>
    %22 = math.rsqrt %21 : vector<1x1xf32>
    %23 = vector.broadcast %22 : vector<1x1xf32> to vector<1x256xf32>
    %24 = arith.mulf %19, %23 : vector<1x256xf32>
    %25 = arith.mulf %24, %3 : vector<1x256xf32>
    %26 = arith.addf %25, %4 : vector<1x256xf32>
    %c0_11 = arith.constant 0 : index
    %c0_12 = arith.constant 0 : index
    %c0_13 = arith.constant 0 : index
    %27 = vector.load %arg4[%c0_11, %c0_12, %c0_13] : memref<1x1x256xf32, #tpu.memory_space<vmem>>, vector<1x1x256xf32>
    %28 = vector.shape_cast %27 : vector<1x1x256xf32> to vector<1x256xf32>
    %29 = vector.shape_cast %26 : vector<1x256xf32> to vector<1x1x256xf32>
    tpu.vector_store %arg4[%c0_11, %c0_12, %c0_13], %29 {strides = array<i32>} : memref<1x1x256xf32, #tpu.memory_space<vmem>>, vector<1x1x256xf32>,
    return
  }
  func.func @transform_0(%arg0: i32) -> (i32, i32, i32) {
    %c0_i32 = arith.constant 0 : i32
    %c0_i32_0 = arith.constant 0 : i32
    %c0_i32_1 = arith.constant 0 : i32
    return %arg0, %c0_i32, %c0_i32_0 : i32, i32, i32
  }
  func.func @transform_1(%arg0: i32) -> (i32, i32) {
    %c0_i32 = arith.constant 0 : i32
    %c0_i32_0 = arith.constant 0 : i32
    %c0_i32_1 = arith.constant 0 : i32
    return %c0_i32, %c0_i32_0 : i32, i32
  }
  func.func @transform_2(%arg0: i32) -> (i32, i32) {
    %c0_i32 = arith.constant 0 : i32
    %c0_i32_0 = arith.constant 0 : i32
    %c0_i32_1 = arith.constant 0 : i32
    return %c0_i32, %c0_i32_0 : i32, i32
  }
  func.func @transform_3(%arg0: i32) -> (i32, i32, i32) {
    %c0_i32 = arith.constant 0 : i32
    %c0_i32_0 = arith.constant 0 : i32
    %c0_i32_1 = arith.constant 0 : i32
    return %arg0, %c0_i32, %c0_i32_0 : i32, i32, i32
  }
}

</mosaic_0001>

<bundles_post_ra>
// kernel: attribute_transformer13_forward.5
= control target key start
LH: loop header
LB: loop body
LE: loop exit
PB: predicated region body
PF: predicated region fallthrough
CT: control target
= control target key end

     0   :  { %10 = vsyncpa [#allocation3], 0  ;;  %s1072_s18 = smov 0   ;;  %s1167_s0 = inlined_call_operand.vmem [shape: f32[2,4,768], index: 0, kind: input, shape index: {}]   ;;  %s1168_s1 = inlined_call_operand.hbm [shape: f32[768,256], index: 1, kind: input, shape index: {}]   ;;  %s1169_s2 = inlined_call_operand.vmem [shape: f32[1,256], index: 2, kind: input, shape index: {}]   ;;  %s1170_s3 = inlined_call_operand.vmem [shape: f32[1,256], index: 3, kind: input, shape index: {}]   ;;  %s1171_s4 = inlined_call_operand.vmem [shape: f32[5,256], index: 4, kind: input, shape index: {}]   ;;  %s1172_s5 = inlined_call_operand.vmem [shape: f32[2,5,256], index: 5, kind: output, shape index: {}]  }
   0x1 LB: > { %s1078_s19 = sadd.s32 4294967295, %s1037_s18   ;;  %p765_p0 = scmp.ge.s32.totalorder %s1037_s18, 1  ;;  %s1037_s18 = sphi %s1072_s18, %s16_s18  }
   0x2   : > { %p157_p1 = scmp.lt.s32.totalorder %s1037_s18, 3  ;;  %s1039_s20 = smov [#allocation2]  }
   0x3   : > { %s169_s21 = sshll.u32 %s1039_s20, 4  ;;  %p1173_p3 = scmp.eq.s32.totalorder %s1078_s19, 0  ;;  %s170_s21 = int_to_ptr.vmem [resolvable:$true] %s169_s21 }
   0x4   : > { %p1082_p2 = pnand %p765_p0, %p157_p1  ;;  %s999_s26 = scalar_lea.hbm %s1168_s1, 24576 }
   0x5   : > { %p1000_p6 = scmp.ne.s32.totalorder %s1168_s1, %s999_s26  ;;  %p1006_p10 = scmp.lt.u32.totalorder %s999_s26, %s1168_s1 }
   0x6   : > { %s1175_s22 = scalar_select %p1082_p2, 1, 0 }
   0x7   : > { %p979_p4 = pneg %p1082_p2 }
   0x9   : > { %p1091_p5 = pnand %p1173_p3, %p979_p4 }
   0xb   : > { %p1001_p7 = pneg %p1091_p5 }
   0xd   : > { %p1002_p8 = pnand %p1001_p7, %p1000_p6 }
   0xf   : > { %p1003_p9 = pneg %p1002_p8 }
  0x11   : > { %p1008_p11 = pnand %p1006_p10, %p1003_p9 }
  0x13   : > { %1011 = shalt.err (!%p1008_p11)
}
  0x14   : > { %s1012_s6 = scalar_lea.vmem %s170_s21, 24576  ;;  %p1020_p1 = scmp.lt.s32.totalorder %s170_s21, %s170_s21 }
  0x15   : > { %p1013_p12 = scmp.ne.s32.totalorder %s170_s21, %s1012_s6  ;;  %p1021_p4 = scmp.lt.s32.totalorder %s1012_s6, %s1012_s6 }
  0x17   : > { %p1015_p13 = pnand %p1013_p12, %p1001_p7  ;;  %p1022_p3 = por %p1021_p4, %p1020_p1 }
  0x19   : > { %p1016_p0 = pneg %p1015_p13 }
  0x1b   : > { %p1023_p2 = pnand %p1022_p3, %p1016_p0 }
  0x1d   : > { %1026 = shalt.err (!%p1023_p2)
}
  0x1e   : > { %s1040_s7 = smov 256   ;;  %s1041_s8 = smov 16  }
  0x1f   : > { %982 = dma.hbm_to_vmem [thread:$0]  (!%p1091_p5), %s1168_s1, 24576, %s170_s21, [#allocation3], %s1040_s7, %s1040_s7, %s1041_s8  }
  0x20   : > { %p1177_p6 = scmp.ne.s32.totalorder %s1175_s22, 0 }
  0x21   : > { %p1178_p8 = scmp.eq.s32.totalorder (!%p1177_p6), %s1078_s19, 0 }
  0x22   : > { %202 = sbr.rel (%p1177_p6) target bundleno = 393 (0x189), region = 40 }
  0x29   : > { %1032 = dma.done.wait (%p1178_p8), [#allocation3], 24576   ;;  %p1179_p7 = pmov %p1178_p8 }
  0x2a   : > { %v308_v0 = vld [vmem:[#allocation2 + $0x208] sm:$0xff]  ;;  %v310_v1 = vld [vmem:[#allocation2 + $0x218] sm:$0xff]  ;;  %v307_v2 = vld [vmem:[#allocation2 + $0x200] sm:$0xff]  ;;  %p230_p2 = scmp.lt.s32.totalorder %s1078_s19, 1 }
  0x2b   : > { %1034 = vsyncadd (%p1179_p7), [#allocation3], 4294942720  ;;  %v840_v3 = vpack.c.bf16 %v310_v1, %v308_v0  ;;  %v309_v4 = vld [vmem:[#allocation2 + $0x210] sm:$0xff]  ;;  %v312_v5 = vld [vmem:[#allocation2 + $0x228] sm:$0xff] }
  0x2c   : > { %v314_v6 = vld [vmem:[#allocation2 + $0x238] sm:$0xff]  ;;  %v842_v7 = vpack.c.bf16 %v309_v4, %v307_v2  ;;  %v311_v9 = vld [vmem:[#allocation2 + $0x220] sm:$0xff]  ;;  %v313_v10 = vld [vmem:[#allocation2 + $0x230] sm:$0xff]  ;;  %s1181_s19 = smov (!%p230_p2, %s1078_s19), 1 }
  0x2d   : > { %v844_v8 = vpack.c.bf16 %v314_v6, %v312_v5  ;;  %v316_v11 = vld [vmem:[#allocation2 + $0x248] sm:$0xff]  ;;  %841 = vmatprep.subr.bf16.mxu0 %v840_v3  ;;  %v318_v12 = vld [vmem:[#allocation2 + $0x258] sm:$0xff]  ;;  %v846_v13 = vpack.c.bf16 %v313_v10, %v311_v9  ;;  %v315_v15 = vld [vmem:[#allocation2 + $0x240] sm:$0xff]  ;;  %s974_s11 = smul.u32 24, %s1181_s19  ;;  %s775_s15 = sshll.u32 %s1181_s19, 4 }
  0x2e   : > { %843 = vmatpush1.bf16.msra.mxu0 %v842_v7  ;;  %v848_v14 = vpack.c.bf16 %v318_v12, %v316_v11  ;;  %v317_v16 = vld [vmem:[#allocation2 + $0x250] sm:$0xff]  ;;  %v320_v17 = vld [vmem:[#allocation2 + $0x268] sm:$0xff]  ;;  %v322_v18 = vld [vmem:[#allocation2 + $0x278] sm:$0xff]  ;;  %s239_s20 = scalar_lea.vmem %s1172_s5, %s775_s15 }
  0x2f   : > { %845 = vmatprep.subr.bf16.mxu0 %v844_v8  ;;  %v850_v19 = vpack.c.bf16 %v317_v16, %v315_v15  ;;  %v852_v20 = vpack.c.bf16 %v322_v18, %v320_v17  ;;  %v319_v21 = vld [vmem:[#allocation2 + $0x260] sm:$0xff]  ;;  %v321_v22 = vld [vmem:[#allocation2 + $0x270] sm:$0xff]  ;;  %v324_v23 = vld [vmem:[#allocation2 + $0x288] sm:$0xff]  ;;  %s1125_s14 = scalar_lea.vmem %s1167_s0, %s974_s11 }
  0x30   : > { %v326_v24 = vld [vmem:[#allocation2 + $0x298] sm:$0xff]  ;;  %v854_v25 = vpack.c.bf16 %v321_v22, %v319_v21  ;;  %v323_v27 = vld [vmem:[#allocation2 + $0x280] sm:$0xff]  ;;  %v325_v28 = vld [vmem:[#allocation2 + $0x290] sm:$0xff] }
  0x31   : > { %v856_v26 = vpack.c.bf16 %v326_v24, %v324_v23  ;;  %v328_v29 = vld [vmem:[#allocation2 + $0x2a8] sm:$0xff]  ;;  %v330_v30 = vld [vmem:[#allocation2 + $0x2b8] sm:$0xff]  ;;  %v858_v31 = vpack.c.bf16 %v325_v28, %v323_v27  ;;  %v327_v33 = vld [vmem:[#allocation2 + $0x2a0] sm:$0xff] }
  0x32   : > { %847 = vmatpush1.bf16.msra.mxu0 %v846_v13  ;;  %v860_v32 = vpack.c.bf16 %v330_v30, %v328_v29  ;;  %v329_v34 = vld [vmem:[#allocation2 + $0x2b0] sm:$0xff]  ;;  %v332_v35 = vld [vmem:[#allocation2 + $0x2c8] sm:$0xff]  ;;  %v334_v36 = vld [vmem:[#allocation2 + $0x2d8] sm:$0xff] }
  0x33   : > { %849 = vmatprep.subr.bf16.mxu0 %v848_v14  ;;  %v862_v37 = vpack.c.bf16 %v329_v34, %v327_v33  ;;  %v331_v38 = vld [vmem:[#allocation2 + $0x2c0] sm:$0xff]  ;;  %v333_v39 = vld [vmem:[#allocation2 + $0x2d0] sm:$0xff]  ;;  %v244_v40 = vld [vmem:[#allocation2 + $0x8] sm:$0xff]  ;;  %v864_v41 = vpack.c.bf16 %v334_v36, %v332_v35 }
  0x34   : > { %v336_v42 = vld [vmem:[#allocation2 + $0x2e8] sm:$0xff]  ;;  %v338_v43 = vld [vmem:[#allocation2 + $0x2f8] sm:$0xff]  ;;  %v243_v46 = vld [vmem:[#allocation2] sm:$0xff]  ;;  %v866_v52 = vpack.c.bf16 %v333_v39, %v331_v38 }
  0x35   : > { %v246_v44 = vld [vmem:[#allocation2 + $0x18] sm:$0xff]  ;;  %v245_v47 = vld [vmem:[#allocation2 + $0x10] sm:$0xff]  ;;  %v1128_v48 = vld [vmem:[%s1125_s14 + $0x8] sm:$0xff]  ;;  %v868_v56 = vpack.c.bf16 %v338_v43, %v336_v42 }
  0x36   : > { %851 = vmatpush1.bf16.msra.mxu0 %v850_v19  ;;  %v776_v45 = vpack.c.bf16 %v246_v44, %v244_v40  ;;  %v778_v49 = vpack.c.bf16 %v245_v47, %v243_v46  ;;  %v451_v50 = vcombine.high %v1128_v48, %v1128_v48  ;;  %v248_v51 = vld [vmem:[#allocation2 + $0x28] sm:$0xff]  ;;  %v335_v53 = vld [vmem:[#allocation2 + $0x2e0] sm:$0xff]  ;;  %v337_v54 = vld [vmem:[#allocation2 + $0x2f0] sm:$0xff] }
  0x37   : > { %853 = vmatprep.subr.bf16.mxu0 %v852_v20  ;;  %v250_v55 = vld [vmem:[#allocation2 + $0x38] sm:$0xff]  ;;  %v340_v57 = vld [vmem:[#allocation2 + $0x308] sm:$0xff]  ;;  %v247_v59 = vld [vmem:[#allocation2 + $0x20] sm:$0xff]  ;;  %v870_v3 = vpack.c.bf16 %v337_v54, %v335_v53 }
  0x38   : > { %777 = vmatprep.subr.bf16.mxu1 %v776_v45  ;;  %v780_v58 = vpack.c.bf16 %v250_v55, %v248_v51  ;;  %v249_v60 = vld [vmem:[#allocation2 + $0x30] sm:$0xff]  ;;  %v342_v61 = vld [vmem:[#allocation2 + $0x318] sm:$0xff]  ;;  %591 = vmatprep.mubr.f32.mxu0 %v451_v50  ;;  %v252_v63 = vld [vmem:[#allocation2 + $0x48] sm:$0xff] }
  0x39   : > { %779 = vmatpush1.bf16.msra.mxu1 %v778_v49  ;;  %v782_v62 = vpack.c.bf16 %v249_v60, %v247_v59  ;;  %v254_v0 = vld [vmem:[#allocation2 + $0x58] sm:$0xff]  ;;  %v251_v2 = vld [vmem:[#allocation2 + $0x40] sm:$0xff]  ;;  %v341_v5 = vld [vmem:[#allocation2 + $0x310] sm:$0xff]  ;;  %v872_v7 = vpack.c.bf16 %v342_v61, %v340_v57 }
  0x3a   : > { %855 = vmatpush1.bf16.msra.mxu0 %v854_v25  ;;  %781 = vmatprep.subr.bf16.mxu1 %v780_v58  ;;  %v784_v1 = vpack.c.bf16 %v254_v0, %v252_v63  ;;  %v339_v4 = vld [vmem:[#allocation2 + $0x300] sm:$0xff]  ;;  %v253_v6 = vld [vmem:[#allocation2 + $0x50] sm:$0xff]  ;;  %v344_v8 = vld [vmem:[#allocation2 + $0x328] sm:$0xff] }
  0x3b   : > { %857 = vmatprep.subr.bf16.mxu0 %v856_v26  ;;  %v786_v9 = vpack.c.bf16 %v253_v6, %v251_v2  ;;  %v256_v10 = vld [vmem:[#allocation2 + $0x68] sm:$0xff]  ;;  %v258_v11 = vld [vmem:[#allocation2 + $0x78] sm:$0xff]  ;;  %v255_v14 = vld [vmem:[#allocation2 + $0x60] sm:$0xff]  ;;  %v874_v17 = vpack.c.bf16 %v341_v5, %v339_v4 }
  0x3c   : > { %v346_v12 = vld [vmem:[#allocation2 + $0x338] sm:$0xff]  ;;  %v788_v13 = vpack.c.bf16 %v258_v11, %v256_v10  ;;  %v257_v15 = vld [vmem:[#allocation2 + $0x70] sm:$0xff]  ;;  %v260_v16 = vld [vmem:[#allocation2 + $0x88] sm:$0xff] }
  0x3d   : > { %783 = vmatpush1.bf16.msra.mxu1 %v782_v62  ;;  %v262_v18 = vld [vmem:[#allocation2 + $0x98] sm:$0xff]  ;;  %v876_v19 = vpack.c.bf16 %v346_v12, %v344_v8  ;;  %v343_v20 = vld [vmem:[#allocation2 + $0x320] sm:$0xff]  ;;  %v345_v21 = vld [vmem:[#allocation2 + $0x330] sm:$0xff]  ;;  %v790_v23 = vpack.c.bf16 %v257_v15, %v255_v14 }
  0x3e   : > { %859 = vmatpush1.bf16.msra.mxu0 %v858_v31  ;;  %785 = vmatprep.subr.bf16.mxu1 %v784_v1  ;;  %v348_v22 = vld [vmem:[#allocation2 + $0x348] sm:$0xff]  ;;  %v350_v24 = vld [vmem:[#allocation2 + $0x358] sm:$0xff]  ;;  %v792_v25 = vpack.c.bf16 %v262_v18, %v260_v16  ;;  %v259_v26 = vld [vmem:[#allocation2 + $0x80] sm:$0xff]  ;;  %v878_v30 = vpack.c.bf16 %v345_v21, %v343_v20 }
  0x3f   : > { %861 = vmatprep.subr.bf16.mxu0 %v860_v32  ;;  %v261_v27 = vld [vmem:[#allocation2 + $0x90] sm:$0xff]  ;;  %v264_v28 = vld [vmem:[#allocation2 + $0xa8] sm:$0xff]  ;;  %v266_v29 = vld [vmem:[#allocation2 + $0xb8] sm:$0xff]  ;;  %v880_v31 = vpack.c.bf16 %v350_v24, %v348_v22 }
  0x40   : > { %v347_v32 = vld [vmem:[#allocation2 + $0x340] sm:$0xff]  ;;  %v349_v33 = vld [vmem:[#allocation2 + $0x350] sm:$0xff]  ;;  %v352_v34 = vld [vmem:[#allocation2 + $0x368] sm:$0xff]  ;;  %v794_v35 = vpack.c.bf16 %v261_v27, %v259_v26 }
  0x41   : > { %787 = vmatpush1.bf16.msra.mxu1 %v786_v9  ;;  %v354_v36 = vld [vmem:[#allocation2 + $0x378] sm:$0xff]  ;;  %v263_v38 = vld [vmem:[#allocation2 + $0xa0] sm:$0xff]  ;;  %v265_v39 = vld [vmem:[#allocation2 + $0xb0] sm:$0xff]  ;;  %v882_v42 = vpack.c.bf16 %v349_v33, %v347_v32 }
  0x42   : > { %863 = vmatpush1.bf16.msra.mxu0 %v862_v37  ;;  %789 = vmatprep.subr.bf16.mxu1 %v788_v13  ;;  %v796_v37 = vpack.c.bf16 %v266_v29, %v264_v28  ;;  %v268_v40 = vld [vmem:[#allocation2 + $0xc8] sm:$0xff]  ;;  %v884_v43 = vpack.c.bf16 %v354_v36, %v352_v34  ;;  %v351_v44 = vld [vmem:[#allocation2 + $0x360] sm:$0xff]  ;;  %v353_v45 = vld [vmem:[#allocation2 + $0x370] sm:$0xff]  ;;  %v798_v47 = vpack.c.bf16 %v265_v39, %v263_v38 }
  0x43   : > { %865 = vmatprep.subr.bf16.mxu0 %v864_v41  ;;  %v270_v41 = vld [vmem:[#allocation2 + $0xd8] sm:$0xff]  ;;  %v356_v46 = vld [vmem:[#allocation2 + $0x388] sm:$0xff]  ;;  %v267_v51 = vld [vmem:[#allocation2 + $0xc0] sm:$0xff]  ;;  %v886_v55 = vpack.c.bf16 %v353_v45, %v351_v44 }
  0x44   : > { %v358_v49 = vld [vmem:[#allocation2 + $0x398] sm:$0xff]  ;;  %v800_v50 = vpack.c.bf16 %v270_v41, %v268_v40  ;;  %v272_v53 = vld [vmem:[#allocation2 + $0xe8] sm:$0xff]  ;;  %v355_v57 = vld [vmem:[#allocation2 + $0x380] sm:$0xff] }
  0x45   : > { %791 = vmatpush1.bf16.msra.mxu1 %v790_v23  ;;  %v274_v54 = vld [vmem:[#allocation2 + $0xf8] sm:$0xff]  ;;  %v357_v58 = vld [vmem:[#allocation2 + $0x390] sm:$0xff]  ;;  %v360_v59 = vld [vmem:[#allocation2 + $0x3a8] sm:$0xff] }
  0x46   : > { %867 = vmatpush1.bf16.msra.mxu0 %v866_v52  ;;  %793 = vmatprep.subr.bf16.mxu1 %v792_v25  ;;  %v269_v52 = vld [vmem:[#allocation2 + $0xd0] sm:$0xff]  ;;  %v362_v61 = vld [vmem:[#allocation2 + $0x3b8] sm:$0xff]  ;;  %v804_v62 = vpack.c.bf16 %v274_v54, %v272_v53  ;;  %v271_v63 = vld [vmem:[#allocation2 + $0xe0] sm:$0xff] }
  0x47   : > { %869 = vmatprep.subr.bf16.mxu0 %v868_v56  ;;  %v888_v56 = vpack.c.bf16 %v358_v49, %v356_v46  ;;  %v802_v60 = vpack.c.bf16 %v269_v52, %v267_v51  ;;  %v273_v0 = vld [vmem:[#allocation2 + $0xf0] sm:$0xff]  ;;  %v276_v1 = vld [vmem:[#allocation2 + $0x108] sm:$0xff]  ;;  %v278_v2 = vld [vmem:[#allocation2 + $0x118] sm:$0xff]  ;;  %v892_v4 = vpack.c.bf16 %v362_v61, %v360_v59 }
  0x48   : > { %v359_v5 = vld [vmem:[#allocation2 + $0x3a0] sm:$0xff]  ;;  %v361_v6 = vld [vmem:[#allocation2 + $0x3b0] sm:$0xff]  ;;  %v806_v8 = vpack.c.bf16 %v273_v0, %v271_v63  ;;  %v366_v9 = vld [vmem:[#allocation2 + $0x3d8] sm:$0xff]  ;;  %v808_v10 = vpack.c.bf16 %v278_v2, %v276_v1 }
  0x49   : > { %795 = vmatpush1.bf16.msra.mxu1 %v794_v35  ;;  %v275_v11 = vld [vmem:[#allocation2 + $0x100] sm:$0xff]  ;;  %v277_v12 = vld [vmem:[#allocation2 + $0x110] sm:$0xff]  ;;  %v280_v13 = vld [vmem:[#allocation2 + $0x128] sm:$0xff]  ;;  %v894_v15 = vpack.c.bf16 %v361_v6, %v359_v5 }
  0x4a   : > { %871 = vmatpush1.bf16.msra.mxu0 %v870_v3  ;;  %797 = vmatprep.subr.bf16.mxu1 %v796_v37  ;;  %v890_v3 = vpack.c.bf16 %v357_v58, %v355_v57  ;;  %v282_v14 = vld [vmem:[#allocation2 + $0x138] sm:$0xff]  ;;  %v365_v18 = vld [vmem:[#allocation2 + $0x3d0] sm:$0xff]  ;;  %v810_v20 = vpack.c.bf16 %v277_v12, %v275_v11  ;;  %v279_v23 = vld [vmem:[#allocation2 + $0x120] sm:$0xff] }
  0x4b   : > { %873 = vmatprep.subr.bf16.mxu0 %v872_v7  ;;  %v364_v7 = vld [vmem:[#allocation2 + $0x3c8] sm:$0xff]  ;;  %v370_v21 = vld [vmem:[#allocation2 + $0x3f8] sm:$0xff]  ;;  %v812_v22 = vpack.c.bf16 %v282_v14, %v280_v13  ;;  %v281_v24 = vld [vmem:[#allocation2 + $0x130] sm:$0xff] }
  0x4c   : > { %v896_v16 = vpack.c.bf16 %v366_v9, %v364_v7  ;;  %v284_v25 = vld [vmem:[#allocation2 + $0x148] sm:$0xff]  ;;  %v286_v26 = vld [vmem:[#allocation2 + $0x158] sm:$0xff]  ;;  %v367_v29 = vld [vmem:[#allocation2 + $0x3e0] sm:$0xff]  ;;  %v814_v32 = vpack.c.bf16 %v281_v24, %v279_v23 }
  0x4d   : > { %799 = vmatpush1.bf16.msra.mxu1 %v798_v47  ;;  %v374_v33 = vld [vmem:[#allocation2 + $0x418] sm:$0xff]  ;;  %v816_v34 = vpack.c.bf16 %v286_v26, %v284_v25  ;;  %v283_v35 = vld [vmem:[#allocation2 + $0x140] sm:$0xff]  ;;  %v285_v36 = vld [vmem:[#allocation2 + $0x150] sm:$0xff] }
  0x4e   : > { %875 = vmatpush1.bf16.msra.mxu0 %v874_v17  ;;  %801 = vmatprep.subr.bf16.mxu1 %v800_v50  ;;  %v363_v17 = vld [vmem:[#allocation2 + $0x3c0] sm:$0xff]  ;;  %v288_v37 = vld [vmem:[#allocation2 + $0x168] sm:$0xff]  ;;  %v290_v38 = vld [vmem:[#allocation2 + $0x178] sm:$0xff]  ;;  %v818_v44 = vpack.c.bf16 %v285_v36, %v283_v35 }
  0x4f   : > { %877 = vmatprep.subr.bf16.mxu0 %v876_v19  ;;  %v368_v19 = vld [vmem:[#allocation2 + $0x3e8] sm:$0xff]  ;;  %v898_v27 = vpack.c.bf16 %v365_v18, %v363_v17  ;;  %v371_v41 = vld [vmem:[#allocation2 + $0x400] sm:$0xff]  ;;  %v378_v45 = vld [vmem:[#allocation2 + $0x438] sm:$0xff]  ;;  %v820_v46 = vpack.c.bf16 %v290_v38, %v288_v37 }
  0x50   : > { %v900_v28 = vpack.c.bf16 %v370_v21, %v368_v19  ;;  %v287_v47 = vld [vmem:[#allocation2 + $0x160] sm:$0xff]  ;;  %v289_v49 = vld [vmem:[#allocation2 + $0x170] sm:$0xff]  ;;  %v292_v50 = vld [vmem:[#allocation2 + $0x188] sm:$0xff] }
  0x51   : > { %803 = vmatpush1.bf16.msra.mxu1 %v802_v60  ;;  %v294_v51 = vld [vmem:[#allocation2 + $0x198] sm:$0xff]  ;;  %v1133_v52 = vld [vmem:[%s1125_s14] sm:$0xff]  ;;  %v377_v58 = vld [vmem:[#allocation2 + $0x430] sm:$0xff]  ;;  %v822_v60 = vpack.c.bf16 %v289_v49, %v287_v47 }
  0x52   : > { %879 = vmatpush1.bf16.msra.mxu0 %v878_v30  ;;  %805 = vmatprep.subr.bf16.mxu1 %v804_v62  ;;  %v369_v30 = vld [vmem:[#allocation2 + $0x3f0] sm:$0xff]  ;;  %v450_v54 = vcombine.high %v1133_v52, %v1133_v52  ;;  %v375_v57 = vld [vmem:[#allocation2 + $0x420] sm:$0xff]  ;;  %v380_v59 = vld [vmem:[#allocation2 + $0x448] sm:$0xff]  ;;  %v824_v63 = vpack.c.bf16 %v294_v51, %v292_v50 }
  0x53   : > { %881 = vmatprep.subr.bf16.mxu0 %v880_v31  ;;  %v372_v31 = vld [vmem:[#allocation2 + $0x408] sm:$0xff]  ;;  %v902_v39 = vpack.c.bf16 %v369_v30, %v367_v29  ;;  %v382_v62 = vld [vmem:[#allocation2 + $0x458] sm:$0xff]  ;;  %v291_v0 = vld [vmem:[#allocation2 + $0x180] sm:$0xff] }
  0x54   : > { %v904_v40 = vpack.c.bf16 %v374_v33, %v372_v31  ;;  %v293_v1 = vld [vmem:[#allocation2 + $0x190] sm:$0xff]  ;;  %520 = vmatprep.mubr.f32.mxu1 %v450_v54  ;;  %v296_v2 = vld [vmem:[#allocation2 + $0x1a8] sm:$0xff]  ;;  %v912_v5 = vpack.c.bf16 %v382_v62, %v380_v59  ;;  %v379_v6 = vld [vmem:[#allocation2 + $0x440] sm:$0xff] }
  0x55   : > { %807 = vmatpush1.bf16.msra.mxu1 %v806_v8  ;;  %v381_v7 = vld [vmem:[#allocation2 + $0x450] sm:$0xff]  ;;  %v384_v8 = vld [vmem:[#allocation2 + $0x468] sm:$0xff]  ;;  %v826_v9 = vpack.c.bf16 %v293_v1, %v291_v0  ;;  %v295_v12 = vld [vmem:[#allocation2 + $0x1a0] sm:$0xff] }
  0x56   : > { %883 = vmatpush1.bf16.msra.mxu0 %v882_v42  ;;  %809 = vmatprep.subr.bf16.mxu1 %v808_v10  ;;  %v373_v42 = vld [vmem:[#allocation2 + $0x410] sm:$0xff]  ;;  %v386_v10 = vld [vmem:[#allocation2 + $0x478] sm:$0xff]  ;;  %v300_v14 = vld [vmem:[#allocation2 + $0x1c8] sm:$0xff] }
  0x57   : > { %885 = vmatprep.subr.bf16.mxu0 %v884_v43  ;;  %v376_v43 = vld [vmem:[#allocation2 + $0x428] sm:$0xff]  ;;  %v906_v53 = vpack.c.bf16 %v373_v42, %v371_v41  ;;  %v297_v13 = vld [vmem:[#allocation2 + $0x1b0] sm:$0xff]  ;;  %v383_v17 = vld [vmem:[#allocation2 + $0x460] sm:$0xff] }
  0x58   : > { %v385_v18 = vld [vmem:[#allocation2 + $0x470] sm:$0xff]  ;;  %v388_v19 = vld [vmem:[#allocation2 + $0x488] sm:$0xff]  ;;  %v390_v21 = vld [vmem:[#allocation2 + $0x498] sm:$0xff] }
  0x59   : > { %811 = vmatpush1.bf16.msra.mxu1 %v810_v20  ;;  %v830_v20 = vpack.c.bf16 %v297_v13, %v295_v12  ;;  %v299_v23 = vld [vmem:[#allocation2 + $0x1c0] sm:$0xff]  ;;  %v301_v24 = vld [vmem:[#allocation2 + $0x1d0] sm:$0xff]  ;;  %v304_v25 = vld [vmem:[#allocation2 + $0x1e8] sm:$0xff] }
  0x5a   : > { %887 = vmatpush1.bf16.msra.mxu0 %v886_v55  ;;  %813 = vmatprep.subr.bf16.mxu1 %v812_v22  ;;  %v1138_v55 = vld [vmem:[%s1125_s14 + $0x10] sm:$0xff]  ;;  %v306_v26 = vld [vmem:[#allocation2 + $0x1f8] sm:$0xff]  ;;  %v387_v29 = vld [vmem:[#allocation2 + $0x480] sm:$0xff] }
  0x5b   : > { %889 = vmatprep.subr.bf16.mxu0 %v888_v56  ;;  %v908_v56 = vpack.c.bf16 %v378_v45, %v376_v43  ;;  %v452_v61 = vcombine.high %v1138_v55, %v1138_v55  ;;  %v389_v30 = vld [vmem:[#allocation2 + $0x490] sm:$0xff]  ;;  %v392_v31 = vld [vmem:[#allocation2 + $0x4a8] sm:$0xff]  ;;  %v394_v33 = vld [vmem:[#allocation2 + $0x4b8] sm:$0xff] }
  0x5c   : > { %v303_v35 = vld [vmem:[#allocation2 + $0x1e0] sm:$0xff]  ;;  %v305_v36 = vld [vmem:[#allocation2 + $0x1f0] sm:$0xff]  ;;  %v922_v37 = vpack.c.bf16 %v389_v30, %v387_v29  ;;  %v924_v38 = vpack.c.bf16 %v394_v33, %v392_v31  ;;  %v396_v42 = vld [vmem:[#allocation2 + $0x4c8] sm:$0xff] }
  0x5d   : > { %815 = vmatpush1.bf16.msra.mxu1 %v814_v32  ;;  %v834_v32 = vpack.c.bf16 %v301_v24, %v299_v23  ;;  %v838_v41 = vpack.c.bf16 %v305_v36, %v303_v35  ;;  %v398_v43 = vld [vmem:[#allocation2 + $0x4d8] sm:$0xff]  ;;  %v397_v47 = vld [vmem:[#allocation2 + $0x4d0] sm:$0xff]  ;;  %v400_v49 = vld [vmem:[#allocation2 + $0x4e8] sm:$0xff] }
  0x5e   : > { %891 = vmatpush1.bf16.msra.mxu0 %v890_v3  ;;  %817 = vmatprep.subr.bf16.mxu1 %v816_v34  ;;  %v298_v3 = vld [vmem:[#allocation2 + $0x1b8] sm:$0xff]  ;;  %v836_v34 = vpack.c.bf16 %v306_v26, %v304_v25  ;;  %v928_v45 = vpack.c.bf16 %v398_v43, %v396_v42  ;;  %v399_v54 = vld [vmem:[#allocation2 + $0x4e0] sm:$0xff]  ;;  %v405_v62 = vld [vmem:[#allocation2 + $0x510] sm:$0xff] }
  0x5f   : > { %893 = vmatprep.subr.bf16.mxu0 %v892_v4  ;;  %v910_v4 = vpack.c.bf16 %v377_v58, %v375_v57  ;;  %v828_v11 = vpack.c.bf16 %v298_v3, %v296_v2  ;;  %v402_v50 = vld [vmem:[#allocation2 + $0x4f8] sm:$0xff]  ;;  %v404_v57 = vld [vmem:[#allocation2 + $0x508] sm:$0xff]  ;;  %v407_v3 = vld [vmem:[#allocation2 + $0x520] sm:$0xff] }
  0x60   : > { %v406_v58 = vld [vmem:[#allocation2 + $0x518] sm:$0xff]  ;;  %v423_v25 = vld [vmem:[#allocation2 + $0x5a0] sm:$0xff]  ;;  %v425_v26 = vld [vmem:[#allocation2 + $0x5b0] sm:$0xff] }
  0x61   : > { %819 = vmatpush1.bf16.msra.mxu1 %v818_v44  ;;  %v410_v0 = vld [vmem:[#allocation2 + $0x538] sm:$0xff]  ;;  %v958_v29 = vpack.c.bf16 %v425_v26, %v423_v25  ;;  %v427_v31 = vld [vmem:[#allocation2 + $0x5c0] sm:$0xff]  ;;  %v432_v33 = vld [vmem:[#allocation2 + $0x5e8] sm:$0xff] }
  0x62   : > { %895 = vmatpush1.bf16.msra.mxu0 %v894_v15  ;;  %821 = vmatprep.subr.bf16.mxu1 %v820_v46  ;;  %v302_v15 = vld [vmem:[#allocation2 + $0x1d8] sm:$0xff]  ;;  %v395_v46 = vld [vmem:[#allocation2 + $0x4c0] sm:$0xff] }
  0x63   : > { %897 = vmatprep.subr.bf16.mxu0 %v896_v16  ;;  %v916_v16 = vpack.c.bf16 %v386_v10, %v384_v8  ;;  %v832_v22 = vpack.c.bf16 %v302_v15, %v300_v14  ;;  %v930_v51 = vpack.c.bf16 %v397_v47, %v395_v46  ;;  %v411_v8 = vld [vmem:[#allocation2 + $0x540] sm:$0xff]  ;;  %v416_v10 = vld [vmem:[#allocation2 + $0x568] sm:$0xff]  ;;  %v417_v15 = vld [vmem:[#allocation2 + $0x570] sm:$0xff] }
  0x64   : > { %v415_v14 = vld [vmem:[#allocation2 + $0x560] sm:$0xff] }
  0x65   : > { %823 = vmatpush1.bf16.msra.mxu1 %v822_v60  ;;  %v936_v60 = vpack.c.bf16 %v406_v58, %v404_v57  ;;  %v670_v42 = vld [vmem:[%s1171_s4] ss:$8 sm:$0x3] }
  0x66   : > { %899 = vmatpush1.bf16.msra.mxu0 %v898_v27  ;;  %825 = vmatprep.subr.bf16.mxu1 %v824_v63  ;;  %v918_v27 = vpack.c.bf16 %v385_v18, %v383_v17  ;;  %v408_v63 = vld [vmem:[#allocation2 + $0x528] sm:$0xff]  ;;  %v950_v17 = vpack.c.bf16 %v417_v15, %v415_v14  ;;  %v435_v47 = vld [vmem:[%s1169_s2] sm:$0x3] }
  0x67   : > { %901 = vmatprep.subr.bf16.mxu0 %v900_v28  ;;  %v920_v28 = vpack.c.bf16 %v390_v21, %v388_v19  ;;  %v940_v2 = vpack.c.bf16 %v410_v0, %v408_v63  ;;  %v419_v19 = vld [vmem:[#allocation2 + $0x580] sm:$0xff]  ;;  %v424_v21 = vld [vmem:[#allocation2 + $0x5a8] sm:$0xff] }
  0x69   : > { %827 = vmatpush1.bf16.msra.mxu1 %v826_v9  ;;  %v413_v9 = vld [vmem:[#allocation2 + $0x550] sm:$0xff] }
  0x6a   : > { %903 = vmatpush1.bf16.msra.mxu0 %v902_v39  ;;  %829 = vmatprep.subr.bf16.mxu1 %v828_v11  ;;  %v391_v39 = vld [vmem:[#allocation2 + $0x4a0] sm:$0xff]  ;;  %v418_v11 = vld [vmem:[#allocation2 + $0x578] sm:$0xff]  ;;  %v946_v12 = vpack.c.bf16 %v413_v9, %v411_v8 }
  0x6b   : > { %905 = vmatprep.subr.bf16.mxu0 %v904_v40  ;;  %v393_v40 = vld [vmem:[#allocation2 + $0x4b0] sm:$0xff]  ;;  %v948_v13 = vpack.c.bf16 %v418_v11, %v416_v10 }
  0x6c   : > { %v926_v44 = vpack.c.bf16 %v393_v40, %v391_v39  ;;  %v437_v40 = vlaneseq }
  0x6d   : > { %592 = vmatmul.mubr.f32.vlgmr.msra.gmra.mrb[0].mxu0 %v1128_v48  ;;  %v914_v48 = vpack.c.bf16 %v381_v7, %v379_v6  ;;  %831 = vmatpush1.bf16.msra.mxu1 %v830_v20  ;;  %v421_v20 = vld [vmem:[#allocation2 + $0x590] sm:$0xff] }
  0x6e   : > { %907 = vmatpush1.bf16.msra.mxu0 %v906_v53  ;;  %662 = vmatprep.mubr.f32.mxu0 %v452_v61  ;;  %v932_v53 = vpack.c.bf16 %v402_v50, %v400_v49  ;;  %v403_v61 = vld [vmem:[#allocation2 + $0x500] sm:$0xff]  ;;  %v954_v23 = vpack.c.bf16 %v421_v20, %v419_v19  ;;  %vm674_vm0 = vcmp.lt.s32.totalorder %v437_v40, 256 }
  0x6f   : > { %909 = vmatprep.subr.bf16.mxu0 %v908_v56  ;;  %833 = vmatprep.subr.bf16.mxu1 %v832_v22  ;;  %v401_v56 = vld [vmem:[#allocation2 + $0x4f0] sm:$0xff]  ;;  %v938_v1 = vpack.c.bf16 %v405_v62, %v403_v61  ;;  %v426_v22 = vld [vmem:[#allocation2 + $0x5b8] sm:$0xff] }
  0x70   : > { %v934_v59 = vpack.c.bf16 %v401_v56, %v399_v54  ;;  %v956_v24 = vpack.c.bf16 %v426_v22, %v424_v21  ;;  %v679_v56 = vld [vmem:[%s1171_s4 + $0x8] sm:$0x1e] }
  0x71   : > { %835 = vmatpush1.bf16.msra.mxu1 %v834_v32  ;;  %v429_v32 = vld [vmem:[#allocation2 + $0x5d0] sm:$0xff] }
  0x72   : > { %911 = vmatpush1.bf16.msra.mxu0 %v910_v4  ;;  %837 = vmatprep.subr.bf16.mxu1 %v836_v34  ;;  %v412_v4 = vld [vmem:[#allocation2 + $0x548] sm:$0xff]  ;;  %v434_v34 = vld [vmem:[#allocation2 + $0x5f8] sm:$0xff]  ;;  %v962_v35 = vpack.c.bf16 %v429_v32, %v427_v31 }
  0x73   : > { %913 = vmatprep.subr.bf16.mxu0 %v912_v5  ;;  %v414_v5 = vld [vmem:[#allocation2 + $0x558] sm:$0xff]  ;;  %v964_v36 = vpack.c.bf16 %v434_v34, %v432_v33 }
  0x74   : > { %v944_v7 = vpack.c.bf16 %v414_v5, %v412_v4 }
  0x75   : > { %839 = vmatpush1.bf16.msra.mxu1 %v838_v41  ;;  %v669_v41 = vld [vmem:[%s1170_s3] sm:$0x3] }
  0x76   : > { %915 = vmatpush1.bf16.msra.mxu0 %v914_v48  ;;  %v420_v48 = vld [vmem:[#allocation2 + $0x588] sm:$0xff]  ;;  %v671_v43 = vadd.f32 %v670_v42, %v669_v41 }
  0x77   : > { %917 = vmatprep.subr.bf16.mxu0 %v916_v16  ;;  %v422_v16 = vld [vmem:[#allocation2 + $0x598] sm:$0xff] }
  0x78   : > { %521 = vmatmul.mubr.f32.vlgmr.msra.gmra.mrb[0].mxu1 %v1133_v52  ;;  %v409_v52 = vld [vmem:[#allocation2 + $0x530] sm:$0xff]  ;;  %v952_v18 = vpack.c.bf16 %v422_v16, %v420_v48  ;;  %676 = vst.msk [vmem:[%s239_s20] ss:$8 sm:$0x3] %vm674_vm0, %v671_v43 }
  0x79   : > { %v942_v6 = vpack.c.bf16 %v409_v52, %v407_v3 }
  0x7a   : > { %919 = vmatpush1.bf16.msra.mxu0 %v918_v27  ;;  %v428_v27 = vld [vmem:[#allocation2 + $0x5c8] sm:$0xff] }
  0x7b   : > { %921 = vmatprep.subr.bf16.mxu0 %v920_v28  ;;  %v430_v28 = vld [vmem:[#allocation2 + $0x5d8] sm:$0xff] }
  0x7c   : > { %v960_v30 = vpack.c.bf16 %v430_v28, %v428_v27 }
  0x7e   : > { %923 = vmatpush1.bf16.msra.mxu0 %v922_v37  ;;  %v431_v37 = vld [vmem:[#allocation2 + $0x5e0] sm:$0xff] }
  0x7f   : > { %925 = vmatprep.subr.bf16.mxu0 %v924_v38  ;;  %v433_v38 = vld [vmem:[#allocation2 + $0x5f0] sm:$0xff] }
  0x80   : > { %v966_v39 = vpack.c.bf16 %v433_v38, %v431_v37 }
  0x82   : > { %927 = vmatpush1.bf16.msra.mxu0 %v926_v44 }
  0x83   : > { %929 = vmatprep.subr.bf16.mxu0 %v928_v45 }
  0x86   : > { %931 = vmatpush1.bf16.msra.mxu0 %v930_v51 }
  0x87   : > { %933 = vmatprep.subr.bf16.mxu0 %v932_v53  ;;  %v678_v53 = vld [vmem:[%s1171_s4] sm:$0x1e] }
  0x88   : > { %v682_v58 = vrot.slane %v678_v53, 1 }
  0x8a   : > { %935 = vmatpush1.bf16.msra.mxu0 %v934_v59 }
  0x8b   : > { %937 = vmatprep.subr.bf16.mxu0 %v936_v60  ;;  %v683_v60 = vrot.slane %v679_v56, 1 }
  0x8e   : > { %939 = vmatpush1.bf16.msra.mxu0 %v938_v1 }
  0x8f   : > { %941 = vmatprep.subr.bf16.mxu0 %v940_v2 }
  0x92   : > { %943 = vmatpush1.bf16.msra.mxu0 %v942_v6 }
  0x93   : > { %945 = vmatprep.subr.bf16.mxu0 %v944_v7 }
  0x96   : > { %947 = vmatpush1.bf16.msra.mxu0 %v946_v12 }
  0x97   : > { %949 = vmatprep.subr.bf16.mxu0 %v948_v13 }
  0x9a   : > { %951 = vmatpush1.bf16.msra.mxu0 %v950_v17 }
  0x9b   : > { %953 = vmatprep.subr.bf16.mxu0 %v952_v18 }
  0x9e   : > { %955 = vmatpush1.bf16.msra.mxu0 %v954_v23 }
  0x9f   : > { %957 = vmatprep.subr.bf16.mxu0 %v956_v24 }
  0xa2   : > { %959 = vmatpush1.bf16.msra.mxu0 %v958_v29 }
  0xa3   : > { %961 = vmatprep.subr.bf16.mxu0 %v960_v30 }
  0xa6   : > { %963 = vmatpush1.bf16.msra.mxu0 %v962_v35 }
  0xa7   : > { %965 = vmatprep.subr.bf16.mxu0 %v964_v36 }
  0xaa   : > { %967 = vmatpush1.bf16.msra.mxu0 %v966_v39 }
  0xad   : > { %663 = vmatmul.mubr.f32.vlgmr.msra.gmra.mrb[0].mxu0 %v1138_v55  ;;  %v438_v55 = vshrl.u32 %v437_v40, 7 }
  0xaf   : > { %v439_v46 = vsub.s32 0, %v438_v55  ;;  %v443_v49 = vsub.s32 1, %v438_v55 }
  0xb1   : > { %v440_v50 = vrot.slane %v435_v47, %v439_v46  ;;  %v444_v51 = vrot.slane %v435_v47, %v443_v49 }
 0x14b   : > { %v522_v44 = vpop.f32.mrb[0].mxu1 }
 0x14c   : > { %v524_v45 = vpop.f32.mrb[1].mxu1  ;;  %v523_v54 = vadd.f32 %v522_v44, %v440_v50 }
 0x14d   : > { %v525_v57 = vadd.f32 %v524_v45, %v444_v51 }
 0x180   : > { %v664_v59 = vpop.f32.mrb[0].mxu0 }
 0x181   : > { %v969_v61 = vadd.f32 %v664_v59, %v523_v54  ;;  %v666_v62 = vpop.f32.mrb[1].mxu0 }
 0x182   : > { %v971_v63 = vadd.f32 %v666_v62, %v525_v57 }
 0x183   : > { %v686_v0 = vadd.f32 %v969_v61, %v682_v58 }
 0x184   : > { %v687_v1 = vadd.f32 %v971_v63, %v683_v60 }
 0x185   : > { %v690_v2 = vrot.slane %v686_v0, 7 }
 0x186   : > { %v691_v3 = vrot.slane %v687_v1, 7 }
 0x187   : > { %694 = vst [vmem:[%s239_s20] sm:$0x1e] %v690_v2 }
 0x188   : > { %695 = vst [vmem:[%s239_s20 + $0x8] sm:$0x1e] %v691_v3 }
 0x189 PF: > { %s16_s18 = sadd.s32 1, %s1037_s18  }
 0x18a   : > { %p13_p3 = scmp.ge.s32.totalorder %s16_s18, 4  }
 0x18c   :  { %15 = sbr.rel (!%p13_p3) target bundleno = 1 (0x1), region = 75 }
 0x193   :  { %717 = vsyncpa [#allocation3], 1 }
 0x194   :  { %719 = vsyncpa [#allocation3 + $0x1], 1 }

// kernel: attribute_transformer13_forward.9
= control target key start
LH: loop header
LB: loop body
LE: loop exit
PB: predicated region body
PF: predicated region fallthrough
CT: control target
= control target key end

     0   :  { %s351_s12 = smov 0   ;;  %s378_s0 = inlined_call_operand.vmem [shape: f32[2,5,256], index: 0, kind: input, shape index: {}]   ;;  %s379_s1 = inlined_call_operand.vmem [shape: f32[1,256], index: 1, kind: input, shape index: {}]   ;;  %s380_s2 = inlined_call_operand.vmem [shape: f32[1,256], index: 2, kind: input, shape index: {}]   ;;  %s381_s3 = inlined_call_operand.vmem [shape: f32[2,1,256], index: 3, kind: output, shape index: {}]  }
   0x1 LB: > { %s300_s13 = sadd.s32 4294967295, %s328_s12   ;;  %p304_p0 = scmp.ge.s32.totalorder %s328_s12, 1  ;;  %s328_s12 = sphi %s351_s12, %s13_s12  }
   0x2   : > { %p137_p1 = scmp.lt.s32.totalorder %s328_s12, 3 }
   0x4   : > { %p138_p2 = pnand %p304_p0, %p137_p1 }
   0x5   : > { %p160_p3 = scmp.lt.s32.totalorder (!%p138_p2), %s300_s13, 1  ;;  %vm173_vm0 = vcmask (!%p138_p2), 1040384   ;;  %v199_v17 = vlaneseq (!%p138_p2)  ;;  %v171_v22 = vld [vmem:[%s379_s1] sm:$0x3] (!%p138_p2)  ;;  %v330_v23 = vmov (!%p138_p2), 1966171168  }
   0x6   : > { %141 = sbr.rel (%p138_p2) target bundleno = 198 (0xc6), region = 32  ;;  %v228_v24 = vunpack.c.l.s4 (!%p138_p2), %v330_v23  ;;  %v172_v25 = vld [vmem:[%s380_s2] sm:$0x3] (!%p138_p2) }
   0x7   : > { %v200_v19 = vshrl.u32 (!%p138_p2), %v199_v17, 7  ;;  %vm244_vm1 = vcmp.lt.s32.totalorder (!%p138_p2), %v199_v17, 256 }
   0x8   : > { %v229_v31 = vunpack.c.0.s8 (!%p138_p2), %v228_v24 }
   0x9   : > { %v201_v20 = vsub.s32 (!%p138_p2), 0, %v200_v19  ;;  %v205_v21 = vsub.s32 (!%p138_p2), 1, %v200_v19 }
   0xa   : > { %v232_v38 = vsub.s32 (!%p138_p2), %v229_v31, %v200_v19 }
   0xb   : > { %v202_v28 = vrot.slane (!%p138_p2), %v171_v22, %v201_v20  ;;  %v206_v29 = vrot.slane (!%p138_p2), %v171_v22, %v205_v21  ;;  %v215_v32 = vrot.slane (!%p138_p2), %v172_v25, %v201_v20  ;;  %v219_v33 = vrot.slane (!%p138_p2), %v172_v25, %v205_v21 }
   0xd   : > { %s383_s13 = smov (!%p160_p3, %s300_s13), 1 }
   0xe   : > { %s310_s14 = sshll.u32 %s383_s13, 4  ;;  %s307_s22 = sshll.u32 %s383_s13, 1 }
   0xf   : > { %s164_s17 = scalar_lea.vmem %s378_s0, %s310_s14  ;;  %s168_s25 = scalar_lea.vmem %s381_s3, %s307_s22 }
  0x10   : > { %v169_v0 = vld [vmem:[%s164_s17] sm:$0x1f]  ;;  %v170_v1 = vld [vmem:[%s164_s17 + $0x8] sm:$0x1f] }
  0x11   : > { %v174_v2 = vsel %vm173_vm0, %v169_v0, 0.0  ;;  %v175_v3 = vsel %vm173_vm0, %v170_v1, 0.0  ;;  %v181_v4 = vmul.f32 %v169_v0, %v169_v0  ;;  %v182_v5 = vmul.f32 %v170_v1, %v170_v1 }
  0x12   : > { %v176_v6 = vadd.f32 %v175_v3, %v174_v2 }
  0x13   : > { %v183_v7 = vsel %vm173_vm0, %v181_v4, 0.0  ;;  %v184_v8 = vsel %vm173_vm0, %v182_v5, 0.0 }
  0x14   : > { %177 = vadd.xlane.f32.xlu0 %v176_v6  ;;  %v185_v9 = vadd.f32 %v184_v8, %v183_v7 }
  0x18   : > { %186 = vadd.xlane.f32.xlu0 %v185_v9 }
  0xa1   : > { %v178_v10 = vpop.xlane.xlu0 %177 }
  0xa2   : > { %v180_v11 = vmul.f32 0.00390625, %v178_v10 }
  0xa4   : > { %v189_v13 = vmul.f32 %v180_v11, %v180_v11  ;;  %v192_v26 = vsub.f32 %v169_v0, %v180_v11  ;;  %v193_v27 = vsub.f32 %v170_v1, %v180_v11 }
  0xa5   : > { %v187_v12 = vpop.xlane.xlu0 %186 }
  0xa6   : > { %v188_v14 = vmul.f32 0.00390625, %v187_v12 }
  0xa8   : > { %v190_v15 = vsub.f32 %v188_v14, %v189_v13 }
  0xaa   : > { %v191_v16 = vmax.f32 %v190_v15, 0.0 }
  0xac   : > { %v194_v18 = vadd.f32 1e-06, %v191_v16 }
  0xae   : > { %320 = vrsqrt.f32 %v194_v18 }
  0xb8   : > { %v321_v30 = vpop.eup %320 }
  0xb9   : > { %v196_v34 = vmul.f32 %v321_v30, %v192_v26  ;;  %v197_v35 = vmul.f32 %v321_v30, %v193_v27 }
  0xbb   : > { %v209_v36 = vmul.f32 %v202_v28, %v196_v34  ;;  %v210_v37 = vmul.f32 %v206_v29, %v197_v35 }
  0xbd   : > { %v222_v39 = vadd.f32 %v215_v32, %v209_v36  ;;  %v223_v40 = vadd.f32 %v219_v33, %v210_v37 }
  0xbf   : > { %v226_v41 = vcombine.low %v222_v39, %v223_v40 }
  0xc1   : > { %v233_v42 = vrot.slane %v226_v41, %v232_v38 }
  0xc3   : > { %v240_v43 = vrot.slane %v233_v42, %v232_v38 }
  0xc5   : > { %246 = vst.msk [vmem:[%s168_s25] sm:$0x3] %vm244_vm1, %v240_v43 }
  0xc6 PF: > { %s13_s12 = sadd.s32 1, %s328_s12  }
  0xc7   : > { %p10_p4 = scmp.ge.s32.totalorder %s13_s12, 4  }
  0xc9   :  { %12 = sbr.rel (!%p10_p4) target bundleno = 1 (0x1), region = 62 }

// kernel: attribute_transformer13_forward.6
= control target key start
LH: loop header
LB: loop body
LE: loop exit
PB: predicated region body
PF: predicated region fallthrough
CT: control target
= control target key end

     0   :  { %18 = vsyncpa [#allocation3], 0  ;;  %s5399_s0 = inlined_call_operand.vmem [shape: f32[2,5,256], index: 0, kind: input, shape index: {}]   ;;  %s5400_s1 = inlined_call_operand.vmem [shape: f32[1,256], index: 1, kind: input, shape index: {}]   ;;  %s5401_s2 = inlined_call_operand.vmem [shape: f32[1,256], index: 2, kind: input, shape index: {}]   ;;  %s5402_s3 = inlined_call_operand.hbm [shape: f32[256,768], index: 3, kind: input, shape index: {}]   ;;  %s5403_s4 = inlined_call_operand.vmem [shape: f32[1,768], index: 4, kind: input, shape index: {}]   ;;  %s5404_s5 = inlined_call_operand.vmem [shape: f32[256,256], index: 5, kind: input, shape index: {}]   ;;  %s5405_s6 = inlined_call_operand.vmem [shape: f32[1,256], index: 6, kind: input, shape index: {}]   ;;  %s5406_s7 = inlined_call_operand.vmem [shape: f32[1,256], index: 7, kind: input, shape index: {}]   ;;  %s5407_s8 = inlined_call_operand.vmem [shape: f32[1,256], index: 8, kind: input, shape index: {}]   ;;  %s5408_s9 = inlined_call_operand.vmem [shape: f32[256,1024], index: 9, kind: input, shape index: {}]   ;;  %s5409_s10 = inlined_call_operand.vmem [shape: f32[1,1024], index: 10, kind: input, shape index: {}]   ;;  %s5410_s11 = inlined_call_operand.hbm [shape: f32[1024,256], index: 11, kind: input, shape index: {}]   ;;  %s5411_s12 = inlined_call_operand.vmem [shape: f32[1,256], index: 12, kind: input, shape index: {}]   ;;  %s5412_s13 = inlined_call_operand.vmem [shape: f32[2,5,256], index: 13, kind: output, shape index: {}]  }
   0x1   :  { %19 = vsyncpa [#allocation5], 0  ;;  %s4045_s25 = smov 0  }
   0x2 LB: > { %s3966_s26 = smov [#allocation2]   ;;  %s4051_s28 = sadd.s32 4294967295, %s3964_s25   ;;  %s3964_s25 = sphi %s4045_s25, %s25_s25  }
   0x3   : > { %s352_s27 = sshll.u32 %s3966_s26, 4  ;;  %p2989_p0 = scmp.ge.s32.totalorder %s3964_s25, 1  ;;  %s353_s27 = int_to_ptr.vmem [resolvable:$true] %s352_s27 }
   0x4   : > { %p334_p1 = scmp.lt.s32.totalorder %s3964_s25, 3  ;;  %p5413_p3 = scmp.eq.s32.totalorder %s4051_s28, 0 }
   0x5   : > { %s3967_s30 = smov [#allocation4]   ;;  %s3894_s18 = scalar_lea.hbm %s5402_s3, 24576 }
   0x6   : > { %p4055_p2 = pnand %p2989_p0, %p334_p1  ;;  %s386_s14 = sshll.u32 %s3967_s30, 4  ;;  %s4068_s14 = int_to_ptr.vmem [resolvable:$true] %s386_s14 }
   0x7   : > { %p3895_p6 = scmp.ne.s32.totalorder %s5402_s3, %s3894_s18  ;;  %p3901_p10 = scmp.lt.u32.totalorder %s3894_s18, %s5402_s3 }
   0x8   : > { %s5415_s29 = scalar_select %p4055_p2, 1, 0 }
   0x9   : > { %p3820_p4 = pneg %p4055_p2 }
   0xb   : > { %p4064_p5 = pnand %p5413_p3, %p3820_p4 }
   0xd   : > { %p3896_p7 = pneg %p4064_p5 }
   0xf   : > { %p3897_p8 = pnand %p3896_p7, %p3895_p6 }
  0x11   : > { %p3898_p9 = pneg %p3897_p8 }
  0x13   : > { %p3903_p11 = pnand %p3901_p10, %p3898_p9 }
  0x15   : > { %3906 = shalt.err (!%p3903_p11)
}
  0x16   : > { %s3907_s23 = scalar_lea.vmem %s353_s27, 24576  ;;  %p3915_p1 = scmp.lt.s32.totalorder %s353_s27, %s353_s27 }
  0x17   : > { %p3908_p12 = scmp.ne.s32.totalorder %s353_s27, %s3907_s23  ;;  %p3916_p4 = scmp.lt.s32.totalorder %s3907_s23, %s3907_s23 }
  0x19   : > { %p3910_p13 = pnand %p3908_p12, %p3896_p7  ;;  %p3917_p3 = por %p3916_p4, %p3915_p1 }
  0x1b   : > { %p3911_p0 = pneg %p3910_p13 }
  0x1d   : > { %p3918_p2 = pnand %p3917_p3, %p3911_p0 }
  0x1f   : > { %3921 = shalt.err (!%p3918_p2)
}
  0x20   : > { %s3968_s24 = smov 768   ;;  %s3969_s26 = smov 48  }
  0x21   : > { %3823 = dma.hbm_to_vmem [thread:$0]  (!%p4064_p5), %s5402_s3, 24576, %s353_s27, [#allocation3], %s3968_s24, %s3968_s24, %s3969_s26  }
  0x22   : > { %s3922_s19 = scalar_lea.hbm %s5410_s11, 32768 }
  0x23   : > { %p3923_p6 = scmp.ne.s32.totalorder %s5410_s11, %s3922_s19  ;;  %p3929_p8 = scmp.lt.u32.totalorder %s3922_s19, %s5410_s11 }
  0x25   : > { %p3925_p2 = pnand %p3923_p6, %p3896_p7 }
  0x27   : > { %p3926_p3 = pneg %p3925_p2 }
  0x29   : > { %p3931_p9 = pnand %p3929_p8, %p3926_p3 }
  0x2b   : > { %3934 = shalt.err (!%p3931_p9)
}
  0x2c   : > { %s3935_s27 = scalar_lea.vmem %s4068_s14, 32768  ;;  %p3943_p13 = scmp.lt.s32.totalorder %s4068_s14, %s4068_s14 }
  0x2d   : > { %p3936_p10 = scmp.ne.s32.totalorder %s4068_s14, %s3935_s27  ;;  %p3944_p0 = scmp.lt.s32.totalorder %s3935_s27, %s3935_s27 }
  0x2f   : > { %p3938_p11 = pnand %p3936_p10, %p3896_p7  ;;  %p3945_p1 = por %p3944_p0, %p3943_p13 }
  0x31   : > { %p3939_p12 = pneg %p3938_p11 }
  0x33   : > { %p3946_p4 = pnand %p3945_p1, %p3939_p12 }
  0x35   : > { %3949 = shalt.err (!%p3946_p4)
}
  0x36   : > { %s3970_s24 = smov 256   ;;  %s3971_s26 = smov 16  }
  0x37   : > { %3826 = dma.hbm_to_vmem [thread:$0]  (!%p4064_p5), %s5410_s11, 32768, %s4068_s14, [#allocation5], %s3970_s24, %s3970_s24, %s3971_s26  }
  0x38   : > { %p5417_p6 = scmp.ne.s32.totalorder %s5415_s29, 0 }
  0x39   : > { %p5418_p7 = scmp.eq.s32.totalorder (!%p5417_p6), %s4051_s28, 0 }
  0x3a   : > { %413 = sbr.rel (%p5417_p6) target bundleno = 2368 (0x940), region = 72 }
  0x41   : > { %3955 = dma.done.wait (%p5418_p7), [#allocation3], 24576   ;;  %p5419_p2 = pmov %p5418_p7 }
  0x43   : > { %3957 = vsyncadd (%p5419_p2), [#allocation3], 4294942720  ;;  %p5420_p3 = pmov %p5419_p2 }
  0x44   : > { %p5421_p8 = pmov %p5419_p2 }
  0x45   : > { %3959 = dma.done.wait (%p5420_p3), [#allocation5], 32768  }
  0x46   : > { %3961 = vsyncadd (%p5421_p8), [#allocation5], 4294934528  ;;  %p461_p9 = scmp.lt.s32.totalorder %s4051_s28, 1  ;;  %vm475_vm0 = vcmask 1044480   ;;  %v527_v2 = vld [vmem:[#allocation2 + $0x8] sm:$0xff]  ;;  %v533_v7 = vld [vmem:[#allocation2 + $0x38] sm:$0xff] }
  0x47   : > { %v526_v8 = vld [vmem:[#allocation2] sm:$0xff]  ;;  %v532_v9 = vld [vmem:[#allocation2 + $0x30] sm:$0xff]  ;;  %v3036_v11 = vpack.c.bf16 %v533_v7, %v527_v2  ;;  %v539_v13 = vld [vmem:[#allocation2 + $0x68] sm:$0xff]  ;;  %vm3973_vm1 = vmmov 0   ;;  %vm1034_vm2 = vcmask 36864   ;;  %vm1046_vm3 = vcmask 39936  }
  0x48   : > { %s5423_s28 = smov (!%p461_p9, %s4051_s28), 1  ;;  %v3038_v12 = vpack.c.bf16 %v532_v9, %v526_v8  ;;  %v545_v14 = vld [vmem:[#allocation2 + $0x98] sm:$0xff]  ;;  %v538_v15 = vld [vmem:[#allocation2 + $0x60] sm:$0xff]  ;;  %v544_v19 = vld [vmem:[#allocation2 + $0x90] sm:$0xff] }
  0x49   : > { %s3006_s29 = sshll.u32 %s5423_s28, 4  ;;  %v3040_v18 = vpack.c.bf16 %v545_v14, %v539_v13  ;;  %v551_v20 = vld [vmem:[#allocation2 + $0xc8] sm:$0xff]  ;;  %v557_v21 = vld [vmem:[#allocation2 + $0xf8] sm:$0xff]  ;;  %3037 = vmatprep.subr.bf16.mxu1 %v3036_v11  ;;  %v3042_v23 = vpack.c.bf16 %v544_v19, %v538_v15  ;;  %v550_v25 = vld [vmem:[#allocation2 + $0xc0] sm:$0xff] }
  0x4a   : > { %s4137_s17 = scalar_lea.vmem %s5399_s0, %s3006_s29  ;;  %3039 = vmatpush1.bf16.msra.mxu1 %v3038_v12  ;;  %v3044_v24 = vpack.c.bf16 %v557_v21, %v551_v20  ;;  %v556_v26 = vld [vmem:[#allocation2 + $0xf0] sm:$0xff]  ;;  %v563_v27 = vld [vmem:[#allocation2 + $0x128] sm:$0xff]  ;;  %v569_v28 = vld [vmem:[#allocation2 + $0x158] sm:$0xff]  ;;  %s470_s24 = scalar_lea.vmem %s5412_s13, %s3006_s29 }
  0x4b   : > { %v4140_v0 = vld [vmem:[%s4137_s17] sm:$0x1f]  ;;  %v4143_v1 = vld [vmem:[%s4137_s17 + $0x8] sm:$0x1f]  ;;  %3041 = vmatprep.subr.bf16.mxu1 %v3040_v18  ;;  %v3046_v29 = vpack.c.bf16 %v556_v26, %v550_v25  ;;  %v3048_v30 = vpack.c.bf16 %v569_v28, %v563_v27  ;;  %v568_v32 = vld [vmem:[#allocation2 + $0x150] sm:$0xff] }
  0x4c   : > { %v476_v3 = vsel %vm475_vm0, %v4140_v0, 0.0  ;;  %v477_v4 = vsel %vm475_vm0, %v4143_v1, 0.0  ;;  %v483_v5 = vmul.f32 %v4140_v0, %v4140_v0  ;;  %v484_v6 = vmul.f32 %v4143_v1, %v4143_v1  ;;  %v562_v31 = vld [vmem:[#allocation2 + $0x120] sm:$0xff]  ;;  %v575_v33 = vld [vmem:[#allocation2 + $0x188] sm:$0xff]  ;;  %v581_v34 = vld [vmem:[#allocation2 + $0x1b8] sm:$0xff] }
  0x4d   : > { %v478_v10 = vadd.f32 %v477_v4, %v476_v3  ;;  %v3050_v35 = vpack.c.bf16 %v568_v32, %v562_v31  ;;  %v3052_v36 = vpack.c.bf16 %v581_v34, %v575_v33  ;;  %v574_v37 = vld [vmem:[#allocation2 + $0x180] sm:$0xff]  ;;  %v580_v38 = vld [vmem:[#allocation2 + $0x1b0] sm:$0xff]  ;;  %v587_v39 = vld [vmem:[#allocation2 + $0x1e8] sm:$0xff] }
  0x4e   : > { %v485_v16 = vsel %vm475_vm0, %v483_v5, 0.0  ;;  %v486_v17 = vsel %vm475_vm0, %v484_v6, 0.0  ;;  %3043 = vmatpush1.bf16.msra.mxu1 %v3042_v23  ;;  %v593_v40 = vld [vmem:[#allocation2 + $0x218] sm:$0xff]  ;;  %v3054_v41 = vpack.c.bf16 %v580_v38, %v574_v37  ;;  %v586_v43 = vld [vmem:[#allocation2 + $0x1e0] sm:$0xff]  ;;  %v592_v44 = vld [vmem:[#allocation2 + $0x210] sm:$0xff] }
  0x4f   : > { %479 = vadd.xlane.f32.xlu0 %v478_v10  ;;  %v487_v22 = vadd.f32 %v486_v17, %v485_v16  ;;  %3045 = vmatprep.subr.bf16.mxu1 %v3044_v24  ;;  %v3056_v42 = vpack.c.bf16 %v593_v40, %v587_v39  ;;  %v599_v45 = vld [vmem:[#allocation2 + $0x248] sm:$0xff]  ;;  %v605_v46 = vld [vmem:[#allocation2 + $0x278] sm:$0xff]  ;;  %v3058_v47 = vpack.c.bf16 %v592_v44, %v586_v43  ;;  %v598_v49 = vld [vmem:[#allocation2 + $0x240] sm:$0xff] }
  0x50   : > { %v3060_v48 = vpack.c.bf16 %v605_v46, %v599_v45  ;;  %v604_v50 = vld [vmem:[#allocation2 + $0x270] sm:$0xff]  ;;  %v611_v51 = vld [vmem:[#allocation2 + $0x2a8] sm:$0xff]  ;;  %v617_v52 = vld [vmem:[#allocation2 + $0x2d8] sm:$0xff] }
  0x51   : > { %v3062_v53 = vpack.c.bf16 %v604_v50, %v598_v49  ;;  %v3064_v54 = vpack.c.bf16 %v617_v52, %v611_v51  ;;  %v610_v55 = vld [vmem:[#allocation2 + $0x2a0] sm:$0xff]  ;;  %v616_v56 = vld [vmem:[#allocation2 + $0x2d0] sm:$0xff]  ;;  %v623_v57 = vld [vmem:[#allocation2 + $0x308] sm:$0xff] }
  0x52   : > { %3047 = vmatpush1.bf16.msra.mxu1 %v3046_v29  ;;  %v629_v58 = vld [vmem:[#allocation2 + $0x338] sm:$0xff]  ;;  %v3066_v59 = vpack.c.bf16 %v616_v56, %v610_v55  ;;  %v622_v61 = vld [vmem:[#allocation2 + $0x300] sm:$0xff]  ;;  %v628_v62 = vld [vmem:[#allocation2 + $0x330] sm:$0xff] }
  0x53   : > { %488 = vadd.xlane.f32.xlu0 %v487_v22  ;;  %3049 = vmatprep.subr.bf16.mxu1 %v3048_v30  ;;  %v3068_v60 = vpack.c.bf16 %v629_v58, %v623_v57  ;;  %v635_v63 = vld [vmem:[#allocation2 + $0x368] sm:$0xff]  ;;  %v641_v2 = vld [vmem:[#allocation2 + $0x398] sm:$0xff]  ;;  %v3070_v3 = vpack.c.bf16 %v628_v62, %v622_v61  ;;  %v634_v5 = vld [vmem:[#allocation2 + $0x360] sm:$0xff] }
  0x54   : > { %v3072_v4 = vpack.c.bf16 %v641_v2, %v635_v63  ;;  %v640_v6 = vld [vmem:[#allocation2 + $0x390] sm:$0xff]  ;;  %v647_v7 = vld [vmem:[#allocation2 + $0x3c8] sm:$0xff]  ;;  %v653_v8 = vld [vmem:[#allocation2 + $0x3f8] sm:$0xff] }
  0x55   : > { %v3074_v9 = vpack.c.bf16 %v640_v6, %v634_v5  ;;  %v3076_v10 = vpack.c.bf16 %v653_v8, %v647_v7  ;;  %v646_v11 = vld [vmem:[#allocation2 + $0x3c0] sm:$0xff]  ;;  %v652_v12 = vld [vmem:[#allocation2 + $0x3f0] sm:$0xff]  ;;  %v659_v13 = vld [vmem:[#allocation2 + $0x428] sm:$0xff] }
  0x56   : > { %3051 = vmatpush1.bf16.msra.mxu1 %v3050_v35  ;;  %v665_v14 = vld [vmem:[#allocation2 + $0x458] sm:$0xff]  ;;  %v3078_v15 = vpack.c.bf16 %v652_v12, %v646_v11  ;;  %v658_v17 = vld [vmem:[#allocation2 + $0x420] sm:$0xff]  ;;  %v664_v18 = vld [vmem:[#allocation2 + $0x450] sm:$0xff] }
  0x57   : > { %3053 = vmatprep.subr.bf16.mxu1 %v3052_v36  ;;  %v3080_v16 = vpack.c.bf16 %v665_v14, %v659_v13  ;;  %v671_v19 = vld [vmem:[#allocation2 + $0x488] sm:$0xff]  ;;  %v677_v20 = vld [vmem:[#allocation2 + $0x4b8] sm:$0xff]  ;;  %v3082_v21 = vpack.c.bf16 %v664_v18, %v658_v17  ;;  %v670_v23 = vld [vmem:[#allocation2 + $0x480] sm:$0xff] }
  0x58   : > { %v3084_v22 = vpack.c.bf16 %v677_v20, %v671_v19  ;;  %v676_v24 = vld [vmem:[#allocation2 + $0x4b0] sm:$0xff]  ;;  %v683_v25 = vld [vmem:[#allocation2 + $0x4e8] sm:$0xff]  ;;  %v689_v26 = vld [vmem:[#allocation2 + $0x518] sm:$0xff] }
  0x59   : > { %v3086_v27 = vpack.c.bf16 %v676_v24, %v670_v23  ;;  %v3088_v28 = vpack.c.bf16 %v689_v26, %v683_v25  ;;  %v682_v29 = vld [vmem:[#allocation2 + $0x4e0] sm:$0xff]  ;;  %v688_v30 = vld [vmem:[#allocation2 + $0x510] sm:$0xff]  ;;  %v695_v31 = vld [vmem:[#allocation2 + $0x548] sm:$0xff] }
  0x5a   : > { %3055 = vmatpush1.bf16.msra.mxu1 %v3054_v41  ;;  %v701_v32 = vld [vmem:[#allocation2 + $0x578] sm:$0xff]  ;;  %v3090_v33 = vpack.c.bf16 %v688_v30, %v682_v29  ;;  %v694_v35 = vld [vmem:[#allocation2 + $0x540] sm:$0xff]  ;;  %v700_v36 = vld [vmem:[#allocation2 + $0x570] sm:$0xff] }
  0x5b   : > { %3057 = vmatprep.subr.bf16.mxu1 %v3056_v42  ;;  %v3092_v34 = vpack.c.bf16 %v701_v32, %v695_v31  ;;  %v707_v37 = vld [vmem:[#allocation2 + $0x5a8] sm:$0xff]  ;;  %v713_v38 = vld [vmem:[#allocation2 + $0x5d8] sm:$0xff]  ;;  %v3094_v39 = vpack.c.bf16 %v700_v36, %v694_v35  ;;  %v706_v41 = vld [vmem:[#allocation2 + $0x5a0] sm:$0xff] }
  0x5c   : > { %v3096_v40 = vpack.c.bf16 %v713_v38, %v707_v37  ;;  %v712_v42 = vld [vmem:[#allocation2 + $0x5d0] sm:$0xff]  ;;  %v529_v43 = vld [vmem:[#allocation2 + $0x18] sm:$0xff]  ;;  %v535_v44 = vld [vmem:[#allocation2 + $0x48] sm:$0xff] }
  0x5d   : > { %v3098_v45 = vpack.c.bf16 %v712_v42, %v706_v41  ;;  %v3100_v46 = vpack.c.bf16 %v535_v44, %v529_v43  ;;  %v528_v8 = vld [vmem:[#allocation2 + $0x10] sm:$0xff]  ;;  %v541_v12 = vld [vmem:[#allocation2 + $0x78] sm:$0xff]  ;;  %v547_v13 = vld [vmem:[#allocation2 + $0xa8] sm:$0xff] }
  0x5e   : > { %3059 = vmatpush1.bf16.msra.mxu1 %v3058_v47  ;;  %v546_v17 = vld [vmem:[#allocation2 + $0xa0] sm:$0xff]  ;;  %v553_v18 = vld [vmem:[#allocation2 + $0xd8] sm:$0xff]  ;;  %v559_v19 = vld [vmem:[#allocation2 + $0x108] sm:$0xff] }
  0x5f   : > { %3061 = vmatprep.subr.bf16.mxu1 %v3060_v48  ;;  %v558_v23 = vld [vmem:[#allocation2 + $0x100] sm:$0xff]  ;;  %v565_v24 = vld [vmem:[#allocation2 + $0x138] sm:$0xff]  ;;  %v571_v25 = vld [vmem:[#allocation2 + $0x168] sm:$0xff] }
  0x60   : > { %v570_v29 = vld [vmem:[#allocation2 + $0x160] sm:$0xff]  ;;  %v577_v30 = vld [vmem:[#allocation2 + $0x198] sm:$0xff]  ;;  %v583_v31 = vld [vmem:[#allocation2 + $0x1c8] sm:$0xff] }
  0x61   : > { %v582_v35 = vld [vmem:[#allocation2 + $0x1c0] sm:$0xff]  ;;  %v589_v36 = vld [vmem:[#allocation2 + $0x1f8] sm:$0xff]  ;;  %v595_v37 = vld [vmem:[#allocation2 + $0x228] sm:$0xff] }
  0x62   : > { %3063 = vmatpush1.bf16.msra.mxu1 %v3062_v53  ;;  %v594_v41 = vld [vmem:[#allocation2 + $0x220] sm:$0xff]  ;;  %v601_v42 = vld [vmem:[#allocation2 + $0x258] sm:$0xff]  ;;  %v607_v43 = vld [vmem:[#allocation2 + $0x288] sm:$0xff] }
  0x63   : > { %3065 = vmatprep.subr.bf16.mxu1 %v3064_v54  ;;  %v501_v54 = vlaneseq }
  0x65   : > { %v4155_v56 = vshrl.u32 %v501_v54, 7  ;;  %v625_v54 = vld [vmem:[#allocation2 + $0x318] sm:$0xff] }
  0x66   : > { %3067 = vmatpush1.bf16.msra.mxu1 %v3066_v59  ;;  %v473_v59 = vld [vmem:[%s5400_s1] sm:$0x3] }
  0x67   : > { %3069 = vmatprep.subr.bf16.mxu1 %v3068_v60  ;;  %v4158_v57 = vsub.s32 1, %v4155_v56  ;;  %v4161_v58 = vsub.s32 0, %v4155_v56  ;;  %v474_v60 = vld [vmem:[%s5401_s2] sm:$0x3] }
  0x69   : > { %v508_v63 = vrot.slane %v473_v59, %v4158_v57  ;;  %v504_v2 = vrot.slane %v473_v59, %v4161_v58  ;;  %v521_v5 = vrot.slane %v474_v60, %v4158_v57  ;;  %v517_v7 = vrot.slane %v474_v60, %v4161_v58 }
  0x6a   : > { %3071 = vmatpush1.bf16.msra.mxu1 %v3070_v3 }
  0x6b   : > { %3073 = vmatprep.subr.bf16.mxu1 %v3072_v4 }
  0x6e   : > { %3075 = vmatpush1.bf16.msra.mxu1 %v3074_v9  ;;  %v534_v9 = vld [vmem:[#allocation2 + $0x40] sm:$0xff] }
  0x6f   : > { %3077 = vmatprep.subr.bf16.mxu1 %v3076_v10  ;;  %v3102_v14 = vpack.c.bf16 %v534_v9, %v528_v8  ;;  %v655_v8 = vld [vmem:[#allocation2 + $0x408] sm:$0xff] }
  0x72   : > { %3079 = vmatpush1.bf16.msra.mxu1 %v3078_v15  ;;  %v3104_v15 = vpack.c.bf16 %v547_v13, %v541_v12  ;;  %v654_v12 = vld [vmem:[#allocation2 + $0x400] sm:$0xff]  ;;  %v661_v13 = vld [vmem:[#allocation2 + $0x438] sm:$0xff] }
  0x73   : > { %3081 = vmatprep.subr.bf16.mxu1 %v3080_v16  ;;  %v540_v16 = vld [vmem:[#allocation2 + $0x70] sm:$0xff] }
  0x74   : > { %v3106_v20 = vpack.c.bf16 %v546_v17, %v540_v16  ;;  %v660_v17 = vld [vmem:[#allocation2 + $0x430] sm:$0xff] }
  0x76   : > { %3083 = vmatpush1.bf16.msra.mxu1 %v3082_v21  ;;  %v3108_v21 = vpack.c.bf16 %v559_v19, %v553_v18  ;;  %v666_v18 = vld [vmem:[#allocation2 + $0x460] sm:$0xff]  ;;  %v673_v19 = vld [vmem:[#allocation2 + $0x498] sm:$0xff] }
  0x77   : > { %3085 = vmatprep.subr.bf16.mxu1 %v3084_v22  ;;  %v552_v22 = vld [vmem:[#allocation2 + $0xd0] sm:$0xff] }
  0x78   : > { %v3110_v26 = vpack.c.bf16 %v558_v23, %v552_v22  ;;  %v672_v23 = vld [vmem:[#allocation2 + $0x490] sm:$0xff] }
  0x7a   : > { %3087 = vmatpush1.bf16.msra.mxu1 %v3086_v27  ;;  %v3112_v27 = vpack.c.bf16 %v571_v25, %v565_v24  ;;  %v678_v24 = vld [vmem:[#allocation2 + $0x4c0] sm:$0xff]  ;;  %v685_v25 = vld [vmem:[#allocation2 + $0x4f8] sm:$0xff] }
  0x7b   : > { %3089 = vmatprep.subr.bf16.mxu1 %v3088_v28  ;;  %v564_v28 = vld [vmem:[#allocation2 + $0x130] sm:$0xff] }
  0x7c   : > { %v3114_v32 = vpack.c.bf16 %v570_v29, %v564_v28  ;;  %v684_v29 = vld [vmem:[#allocation2 + $0x4f0] sm:$0xff] }
  0x7e   : > { %3091 = vmatpush1.bf16.msra.mxu1 %v3090_v33  ;;  %v3116_v33 = vpack.c.bf16 %v583_v31, %v577_v30  ;;  %v690_v30 = vld [vmem:[#allocation2 + $0x520] sm:$0xff]  ;;  %v697_v31 = vld [vmem:[#allocation2 + $0x558] sm:$0xff] }
  0x7f   : > { %3093 = vmatprep.subr.bf16.mxu1 %v3092_v34  ;;  %v576_v34 = vld [vmem:[#allocation2 + $0x190] sm:$0xff] }
  0x80   : > { %v3118_v38 = vpack.c.bf16 %v582_v35, %v576_v34  ;;  %v696_v35 = vld [vmem:[#allocation2 + $0x550] sm:$0xff] }
  0x82   : > { %3095 = vmatpush1.bf16.msra.mxu1 %v3094_v39  ;;  %v3120_v39 = vpack.c.bf16 %v595_v37, %v589_v36  ;;  %v702_v36 = vld [vmem:[#allocation2 + $0x580] sm:$0xff]  ;;  %v709_v37 = vld [vmem:[#allocation2 + $0x5b8] sm:$0xff] }
  0x83   : > { %3097 = vmatprep.subr.bf16.mxu1 %v3096_v40  ;;  %v588_v40 = vld [vmem:[#allocation2 + $0x1f0] sm:$0xff] }
  0x84   : > { %v3122_v44 = vpack.c.bf16 %v594_v41, %v588_v40  ;;  %v708_v41 = vld [vmem:[#allocation2 + $0x5b0] sm:$0xff] }
  0x86   : > { %3099 = vmatpush1.bf16.msra.mxu1 %v3098_v45  ;;  %v3124_v45 = vpack.c.bf16 %v607_v43, %v601_v42  ;;  %v714_v42 = vld [vmem:[#allocation2 + $0x5e0] sm:$0xff]  ;;  %v531_v43 = vld [vmem:[#allocation2 + $0x28] sm:$0xff] }
  0x87   : > { %3101 = vmatprep.subr.bf16.mxu1 %v3100_v46  ;;  %v600_v46 = vld [vmem:[#allocation2 + $0x250] sm:$0xff] }
  0xdc   : > { %v480_v47 = vpop.xlane.xlu0 %479 }
  0xdd   : > { %v482_v48 = vmul.f32 0.00390625, %v480_v47  ;;  %v606_v47 = vld [vmem:[#allocation2 + $0x280] sm:$0xff] }
  0xdf   : > { %v491_v50 = vmul.f32 %v482_v48, %v482_v48  ;;  %v494_v61 = vsub.f32 %v4140_v0, %v482_v48  ;;  %v495_v62 = vsub.f32 %v4143_v1, %v482_v48  ;;  %v613_v48 = vld [vmem:[#allocation2 + $0x2b8] sm:$0xff] }
  0xe0   : > { %v489_v49 = vpop.xlane.xlu0 %488 }
  0xe1   : > { %v490_v51 = vmul.f32 0.00390625, %v489_v49  ;;  %v619_v49 = vld [vmem:[#allocation2 + $0x2e8] sm:$0xff] }
  0xe3   : > { %v492_v52 = vsub.f32 %v490_v51, %v491_v50  ;;  %v3126_v50 = vpack.c.bf16 %v606_v47, %v600_v46  ;;  %v3128_v51 = vpack.c.bf16 %v619_v49, %v613_v48  ;;  %v530_v47 = vld [vmem:[#allocation2 + $0x20] sm:$0xff]  ;;  %v536_v48 = vld [vmem:[#allocation2 + $0x50] sm:$0xff]  ;;  %v543_v49 = vld [vmem:[#allocation2 + $0x88] sm:$0xff] }
  0xe5   : > { %v493_v53 = vmax.f32 %v492_v52, 0.0  ;;  %v612_v52 = vld [vmem:[#allocation2 + $0x2b0] sm:$0xff] }
  0xe7   : > { %v496_v55 = vadd.f32 1e-06, %v493_v53  ;;  %v618_v53 = vld [vmem:[#allocation2 + $0x2e0] sm:$0xff] }
  0xe8   : > { %v3130_v59 = vpack.c.bf16 %v618_v53, %v612_v52  ;;  %v542_v53 = vld [vmem:[#allocation2 + $0x80] sm:$0xff] }
  0xe9   : > { %3848 = vrsqrt.f32 %v496_v55  ;;  %v631_v55 = vld [vmem:[#allocation2 + $0x348] sm:$0xff] }
  0xea   : > { %v3132_v60 = vpack.c.bf16 %v631_v55, %v625_v54  ;;  %v548_v54 = vld [vmem:[#allocation2 + $0xb0] sm:$0xff]  ;;  %v555_v55 = vld [vmem:[#allocation2 + $0xe8] sm:$0xff] }
  0xf3   : > { %v3849_v3 = vpop.eup %3848 }
  0xf4   : > { %v499_v4 = vmul.f32 %v3849_v3, %v495_v62  ;;  %v498_v6 = vmul.f32 %v3849_v3, %v494_v61  ;;  %v624_v61 = vld [vmem:[#allocation2 + $0x310] sm:$0xff]  ;;  %v630_v62 = vld [vmem:[#allocation2 + $0x340] sm:$0xff] }
  0xf5   : > { %v3134_v3 = vpack.c.bf16 %v630_v62, %v624_v61  ;;  %v554_v62 = vld [vmem:[#allocation2 + $0xe0] sm:$0xff] }
  0xf6   : > { %v512_v10 = vmul.f32 %v508_v63, %v499_v4  ;;  %v511_v11 = vmul.f32 %v504_v2, %v498_v6  ;;  %v637_v63 = vld [vmem:[#allocation2 + $0x378] sm:$0xff]  ;;  %v643_v2 = vld [vmem:[#allocation2 + $0x3a8] sm:$0xff]  ;;  %v642_v6 = vld [vmem:[#allocation2 + $0x3a0] sm:$0xff] }
  0xf7   : > { %v3136_v4 = vpack.c.bf16 %v643_v2, %v637_v63  ;;  %v560_v63 = vld [vmem:[#allocation2 + $0x110] sm:$0xff]  ;;  %v567_v2 = vld [vmem:[#allocation2 + $0x148] sm:$0xff] }
  0xf8   : > { %v4175_v0 = vadd.f32 %v521_v5, %v512_v10  ;;  %v4177_v1 = vadd.f32 %v517_v7, %v511_v11  ;;  %v636_v5 = vld [vmem:[#allocation2 + $0x370] sm:$0xff]  ;;  %v649_v7 = vld [vmem:[#allocation2 + $0x3d8] sm:$0xff] }
  0xf9   : > { %v3138_v9 = vpack.c.bf16 %v642_v6, %v636_v5  ;;  %v3140_v10 = vpack.c.bf16 %v655_v8, %v649_v7  ;;  %v648_v11 = vld [vmem:[#allocation2 + $0x3d0] sm:$0xff]  ;;  %v566_v6 = vld [vmem:[#allocation2 + $0x140] sm:$0xff]  ;;  %v579_v8 = vld [vmem:[#allocation2 + $0x1a8] sm:$0xff] }
  0xfa   : > { %814 = vmatprep.mubr.f32.mxu1 %v4175_v0  ;;  %v572_v7 = vld [vmem:[#allocation2 + $0x170] sm:$0xff] }
  0xfb   : > { %815 = vmatmul.mubr.f32.vlgmr.msra.gmra.mrb[0].mxu1 %v4177_v1 }
  0xfc   : > { %3103 = vmatpush1.bf16.msra.mxu1 %v3102_v14  ;;  %885 = vmatprep.mubr.f32.mxu1 %v4175_v0  ;;  %v667_v14 = vld [vmem:[#allocation2 + $0x468] sm:$0xff] }
  0xfd   : > { %3105 = vmatprep.subr.bf16.mxu1 %v3104_v15  ;;  %v3142_v15 = vpack.c.bf16 %v654_v12, %v648_v11  ;;  %v3144_v16 = vpack.c.bf16 %v667_v14, %v661_v13  ;;  %v584_v12 = vld [vmem:[#allocation2 + $0x1d0] sm:$0xff]  ;;  %v591_v13 = vld [vmem:[#allocation2 + $0x208] sm:$0xff]  ;;  %v597_v14 = vld [vmem:[#allocation2 + $0x238] sm:$0xff] }
 0x100   : > { %3107 = vmatpush1.bf16.msra.mxu1 %v3106_v20  ;;  %v679_v20 = vld [vmem:[#allocation2 + $0x4c8] sm:$0xff] }
 0x101   : > { %3109 = vmatprep.subr.bf16.mxu1 %v3108_v21  ;;  %v3146_v21 = vpack.c.bf16 %v666_v18, %v660_v17  ;;  %v3148_v22 = vpack.c.bf16 %v679_v20, %v673_v19  ;;  %v590_v17 = vld [vmem:[#allocation2 + $0x200] sm:$0xff]  ;;  %v596_v18 = vld [vmem:[#allocation2 + $0x230] sm:$0xff]  ;;  %v603_v19 = vld [vmem:[#allocation2 + $0x268] sm:$0xff] }
 0x102   : > { %v609_v20 = vld [vmem:[#allocation2 + $0x298] sm:$0xff] }
 0x104   : > { %3111 = vmatpush1.bf16.msra.mxu1 %v3110_v26  ;;  %v691_v26 = vld [vmem:[#allocation2 + $0x528] sm:$0xff] }
 0x105   : > { %3113 = vmatprep.subr.bf16.mxu1 %v3112_v27  ;;  %v3150_v27 = vpack.c.bf16 %v678_v24, %v672_v23  ;;  %v3152_v28 = vpack.c.bf16 %v691_v26, %v685_v25  ;;  %v602_v23 = vld [vmem:[#allocation2 + $0x260] sm:$0xff]  ;;  %v608_v24 = vld [vmem:[#allocation2 + $0x290] sm:$0xff]  ;;  %v615_v25 = vld [vmem:[#allocation2 + $0x2c8] sm:$0xff] }
 0x106   : > { %v621_v26 = vld [vmem:[#allocation2 + $0x2f8] sm:$0xff] }
 0x108   : > { %3115 = vmatpush1.bf16.msra.mxu1 %v3114_v32  ;;  %v703_v32 = vld [vmem:[#allocation2 + $0x588] sm:$0xff] }
 0x109   : > { %3117 = vmatprep.subr.bf16.mxu1 %v3116_v33  ;;  %v3154_v33 = vpack.c.bf16 %v690_v30, %v684_v29  ;;  %v3156_v34 = vpack.c.bf16 %v703_v32, %v697_v31  ;;  %v614_v29 = vld [vmem:[#allocation2 + $0x2c0] sm:$0xff]  ;;  %v620_v30 = vld [vmem:[#allocation2 + $0x2f0] sm:$0xff]  ;;  %v627_v31 = vld [vmem:[#allocation2 + $0x328] sm:$0xff] }
 0x10a   : > { %v633_v32 = vld [vmem:[#allocation2 + $0x358] sm:$0xff] }
 0x10c   : > { %3119 = vmatpush1.bf16.msra.mxu1 %v3118_v38  ;;  %v715_v38 = vld [vmem:[#allocation2 + $0x5e8] sm:$0xff] }
 0x10d   : > { %3121 = vmatprep.subr.bf16.mxu1 %v3120_v39  ;;  %v3158_v39 = vpack.c.bf16 %v702_v36, %v696_v35  ;;  %v3160_v40 = vpack.c.bf16 %v715_v38, %v709_v37  ;;  %v626_v35 = vld [vmem:[#allocation2 + $0x320] sm:$0xff]  ;;  %v632_v36 = vld [vmem:[#allocation2 + $0x350] sm:$0xff]  ;;  %v639_v37 = vld [vmem:[#allocation2 + $0x388] sm:$0xff] }
 0x10e   : > { %v645_v38 = vld [vmem:[#allocation2 + $0x3b8] sm:$0xff] }
 0x110   : > { %3123 = vmatpush1.bf16.msra.mxu1 %v3122_v44  ;;  %v537_v44 = vld [vmem:[#allocation2 + $0x58] sm:$0xff] }
 0x111   : > { %3125 = vmatprep.subr.bf16.mxu1 %v3124_v45  ;;  %v3162_v45 = vpack.c.bf16 %v714_v42, %v708_v41  ;;  %v3164_v46 = vpack.c.bf16 %v537_v44, %v531_v43  ;;  %v638_v41 = vld [vmem:[#allocation2 + $0x380] sm:$0xff]  ;;  %v644_v42 = vld [vmem:[#allocation2 + $0x3b0] sm:$0xff]  ;;  %v651_v43 = vld [vmem:[#allocation2 + $0x3e8] sm:$0xff] }
 0x112   : > { %v657_v44 = vld [vmem:[#allocation2 + $0x418] sm:$0xff] }
 0x114   : > { %3127 = vmatpush1.bf16.msra.mxu1 %v3126_v50  ;;  %v549_v50 = vld [vmem:[#allocation2 + $0xb8] sm:$0xff] }
 0x115   : > { %3129 = vmatprep.subr.bf16.mxu1 %v3128_v51  ;;  %v3166_v51 = vpack.c.bf16 %v536_v48, %v530_v47  ;;  %v3168_v52 = vpack.c.bf16 %v549_v50, %v543_v49  ;;  %v650_v47 = vld [vmem:[#allocation2 + $0x3e0] sm:$0xff]  ;;  %v656_v48 = vld [vmem:[#allocation2 + $0x410] sm:$0xff]  ;;  %v663_v49 = vld [vmem:[#allocation2 + $0x448] sm:$0xff] }
 0x116   : > { %v669_v50 = vld [vmem:[#allocation2 + $0x478] sm:$0xff] }
 0x118   : > { %3131 = vmatpush1.bf16.msra.mxu1 %v3130_v59  ;;  %v561_v59 = vld [vmem:[#allocation2 + $0x118] sm:$0xff] }
 0x119   : > { %3133 = vmatprep.subr.bf16.mxu1 %v3132_v60  ;;  %v3170_v60 = vpack.c.bf16 %v548_v54, %v542_v53  ;;  %v3172_v61 = vpack.c.bf16 %v561_v59, %v555_v55  ;;  %v662_v53 = vld [vmem:[#allocation2 + $0x440] sm:$0xff]  ;;  %v668_v54 = vld [vmem:[#allocation2 + $0x470] sm:$0xff]  ;;  %v675_v55 = vld [vmem:[#allocation2 + $0x4a8] sm:$0xff] }
 0x11a   : > { %v681_v59 = vld [vmem:[#allocation2 + $0x4d8] sm:$0xff] }
 0x11c   : > { %3135 = vmatpush1.bf16.msra.mxu1 %v3134_v3  ;;  %v573_v3 = vld [vmem:[#allocation2 + $0x178] sm:$0xff] }
 0x11d   : > { %3137 = vmatprep.subr.bf16.mxu1 %v3136_v4  ;;  %v3174_v4 = vpack.c.bf16 %v560_v63, %v554_v62  ;;  %v3176_v5 = vpack.c.bf16 %v573_v3, %v567_v2  ;;  %v674_v62 = vld [vmem:[#allocation2 + $0x4a0] sm:$0xff]  ;;  %v680_v63 = vld [vmem:[#allocation2 + $0x4d0] sm:$0xff]  ;;  %v687_v2 = vld [vmem:[#allocation2 + $0x508] sm:$0xff] }
 0x11e   : > { %v693_v3 = vld [vmem:[#allocation2 + $0x538] sm:$0xff] }
 0x120   : > { %3139 = vmatpush1.bf16.msra.mxu1 %v3138_v9  ;;  %v585_v9 = vld [vmem:[#allocation2 + $0x1d8] sm:$0xff] }
 0x121   : > { %3141 = vmatprep.subr.bf16.mxu1 %v3140_v10  ;;  %v3178_v10 = vpack.c.bf16 %v572_v7, %v566_v6  ;;  %v3180_v11 = vpack.c.bf16 %v585_v9, %v579_v8  ;;  %v686_v6 = vld [vmem:[#allocation2 + $0x500] sm:$0xff]  ;;  %v692_v7 = vld [vmem:[#allocation2 + $0x530] sm:$0xff]  ;;  %v699_v8 = vld [vmem:[#allocation2 + $0x568] sm:$0xff] }
 0x122   : > { %v705_v9 = vld [vmem:[#allocation2 + $0x598] sm:$0xff] }
 0x124   : > { %3143 = vmatpush1.bf16.msra.mxu1 %v3142_v15 }
 0x125   : > { %3145 = vmatprep.subr.bf16.mxu1 %v3144_v16  ;;  %v3184_v16 = vpack.c.bf16 %v597_v14, %v591_v13  ;;  %v711_v13 = vld [vmem:[#allocation2 + $0x5c8] sm:$0xff]  ;;  %v717_v14 = vld [vmem:[#allocation2 + $0x5f8] sm:$0xff] }
 0x128   : > { %3147 = vmatpush1.bf16.msra.mxu1 %v3146_v21  ;;  %v3186_v21 = vpack.c.bf16 %v596_v18, %v590_v17  ;;  %v710_v17 = vld [vmem:[#allocation2 + $0x5c0] sm:$0xff]  ;;  %v716_v18 = vld [vmem:[#allocation2 + $0x5f0] sm:$0xff] }
 0x129   : > { %3149 = vmatprep.subr.bf16.mxu1 %v3148_v22  ;;  %v3188_v22 = vpack.c.bf16 %v609_v20, %v603_v19  ;;  %v3226_v19 = vpack.c.bf16 %v716_v18, %v710_v17  ;;  %v3972_v20 = vmov 0.0   ;;  %v1324_v17 = vld [vmem:[%s5404_s5 + $0x158] sm:$0xff] }
 0x12a   : > { %3016 = vmatprep.subr.mxu0 %v3972_v20  ;;  %3018 = vmatprep.mubr.msk.f32.mxu0 %vm3973_vm1, %v3972_v20 }
 0x12c   : > { %3151 = vmatpush1.bf16.msra.mxu1 %v3150_v27  ;;  %v3190_v27 = vpack.c.bf16 %v608_v24, %v602_v23  ;;  %v730_v23 = vsub.s32 2, %v4155_v56  ;;  %v734_v24 = vsub.s32 3, %v4155_v56 }
 0x12d   : > { %3153 = vmatprep.subr.bf16.mxu1 %v3152_v28  ;;  %v3192_v28 = vpack.c.bf16 %v621_v26, %v615_v25 }
 0x130   : > { %3155 = vmatpush1.bf16.msra.mxu1 %v3154_v33  ;;  %v3194_v33 = vpack.c.bf16 %v620_v30, %v614_v29 }
 0x131   : > { %3157 = vmatprep.subr.bf16.mxu1 %v3156_v34  ;;  %v3196_v34 = vpack.c.bf16 %v633_v32, %v627_v31 }
 0x134   : > { %3159 = vmatpush1.bf16.msra.mxu1 %v3158_v39  ;;  %v3198_v39 = vpack.c.bf16 %v632_v36, %v626_v35  ;;  %v738_v35 = vsub.s32 4, %v4155_v56  ;;  %v742_v36 = vsub.s32 5, %v4155_v56 }
 0x135   : > { %3161 = vmatprep.subr.bf16.mxu1 %v3160_v40  ;;  %v3200_v40 = vpack.c.bf16 %v645_v38, %v639_v37 }
 0x138   : > { %3163 = vmatpush1.bf16.msra.mxu1 %v3162_v45  ;;  %v3202_v45 = vpack.c.bf16 %v644_v42, %v638_v41 }
 0x139   : > { %3165 = vmatprep.subr.bf16.mxu1 %v3164_v46  ;;  %v3204_v46 = vpack.c.bf16 %v657_v44, %v651_v43 }
 0x13b   : > { %886 = vmatmul.mubr.f32.vlgmr.msra.gmra.mrb[2].mxu1 %v4177_v1 }
 0x13c   : > { %3167 = vmatpush1.bf16.msra.mxu1 %v3166_v51  ;;  %956 = vmatprep.mubr.f32.mxu1 %v4175_v0  ;;  %v578_v0 = vld [vmem:[#allocation2 + $0x1a0] sm:$0xff]  ;;  %v3206_v51 = vpack.c.bf16 %v656_v48, %v650_v47 }
 0x13d   : > { %3169 = vmatprep.subr.bf16.mxu1 %v3168_v52  ;;  %v3182_v15 = vpack.c.bf16 %v584_v12, %v578_v0  ;;  %v3208_v52 = vpack.c.bf16 %v669_v50, %v663_v49  ;;  %v698_v0 = vld [vmem:[#allocation2 + $0x560] sm:$0xff]  ;;  %v704_v12 = vld [vmem:[#allocation2 + $0x590] sm:$0xff] }
 0x140   : > { %3171 = vmatpush1.bf16.msra.mxu1 %v3170_v60  ;;  %v3210_v60 = vpack.c.bf16 %v668_v54, %v662_v53 }
 0x141   : > { %3173 = vmatprep.subr.bf16.mxu1 %v3172_v61  ;;  %v3212_v61 = vpack.c.bf16 %v681_v59, %v675_v55 }
 0x144   : > { %3175 = vmatpush1.bf16.msra.mxu1 %v3174_v4  ;;  %v3214_v4 = vpack.c.bf16 %v680_v63, %v674_v62 }
 0x145   : > { %3177 = vmatprep.subr.bf16.mxu1 %v3176_v5  ;;  %v3216_v5 = vpack.c.bf16 %v693_v3, %v687_v2  ;;  %v1314_v2 = vld [vmem:[%s5404_s5 + $0x108] sm:$0xff]  ;;  %v1316_v3 = vld [vmem:[%s5404_s5 + $0x118] sm:$0xff] }
 0x148   : > { %3179 = vmatpush1.bf16.msra.mxu1 %v3178_v10  ;;  %v3218_v10 = vpack.c.bf16 %v692_v7, %v686_v6  ;;  %v1313_v7 = vld [vmem:[%s5404_s5 + $0x100] sm:$0xff] }
 0x149   : > { %3181 = vmatprep.subr.bf16.mxu1 %v3180_v11  ;;  %v3220_v11 = vpack.c.bf16 %v705_v9, %v699_v8  ;;  %v1315_v8 = vld [vmem:[%s5404_s5 + $0x110] sm:$0xff]  ;;  %v1318_v9 = vld [vmem:[%s5404_s5 + $0x128] sm:$0xff] }
 0x14c   : > { %3183 = vmatpush1.bf16.msra.mxu1 %v3182_v15  ;;  %v3222_v15 = vpack.c.bf16 %v704_v12, %v698_v0  ;;  %v3230_v0 = vpack.c.bf16 %v1315_v8, %v1313_v7 }
 0x14d   : > { %3185 = vmatprep.subr.bf16.mxu1 %v3184_v16  ;;  %v3224_v16 = vpack.c.bf16 %v717_v14, %v711_v13  ;;  %v1317_v14 = vld [vmem:[%s5404_s5 + $0x120] sm:$0xff] }
 0x150   : > { %3187 = vmatpush1.bf16.msra.mxu1 %v3186_v21 }
 0x151   : > { %3189 = vmatprep.subr.bf16.mxu1 %v3188_v22 }
 0x154   : > { %3191 = vmatpush1.bf16.msra.mxu1 %v3190_v27 }
 0x155   : > { %3193 = vmatprep.subr.bf16.mxu1 %v3192_v28 }
 0x158   : > { %3195 = vmatpush1.bf16.msra.mxu1 %v3194_v33 }
 0x159   : > { %3197 = vmatprep.subr.bf16.mxu1 %v3196_v34 }
 0x15c   : > { %3199 = vmatpush1.bf16.msra.mxu1 %v3198_v39 }
 0x15d   : > { %3201 = vmatprep.subr.bf16.mxu1 %v3200_v40 }
 0x160   : > { %3203 = vmatpush1.bf16.msra.mxu1 %v3202_v45 }
 0x161   : > { %3205 = vmatprep.subr.bf16.mxu1 %v3204_v46 }
 0x164   : > { %3207 = vmatpush1.bf16.msra.mxu1 %v3206_v51 }
 0x165   : > { %3209 = vmatprep.subr.bf16.mxu1 %v3208_v52 }
 0x168   : > { %3211 = vmatpush1.bf16.msra.mxu1 %v3210_v60 }
 0x169   : > { %3213 = vmatprep.subr.bf16.mxu1 %v3212_v61 }
 0x16c   : > { %3215 = vmatpush1.bf16.msra.mxu1 %v3214_v4  ;;  %v3228_v4 = vpack.c.bf16 %v1316_v3, %v1314_v2  ;;  %v1123_v3 = vld [vmem:[%s5404_s5] sm:$0xff] }
 0x16d   : > { %3217 = vmatprep.subr.bf16.mxu1 %v3216_v5 }
 0x170   : > { %3219 = vmatpush1.bf16.msra.mxu1 %v3218_v10  ;;  %v1320_v10 = vld [vmem:[%s5404_s5 + $0x138] sm:$0xff] }
 0x171   : > { %3221 = vmatprep.subr.bf16.mxu1 %v3220_v11  ;;  %v3232_v13 = vpack.c.bf16 %v1320_v10, %v1318_v9  ;;  %v1127_v9 = vld [vmem:[%s5404_s5 + $0x20] sm:$0xff]  ;;  %v1129_v10 = vld [vmem:[%s5404_s5 + $0x30] sm:$0xff] }
 0x174   : > { %3223 = vmatpush1.bf16.msra.mxu1 %v3222_v15  ;;  %v1319_v15 = vld [vmem:[%s5404_s5 + $0x130] sm:$0xff] }
 0x175   : > { %3225 = vmatprep.subr.bf16.mxu1 %v3224_v16  ;;  %v1322_v16 = vld [vmem:[%s5404_s5 + $0x148] sm:$0xff] }
 0x178   : > { %3227 = vmatpush1.bf16.msra.mxu1 %v3226_v19  ;;  %v3234_v19 = vpack.c.bf16 %v1319_v15, %v1317_v14  ;;  %v3266_v14 = vpack.c.bf16 %v1129_v10, %v1127_v9  ;;  %v1573_v9 = vld [vmem:[%s5408_s9 + $0x98] sm:$0xff] }
 0x179   : > { %3026 = vmatprep.subr.mxu1 %v3972_v20  ;;  %v1581_v10 = vld [vmem:[%s5408_s9 + $0xd8] sm:$0xff] }
 0x17b   : > { %957 = vmatmul.mubr.f32.vlgmr.msra.gmra.mrb[4].mxu1 %v4177_v1  ;;  %v718_v1 = vld [vmem:[%s5403_s4] sm:$0x3f] }
 0x17c   : > { %3028 = vmatprep.mubr.msk.f32.mxu1 %vm3973_vm1, %v3972_v20  ;;  %v731_v25 = vrot.slane %v718_v1, %v730_v23  ;;  %v735_v26 = vrot.slane %v718_v1, %v734_v24  ;;  %v723_v27 = vrot.slane %v718_v1, %v4161_v58  ;;  %v727_v29 = vrot.slane %v718_v1, %v4158_v57 }
 0x17d   : > { %v739_v37 = vrot.slane %v718_v1, %v738_v35  ;;  %v743_v38 = vrot.slane %v718_v1, %v742_v36  ;;  %v1321_v1 = vld [vmem:[%s5404_s5 + $0x140] sm:$0xff] }
 0x1ce   : > { %v816_v21 = vpop.f32.mrb[0].mxu1 }
 0x1cf   : > { %v818_v22 = vpop.f32.mrb[1].mxu1  ;;  %v817_v33 = vadd.f32 %v816_v21, %v723_v27  ;;  %v1328_v27 = vld [vmem:[%s5404_s5 + $0x178] sm:$0xff] }
 0x1d0   : > { %v819_v34 = vadd.f32 %v818_v22, %v727_v29  ;;  %v3236_v22 = vpack.c.bf16 %v1324_v17, %v1322_v16  ;;  %v1131_v16 = vld [vmem:[%s5404_s5 + $0x40] sm:$0xff]  ;;  %v1133_v17 = vld [vmem:[%s5404_s5 + $0x50] sm:$0xff] }
 0x20e   : > { %v887_v28 = vpop.f32.mrb[2].mxu1 }
 0x20f   : > { %v888_v30 = vadd.f32 %v887_v28, %v731_v25  ;;  %v889_v31 = vpop.f32.mrb[3].mxu1  ;;  %v1323_v25 = vld [vmem:[%s5404_s5 + $0x150] sm:$0xff] }
 0x210   : > { %v890_v32 = vadd.f32 %v889_v31, %v735_v26  ;;  %v1326_v26 = vld [vmem:[%s5404_s5 + $0x168] sm:$0xff]  ;;  %v3238_v28 = vpack.c.bf16 %v1323_v25, %v1321_v1  ;;  %v1327_v31 = vld [vmem:[%s5404_s5 + $0x170] sm:$0xff]  ;;  %v1135_v25 = vld [vmem:[%s5404_s5 + $0x60] sm:$0xff] }
 0x211   : > { %3017 = vmatpush3.xpose.msra.mxu0 %v888_v30  ;;  %v3240_v29 = vpack.c.bf16 %v1328_v27, %v1326_v26  ;;  %v1325_v30 = vld [vmem:[%s5404_s5 + $0x160] sm:$0xff]  ;;  %v1137_v26 = vld [vmem:[%s5404_s5 + $0x70] sm:$0xff]  ;;  %v1140_v27 = vld [vmem:[%s5404_s5 + $0x88] sm:$0xff] }
 0x212   : > { %3027 = vmatpush3.xpose.msra.mxu1 %v890_v32  ;;  %3021 = vmatprep.subr.mxu0 %v3972_v20  ;;  %v1330_v32 = vld [vmem:[%s5404_s5 + $0x188] sm:$0xff] }
 0x213   : > { %3031 = vmatprep.subr.mxu1 %v3972_v20 }
 0x214   : > { %3019 = vmatmul.mubr.f32.vlgmr.msra.gmra.mrb[0].mxu0 %v817_v33  ;;  %v1332_v33 = vld [vmem:[%s5404_s5 + $0x198] sm:$0xff] }
 0x215   : > { %3029 = vmatmul.mubr.f32.vlgmr.msra.gmra.mrb[6].mxu1 %v819_v34  ;;  %3023 = vmatprep.mubr.msk.f32.mxu0 %vm3973_vm1, %v3972_v20  ;;  %v3242_v34 = vpack.c.bf16 %v1327_v31, %v1325_v30  ;;  %v1139_v31 = vld [vmem:[%s5404_s5 + $0x80] sm:$0xff] }
 0x216   : > { %3033 = vmatprep.mubr.msk.f32.mxu1 %vm3973_vm1, %v3972_v20 }
 0x24e   : > { %v958_v39 = vpop.f32.mrb[4].mxu1 }
 0x24f   : > { %v959_v40 = vadd.f32 %v958_v39, %v739_v37  ;;  %v960_v41 = vpop.f32.mrb[5].mxu1  ;;  %v3244_v37 = vpack.c.bf16 %v1332_v33, %v1330_v32  ;;  %v1331_v39 = vld [vmem:[%s5404_s5 + $0x190] sm:$0xff]  ;;  %v1144_v33 = vld [vmem:[%s5404_s5 + $0xa8] sm:$0xff] }
 0x250   : > { %v961_v42 = vadd.f32 %v960_v41, %v743_v38  ;;  %v1329_v38 = vld [vmem:[%s5404_s5 + $0x180] sm:$0xff]  ;;  %v1336_v41 = vld [vmem:[%s5404_s5 + $0x1b8] sm:$0xff]  ;;  %v1141_v32 = vld [vmem:[%s5404_s5 + $0x90] sm:$0xff] }
 0x251   : > { %3022 = vmatpush3.msk.msra.mxu0 %vm475_vm0, %v959_v40  ;;  %v1334_v40 = vld [vmem:[%s5404_s5 + $0x1a8] sm:$0xff] }
 0x252   : > { %3032 = vmatpush3.msk.msra.mxu1 %vm475_vm0, %v961_v42  ;;  %v3246_v42 = vpack.c.bf16 %v1331_v39, %v1329_v38  ;;  %v1143_v39 = vld [vmem:[%s5404_s5 + $0xa0] sm:$0xff] }
 0x253   : > { %3229 = vmatprep.subr.bf16.mxu1 %v3228_v4  ;;  %v1125_v4 = vld [vmem:[%s5404_s5 + $0x10] sm:$0xff] }
 0x254   : > { %v3262_v7 = vpack.c.bf16 %v1125_v4, %v1123_v3  ;;  %v1556_v4 = vld [vmem:[%s5408_s9 + $0x10] sm:$0xff] }
 0x2e7   : > { %v1029_v43 = vpop.f32.mrb[0].mxu0 }
 0x2e8   : > { %v3020_v44 = vpop.f32.mrb[1].mxu0  ;;  %v1221_v45 = vpop.f32.mrb[6].mxu1  ;;  %v1033_v48 = vmul.f32 0.088388346, %v1029_v43  ;;  %v3248_v43 = vpack.c.bf16 %v1336_v41, %v1334_v40  ;;  %v1145_v40 = vld [vmem:[%s5404_s5 + $0xb0] sm:$0xff]  ;;  %v1148_v41 = vld [vmem:[%s5404_s5 + $0xc8] sm:$0xff] }
 0x2e9   : > { %v1225_v46 = vmul.f32 0.088388346, %v1221_v45  ;;  %v3030_v47 = vpop.f32.mrb[7].mxu1  ;;  %v1333_v44 = vld [vmem:[%s5404_s5 + $0x1a0] sm:$0xff]  ;;  %v1335_v45 = vld [vmem:[%s5404_s5 + $0x1b0] sm:$0xff] }
 0x2ea   : > { %v1035_v50 = vsel %vm1034_vm2, %v1033_v48, -inf  ;;  %v1340_v47 = vld [vmem:[%s5404_s5 + $0x1d8] sm:$0xff] }
 0x2eb   : > { %v1226_v49 = vsel %vm1034_vm2, %v1225_v46, -inf }
 0x2ec   : > { %1227 = vmax.xlane.f32.xlu1 %v1226_v49 }
 0x2f0   : > { %1036 = vmax.xlane.f32.xlu1 %v1035_v50  ;;  %v1337_v50 = vld [vmem:[%s5404_s5 + $0x1c0] sm:$0xff] }
 0x379   : > { %v1228_v51 = vpop.xlane.xlu1 %1227 }
 0x37a   : > { %v1229_v52 = vsub.f32 %v1225_v46, %v1228_v51  ;;  %v1338_v46 = vld [vmem:[%s5404_s5 + $0x1c8] sm:$0xff]  ;;  %v1339_v51 = vld [vmem:[%s5404_s5 + $0x1d0] sm:$0xff] }
 0x37b   : > { %v3252_v49 = vpack.c.bf16 %v1340_v47, %v1338_v46  ;;  %v1149_v46 = vld [vmem:[%s5404_s5 + $0xd0] sm:$0xff]  ;;  %v1152_v47 = vld [vmem:[%s5404_s5 + $0xe8] sm:$0xff] }
 0x37c   : > { %v1230_v53 = vmul.f32 1.442695, %v1229_v52  ;;  %v1342_v52 = vld [vmem:[%s5404_s5 + $0x1e8] sm:$0xff] }
 0x37d   : > { %v1037_v54 = vpop.xlane.xlu1 %1036 }
 0x37e   : > { %3850 = vpow2.f32 %v1230_v53  ;;  %v1038_v55 = vsub.f32 %v1033_v48, %v1037_v54  ;;  %v3250_v48 = vpack.c.bf16 %v1335_v45, %v1333_v44  ;;  %v1344_v53 = vld [vmem:[%s5404_s5 + $0x1f8] sm:$0xff]  ;;  %v3254_v54 = vpack.c.bf16 %v1339_v51, %v1337_v50  ;;  %v1147_v45 = vld [vmem:[%s5404_s5 + $0xc0] sm:$0xff] }
 0x37f   : > { %v1151_v51 = vld [vmem:[%s5404_s5 + $0xe0] sm:$0xff] }
 0x380   : > { %v1039_v59 = vmul.f32 1.442695, %v1038_v55  ;;  %v3256_v55 = vpack.c.bf16 %v1344_v53, %v1342_v52  ;;  %v1153_v52 = vld [vmem:[%s5404_s5 + $0xf0] sm:$0xff] }
 0x381   : > { %v3290_v53 = vpack.c.bf16 %v1153_v52, %v1151_v51  ;;  %v1626_v51 = vld [vmem:[%s5408_s9 + $0x240] sm:$0xff]  ;;  %v1620_v52 = vld [vmem:[%s5408_s9 + $0x210] sm:$0xff] }
 0x382   : > { %3852 = vpow2.f32 %v1039_v59  ;;  %v1341_v59 = vld [vmem:[%s5404_s5 + $0x1e0] sm:$0xff] }
 0x388   : > { %v3851_v60 = vpop.eup %3850 }
 0x389   : > { %v1232_v61 = vsel %vm1034_vm2, %v3851_v60, 0.0 }
 0x38a   : > { %1233 = vadd.xlane.f32.xlu0 %v1232_v61 }
 0x38c   : > { %v3853_v62 = vpop.eup %3852 }
 0x38d   : > { %v1041_v63 = vsel %vm1034_vm2, %v3853_v62, 0.0 }
 0x38e   : > { %1042 = vadd.xlane.f32.xlu1 %v1041_v63  ;;  %v1126_v63 = vld [vmem:[%s5404_s5 + $0x18] sm:$0xff] }
 0x417   : > { %v1234_v5 = vpop.xlane.xlu0 %1233 }
 0x418   : > { %3854 = vrcp.f32 %v1234_v5  ;;  %v1128_v5 = vld [vmem:[%s5404_s5 + $0x28] sm:$0xff] }
 0x41b   : > { %v1043_v6 = vpop.xlane.xlu1 %1042 }
 0x41c   : > { %3856 = vrcp.f32 %v1043_v6  ;;  %v1130_v6 = vld [vmem:[%s5404_s5 + $0x38] sm:$0xff] }
 0x41d   : > { %v3264_v8 = vpack.c.bf16 %v1130_v6, %v1128_v5  ;;  %v1564_v5 = vld [vmem:[%s5408_s9 + $0x50] sm:$0xff]  ;;  %v1571_v6 = vld [vmem:[%s5408_s9 + $0x88] sm:$0xff] }
 0x422   : > { %v3855_v11 = vpop.eup %3854 }
 0x423   : > { %v1236_v12 = vmul.f32 %v3855_v11, %v3851_v60  ;;  %v1343_v60 = vld [vmem:[%s5404_s5 + $0x1f0] sm:$0xff] }
 0x424   : > { %v3258_v61 = vpack.c.bf16 %v1343_v60, %v1341_v59  ;;  %v1557_v59 = vld [vmem:[%s5408_s9 + $0x18] sm:$0xff] }
 0x425   : > { %3034 = vmatmul.mubr.msk.f32.vlgmr.msra.gmra.mrb[8].mxu1 %vm1046_vm3, %v1236_v12  ;;  %v1134_v12 = vld [vmem:[%s5404_s5 + $0x58] sm:$0xff] }
 0x426   : > { %v3857_v18 = vpop.eup %3856  ;;  %3231 = vmatpush1.bf16.msra.mxu1 %v3230_v0  ;;  %1409 = vmatprep.mubr.f32.mxu1 %v3972_v20  ;;  %v1132_v0 = vld [vmem:[%s5404_s5 + $0x48] sm:$0xff] }
 0x427   : > { %v1045_v21 = vmul.f32 %v3857_v18, %v3853_v62  ;;  %3233 = vmatprep.subr.bf16.mxu1 %v3232_v13  ;;  %v1124_v62 = vld [vmem:[%s5404_s5 + $0x8] sm:$0xff]  ;;  %v3268_v15 = vpack.c.bf16 %v1134_v12, %v1132_v0  ;;  %v3360_v0 = vpack.c.bf16 %v1581_v10, %v1573_v9  ;;  %v1570_v12 = vld [vmem:[%s5408_s9 + $0x80] sm:$0xff]  ;;  %v1653_v10 = vld [vmem:[%s5408_s9 + $0x318] sm:$0xff] }
 0x428   : > { %v3260_v2 = vpack.c.bf16 %v1126_v63, %v1124_v62  ;;  %v1554_v62 = vld [vmem:[%s5408_s9] sm:$0xff]  ;;  %v1659_v9 = vld [vmem:[%s5408_s9 + $0x348] sm:$0xff] }
 0x429   : > { %3024 = vmatmul.mubr.msk.f32.vlgmr.msra.gmra.mrb[2].mxu0 %vm1046_vm3, %v1045_v21  ;;  %v1138_v21 = vld [vmem:[%s5404_s5 + $0x78] sm:$0xff]  ;;  %v1562_v63 = vld [vmem:[%s5408_s9 + $0x40] sm:$0xff] }
 0x42a   : > { %3235 = vmatpush1.bf16.msra.mxu1 %v3234_v19  ;;  %v1136_v19 = vld [vmem:[%s5404_s5 + $0x68] sm:$0xff]  ;;  %v3294_v3 = vpack.c.bf16 %v1562_v63, %v1554_v62 }
 0x42b   : > { %3237 = vmatprep.subr.bf16.mxu1 %v3236_v22  ;;  %v3270_v22 = vpack.c.bf16 %v1133_v17, %v1131_v16  ;;  %v3272_v1 = vpack.c.bf16 %v1138_v21, %v1136_v19  ;;  %v1580_v16 = vld [vmem:[%s5408_s9 + $0xd0] sm:$0xff]  ;;  %v1587_v17 = vld [vmem:[%s5408_s9 + $0x108] sm:$0xff] }
 0x42e   : > { %3239 = vmatpush1.bf16.msra.mxu1 %v3238_v28  ;;  %v1142_v28 = vld [vmem:[%s5404_s5 + $0x98] sm:$0xff] }
 0x42f   : > { %3241 = vmatprep.subr.bf16.mxu1 %v3240_v29  ;;  %v3274_v29 = vpack.c.bf16 %v1137_v26, %v1135_v25  ;;  %v3276_v30 = vpack.c.bf16 %v1142_v28, %v1140_v27  ;;  %v1594_v26 = vld [vmem:[%s5408_s9 + $0x140] sm:$0xff]  ;;  %v1588_v27 = vld [vmem:[%s5408_s9 + $0x110] sm:$0xff] }
 0x430   : > { %v1596_v28 = vld [vmem:[%s5408_s9 + $0x150] sm:$0xff] }
 0x432   : > { %3243 = vmatpush1.bf16.msra.mxu1 %v3242_v34  ;;  %v1146_v34 = vld [vmem:[%s5404_s5 + $0xb8] sm:$0xff] }
 0x433   : > { %3245 = vmatprep.subr.bf16.mxu1 %v3244_v37  ;;  %v3278_v37 = vpack.c.bf16 %v1141_v32, %v1139_v31  ;;  %v3280_v38 = vpack.c.bf16 %v1146_v34, %v1144_v33  ;;  %v1611_v31 = vld [vmem:[%s5408_s9 + $0x1c8] sm:$0xff]  ;;  %v1605_v32 = vld [vmem:[%s5408_s9 + $0x198] sm:$0xff]  ;;  %v3366_v33 = vpack.c.bf16 %v1596_v28, %v1588_v27  ;;  %v1666_v27 = vld [vmem:[%s5408_s9 + $0x380] sm:$0xff] }
 0x434   : > { %v1674_v28 = vld [vmem:[%s5408_s9 + $0x3c0] sm:$0xff] }
 0x436   : > { %3247 = vmatpush1.bf16.msra.mxu1 %v3246_v42  ;;  %v1150_v42 = vld [vmem:[%s5404_s5 + $0xd8] sm:$0xff] }
 0x437   : > { %3249 = vmatprep.subr.bf16.mxu1 %v3248_v43  ;;  %v3282_v43 = vpack.c.bf16 %v1145_v40, %v1143_v39  ;;  %v3284_v44 = vpack.c.bf16 %v1150_v42, %v1148_v41  ;;  %v1610_v39 = vld [vmem:[%s5408_s9 + $0x1c0] sm:$0xff]  ;;  %v1604_v41 = vld [vmem:[%s5408_s9 + $0x190] sm:$0xff] }
 0x438   : > { %v1612_v42 = vld [vmem:[%s5408_s9 + $0x1d0] sm:$0xff] }
 0x43a   : > { %3251 = vmatpush1.bf16.msra.mxu1 %v3250_v48  ;;  %v1154_v48 = vld [vmem:[%s5404_s5 + $0xf8] sm:$0xff] }
 0x43b   : > { %3253 = vmatprep.subr.bf16.mxu1 %v3252_v49  ;;  %v3286_v49 = vpack.c.bf16 %v1149_v46, %v1147_v45  ;;  %v3288_v50 = vpack.c.bf16 %v1154_v48, %v1152_v47  ;;  %v1621_v45 = vld [vmem:[%s5408_s9 + $0x218] sm:$0xff]  ;;  %v3370_v48 = vpack.c.bf16 %v1612_v42, %v1604_v41  ;;  %v1682_v41 = vld [vmem:[%s5408_s9 + $0x400] sm:$0xff] }
 0x43c   : > { %v1629_v46 = vld [vmem:[%s5408_s9 + $0x258] sm:$0xff]  ;;  %v1690_v42 = vld [vmem:[%s5408_s9 + $0x440] sm:$0xff] }
 0x43e   : > { %3255 = vmatpush1.bf16.msra.mxu1 %v3254_v54  ;;  %v1555_v54 = vld [vmem:[%s5408_s9 + $0x8] sm:$0xff] }
 0x43f   : > { %3257 = vmatprep.subr.bf16.mxu1 %v3256_v55  ;;  %v1563_v55 = vld [vmem:[%s5408_s9 + $0x48] sm:$0xff] }
 0x440   : > { %v3292_v60 = vpack.c.bf16 %v1563_v55, %v1555_v54  ;;  %v1628_v54 = vld [vmem:[%s5408_s9 + $0x250] sm:$0xff]  ;;  %v1635_v55 = vld [vmem:[%s5408_s9 + $0x288] sm:$0xff] }
 0x441   : > { %v3374_v63 = vpack.c.bf16 %v1628_v54, %v1620_v52  ;;  %v1489_v54 = vld [vmem:[%s5405_s6] sm:$0x3] }
 0x442   : > { %3259 = vmatpush1.bf16.msra.mxu1 %v3258_v61  ;;  %v1565_v61 = vld [vmem:[%s5408_s9 + $0x58] sm:$0xff]  ;;  %3293 = vmatprep.subr.bf16.mxu0 %v3292_v60 }
 0x443   : > { %3261 = vmatprep.subr.bf16.mxu1 %v3260_v2  ;;  %v3356_v2 = vpack.c.bf16 %v1565_v61, %v1557_v59  ;;  %3295 = vmatpush1.bf16.msra.mxu0 %v3294_v3  ;;  %v1643_v59 = vld [vmem:[%s5408_s9 + $0x2c8] sm:$0xff]  ;;  %v1637_v60 = vld [vmem:[%s5408_s9 + $0x298] sm:$0xff]  ;;  %v1634_v3 = vld [vmem:[%s5408_s9 + $0x280] sm:$0xff] }
 0x444   : > { %v1645_v61 = vld [vmem:[%s5408_s9 + $0x2d8] sm:$0xff] }
 0x4f8   : > { %v1309_v11 = vpop.f32.mrb[8].mxu1 }
 0x4f9   : > { %v3035_v13 = vpop.f32.mrb[9].mxu1  ;;  %1410 = vmatmul.mubr.f32.vlgmr.msra.gmra.mrb[10].mxu1 %v1309_v11 }
 0x4fa   : > { %3263 = vmatpush1.bf16.msra.mxu1 %v3262_v7  ;;  %1480 = vmatprep.mubr.f32.mxu1 %v3972_v20  ;;  %v3358_v7 = vpack.c.bf16 %v1564_v5, %v1556_v4  ;;  %v1578_v13 = vld [vmem:[%s5408_s9 + $0xc0] sm:$0xff]  ;;  %v1636_v5 = vld [vmem:[%s5408_s9 + $0x290] sm:$0xff] }
 0x4fb   : > { %3265 = vmatprep.subr.bf16.mxu1 %v3264_v8  ;;  %v1579_v8 = vld [vmem:[%s5408_s9 + $0xc8] sm:$0xff]  ;;  %v1642_v4 = vld [vmem:[%s5408_s9 + $0x2c0] sm:$0xff] }
 0x4fc   : > { %v1119_v18 = vpop.f32.mrb[2].mxu0  ;;  %v3296_v11 = vpack.c.bf16 %v1579_v8, %v1571_v6  ;;  %v3376_v6 = vpack.c.bf16 %v1645_v61, %v1637_v60  ;;  %v1651_v8 = vld [vmem:[%s5408_s9 + $0x308] sm:$0xff]  ;;  %v1498_v60 = vrot.slane %v1489_v54, %v4158_v57  ;;  %v3892_v61 = vld [vmem:[%s4137_s17] sm:$0x1f] }
 0x4fd   : > { %v3025_v20 = vpop.f32.mrb[3].mxu0 }
 0x4fe   : > { %3267 = vmatpush1.bf16.msra.mxu1 %v3266_v14  ;;  %v1572_v14 = vld [vmem:[%s5408_s9 + $0x90] sm:$0xff]  ;;  %3297 = vmatprep.subr.bf16.mxu0 %v3296_v11  ;;  %v1589_v20 = vld [vmem:[%s5408_s9 + $0x118] sm:$0xff] }
 0x4ff   : > { %3269 = vmatprep.subr.bf16.mxu1 %v3268_v15  ;;  %v3298_v15 = vpack.c.bf16 %v1578_v13, %v1570_v12  ;;  %v3362_v19 = vpack.c.bf16 %v1580_v16, %v1572_v14  ;;  %v1661_v11 = vld [vmem:[%s5408_s9 + $0x358] sm:$0xff]  ;;  %v3316_v13 = vpack.c.bf16 %v1659_v9, %v1651_v8  ;;  %v1650_v14 = vld [vmem:[%s5408_s9 + $0x300] sm:$0xff]  ;;  %v1652_v16 = vld [vmem:[%s5408_s9 + $0x310] sm:$0xff] }
 0x501   : > { %3299 = vmatpush1.bf16.msra.mxu0 %v3298_v15  ;;  %v1658_v15 = vld [vmem:[%s5408_s9 + $0x340] sm:$0xff] }
 0x502   : > { %3271 = vmatpush1.bf16.msra.mxu1 %v3270_v22  ;;  %v1597_v22 = vld [vmem:[%s5408_s9 + $0x158] sm:$0xff] }
 0x503   : > { %3273 = vmatprep.subr.bf16.mxu1 %v3272_v1  ;;  %v1586_v1 = vld [vmem:[%s5408_s9 + $0x100] sm:$0xff]  ;;  %v3364_v25 = vpack.c.bf16 %v1597_v22, %v1589_v20  ;;  %v1669_v20 = vld [vmem:[%s5408_s9 + $0x398] sm:$0xff] }
 0x504   : > { %v1677_v22 = vld [vmem:[%s5408_s9 + $0x3d8] sm:$0xff] }
 0x506   : > { %3275 = vmatpush1.bf16.msra.mxu1 %v3274_v29  ;;  %v3302_v29 = vpack.c.bf16 %v1594_v26, %v1586_v1  ;;  %v3318_v1 = vpack.c.bf16 %v1658_v15, %v1650_v14  ;;  %v1706_v14 = vld [vmem:[%s5408_s9 + $0x4c0] sm:$0xff]  ;;  %v1700_v15 = vld [vmem:[%s5408_s9 + $0x490] sm:$0xff] }
 0x507   : > { %3277 = vmatprep.subr.bf16.mxu1 %v3276_v30  ;;  %v1603_v30 = vld [vmem:[%s5408_s9 + $0x188] sm:$0xff] }
 0x508   : > { %v3304_v34 = vpack.c.bf16 %v1611_v31, %v1603_v30  ;;  %v3384_v30 = vpack.c.bf16 %v1677_v22, %v1669_v20  ;;  %v1676_v31 = vld [vmem:[%s5408_s9 + $0x3d0] sm:$0xff]  ;;  %v1717_v20 = vld [vmem:[%s5408_s9 + $0x518] sm:$0xff] }
 0x50a   : > { %3279 = vmatpush1.bf16.msra.mxu1 %v3278_v37  ;;  %v1613_v37 = vld [vmem:[%s5408_s9 + $0x1d8] sm:$0xff] }
 0x50b   : > { %3281 = vmatprep.subr.bf16.mxu1 %v3280_v38  ;;  %v1602_v38 = vld [vmem:[%s5408_s9 + $0x180] sm:$0xff]  ;;  %v3368_v40 = vpack.c.bf16 %v1613_v37, %v1605_v32  ;;  %v1683_v32 = vld [vmem:[%s5408_s9 + $0x408] sm:$0xff]  ;;  %v1693_v37 = vld [vmem:[%s5408_s9 + $0x458] sm:$0xff] }
 0x50c   : > { %v3306_v47 = vpack.c.bf16 %v1610_v39, %v1602_v38  ;;  %v3322_v38 = vpack.c.bf16 %v1674_v28, %v1666_v27 }
 0x50e   : > { %3283 = vmatpush1.bf16.msra.mxu1 %v3282_v43  ;;  %v1619_v43 = vld [vmem:[%s5408_s9 + $0x208] sm:$0xff] }
 0x50f   : > { %3285 = vmatprep.subr.bf16.mxu1 %v3284_v44  ;;  %v1627_v44 = vld [vmem:[%s5408_s9 + $0x248] sm:$0xff] }
 0x512   : > { %3287 = vmatpush1.bf16.msra.mxu1 %v3286_v49  ;;  %v3308_v49 = vpack.c.bf16 %v1627_v44, %v1619_v43  ;;  %v1684_v43 = vld [vmem:[%s5408_s9 + $0x410] sm:$0xff] }
 0x513   : > { %3289 = vmatprep.subr.bf16.mxu1 %v3288_v50  ;;  %v1618_v50 = vld [vmem:[%s5408_s9 + $0x200] sm:$0xff] }
 0x514   : > { %v3310_v62 = vpack.c.bf16 %v1626_v51, %v1618_v50  ;;  %v3326_v50 = vpack.c.bf16 %v1690_v42, %v1682_v41 }
 0x516   : > { %3291 = vmatpush1.bf16.msra.mxu1 %v3290_v53  ;;  %v3372_v53 = vpack.c.bf16 %v1629_v46, %v1621_v45  ;;  %v1692_v45 = vld [vmem:[%s5408_s9 + $0x450] sm:$0xff]  ;;  %v1699_v46 = vld [vmem:[%s5408_s9 + $0x488] sm:$0xff] }
 0x517   : > { %3357 = vmatprep.subr.bf16.mxu1 %v3356_v2  ;;  %v3312_v2 = vpack.c.bf16 %v1643_v59, %v1635_v55  ;;  %v3390_v51 = vpack.c.bf16 %v1692_v45, %v1684_v43  ;;  %v1494_v55 = vrot.slane %v1489_v54, %v4161_v58  ;;  %v1732_v43 = vld [vmem:[%s5408_s9 + $0x590] sm:$0xff] }
 0x519   : > { %1481 = vmatmul.mubr.f32.vlgmr.msra.gmra.mrb[10].mxu1 %v1119_v18  ;;  %v1595_v18 = vld [vmem:[%s5408_s9 + $0x148] sm:$0xff] }
 0x51a   : > { %3359 = vmatpush1.bf16.msra.mxu1 %v3358_v7  ;;  %v3300_v21 = vpack.c.bf16 %v1595_v18, %v1587_v17  ;;  %v1644_v7 = vld [vmem:[%s5408_s9 + $0x2d0] sm:$0xff]  ;;  %v3380_v17 = vpack.c.bf16 %v1661_v11, %v1653_v10 }
 0x51b   : > { %3361 = vmatprep.subr.bf16.mxu1 %v3360_v0  ;;  %v3314_v0 = vpack.c.bf16 %v1642_v4, %v1634_v3  ;;  %v3378_v12 = vpack.c.bf16 %v1644_v7, %v1636_v5  ;;  %v1660_v18 = vld [vmem:[%s5408_s9 + $0x350] sm:$0xff] }
 0x51c   : > { %3301 = vmatprep.subr.bf16.mxu0 %v3300_v21  ;;  %v1675_v21 = vld [vmem:[%s5408_s9 + $0x3c8] sm:$0xff] }
 0x51d   : > { %3303 = vmatpush1.bf16.msra.mxu0 %v3302_v29  ;;  %v1668_v29 = vld [vmem:[%s5408_s9 + $0x390] sm:$0xff] }
 0x51e   : > { %3363 = vmatpush1.bf16.msra.mxu1 %v3362_v19  ;;  %3305 = vmatprep.subr.bf16.mxu0 %v3304_v34  ;;  %v1667_v19 = vld [vmem:[%s5408_s9 + $0x388] sm:$0xff]  ;;  %v1685_v34 = vld [vmem:[%s5408_s9 + $0x418] sm:$0xff]  ;;  %v3386_v39 = vpack.c.bf16 %v1676_v31, %v1668_v29  ;;  %v1716_v29 = vld [vmem:[%s5408_s9 + $0x510] sm:$0xff] }
 0x51f   : > { %3365 = vmatprep.subr.bf16.mxu1 %v3364_v25  ;;  %v3382_v25 = vpack.c.bf16 %v1660_v18, %v1652_v16  ;;  %v3320_v26 = vpack.c.bf16 %v1675_v21, %v1667_v19  ;;  %v3388_v44 = vpack.c.bf16 %v1693_v37, %v1685_v34  ;;  %v1715_v19 = vld [vmem:[%s5408_s9 + $0x508] sm:$0xff]  ;;  %v1733_v34 = vld [vmem:[%s5408_s9 + $0x598] sm:$0xff] }
 0x520   : > { %v1723_v21 = vld [vmem:[%s5408_s9 + $0x548] sm:$0xff] }
 0x521   : > { %3307 = vmatpush1.bf16.msra.mxu0 %v3306_v47  ;;  %v1707_v47 = vld [vmem:[%s5408_s9 + $0x4c8] sm:$0xff]  ;;  %v3332_v22 = vpack.c.bf16 %v1723_v21, %v1715_v19  ;;  %v1786_v19 = vld [vmem:[%s5408_s9 + $0x740] sm:$0xff]  ;;  %v1780_v21 = vld [vmem:[%s5408_s9 + $0x710] sm:$0xff] }
 0x522   : > { %3367 = vmatpush1.bf16.msra.mxu1 %v3366_v33  ;;  %3309 = vmatprep.subr.bf16.mxu0 %v3308_v49  ;;  %v1691_v33 = vld [vmem:[%s5408_s9 + $0x448] sm:$0xff]  ;;  %v1709_v49 = vld [vmem:[%s5408_s9 + $0x4d8] sm:$0xff]  ;;  %v3328_v52 = vpack.c.bf16 %v1707_v47, %v1699_v46 }
 0x523   : > { %3369 = vmatprep.subr.bf16.mxu1 %v3368_v40  ;;  %v3324_v40 = vpack.c.bf16 %v1691_v33, %v1683_v32  ;;  %v1731_v32 = vld [vmem:[%s5408_s9 + $0x588] sm:$0xff] }
 0x524   : > { %v1739_v33 = vld [vmem:[%s5408_s9 + $0x5c8] sm:$0xff] }
 0x525   : > { %3311 = vmatpush1.bf16.msra.mxu0 %v3310_v62  ;;  %v3336_v37 = vpack.c.bf16 %v1739_v33, %v1731_v32  ;;  %v1747_v46 = vld [vmem:[%s5408_s9 + $0x608] sm:$0xff]  ;;  %v1796_v33 = vld [vmem:[%s5408_s9 + $0x790] sm:$0xff] }
 0x526   : > { %3371 = vmatpush1.bf16.msra.mxu1 %v3370_v48  ;;  %3313 = vmatprep.subr.bf16.mxu0 %v3312_v2  ;;  %v1701_v48 = vld [vmem:[%s5408_s9 + $0x498] sm:$0xff]  ;;  %v3893_v2 = vld [vmem:[%s4137_s17 + $0x8] sm:$0x1f] }
 0x527   : > { %3373 = vmatprep.subr.bf16.mxu1 %v3372_v53  ;;  %v3392_v53 = vpack.c.bf16 %v1709_v49, %v1701_v48  ;;  %v1755_v47 = vld [vmem:[%s5408_s9 + $0x648] sm:$0xff]  ;;  %v1749_v48 = vld [vmem:[%s5408_s9 + $0x618] sm:$0xff] }
 0x528   : > { %v3340_v49 = vpack.c.bf16 %v1755_v47, %v1747_v46 }
 0x529   : > { %3315 = vmatpush1.bf16.msra.mxu0 %v3314_v0 }
 0x52a   : > { %3375 = vmatpush1.bf16.msra.mxu1 %v3374_v63  ;;  %3317 = vmatprep.subr.bf16.mxu0 %v3316_v13  ;;  %v1698_v13 = vld [vmem:[%s5408_s9 + $0x480] sm:$0xff] }
 0x52b   : > { %3377 = vmatprep.subr.bf16.mxu1 %v3376_v6  ;;  %v3330_v16 = vpack.c.bf16 %v1706_v14, %v1698_v13 }
 0x52d   : > { %3319 = vmatpush1.bf16.msra.mxu0 %v3318_v1  ;;  %v1725_v1 = vld [vmem:[%s5408_s9 + $0x558] sm:$0xff] }
 0x52e   : > { %3379 = vmatpush1.bf16.msra.mxu1 %v3378_v12  ;;  %3321 = vmatprep.subr.bf16.mxu0 %v3320_v26  ;;  %v1722_v26 = vld [vmem:[%s5408_s9 + $0x540] sm:$0xff]  ;;  %v3396_v27 = vpack.c.bf16 %v1725_v1, %v1717_v20  ;;  %v1788_v20 = vld [vmem:[%s5408_s9 + $0x750] sm:$0xff]  ;;  %v1795_v1 = vld [vmem:[%s5408_s9 + $0x788] sm:$0xff] }
 0x52f   : > { %3381 = vmatprep.subr.bf16.mxu1 %v3380_v17  ;;  %v1708_v17 = vld [vmem:[%s5408_s9 + $0x4d0] sm:$0xff] }
 0x530   : > { %v3394_v18 = vpack.c.bf16 %v1708_v17, %v1700_v15  ;;  %v1781_v15 = vld [vmem:[%s5408_s9 + $0x718] sm:$0xff]  ;;  %v1778_v17 = vld [vmem:[%s5408_s9 + $0x700] sm:$0xff] }
 0x531   : > { %3323 = vmatpush1.bf16.msra.mxu0 %v3322_v38  ;;  %v1741_v38 = vld [vmem:[%s5408_s9 + $0x5d8] sm:$0xff] }
 0x532   : > { %3383 = vmatpush1.bf16.msra.mxu1 %v3382_v25  ;;  %3325 = vmatprep.subr.bf16.mxu0 %v3324_v40  ;;  %v1714_v25 = vld [vmem:[%s5408_s9 + $0x500] sm:$0xff]  ;;  %v3400_v41 = vpack.c.bf16 %v1741_v38, %v1733_v34  ;;  %v1804_v34 = vld [vmem:[%s5408_s9 + $0x7d0] sm:$0xff] }
 0x533   : > { %3385 = vmatprep.subr.bf16.mxu1 %v3384_v30  ;;  %v3334_v28 = vpack.c.bf16 %v1722_v26, %v1714_v25  ;;  %v1724_v30 = vld [vmem:[%s5408_s9 + $0x550] sm:$0xff]  ;;  %v1738_v40 = vld [vmem:[%s5408_s9 + $0x5c0] sm:$0xff]  ;;  %v1803_v25 = vld [vmem:[%s5408_s9 + $0x7c8] sm:$0xff]  ;;  %v3418_v38 = vpack.c.bf16 %v1804_v34, %v1796_v33 }
 0x534   : > { %v3398_v31 = vpack.c.bf16 %v1724_v30, %v1716_v29  ;;  %v1797_v26 = vld [vmem:[%s5408_s9 + $0x798] sm:$0xff]  ;;  %v1794_v30 = vld [vmem:[%s5408_s9 + $0x780] sm:$0xff] }
 0x535   : > { %3327 = vmatpush1.bf16.msra.mxu0 %v3326_v50  ;;  %v1757_v50 = vld [vmem:[%s5408_s9 + $0x658] sm:$0xff]  ;;  %v1590_v33 = vld [vmem:[%s5408_s9 + $0x120] sm:$0xff] }
 0x536   : > { %3387 = vmatpush1.bf16.msra.mxu1 %v3386_v39  ;;  %3329 = vmatprep.subr.bf16.mxu0 %v3328_v52  ;;  %v1730_v39 = vld [vmem:[%s5408_s9 + $0x580] sm:$0xff]  ;;  %v1805_v29 = vld [vmem:[%s5408_s9 + $0x7d8] sm:$0xff] }
 0x537   : > { %3389 = vmatprep.subr.bf16.mxu1 %v3388_v44  ;;  %v3338_v42 = vpack.c.bf16 %v1738_v40, %v1730_v39  ;;  %v1740_v44 = vld [vmem:[%s5408_s9 + $0x5d0] sm:$0xff]  ;;  %v1754_v52 = vld [vmem:[%s5408_s9 + $0x640] sm:$0xff]  ;;  %v3416_v32 = vpack.c.bf16 %v1805_v29, %v1797_v26  ;;  %v1559_v39 = vld [vmem:[%s5408_s9 + $0x28] sm:$0xff] }
 0x538   : > { %v3402_v45 = vpack.c.bf16 %v1740_v44, %v1732_v43  ;;  %v1567_v40 = vld [vmem:[%s5408_s9 + $0x68] sm:$0xff]  ;;  %v1569_v43 = vld [vmem:[%s5408_s9 + $0x78] sm:$0xff]  ;;  %v1598_v34 = vld [vmem:[%s5408_s9 + $0x160] sm:$0xff] }
 0x539   : > { %3331 = vmatpush1.bf16.msra.mxu0 %v3330_v16  ;;  %v1789_v16 = vld [vmem:[%s5408_s9 + $0x758] sm:$0xff] }
 0x53a   : > { %3391 = vmatpush1.bf16.msra.mxu1 %v3390_v51  ;;  %3333 = vmatprep.subr.bf16.mxu0 %v3332_v22  ;;  %v1746_v51 = vld [vmem:[%s5408_s9 + $0x600] sm:$0xff]  ;;  %v3350_v22 = vpack.c.bf16 %v1786_v19, %v1778_v17  ;;  %v1593_v29 = vld [vmem:[%s5408_s9 + $0x138] sm:$0xff] }
 0x53b   : > { %3393 = vmatprep.subr.bf16.mxu1 %v3392_v53  ;;  %v3404_v53 = vpack.c.bf16 %v1757_v50, %v1749_v48  ;;  %v3342_v54 = vpack.c.bf16 %v1754_v52, %v1746_v51 }
 0x53d   : > { %3335 = vmatpush1.bf16.msra.mxu0 %v3334_v28  ;;  %v3352_v28 = vpack.c.bf16 %v1803_v25, %v1795_v1  ;;  %v1584_v1 = vld [vmem:[%s5408_s9 + $0xf0] sm:$0xff]  ;;  %v1591_v25 = vld [vmem:[%s5408_s9 + $0x128] sm:$0xff] }
 0x53e   : > { %3395 = vmatpush1.bf16.msra.mxu1 %v3394_v18  ;;  %3337 = vmatprep.subr.bf16.mxu0 %v3336_v37  ;;  %v3412_v18 = vpack.c.bf16 %v1789_v16, %v1781_v15  ;;  %v1585_v15 = vld [vmem:[%s5408_s9 + $0xf8] sm:$0xff] }
 0x53f   : > { %3397 = vmatprep.subr.bf16.mxu1 %v3396_v27  ;;  %v3414_v27 = vpack.c.bf16 %v1788_v20, %v1780_v21  ;;  %v1574_v21 = vld [vmem:[%s5408_s9 + $0xa0] sm:$0xff] }
 0x540   : > { %v1582_v20 = vld [vmem:[%s5408_s9 + $0xe0] sm:$0xff] }
 0x541   : > { %3339 = vmatpush1.bf16.msra.mxu0 %v3338_v42  ;;  %v3420_v42 = vpack.c.bf16 %v1567_v40, %v1559_v39  ;;  %v1592_v39 = vld [vmem:[%s5408_s9 + $0x130] sm:$0xff] }
 0x542   : > { %3399 = vmatpush1.bf16.msra.mxu1 %v3398_v31  ;;  %3341 = vmatprep.subr.bf16.mxu0 %v3340_v49  ;;  %v1802_v31 = vld [vmem:[%s5408_s9 + $0x7c0] sm:$0xff]  ;;  %v1600_v40 = vld [vmem:[%s5408_s9 + $0x170] sm:$0xff] }
 0x543   : > { %3401 = vmatprep.subr.bf16.mxu1 %v3400_v41  ;;  %v3354_v37 = vpack.c.bf16 %v1802_v31, %v1794_v30  ;;  %v1561_v41 = vld [vmem:[%s5408_s9 + $0x38] sm:$0xff]  ;;  %v3426_v31 = vpack.c.bf16 %v1582_v20, %v1574_v21  ;;  %v1655_v21 = vld [vmem:[%s5408_s9 + $0x328] sm:$0xff] }
 0x544   : > { %v3484_v44 = vpack.c.bf16 %v1569_v43, %v1561_v41  ;;  %v1601_v30 = vld [vmem:[%s5408_s9 + $0x178] sm:$0xff]  ;;  %v1607_v41 = vld [vmem:[%s5408_s9 + $0x1a8] sm:$0xff] }
 0x545   : > { %3343 = vmatpush1.bf16.msra.mxu0 %v3342_v54  ;;  %v1504_v54 = vld [vmem:[%s5407_s8] sm:$0x3]  ;;  %v1609_v43 = vld [vmem:[%s5408_s9 + $0x1b8] sm:$0xff]  ;;  %v1663_v20 = vld [vmem:[%s5408_s9 + $0x368] sm:$0xff] }
 0x546   : > { %3403 = vmatpush1.bf16.msra.mxu1 %v3402_v45 }
 0x547   : > { %3405 = vmatprep.subr.bf16.mxu1 %v3404_v53  ;;  %v1503_v53 = vld [vmem:[%s5406_s7] sm:$0x3] }
 0x5ec   : > { %v1482_v59 = vpop.f32.mrb[10].mxu1 }
 0x5ed   : > { %v1487_v62 = vadd.f32 %v3892_v61, %v1482_v59  ;;  %v1484_v63 = vpop.f32.mrb[11].mxu1  ;;  %v1756_v59 = vld [vmem:[%s5408_s9 + $0x650] sm:$0xff] }
 0x5ee   : > { %v1488_v3 = vadd.f32 %v3893_v2, %v1484_v63  ;;  %v1765_v63 = vld [vmem:[%s5408_s9 + $0x698] sm:$0xff] }
 0x5ef   : > { %v4651_v4 = vadd.f32 %v1494_v55, %v1487_v62  ;;  %v1748_v55 = vld [vmem:[%s5408_s9 + $0x610] sm:$0xff]  ;;  %v1771_v62 = vld [vmem:[%s5408_s9 + $0x6c8] sm:$0xff]  ;;  %v1773_v2 = vld [vmem:[%s5408_s9 + $0x6d8] sm:$0xff] }
 0x5f0   : > { %v4653_v5 = vadd.f32 %v1498_v60, %v1488_v3  ;;  %v1763_v60 = vld [vmem:[%s5408_s9 + $0x688] sm:$0xff]  ;;  %v3406_v61 = vpack.c.bf16 %v1756_v59, %v1748_v55 }
 0x5f1   : > { %v1505_v6 = vsel %vm475_vm0, %v4651_v4, 0.0  ;;  %v1511_v7 = vmul.f32 %v4651_v4, %v4651_v4  ;;  %v3344_v3 = vpack.c.bf16 %v1771_v62, %v1763_v60  ;;  %v1536_v60 = vrot.slane %v1503_v53, %v4158_v57 }
 0x5f2   : > { %v1506_v8 = vsel %vm475_vm0, %v4653_v5, 0.0  ;;  %v1512_v9 = vmul.f32 %v4653_v5, %v4653_v5  ;;  %3407 = vmatpush1.bf16.msra.mxu1 %v3406_v61  ;;  %v1532_v61 = vrot.slane %v1503_v53, %v4161_v58  ;;  %v1623_v53 = vld [vmem:[%s5408_s9 + $0x228] sm:$0xff] }
 0x5f3   : > { %v1507_v10 = vadd.f32 %v1506_v8, %v1505_v6  ;;  %v1513_v11 = vsel %vm475_vm0, %v1511_v7, 0.0  ;;  %v3408_v6 = vpack.c.bf16 %v1773_v2, %v1765_v63  ;;  %v1762_v7 = vld [vmem:[%s5408_s9 + $0x680] sm:$0xff]  ;;  %3345 = vmatprep.subr.bf16.mxu0 %v3344_v3  ;;  %v1549_v2 = vrot.slane %v1504_v54, %v4158_v57 }
 0x5f4   : > { %v1514_v0 = vsel %vm475_vm0, %v1512_v9, 0.0  ;;  %v1770_v8 = vld [vmem:[%s5408_s9 + $0x6c0] sm:$0xff]  ;;  %v1764_v9 = vld [vmem:[%s5408_s9 + $0x690] sm:$0xff] }
 0x5f5   : > { %1508 = vadd.xlane.f32.xlu0 %v1507_v10  ;;  %v1515_v12 = vadd.f32 %v1514_v0, %v1513_v11  ;;  %v3346_v10 = vpack.c.bf16 %v1770_v8, %v1762_v7  ;;  %v1772_v11 = vld [vmem:[%s5408_s9 + $0x6d0] sm:$0xff]  ;;  %v1779_v0 = vld [vmem:[%s5408_s9 + $0x708] sm:$0xff]  ;;  %3409 = vmatprep.subr.bf16.mxu1 %v3408_v6  ;;  %v1545_v6 = vrot.slane %v1504_v54, %v4161_v58  ;;  %v1558_v7 = vld [vmem:[%s5408_s9 + $0x20] sm:$0xff] }
 0x5f6   : > { %v3410_v13 = vpack.c.bf16 %v1772_v11, %v1764_v9  ;;  %v1566_v8 = vld [vmem:[%s5408_s9 + $0x60] sm:$0xff]  ;;  %v1560_v9 = vld [vmem:[%s5408_s9 + $0x30] sm:$0xff]  ;;  %v1631_v54 = vld [vmem:[%s5408_s9 + $0x268] sm:$0xff] }
 0x5f7   : > { %1516 = vadd.xlane.f32.xlu1 %v1515_v12  ;;  %v1787_v12 = vld [vmem:[%s5408_s9 + $0x748] sm:$0xff]  ;;  %3347 = vmatpush1.bf16.msra.mxu0 %v3346_v10  ;;  %v1568_v10 = vld [vmem:[%s5408_s9 + $0x70] sm:$0xff] }
 0x5f8   : > { %v3348_v14 = vpack.c.bf16 %v1787_v12, %v1779_v0  ;;  %3411 = vmatpush1.bf16.msra.mxu1 %v3410_v13  ;;  %v1575_v12 = vld [vmem:[%s5408_s9 + $0xa8] sm:$0xff]  ;;  %v3486_v19 = vpack.c.bf16 %v1568_v10, %v1560_v9  ;;  %v1641_v10 = vld [vmem:[%s5408_s9 + $0x2b8] sm:$0xff] }
 0x5f9   : > { %3413 = vmatprep.subr.bf16.mxu1 %v3412_v18  ;;  %v1583_v13 = vld [vmem:[%s5408_s9 + $0xe8] sm:$0xff]  ;;  %v3422_v18 = vpack.c.bf16 %v1566_v8, %v1558_v7  ;;  %v1632_v7 = vld [vmem:[%s5408_s9 + $0x270] sm:$0xff] }
 0x5fa   : > { %3349 = vmatprep.subr.bf16.mxu0 %v3348_v14  ;;  %v1577_v14 = vld [vmem:[%s5408_s9 + $0xb8] sm:$0xff]  ;;  %v3424_v26 = vpack.c.bf16 %v1583_v13, %v1575_v12  ;;  %v1639_v8 = vld [vmem:[%s5408_s9 + $0x2a8] sm:$0xff]  ;;  %v1638_v13 = vld [vmem:[%s5408_s9 + $0x2a0] sm:$0xff] }
 0x5fb   : > { %3351 = vmatpush1.bf16.msra.mxu0 %v3350_v22  ;;  %v1576_v22 = vld [vmem:[%s5408_s9 + $0xb0] sm:$0xff]  ;;  %v1647_v9 = vld [vmem:[%s5408_s9 + $0x2e8] sm:$0xff] }
 0x5fc   : > { %3415 = vmatpush1.bf16.msra.mxu1 %v3414_v27  ;;  %3353 = vmatprep.subr.bf16.mxu0 %v3352_v28  ;;  %v3488_v27 = vpack.c.bf16 %v1585_v15, %v1577_v14  ;;  %v1599_v28 = vld [vmem:[%s5408_s9 + $0x168] sm:$0xff]  ;;  %v1646_v14 = vld [vmem:[%s5408_s9 + $0x2e0] sm:$0xff]  ;;  %v3440_v15 = vpack.c.bf16 %v1647_v9, %v1639_v8 }
 0x5fd   : > { %3417 = vmatprep.subr.bf16.mxu1 %v3416_v32  ;;  %v3490_v32 = vpack.c.bf16 %v1584_v1, %v1576_v22  ;;  %v1657_v22 = vld [vmem:[%s5408_s9 + $0x338] sm:$0xff]  ;;  %v1702_v8 = vld [vmem:[%s5408_s9 + $0x4a0] sm:$0xff] }
 0x5fe   : > { %v1665_v1 = vld [vmem:[%s5408_s9 + $0x378] sm:$0xff]  ;;  %v1710_v9 = vld [vmem:[%s5408_s9 + $0x4e0] sm:$0xff] }
 0x5ff   : > { %3355 = vmatpush1.bf16.msra.mxu0 %v3354_v37  ;;  %v3428_v37 = vpack.c.bf16 %v1599_v28, %v1591_v25  ;;  %v3442_v25 = vpack.c.bf16 %v1646_v14, %v1638_v13  ;;  %v1662_v28 = vld [vmem:[%s5408_s9 + $0x360] sm:$0xff]  ;;  %v1719_v13 = vld [vmem:[%s5408_s9 + $0x528] sm:$0xff] }
 0x600   : > { %3419 = vmatpush1.bf16.msra.mxu1 %v3418_v38  ;;  %3421 = vmatprep.subr.bf16.mxu0 %v3420_v42  ;;  %v3492_v38 = vpack.c.bf16 %v1601_v30, %v1593_v29  ;;  %v1615_v42 = vld [vmem:[%s5408_s9 + $0x1e8] sm:$0xff]  ;;  %v3444_v29 = vpack.c.bf16 %v1663_v20, %v1655_v21  ;;  %v3508_v30 = vpack.c.bf16 %v1665_v1, %v1657_v22  ;;  %v1718_v21 = vld [vmem:[%s5408_s9 + $0x520] sm:$0xff] }
 0x601   : > { %3485 = vmatprep.subr.bf16.mxu1 %v3484_v44  ;;  %v1617_v44 = vld [vmem:[%s5408_s9 + $0x1f8] sm:$0xff]  ;;  %v1727_v14 = vld [vmem:[%s5408_s9 + $0x568] sm:$0xff]  ;;  %v1726_v20 = vld [vmem:[%s5408_s9 + $0x560] sm:$0xff] }
 0x602   : > { %v3460_v22 = vpack.c.bf16 %v1727_v14, %v1719_v13  ;;  %v1782_v13 = vld [vmem:[%s5408_s9 + $0x720] sm:$0xff] }
 0x603   : > { %v1790_v14 = vld [vmem:[%s5408_s9 + $0x760] sm:$0xff] }
 0x682   : > { %v1509_v45 = vpop.xlane.xlu0 %1508 }
 0x683   : > { %v1510_v46 = vmul.f32 0.00390625, %v1509_v45  ;;  %v3430_v45 = vpack.c.bf16 %v1598_v34, %v1590_v33  ;;  %v1671_v33 = vld [vmem:[%s5408_s9 + $0x3a8] sm:$0xff] }
 0x684   : > { %v1517_v47 = vpop.xlane.xlu1 %1516  ;;  %v1679_v34 = vld [vmem:[%s5408_s9 + $0x3e8] sm:$0xff] }
 0x685   : > { %v1518_v48 = vmul.f32 0.00390625, %v1517_v47  ;;  %v1519_v49 = vmul.f32 %v1510_v46, %v1510_v46  ;;  %v1522_v55 = vsub.f32 %v4651_v4, %v1510_v46  ;;  %v1523_v59 = vsub.f32 %v4653_v5, %v1510_v46  ;;  %v1606_v47 = vld [vmem:[%s5408_s9 + $0x1a0] sm:$0xff] }
 0x686   : > { %v3494_v46 = vpack.c.bf16 %v1600_v40, %v1592_v39 }
 0x687   : > { %v1520_v50 = vsub.f32 %v1518_v48, %v1519_v49  ;;  %v1614_v48 = vld [vmem:[%s5408_s9 + $0x1e0] sm:$0xff]  ;;  %v3432_v49 = vpack.c.bf16 %v1615_v42, %v1607_v41 }
 0x688   : > { %v1670_v41 = vld [vmem:[%s5408_s9 + $0x3a0] sm:$0xff] }
 0x689   : > { %v1521_v51 = vmax.f32 %v1520_v50, 0.0  ;;  %v3496_v50 = vpack.c.bf16 %v1617_v44, %v1609_v43  ;;  %v1678_v42 = vld [vmem:[%s5408_s9 + $0x3e0] sm:$0xff]  ;;  %v3448_v43 = vpack.c.bf16 %v1679_v34, %v1671_v33 }
 0x68a   : > { %v1734_v33 = vld [vmem:[%s5408_s9 + $0x5a0] sm:$0xff] }
 0x68b   : > { %v1524_v52 = vadd.f32 1e-06, %v1521_v51  ;;  %v1608_v51 = vld [vmem:[%s5408_s9 + $0x1b0] sm:$0xff]  ;;  %v1742_v34 = vld [vmem:[%s5408_s9 + $0x5e0] sm:$0xff] }
 0x68d   : > { %3858 = vrsqrt.f32 %v1524_v52  ;;  %v1616_v52 = vld [vmem:[%s5408_s9 + $0x1f0] sm:$0xff] }
 0x697   : > { %v3859_v62 = vpop.eup %3858 }
 0x698   : > { %v1527_v63 = vmul.f32 %v3859_v62, %v1523_v59  ;;  %v1526_v3 = vmul.f32 %v3859_v62, %v1522_v55  ;;  %v1625_v55 = vld [vmem:[%s5408_s9 + $0x238] sm:$0xff]  ;;  %v1622_v62 = vld [vmem:[%s5408_s9 + $0x220] sm:$0xff] }
 0x699   : > { %v1633_v59 = vld [vmem:[%s5408_s9 + $0x278] sm:$0xff] }
 0x69a   : > { %v1540_v11 = vmul.f32 %v1536_v60, %v1527_v63  ;;  %v1539_v0 = vmul.f32 %v1532_v61, %v1526_v3  ;;  %v3434_v60 = vpack.c.bf16 %v1614_v48, %v1606_v47  ;;  %v3498_v61 = vpack.c.bf16 %v1616_v52, %v1608_v51  ;;  %v1630_v63 = vld [vmem:[%s5408_s9 + $0x260] sm:$0xff]  ;;  %v1687_v47 = vld [vmem:[%s5408_s9 + $0x428] sm:$0xff] }
 0x69b   : > { %v3500_v3 = vpack.c.bf16 %v1633_v59, %v1625_v55  ;;  %v1695_v48 = vld [vmem:[%s5408_s9 + $0x468] sm:$0xff]  ;;  %v3450_v51 = vpack.c.bf16 %v1678_v42, %v1670_v41 }
 0x69c   : > { %v1553_v16 = vadd.f32 %v1549_v2, %v1540_v11  ;;  %v4869_v17 = vadd.f32 %v1545_v6, %v1539_v0  ;;  %v3436_v2 = vpack.c.bf16 %v1631_v54, %v1623_v53  ;;  %v1624_v6 = vld [vmem:[%s5408_s9 + $0x230] sm:$0xff]  ;;  %v1649_v11 = vld [vmem:[%s5408_s9 + $0x2f8] sm:$0xff]  ;;  %v3438_v0 = vpack.c.bf16 %v1630_v63, %v1622_v62  ;;  %v1686_v53 = vld [vmem:[%s5408_s9 + $0x420] sm:$0xff] }
 0x69d   : > { %v3502_v12 = vpack.c.bf16 %v1632_v7, %v1624_v6  ;;  %v1694_v54 = vld [vmem:[%s5408_s9 + $0x460] sm:$0xff]  ;;  %v3452_v55 = vpack.c.bf16 %v1695_v48, %v1687_v47  ;;  %v1703_v62 = vld [vmem:[%s5408_s9 + $0x4a8] sm:$0xff] }
 0x69e   : > { %1916 = vmatprep.mubr.f32.mxu0 %v1553_v16  ;;  %1987 = vmatprep.mubr.f32.mxu1 %v1553_v16  ;;  %v1711_v63 = vld [vmem:[%s5408_s9 + $0x4e8] sm:$0xff]  ;;  %v3454_v6 = vpack.c.bf16 %v1694_v54, %v1686_v53  ;;  %v1750_v47 = vld [vmem:[%s5408_s9 + $0x620] sm:$0xff] }
 0x69f   : > { %1917 = vmatmul.mubr.f32.vlgmr.msra.gmra.mrb[4].mxu0 %v4869_v17  ;;  %1988 = vmatmul.mubr.f32.vlgmr.msra.gmra.mrb[12].mxu1 %v4869_v17  ;;  %v1751_v41 = vld [vmem:[%s5408_s9 + $0x628] sm:$0xff]  ;;  %v1758_v48 = vld [vmem:[%s5408_s9 + $0x660] sm:$0xff] }
 0x6a0   : > { %3423 = vmatpush1.bf16.msra.mxu0 %v3422_v18  ;;  %3487 = vmatpush1.bf16.msra.mxu1 %v3486_v19  ;;  %v1640_v18 = vld [vmem:[%s5408_s9 + $0x2b0] sm:$0xff]  ;;  %v1759_v42 = vld [vmem:[%s5408_s9 + $0x668] sm:$0xff] }
 0x6a1   : > { %2058 = vmatprep.mubr.f32.mxu0 %v1553_v16  ;;  %2129 = vmatprep.mubr.f32.mxu1 %v1553_v16  ;;  %v3504_v16 = vpack.c.bf16 %v1649_v11, %v1641_v10  ;;  %v1648_v19 = vld [vmem:[%s5408_s9 + $0x2f0] sm:$0xff]  ;;  %v3456_v10 = vpack.c.bf16 %v1711_v63, %v1703_v62  ;;  %v1767_v53 = vld [vmem:[%s5408_s9 + $0x6a8] sm:$0xff]  ;;  %v1766_v62 = vld [vmem:[%s5408_s9 + $0x6a0] sm:$0xff] }
 0x6a2   : > { %3425 = vmatprep.subr.bf16.mxu0 %v3424_v26  ;;  %3489 = vmatprep.subr.bf16.mxu1 %v3488_v27  ;;  %v3506_v26 = vpack.c.bf16 %v1648_v19, %v1640_v18  ;;  %v1654_v27 = vld [vmem:[%s5408_s9 + $0x320] sm:$0xff]  ;;  %v3458_v18 = vpack.c.bf16 %v1710_v9, %v1702_v8  ;;  %v1775_v54 = vld [vmem:[%s5408_s9 + $0x6e8] sm:$0xff] }
 0x6a3   : > { %v3446_v39 = vpack.c.bf16 %v1662_v28, %v1654_v27  ;;  %v1735_v27 = vld [vmem:[%s5408_s9 + $0x5a8] sm:$0xff]  ;;  %v1774_v63 = vld [vmem:[%s5408_s9 + $0x6e0] sm:$0xff] }
 0x6a4   : > { %3427 = vmatpush1.bf16.msra.mxu0 %v3426_v31  ;;  %3491 = vmatpush1.bf16.msra.mxu1 %v3490_v32  ;;  %v1656_v31 = vld [vmem:[%s5408_s9 + $0x330] sm:$0xff]  ;;  %v1743_v28 = vld [vmem:[%s5408_s9 + $0x5e8] sm:$0xff] }
 0x6a5   : > { %3429 = vmatprep.subr.bf16.mxu0 %v3428_v37  ;;  %3493 = vmatprep.subr.bf16.mxu1 %v3492_v38  ;;  %v1664_v32 = vld [vmem:[%s5408_s9 + $0x370] sm:$0xff]  ;;  %v1673_v37 = vld [vmem:[%s5408_s9 + $0x3b8] sm:$0xff]  ;;  %v1783_v8 = vld [vmem:[%s5408_s9 + $0x728] sm:$0xff] }
 0x6a6   : > { %v1681_v38 = vld [vmem:[%s5408_s9 + $0x3f8] sm:$0xff]  ;;  %v3510_v40 = vpack.c.bf16 %v1664_v32, %v1656_v31  ;;  %v3462_v31 = vpack.c.bf16 %v1726_v20, %v1718_v21  ;;  %v1791_v9 = vld [vmem:[%s5408_s9 + $0x768] sm:$0xff] }
 0x6a7   : > { %v3512_v44 = vpack.c.bf16 %v1681_v38, %v1673_v37  ;;  %v3464_v37 = vpack.c.bf16 %v1743_v28, %v1735_v27  ;;  %v1799_v21 = vld [vmem:[%s5408_s9 + $0x7a8] sm:$0xff]  ;;  %v1798_v27 = vld [vmem:[%s5408_s9 + $0x7a0] sm:$0xff] }
 0x6a8   : > { %3431 = vmatpush1.bf16.msra.mxu0 %v3430_v45  ;;  %3495 = vmatpush1.bf16.msra.mxu1 %v3494_v46  ;;  %v1672_v45 = vld [vmem:[%s5408_s9 + $0x3b0] sm:$0xff]  ;;  %v1807_v20 = vld [vmem:[%s5408_s9 + $0x7e8] sm:$0xff] }
 0x6a9   : > { %3433 = vmatprep.subr.bf16.mxu0 %v3432_v49  ;;  %3497 = vmatprep.subr.bf16.mxu1 %v3496_v50  ;;  %v1680_v46 = vld [vmem:[%s5408_s9 + $0x3f0] sm:$0xff]  ;;  %v1689_v49 = vld [vmem:[%s5408_s9 + $0x438] sm:$0xff]  ;;  %v3480_v28 = vpack.c.bf16 %v1807_v20, %v1799_v21  ;;  %v2381_v20 = vld [vmem:[#allocation4 + $0xe8] sm:$0xff] }
 0x6aa   : > { %v1697_v50 = vld [vmem:[%s5408_s9 + $0x478] sm:$0xff]  ;;  %v3514_v52 = vpack.c.bf16 %v1680_v46, %v1672_v45  ;;  %v3466_v45 = vpack.c.bf16 %v1742_v34, %v1734_v33  ;;  %v2353_v33 = vld [vmem:[#allocation4 + $0x8] sm:$0xff] }
 0x6ab   : > { %v3516_v59 = vpack.c.bf16 %v1697_v50, %v1689_v49  ;;  %v3468_v49 = vpack.c.bf16 %v1759_v42, %v1751_v41  ;;  %v2355_v34 = vld [vmem:[#allocation4 + $0x18] sm:$0xff]  ;;  %v2354_v41 = vld [vmem:[#allocation4 + $0x10] sm:$0xff]  ;;  %v2357_v42 = vld [vmem:[#allocation4 + $0x28] sm:$0xff] }
 0x6ac   : > { %3435 = vmatpush1.bf16.msra.mxu0 %v3434_v60  ;;  %3499 = vmatpush1.bf16.msra.mxu1 %v3498_v61  ;;  %v1688_v60 = vld [vmem:[%s5408_s9 + $0x430] sm:$0xff] }
 0x6ad   : > { %3437 = vmatprep.subr.bf16.mxu0 %v3436_v2  ;;  %3501 = vmatprep.subr.bf16.mxu1 %v3500_v3  ;;  %v1696_v61 = vld [vmem:[%s5408_s9 + $0x470] sm:$0xff]  ;;  %v1705_v2 = vld [vmem:[%s5408_s9 + $0x4b8] sm:$0xff] }
 0x6ae   : > { %v1713_v3 = vld [vmem:[%s5408_s9 + $0x4f8] sm:$0xff]  ;;  %v3518_v7 = vpack.c.bf16 %v1696_v61, %v1688_v60  ;;  %v3470_v60 = vpack.c.bf16 %v1758_v48, %v1750_v47  ;;  %v2358_v47 = vld [vmem:[#allocation4 + $0x30] sm:$0xff]  ;;  %v2361_v48 = vld [vmem:[#allocation4 + $0x48] sm:$0xff] }
 0x6af   : > { %v3520_v11 = vpack.c.bf16 %v1713_v3, %v1705_v2  ;;  %v3472_v2 = vpack.c.bf16 %v1775_v54, %v1767_v53  ;;  %v2362_v53 = vld [vmem:[#allocation4 + $0x50] sm:$0xff]  ;;  %v2365_v54 = vld [vmem:[#allocation4 + $0x68] sm:$0xff] }
 0x6b0   : > { %3439 = vmatpush1.bf16.msra.mxu0 %v3438_v0  ;;  %3503 = vmatpush1.bf16.msra.mxu1 %v3502_v12  ;;  %v1704_v0 = vld [vmem:[%s5408_s9 + $0x4b0] sm:$0xff] }
 0x6b1   : > { %3441 = vmatprep.subr.bf16.mxu0 %v3440_v15  ;;  %3505 = vmatprep.subr.bf16.mxu1 %v3504_v16  ;;  %v1712_v12 = vld [vmem:[%s5408_s9 + $0x4f0] sm:$0xff]  ;;  %v1721_v15 = vld [vmem:[%s5408_s9 + $0x538] sm:$0xff] }
 0x6b2   : > { %v1729_v16 = vld [vmem:[%s5408_s9 + $0x578] sm:$0xff]  ;;  %v3522_v19 = vpack.c.bf16 %v1712_v12, %v1704_v0  ;;  %v3474_v0 = vpack.c.bf16 %v1774_v63, %v1766_v62  ;;  %v2366_v62 = vld [vmem:[#allocation4 + $0x70] sm:$0xff] }
 0x6b3   : > { %v3524_v1 = vpack.c.bf16 %v1729_v16, %v1721_v15  ;;  %v3476_v15 = vpack.c.bf16 %v1791_v9, %v1783_v8  ;;  %v2373_v9 = vld [vmem:[#allocation4 + $0xa8] sm:$0xff] }
 0x6b4   : > { %3443 = vmatpush1.bf16.msra.mxu0 %v3442_v25  ;;  %3507 = vmatpush1.bf16.msra.mxu1 %v3506_v26  ;;  %v1720_v25 = vld [vmem:[%s5408_s9 + $0x530] sm:$0xff] }
 0x6b5   : > { %3445 = vmatprep.subr.bf16.mxu0 %v3444_v29  ;;  %3509 = vmatprep.subr.bf16.mxu1 %v3508_v30  ;;  %v1728_v26 = vld [vmem:[%s5408_s9 + $0x570] sm:$0xff]  ;;  %v1737_v29 = vld [vmem:[%s5408_s9 + $0x5b8] sm:$0xff] }
 0x6b6   : > { %v1745_v30 = vld [vmem:[%s5408_s9 + $0x5f8] sm:$0xff]  ;;  %v3526_v32 = vpack.c.bf16 %v1728_v26, %v1720_v25  ;;  %v3478_v25 = vpack.c.bf16 %v1790_v14, %v1782_v13  ;;  %v2377_v14 = vld [vmem:[#allocation4 + $0xc8] sm:$0xff] }
 0x6b7   : > { %v3528_v38 = vpack.c.bf16 %v1745_v30, %v1737_v29  ;;  %v1806_v30 = vld [vmem:[%s5408_s9 + $0x7e0] sm:$0xff] }
 0x6b8   : > { %3447 = vmatpush1.bf16.msra.mxu0 %v3446_v39  ;;  %3511 = vmatpush1.bf16.msra.mxu1 %v3510_v40  ;;  %v1736_v39 = vld [vmem:[%s5408_s9 + $0x5b0] sm:$0xff] }
 0x6b9   : > { %3449 = vmatprep.subr.bf16.mxu0 %v3448_v43  ;;  %3513 = vmatprep.subr.bf16.mxu1 %v3512_v44  ;;  %v1744_v40 = vld [vmem:[%s5408_s9 + $0x5f0] sm:$0xff]  ;;  %v1753_v43 = vld [vmem:[%s5408_s9 + $0x638] sm:$0xff] }
 0x6ba   : > { %v1761_v44 = vld [vmem:[%s5408_s9 + $0x678] sm:$0xff]  ;;  %v3530_v46 = vpack.c.bf16 %v1744_v40, %v1736_v39  ;;  %v3548_v39 = vpack.c.bf16 %v2355_v34, %v2353_v33  ;;  %v2352_v40 = vld [vmem:[#allocation4] sm:$0xff]  ;;  %v2389_v34 = vld [vmem:[#allocation4 + $0x128] sm:$0xff] }
 0x6bb   : > { %v3532_v50 = vpack.c.bf16 %v1761_v44, %v1753_v43  ;;  %v2359_v43 = vld [vmem:[#allocation4 + $0x38] sm:$0xff]  ;;  %v3550_v44 = vpack.c.bf16 %v2354_v41, %v2352_v40  ;;  %v2390_v40 = vld [vmem:[#allocation4 + $0x130] sm:$0xff] }
 0x6bc   : > { %3451 = vmatpush1.bf16.msra.mxu0 %v3450_v51  ;;  %3515 = vmatpush1.bf16.msra.mxu1 %v3514_v52  ;;  %v1752_v51 = vld [vmem:[%s5408_s9 + $0x630] sm:$0xff] }
 0x6bd   : > { %3453 = vmatprep.subr.bf16.mxu0 %v3452_v55  ;;  %3517 = vmatprep.subr.bf16.mxu1 %v3516_v59  ;;  %v1760_v52 = vld [vmem:[%s5408_s9 + $0x670] sm:$0xff]  ;;  %v1769_v55 = vld [vmem:[%s5408_s9 + $0x6b8] sm:$0xff] }
 0x6be   : > { %v1777_v59 = vld [vmem:[%s5408_s9 + $0x6f8] sm:$0xff]  ;;  %v3534_v61 = vpack.c.bf16 %v1760_v52, %v1752_v51  ;;  %v2360_v52 = vld [vmem:[#allocation4 + $0x40] sm:$0xff] }
 0x6bf   : > { %v3536_v3 = vpack.c.bf16 %v1777_v59, %v1769_v55  ;;  %v2367_v55 = vld [vmem:[#allocation4 + $0x78] sm:$0xff]  ;;  %v3558_v59 = vpack.c.bf16 %v2362_v53, %v2360_v52  ;;  %v2398_v52 = vld [vmem:[#allocation4 + $0x170] sm:$0xff] }
 0x6c0   : > { %3455 = vmatpush1.bf16.msra.mxu0 %v3454_v6  ;;  %3519 = vmatpush1.bf16.msra.mxu1 %v3518_v7  ;;  %v1768_v6 = vld [vmem:[%s5408_s9 + $0x6b0] sm:$0xff] }
 0x6c1   : > { %3457 = vmatprep.subr.bf16.mxu0 %v3456_v10  ;;  %3521 = vmatprep.subr.bf16.mxu1 %v3520_v11  ;;  %v1776_v7 = vld [vmem:[%s5408_s9 + $0x6f0] sm:$0xff]  ;;  %v1785_v10 = vld [vmem:[%s5408_s9 + $0x738] sm:$0xff] }
 0x6c2   : > { %v1793_v11 = vld [vmem:[%s5408_s9 + $0x778] sm:$0xff]  ;;  %v3538_v12 = vpack.c.bf16 %v1776_v7, %v1768_v6  ;;  %v2368_v6 = vld [vmem:[#allocation4 + $0x80] sm:$0xff]  ;;  %v2370_v7 = vld [vmem:[#allocation4 + $0x90] sm:$0xff] }
 0x6c3   : > { %v3540_v16 = vpack.c.bf16 %v1793_v11, %v1785_v10  ;;  %v3566_v8 = vpack.c.bf16 %v2370_v7, %v2368_v6  ;;  %v2375_v10 = vld [vmem:[#allocation4 + $0xb8] sm:$0xff]  ;;  %v2406_v6 = vld [vmem:[#allocation4 + $0x1b0] sm:$0xff] }
 0x6c4   : > { %3459 = vmatpush1.bf16.msra.mxu0 %v3458_v18  ;;  %3523 = vmatpush1.bf16.msra.mxu1 %v3522_v19  ;;  %v1784_v18 = vld [vmem:[%s5408_s9 + $0x730] sm:$0xff]  ;;  %v3568_v11 = vpack.c.bf16 %v2375_v10, %v2373_v9  ;;  %v2411_v9 = vld [vmem:[#allocation4 + $0x1d8] sm:$0xff] }
 0x6c5   : > { %3461 = vmatprep.subr.bf16.mxu0 %v3460_v22  ;;  %3525 = vmatprep.subr.bf16.mxu1 %v3524_v1  ;;  %v1792_v19 = vld [vmem:[%s5408_s9 + $0x770] sm:$0xff]  ;;  %v1801_v22 = vld [vmem:[%s5408_s9 + $0x7b8] sm:$0xff] }
 0x6c6   : > { %v1809_v1 = vld [vmem:[%s5408_s9 + $0x7f8] sm:$0xff]  ;;  %v3542_v26 = vpack.c.bf16 %v1792_v19, %v1784_v18  ;;  %v2376_v18 = vld [vmem:[#allocation4 + $0xc0] sm:$0xff]  ;;  %v2378_v19 = vld [vmem:[#allocation4 + $0xd0] sm:$0xff] }
 0x6c7   : > { %v3544_v29 = vpack.c.bf16 %v1809_v1, %v1801_v22  ;;  %v3574_v21 = vpack.c.bf16 %v2378_v19, %v2376_v18  ;;  %v2383_v22 = vld [vmem:[#allocation4 + $0xf8] sm:$0xff]  ;;  %v2414_v18 = vld [vmem:[#allocation4 + $0x1f0] sm:$0xff] }
 0x6c8   : > { %3463 = vmatpush1.bf16.msra.mxu0 %v3462_v31  ;;  %3527 = vmatpush1.bf16.msra.mxu1 %v3526_v32  ;;  %v1800_v31 = vld [vmem:[%s5408_s9 + $0x7b0] sm:$0xff]  ;;  %v3576_v1 = vpack.c.bf16 %v2383_v22, %v2381_v20  ;;  %v2419_v20 = vld [vmem:[#allocation4 + $0x218] sm:$0xff] }
 0x6c9   : > { %3465 = vmatprep.subr.bf16.mxu0 %v3464_v37  ;;  %3529 = vmatprep.subr.bf16.mxu1 %v3528_v38  ;;  %v1808_v32 = vld [vmem:[%s5408_s9 + $0x7f0] sm:$0xff]  ;;  %v3482_v37 = vpack.c.bf16 %v1806_v30, %v1798_v27 }
 0x6ca   : > { %v3546_v38 = vpack.c.bf16 %v1808_v32, %v1800_v31  ;;  %v2384_v31 = vld [vmem:[#allocation4 + $0x100] sm:$0xff]  ;;  %v2386_v32 = vld [vmem:[#allocation4 + $0x110] sm:$0xff] }
 0x6cb   : > { %v3582_v33 = vpack.c.bf16 %v2386_v32, %v2384_v31 }
 0x6cc   : > { %3467 = vmatpush1.bf16.msra.mxu0 %v3466_v45  ;;  %3531 = vmatpush1.bf16.msra.mxu1 %v3530_v46  ;;  %v3552_v45 = vpack.c.bf16 %v2359_v43, %v2357_v42  ;;  %v2356_v46 = vld [vmem:[#allocation4 + $0x20] sm:$0xff]  ;;  %v2393_v42 = vld [vmem:[#allocation4 + $0x148] sm:$0xff]  ;;  %v2395_v43 = vld [vmem:[#allocation4 + $0x158] sm:$0xff] }
 0x6cd   : > { %3469 = vmatprep.subr.bf16.mxu0 %v3468_v49  ;;  %3533 = vmatprep.subr.bf16.mxu1 %v3532_v50  ;;  %v2363_v49 = vld [vmem:[#allocation4 + $0x58] sm:$0xff]  ;;  %v3554_v50 = vpack.c.bf16 %v2358_v47, %v2356_v46  ;;  %v2394_v46 = vld [vmem:[#allocation4 + $0x150] sm:$0xff] }
 0x6ce   : > { %v3556_v51 = vpack.c.bf16 %v2363_v49, %v2361_v48  ;;  %v2397_v48 = vld [vmem:[#allocation4 + $0x168] sm:$0xff]  ;;  %v2399_v49 = vld [vmem:[#allocation4 + $0x178] sm:$0xff] }
 0x6d0   : > { %3471 = vmatpush1.bf16.msra.mxu0 %v3470_v60  ;;  %3535 = vmatpush1.bf16.msra.mxu1 %v3534_v61  ;;  %v3560_v60 = vpack.c.bf16 %v2367_v55, %v2365_v54  ;;  %v2364_v61 = vld [vmem:[#allocation4 + $0x60] sm:$0xff]  ;;  %v2401_v54 = vld [vmem:[#allocation4 + $0x188] sm:$0xff]  ;;  %v2403_v55 = vld [vmem:[#allocation4 + $0x198] sm:$0xff] }
 0x6d1   : > { %3473 = vmatprep.subr.bf16.mxu0 %v3472_v2  ;;  %3537 = vmatprep.subr.bf16.mxu1 %v3536_v3  ;;  %v3562_v63 = vpack.c.bf16 %v2366_v62, %v2364_v61  ;;  %v2369_v2 = vld [vmem:[#allocation4 + $0x88] sm:$0xff]  ;;  %v2402_v61 = vld [vmem:[#allocation4 + $0x190] sm:$0xff] }
 0x6d4   : > { %3475 = vmatpush1.bf16.msra.mxu0 %v3474_v0  ;;  %3539 = vmatpush1.bf16.msra.mxu1 %v3538_v12  ;;  %v2372_v0 = vld [vmem:[#allocation4 + $0xa0] sm:$0xff]  ;;  %v2374_v12 = vld [vmem:[#allocation4 + $0xb0] sm:$0xff] }
 0x6d5   : > { %3477 = vmatprep.subr.bf16.mxu0 %v3476_v15  ;;  %3541 = vmatprep.subr.bf16.mxu1 %v3540_v16  ;;  %v3570_v13 = vpack.c.bf16 %v2374_v12, %v2372_v0  ;;  %v2379_v15 = vld [vmem:[#allocation4 + $0xd8] sm:$0xff]  ;;  %v2410_v0 = vld [vmem:[#allocation4 + $0x1d0] sm:$0xff] }
 0x6d6   : > { %v3572_v16 = vpack.c.bf16 %v2379_v15, %v2377_v14  ;;  %v2415_v14 = vld [vmem:[#allocation4 + $0x1f8] sm:$0xff]  ;;  %v2412_v15 = vld [vmem:[#allocation4 + $0x1e0] sm:$0xff] }
 0x6d7   : > { %v3610_v19 = vpack.c.bf16 %v2414_v18, %v2412_v15 }
 0x6d8   : > { %3479 = vmatpush1.bf16.msra.mxu0 %v3478_v25  ;;  %3543 = vmatpush1.bf16.msra.mxu1 %v3542_v26  ;;  %v2380_v25 = vld [vmem:[#allocation4 + $0xe0] sm:$0xff]  ;;  %v2382_v26 = vld [vmem:[#allocation4 + $0xf0] sm:$0xff] }
 0x6d9   : > { %3481 = vmatprep.subr.bf16.mxu0 %v3480_v28  ;;  %3545 = vmatprep.subr.bf16.mxu1 %v3544_v29  ;;  %v3578_v27 = vpack.c.bf16 %v2382_v26, %v2380_v25  ;;  %v2385_v28 = vld [vmem:[#allocation4 + $0x108] sm:$0xff]  ;;  %v2387_v29 = vld [vmem:[#allocation4 + $0x118] sm:$0xff] }
 0x6da   : > { %v3580_v30 = vpack.c.bf16 %v2387_v29, %v2385_v28 }
 0x6dc   : > { %3483 = vmatpush1.bf16.msra.mxu0 %v3482_v37  ;;  %3547 = vmatpush1.bf16.msra.mxu1 %v3546_v38  ;;  %v2391_v37 = vld [vmem:[#allocation4 + $0x138] sm:$0xff] }
 0x6dd   : > { %3549 = vmatprep.subr.bf16.mxu0 %v3548_v39  ;;  %v3584_v38 = vpack.c.bf16 %v2391_v37, %v2389_v34  ;;  %v2388_v39 = vld [vmem:[#allocation4 + $0x120] sm:$0xff] }
 0x6de   : > { %v3586_v41 = vpack.c.bf16 %v2390_v40, %v2388_v39 }
 0x6df   : > { %2059 = vmatmul.mubr.f32.vlgmr.msra.gmra.mrb[6].mxu0 %v4869_v17  ;;  %2130 = vmatmul.mubr.f32.vlgmr.msra.gmra.mrb[14].mxu1 %v4869_v17  ;;  %v2371_v17 = vld [vmem:[#allocation4 + $0x98] sm:$0xff] }
 0x6e0   : > { %3551 = vmatpush1.bf16.msra.mxu0 %v3550_v44  ;;  %v3564_v3 = vpack.c.bf16 %v2371_v17, %v2369_v2  ;;  %v3588_v44 = vpack.c.bf16 %v2395_v43, %v2393_v42  ;;  %v2407_v2 = vld [vmem:[#allocation4 + $0x1b8] sm:$0xff] }
 0x6e1   : > { %3553 = vmatprep.subr.bf16.mxu0 %v3552_v45  ;;  %v2392_v45 = vld [vmem:[#allocation4 + $0x140] sm:$0xff] }
 0x6e2   : > { %v3590_v47 = vpack.c.bf16 %v2394_v46, %v2392_v45 }
 0x6e4   : > { %3555 = vmatpush1.bf16.msra.mxu0 %v3554_v50  ;;  %v3592_v50 = vpack.c.bf16 %v2399_v49, %v2397_v48 }
 0x6e5   : > { %3557 = vmatprep.subr.bf16.mxu0 %v3556_v51  ;;  %v2396_v51 = vld [vmem:[#allocation4 + $0x160] sm:$0xff] }
 0x6e6   : > { %v3594_v53 = vpack.c.bf16 %v2398_v52, %v2396_v51 }
 0x6e8   : > { %3559 = vmatpush1.bf16.msra.mxu0 %v3558_v59  ;;  %v3596_v59 = vpack.c.bf16 %v2403_v55, %v2401_v54 }
 0x6e9   : > { %3561 = vmatprep.subr.bf16.mxu0 %v3560_v60  ;;  %v2400_v60 = vld [vmem:[#allocation4 + $0x180] sm:$0xff] }
 0x6ea   : > { %v3598_v62 = vpack.c.bf16 %v2402_v61, %v2400_v60 }
 0x6ec   : > { %3563 = vmatpush1.bf16.msra.mxu0 %v3562_v63  ;;  %v2405_v63 = vld [vmem:[#allocation4 + $0x1a8] sm:$0xff] }
 0x6ed   : > { %3565 = vmatprep.subr.bf16.mxu0 %v3564_v3  ;;  %v3600_v17 = vpack.c.bf16 %v2407_v2, %v2405_v63  ;;  %v2404_v3 = vld [vmem:[#allocation4 + $0x1a0] sm:$0xff] }
 0x6ee   : > { %v3602_v7 = vpack.c.bf16 %v2406_v6, %v2404_v3 }
 0x6f0   : > { %3567 = vmatpush1.bf16.msra.mxu0 %v3566_v8  ;;  %v2409_v8 = vld [vmem:[#allocation4 + $0x1c8] sm:$0xff] }
 0x6f1   : > { %3569 = vmatprep.subr.bf16.mxu0 %v3568_v11  ;;  %v3604_v10 = vpack.c.bf16 %v2411_v9, %v2409_v8  ;;  %v2408_v11 = vld [vmem:[#allocation4 + $0x1c0] sm:$0xff] }
 0x6f2   : > { %v3606_v12 = vpack.c.bf16 %v2410_v0, %v2408_v11 }
 0x6f4   : > { %3571 = vmatpush1.bf16.msra.mxu0 %v3570_v13  ;;  %v2413_v13 = vld [vmem:[#allocation4 + $0x1e8] sm:$0xff] }
 0x6f5   : > { %3573 = vmatprep.subr.bf16.mxu0 %v3572_v16  ;;  %v3608_v16 = vpack.c.bf16 %v2415_v14, %v2413_v13 }
 0x6f8   : > { %3575 = vmatpush1.bf16.msra.mxu0 %v3574_v21  ;;  %v2417_v21 = vld [vmem:[#allocation4 + $0x208] sm:$0xff] }
 0x6f9   : > { %3577 = vmatprep.subr.bf16.mxu0 %v3576_v1  ;;  %v3612_v22 = vpack.c.bf16 %v2419_v20, %v2417_v21  ;;  %v5226_v1 = vld [vmem:[%s5409_s10] sm:$0xff] }
 0x6fa   : > { %v1815_v25 = vrot.slane %v5226_v1, %v4161_v58  ;;  %v1819_v26 = vrot.slane %v5226_v1, %v4158_v57  ;;  %v1823_v3 = vrot.slane %v5226_v1, %v730_v23 }
 0x6fc   : > { %3579 = vmatpush1.bf16.msra.mxu0 %v3578_v27  ;;  %v1827_v27 = vrot.slane %v5226_v1, %v734_v24 }
 0x6fd   : > { %3581 = vmatprep.subr.bf16.mxu0 %v3580_v30 }
 0x700   : > { %3583 = vmatpush1.bf16.msra.mxu0 %v3582_v33 }
 0x701   : > { %3585 = vmatprep.subr.bf16.mxu0 %v3584_v38 }
 0x704   : > { %3587 = vmatpush1.bf16.msra.mxu0 %v3586_v41 }
 0x705   : > { %3589 = vmatprep.subr.bf16.mxu0 %v3588_v44 }
 0x708   : > { %3591 = vmatpush1.bf16.msra.mxu0 %v3590_v47 }
 0x709   : > { %3593 = vmatprep.subr.bf16.mxu0 %v3592_v50 }
 0x70c   : > { %3595 = vmatpush1.bf16.msra.mxu0 %v3594_v53 }
 0x70d   : > { %3597 = vmatprep.subr.bf16.mxu0 %v3596_v59 }
 0x710   : > { %3599 = vmatpush1.bf16.msra.mxu0 %v3598_v62 }
 0x711   : > { %3601 = vmatprep.subr.bf16.mxu0 %v3600_v17 }
 0x714   : > { %3603 = vmatpush1.bf16.msra.mxu0 %v3602_v7 }
 0x715   : > { %3605 = vmatprep.subr.bf16.mxu0 %v3604_v10 }
 0x718   : > { %3607 = vmatpush1.bf16.msra.mxu0 %v3606_v12 }
 0x719   : > { %3609 = vmatprep.subr.bf16.mxu0 %v3608_v16 }
 0x71c   : > { %3611 = vmatpush1.bf16.msra.mxu0 %v3610_v19 }
 0x71d   : > { %3613 = vmatprep.subr.bf16.mxu0 %v3612_v22 }
 0x772   : > { %v1918_v28 = vpop.f32.mrb[4].mxu0  ;;  %v1989_v29 = vpop.f32.mrb[12].mxu1 }
 0x773   : > { %v5235_v30 = vadd.f32 %v1918_v28, %v1815_v25  ;;  %v1920_v31 = vpop.f32.mrb[5].mxu0  ;;  %v1991_v32 = vpop.f32.mrb[13].mxu1  ;;  %v5256_v13 = vadd.f32 %v1989_v29, %v1823_v3  ;;  %v2423_v3 = vld [vmem:[#allocation4 + $0x238] sm:$0xff] }
 0x774   : > { %v5237_v33 = vadd.f32 %v1920_v31, %v1819_v26  ;;  %v5239_v34 = vadd.f32 %v1991_v32, %v1827_v27 }
 0x775   : > { %v5242_v37 = vmul.f32 0.70710677, %v5235_v30  ;;  %v5259_v23 = vmul.f32 0.70710677, %v5256_v13 }
 0x776   : > { %v5245_v38 = vmul.f32 0.70710677, %v5237_v33  ;;  %v5250_v40 = vmul.f32 0.70710677, %v5239_v34 }
 0x777   : > { %v2168_v39 = vand.u32 2147483647, %v5242_v37  ;;  %vm2152_vm4 = vcmp.ge.f32.partialorder %v5242_v37, 0.0  ;;  %v5263_v31 = vand.u32 2147483647, %v5259_v23  ;;  %vm2154_vm7 = vcmp.ge.f32.partialorder %v5259_v23, 0.0 }
 0x778   : > { %v2169_v24 = vand.u32 2147483647, %v5245_v38  ;;  %v2171_v44 = vand.u32 2147483647, %v5250_v40  ;;  %vm2153_vm5 = vcmp.ge.f32.partialorder %v5245_v38, 0.0  ;;  %vm2155_vm6 = vcmp.ge.f32.partialorder %v5250_v40, 0.0 }
 0x779   : > { %v2176_v41 = vmul.f32 0.3275911, %v2168_v39  ;;  %v2280_v48 = vsub.f32 0.0, %v2168_v39  ;;  %v2137_v38 = vmul.f32 0.5, %v5237_v33  ;;  %v2136_v40 = vmul.f32 0.5, %v5235_v30  ;;  %v2427_v33 = vld [vmem:[#allocation4 + $0x258] sm:$0xff] }
 0x77a   : > { %v2177_v42 = vmul.f32 0.3275911, %v2169_v24  ;;  %v2179_v46 = vmul.f32 0.3275911, %v2171_v44  ;;  %v2281_v51 = vsub.f32 0.0, %v2169_v24  ;;  %v2283_v53 = vsub.f32 0.0, %v2171_v44 }
 0x77b   : > { %v2184_v43 = vadd.f32 1.0, %v2176_v41  ;;  %v2288_v50 = vmul.f32 %v2280_v48, %v2168_v39 }
 0x77c   : > { %v2185_v45 = vadd.f32 1.0, %v2177_v42  ;;  %v2187_v47 = vadd.f32 1.0, %v2179_v46  ;;  %v2289_v60 = vmul.f32 %v2281_v51, %v2169_v24  ;;  %v2291_v2 = vmul.f32 %v2283_v53, %v2171_v44 }
 0x77d   : > { %3860 = vrcp.f32 %v2184_v43  ;;  %v2296_v59 = vmul.f32 1.442695, %v2288_v50  ;;  %v3974_v44 = vmov -1.0   ;;  %v2178_v46 = vmul.f32 0.3275911, %v5263_v31 }
 0x77e   : > { %3862 = vrcp.f32 %v2185_v45  ;;  %v2298_v8 = vmul.f32 1.442695, %v2289_v60  ;;  %v2302_v0 = vmul.f32 1.442695, %v2291_v2  ;;  %v2160_v45 = vsel %vm2152_vm4, 1.0, %v3974_v44 }
 0x77f   : > { %3864 = vrcp.f32 %v2187_v47  ;;  %v2186_v53 = vadd.f32 1.0, %v2178_v46 }
 0x780   : > { %3866 = vpow2.f32 %v2296_v59  ;;  %v2418_v59 = vld [vmem:[#allocation4 + $0x210] sm:$0xff] }
 0x781   : > { %3868 = vpow2.f32 %v2298_v8 }
 0x782   : > { %3870 = vpow2.f32 %v2302_v0  ;;  %v2420_v0 = vld [vmem:[#allocation4 + $0x220] sm:$0xff] }
 0x783   : > { %3872 = vrcp.f32 %v2186_v53 }
 0x787   : > { %v3861_v49 = vpop.eup %3860 }
 0x788   : > { %v2208_v52 = vmul.f32 1.0614054, %v3861_v49  ;;  %v3863_v55 = vpop.eup %3862 }
 0x789   : > { %v2209_v62 = vmul.f32 1.0614054, %v3863_v55  ;;  %v3865_v63 = vpop.eup %3864 }
 0x78a   : > { %v2216_v54 = vadd.f32 -1.4531521, %v2208_v52  ;;  %v2211_v7 = vmul.f32 1.0614054, %v3865_v63  ;;  %v3867_v28 = vpop.eup %3866  ;;  %v2161_v52 = vsel %vm2153_vm5, 1.0, %v3974_v44 }
 0x78b   : > { %v2217_v6 = vadd.f32 -1.4531521, %v2209_v62  ;;  %v3869_v43 = vpop.eup %3868  ;;  %v2163_v62 = vsel %vm2155_vm6, 1.0, %v3974_v44 }
 0x78c   : > { %v2224_v61 = vmul.f32 %v3861_v49, %v2216_v54  ;;  %v2219_v11 = vadd.f32 -1.4531521, %v2211_v7  ;;  %v3871_v37 = vpop.eup %3870  ;;  %v2139_v7 = vmul.f32 0.5, %v5239_v34  ;;  %v2431_v34 = vld [vmem:[#allocation4 + $0x278] sm:$0xff] }
 0x78d   : > { %v2225_v10 = vmul.f32 %v3863_v55, %v2217_v6 }
 0x78e   : > { %v2232_v17 = vadd.f32 1.4214138, %v2224_v61  ;;  %v2227_v15 = vmul.f32 %v3865_v63, %v2219_v11 }
 0x78f   : > { %v2233_v14 = vadd.f32 1.4214138, %v2225_v10 }
 0x790   : > { %v2240_v9 = vmul.f32 %v3861_v49, %v2232_v17  ;;  %v2235_v19 = vadd.f32 1.4214138, %v2227_v15  ;;  %v2421_v17 = vld [vmem:[#allocation4 + $0x228] sm:$0xff] }
 0x791   : > { %v2241_v18 = vmul.f32 %v3863_v55, %v2233_v14  ;;  %v3616_v11 = vpack.c.bf16 %v2423_v3, %v2421_v17  ;;  %v2425_v15 = vld [vmem:[#allocation4 + $0x248] sm:$0xff]  ;;  %v2440_v17 = vld [vmem:[#allocation4 + $0x2c0] sm:$0xff]  ;;  %v2442_v3 = vld [vmem:[#allocation4 + $0x2d0] sm:$0xff] }
 0x792   : > { %v2248_v12 = vadd.f32 -0.28449672, %v2240_v9  ;;  %v2243_v22 = vmul.f32 %v3865_v63, %v2235_v19  ;;  %v3620_v30 = vpack.c.bf16 %v2427_v33, %v2425_v15  ;;  %v2426_v19 = vld [vmem:[#allocation4 + $0x250] sm:$0xff]  ;;  %v2451_v15 = vld [vmem:[#allocation4 + $0x318] sm:$0xff] }
 0x793   : > { %v2249_v20 = vadd.f32 -0.28449672, %v2241_v18  ;;  %v2424_v18 = vld [vmem:[#allocation4 + $0x240] sm:$0xff] }
 0x794   : > { %v2256_v16 = vmul.f32 %v3861_v49, %v2248_v12  ;;  %v2251_v27 = vadd.f32 -0.28449672, %v2243_v22  ;;  %v2422_v12 = vld [vmem:[#allocation4 + $0x230] sm:$0xff] }
 0x795   : > { %v2257_v26 = vmul.f32 %v3863_v55, %v2249_v20  ;;  %v3622_v20 = vpack.c.bf16 %v2426_v19, %v2424_v18  ;;  %v2448_v18 = vld [vmem:[#allocation4 + $0x300] sm:$0xff]  ;;  %v2450_v19 = vld [vmem:[#allocation4 + $0x310] sm:$0xff] }
 0x796   : > { %v2264_v21 = vadd.f32 0.2548296, %v2256_v16  ;;  %v2259_v39 = vmul.f32 %v3865_v63, %v2251_v27  ;;  %v3618_v16 = vpack.c.bf16 %v2422_v12, %v2420_v0  ;;  %v5274_v27 = vpop.eup %3872  ;;  %v2446_v0 = vld [vmem:[#allocation4 + $0x2f0] sm:$0xff]  ;;  %v2282_v12 = vsub.f32 0.0, %v5263_v31 }
 0x797   : > { %v2265_v32 = vadd.f32 0.2548296, %v2257_v26  ;;  %v2430_v26 = vld [vmem:[#allocation4 + $0x270] sm:$0xff] }
 0x798   : > { %v2272_v25 = vmul.f32 %v3861_v49, %v2264_v21  ;;  %v2267_v42 = vadd.f32 0.2548296, %v2259_v39  ;;  %v2429_v21 = vld [vmem:[#allocation4 + $0x268] sm:$0xff] }
 0x799   : > { %v2273_v41 = vmul.f32 %v3863_v55, %v2265_v32  ;;  %v2416_v55 = vld [vmem:[#allocation4 + $0x200] sm:$0xff]  ;;  %v3624_v22 = vpack.c.bf16 %v2431_v34, %v2429_v21  ;;  %v2435_v32 = vld [vmem:[#allocation4 + $0x298] sm:$0xff]  ;;  %v2290_v21 = vmul.f32 %v2282_v12, %v5263_v31  ;;  %v2453_v34 = vld [vmem:[#allocation4 + $0x328] sm:$0xff] }
 0x79a   : > { %v2312_v29 = vmul.f32 %v3867_v28, %v2272_v25  ;;  %v2275_v48 = vmul.f32 %v3865_v63, %v2267_v42  ;;  %v3614_v6 = vpack.c.bf16 %v2418_v59, %v2416_v55  ;;  %v2428_v25 = vld [vmem:[#allocation4 + $0x260] sm:$0xff]  ;;  %v1835_v28 = vrot.slane %v5226_v1, %v742_v36  ;;  %v2437_v36 = vld [vmem:[#allocation4 + $0x2a8] sm:$0xff]  ;;  %v2438_v55 = vld [vmem:[#allocation4 + $0x2b0] sm:$0xff] }
 0x79b   : > { %v2313_v47 = vmul.f32 %v3869_v43, %v2273_v41  ;;  %v3626_v41 = vpack.c.bf16 %v2430_v26, %v2428_v25  ;;  %v2210_v42 = vmul.f32 1.0614054, %v5274_v27  ;;  %v2464_v12 = vld [vmem:[#allocation4 + $0x380] sm:$0xff] }
 0x79c   : > { %v2320_v24 = vsub.f32 1.0, %v2312_v29  ;;  %v2315_v51 = vmul.f32 %v3871_v37, %v2275_v48  ;;  %v2433_v29 = vld [vmem:[#allocation4 + $0x288] sm:$0xff]  ;;  %v2434_v48 = vld [vmem:[#allocation4 + $0x290] sm:$0xff] }
 0x79d   : > { %v2321_v50 = vsub.f32 1.0, %v2313_v47  ;;  %v3628_v46 = vpack.c.bf16 %v2435_v32, %v2433_v29  ;;  %v2432_v47 = vld [vmem:[#allocation4 + $0x280] sm:$0xff]  ;;  %v2454_v32 = vld [vmem:[#allocation4 + $0x330] sm:$0xff] }
 0x79e   : > { %v2328_v49 = vmul.f32 %v2320_v24, %v2160_v45  ;;  %v2323_v60 = vsub.f32 1.0, %v2315_v51  ;;  %v3630_v51 = vpack.c.bf16 %v2434_v48, %v2432_v47  ;;  %v2452_v29 = vld [vmem:[#allocation4 + $0x320] sm:$0xff] }
 0x79f   : > { %v2329_v54 = vmul.f32 %v2321_v50, %v2161_v52  ;;  %v2218_v52 = vadd.f32 -1.4531521, %v2210_v42  ;;  %v2457_v42 = vld [vmem:[#allocation4 + $0x348] sm:$0xff] }
 0x7a0   : > { %v2336_v61 = vadd.f32 1.0, %v2328_v49  ;;  %v2331_v63 = vmul.f32 %v2323_v60, %v2163_v62  ;;  %v2439_v49 = vld [vmem:[#allocation4 + $0x2b8] sm:$0xff]  ;;  %v2441_v60 = vld [vmem:[#allocation4 + $0x2c8] sm:$0xff] }
 0x7a1   : > { %v2337_v2 = vadd.f32 1.0, %v2329_v54  ;;  %v3632_v53 = vpack.c.bf16 %v2439_v49, %v2437_v36  ;;  %v2436_v54 = vld [vmem:[#allocation4 + $0x2a0] sm:$0xff]  ;;  %v1842_v36 = vsub.s32 7, %v4155_v56 }
 0x7a2   : > { %v2339_v9 = vadd.f32 1.0, %v2331_v63  ;;  %v2344_v10 = vmul.f32 %v2336_v61, %v2136_v40  ;;  %v2443_v61 = vld [vmem:[#allocation4 + $0x2d8] sm:$0xff]  ;;  %v2445_v40 = vld [vmem:[#allocation4 + $0x2e8] sm:$0xff] }
 0x7a3   : > { %v2345_v8 = vmul.f32 %v2337_v2, %v2137_v38  ;;  %v3634_v38 = vpack.c.bf16 %v2438_v55, %v2436_v54  ;;  %v2226_v2 = vmul.f32 %v5274_v27, %v2218_v52  ;;  %v3636_v63 = vpack.c.bf16 %v2443_v61, %v2441_v60  ;;  %v2458_v52 = vld [vmem:[#allocation4 + $0x350] sm:$0xff]  ;;  %v2463_v54 = vld [vmem:[#allocation4 + $0x378] sm:$0xff] }
 0x7a4   : > { %v2347_v14 = vmul.f32 %v2339_v9, %v2139_v7  ;;  %v1831_v60 = vrot.slane %v5226_v1, %v738_v35 }
 0x7a5   : > { %2672 = vmatprep.mubr.f32.mxu0 %v2345_v8  ;;  %v3638_v8 = vpack.c.bf16 %v2442_v3, %v2440_v17  ;;  %v2234_v9 = vadd.f32 1.4214138, %v2226_v2  ;;  %v1843_v2 = vrot.slane %v5226_v1, %v1842_v36  ;;  %v2460_v17 = vld [vmem:[#allocation4 + $0x360] sm:$0xff]  ;;  %v2462_v3 = vld [vmem:[#allocation4 + $0x370] sm:$0xff]  ;;  %v2479_v36 = vld [vmem:[#allocation4 + $0x3f8] sm:$0xff] }
 0x7a6   : > { %2673 = vmatmul.mubr.f32.vlgmr.msra.gmra.mrb[8].mxu0 %v2344_v10  ;;  %v3658_v35 = vpack.c.bf16 %v2462_v3, %v2460_v17 }
 0x7a7   : > { %3615 = vmatpush1.bf16.msra.mxu0 %v3614_v6  ;;  %2743 = vmatprep.mubr.f32.mxu0 %v2347_v14  ;;  %v2447_v6 = vld [vmem:[#allocation4 + $0x2f8] sm:$0xff]  ;;  %v2449_v14 = vld [vmem:[#allocation4 + $0x308] sm:$0xff] }
 0x7a8   : > { %3617 = vmatprep.subr.bf16.mxu0 %v3616_v11  ;;  %v3640_v10 = vpack.c.bf16 %v2447_v6, %v2445_v40  ;;  %v2444_v11 = vld [vmem:[#allocation4 + $0x2e0] sm:$0xff]  ;;  %v2465_v40 = vld [vmem:[#allocation4 + $0x388] sm:$0xff]  ;;  %v2467_v6 = vld [vmem:[#allocation4 + $0x398] sm:$0xff] }
 0x7a9   : > { %v3642_v33 = vpack.c.bf16 %v2446_v0, %v2444_v11  ;;  %v3660_v0 = vpack.c.bf16 %v2467_v6, %v2465_v40 }
 0x7ab   : > { %3619 = vmatpush1.bf16.msra.mxu0 %v3618_v16  ;;  %v2242_v16 = vmul.f32 %v5274_v27, %v2234_v9 }
 0x7ac   : > { %3621 = vmatprep.subr.bf16.mxu0 %v3620_v30  ;;  %v3644_v30 = vpack.c.bf16 %v2451_v15, %v2449_v14  ;;  %v2466_v14 = vld [vmem:[#allocation4 + $0x390] sm:$0xff]  ;;  %v2469_v15 = vld [vmem:[#allocation4 + $0x3a8] sm:$0xff] }
 0x7ad   : > { %v2250_v25 = vadd.f32 -0.28449672, %v2242_v16 }
 0x7af   : > { %3623 = vmatpush1.bf16.msra.mxu0 %v3622_v20  ;;  %v2455_v20 = vld [vmem:[#allocation4 + $0x338] sm:$0xff]  ;;  %v2258_v48 = vmul.f32 %v5274_v27, %v2250_v25 }
 0x7b0   : > { %3625 = vmatprep.subr.bf16.mxu0 %v3624_v22  ;;  %v3646_v22 = vpack.c.bf16 %v2450_v19, %v2448_v18  ;;  %v3662_v18 = vpack.c.bf16 %v2466_v14, %v2464_v12  ;;  %v2475_v25 = vld [vmem:[#allocation4 + $0x3d8] sm:$0xff]  ;;  %v2138_v14 = vmul.f32 0.5, %v5256_v13 }
 0x7b1   : > { %v2487_v12 = vld [vmem:[#allocation4 + $0x438] sm:$0xff] }
 0x7b2   : > { %v5279_v39 = vpop.f32.mrb[6].mxu0  ;;  %v5281_v24 = vpop.f32.mrb[14].mxu1 }
 0x7b3   : > { %v2062_v43 = vpop.f32.mrb[7].mxu0  ;;  %v5284_v45 = vpop.f32.mrb[15].mxu1  ;;  %3627 = vmatpush1.bf16.msra.mxu0 %v3626_v41  ;;  %v2300_v41 = vmul.f32 1.442695, %v2290_v21 }
 0x7b4   : > { %v5286_v37 = vadd.f32 %v2062_v43, %v1835_v28  ;;  %3629 = vmatprep.subr.bf16.mxu0 %v3628_v46  ;;  %v3648_v28 = vpack.c.bf16 %v2455_v20, %v2453_v34  ;;  %v2459_v43 = vld [vmem:[#allocation4 + $0x358] sm:$0xff]  ;;  %v3650_v46 = vpack.c.bf16 %v2454_v32, %v2452_v29  ;;  %v5311_v11 = vadd.f32 %v5284_v45, %v1843_v2  ;;  %v2468_v34 = vld [vmem:[#allocation4 + $0x3a0] sm:$0xff]  ;;  %v2470_v20 = vld [vmem:[#allocation4 + $0x3b0] sm:$0xff] }
 0x7b5   : > { %v3652_v49 = vpack.c.bf16 %v2459_v43, %v2457_v42  ;;  %v3666_v29 = vpack.c.bf16 %v2470_v20, %v2468_v34  ;;  %v2472_v32 = vld [vmem:[#allocation4 + $0x3c0] sm:$0xff]  ;;  %v2483_v2 = vld [vmem:[#allocation4 + $0x418] sm:$0xff] }
 0x7b6   : > { %v5289_v50 = vmul.f32 0.70710677, %v5286_v37  ;;  %v5318_v21 = vmul.f32 0.70710677, %v5311_v11  ;;  %v2491_v34 = vld [vmem:[#allocation4 + $0x458] sm:$0xff] }
 0x7b7   : > { %3631 = vmatpush1.bf16.msra.mxu0 %v3630_v51  ;;  %v2456_v51 = vld [vmem:[#allocation4 + $0x340] sm:$0xff] }
 0x7b8   : > { %v2173_v59 = vand.u32 2147483647, %v5289_v50  ;;  %3633 = vmatprep.subr.bf16.mxu0 %v3632_v53  ;;  %v2461_v53 = vld [vmem:[#allocation4 + $0x368] sm:$0xff]  ;;  %v3654_v61 = vpack.c.bf16 %v2458_v52, %v2456_v51  ;;  %vm2157_vm8 = vcmp.ge.f32.partialorder %v5289_v50, 0.0  ;;  %vm2159_vm10 = vcmp.ge.f32.partialorder %v5318_v21, 0.0 }
 0x7ba   : > { %v2181_v62 = vmul.f32 0.3275911, %v2173_v59  ;;  %v2285_v26 = vsub.f32 0.0, %v2173_v59 }
 0x7bb   : > { %3635 = vmatpush1.bf16.msra.mxu0 %v3634_v38  ;;  %v2266_v38 = vadd.f32 0.2548296, %v2258_v48 }
 0x7bc   : > { %v2189_v7 = vadd.f32 1.0, %v2181_v62  ;;  %3637 = vmatprep.subr.bf16.mxu0 %v3636_v63  ;;  %v2293_v31 = vmul.f32 %v2285_v26, %v2173_v59  ;;  %v3656_v63 = vpack.c.bf16 %v2463_v54, %v2461_v53  ;;  %v2162_v53 = vsel %vm2154_vm7, 1.0, %v3974_v44 }
 0x7be   : > { %3874 = vrcp.f32 %v2189_v7  ;;  %v2306_v59 = vmul.f32 1.442695, %v2293_v31  ;;  %v2477_v31 = vld [vmem:[#allocation4 + $0x3e8] sm:$0xff] }
 0x7bf   : > { %3639 = vmatpush1.bf16.msra.mxu0 %v3638_v8  ;;  %3876 = vpow2.f32 %v2300_v41  ;;  %v5307_v8 = vadd.f32 %v5279_v39, %v1831_v60  ;;  %v2474_v41 = vld [vmem:[#allocation4 + $0x3d0] sm:$0xff] }
 0x7c0   : > { %3641 = vmatprep.subr.bf16.mxu0 %v3640_v10  ;;  %v2274_v10 = vmul.f32 %v5274_v27, %v2266_v38  ;;  %3878 = vpow2.f32 %v2306_v59  ;;  %v3670_v52 = vpack.c.bf16 %v2474_v41, %v2472_v32  ;;  %v2478_v38 = vld [vmem:[#allocation4 + $0x3f0] sm:$0xff]  ;;  %v2481_v59 = vld [vmem:[#allocation4 + $0x408] sm:$0xff]  ;;  %v2492_v41 = vld [vmem:[#allocation4 + $0x460] sm:$0xff] }
 0x7c1   : > { %v5315_v39 = vmul.f32 0.70710677, %v5307_v8 }
 0x7c3   : > { %3643 = vmatpush1.bf16.msra.mxu0 %v3642_v33  ;;  %v2471_v33 = vld [vmem:[#allocation4 + $0x3b8] sm:$0xff]  ;;  %vm2156_vm9 = vcmp.ge.f32.partialorder %v5315_v39, 0.0 }
 0x7c4   : > { %3645 = vmatprep.subr.bf16.mxu0 %v3644_v30  ;;  %v3664_v45 = vpack.c.bf16 %v2471_v33, %v2469_v15  ;;  %v2141_v15 = vmul.f32 0.5, %v5286_v37  ;;  %v2493_v37 = vld [vmem:[#allocation4 + $0x468] sm:$0xff] }
 0x7c7   : > { %3647 = vmatpush1.bf16.msra.mxu0 %v3646_v22  ;;  %v2473_v22 = vld [vmem:[#allocation4 + $0x3c8] sm:$0xff] }
 0x7c8   : > { %v5296_v47 = vpop.eup %3874  ;;  %3649 = vmatprep.subr.bf16.mxu0 %v3648_v28  ;;  %v5322_v28 = vand.u32 2147483647, %v5315_v39  ;;  %v3668_v48 = vpack.c.bf16 %v2475_v25, %v2473_v22  ;;  %v2488_v22 = vld [vmem:[#allocation4 + $0x440] sm:$0xff]  ;;  %v2490_v25 = vld [vmem:[#allocation4 + $0x450] sm:$0xff] }
 0x7c9   : > { %v2213_v55 = vmul.f32 1.0614054, %v5296_v47  ;;  %v3877_v30 = vpop.eup %3876 }
 0x7ca   : > { %v2314_v27 = vmul.f32 %v3877_v30, %v2274_v10  ;;  %v3879_v51 = vpop.eup %3878  ;;  %v2180_v54 = vmul.f32 0.3275911, %v5322_v28 }
 0x7cb   : > { %3651 = vmatpush1.bf16.msra.mxu0 %v3650_v46  ;;  %v2221_v62 = vadd.f32 -1.4531521, %v2213_v55  ;;  %v5326_v46 = vand.u32 2147483647, %v5318_v21 }
 0x7cc   : > { %3653 = vmatprep.subr.bf16.mxu0 %v3652_v49  ;;  %v2322_v43 = vsub.f32 1.0, %v2314_v27  ;;  %v2188_v17 = vadd.f32 1.0, %v2180_v54  ;;  %v2498_v54 = vld [vmem:[#allocation4 + $0x490] sm:$0xff] }
 0x7cd   : > { %v2229_v7 = vmul.f32 %v5296_v47, %v2221_v62  ;;  %v2183_v60 = vmul.f32 0.3275911, %v5326_v46  ;;  %v2476_v62 = vld [vmem:[#allocation4 + $0x3e0] sm:$0xff] }
 0x7ce   : > { %v2330_v55 = vmul.f32 %v2322_v43, %v2162_v53  ;;  %v3674_v3 = vpack.c.bf16 %v2478_v38, %v2476_v62  ;;  %3880 = vrcp.f32 %v2188_v17  ;;  %v2496_v53 = vld [vmem:[#allocation4 + $0x480] sm:$0xff] }
 0x7cf   : > { %3655 = vmatpush1.bf16.msra.mxu0 %v3654_v61  ;;  %v2237_v9 = vadd.f32 1.4214138, %v2229_v7  ;;  %v3672_v61 = vpack.c.bf16 %v2479_v36, %v2477_v31  ;;  %v2191_v50 = vadd.f32 1.0, %v2183_v60  ;;  %v3676_v7 = vpack.c.bf16 %v2483_v2, %v2481_v59  ;;  %v2499_v31 = vld [vmem:[#allocation4 + $0x498] sm:$0xff]  ;;  %v2500_v59 = vld [vmem:[#allocation4 + $0x4a0] sm:$0xff]  ;;  %v2502_v2 = vld [vmem:[#allocation4 + $0x4b0] sm:$0xff] }
 0x7d0   : > { %3657 = vmatprep.subr.bf16.mxu0 %v3656_v63  ;;  %v2165_v63 = vsel %vm2157_vm8, 1.0, %v3974_v44  ;;  %v2338_v6 = vadd.f32 1.0, %v2330_v55  ;;  %v2503_v55 = vld [vmem:[#allocation4 + $0x4b8] sm:$0xff] }
 0x7d1   : > { %v2245_v16 = vmul.f32 %v5296_v47, %v2237_v9  ;;  %v2482_v9 = vld [vmem:[#allocation4 + $0x410] sm:$0xff]  ;;  %3882 = vrcp.f32 %v2191_v50  ;;  %v2504_v50 = vld [vmem:[#allocation4 + $0x4c0] sm:$0xff] }
 0x7d3   : > { %3659 = vmatpush1.bf16.msra.mxu0 %v3658_v35  ;;  %v2253_v19 = vadd.f32 -0.28449672, %v2245_v16  ;;  %v2480_v35 = vld [vmem:[#allocation4 + $0x400] sm:$0xff]  ;;  %v2346_v16 = vmul.f32 %v2338_v6, %v2138_v14 }
 0x7d4   : > { %3661 = vmatprep.subr.bf16.mxu0 %v3660_v0  ;;  %v2485_v0 = vld [vmem:[#allocation4 + $0x428] sm:$0xff]  ;;  %v3678_v33 = vpack.c.bf16 %v2482_v9, %v2480_v35  ;;  %v2511_v9 = vld [vmem:[#allocation4 + $0x4f8] sm:$0xff] }
 0x7d5   : > { %v2261_v26 = vmul.f32 %v5296_v47, %v2253_v19  ;;  %v3680_v30 = vpack.c.bf16 %v2487_v12, %v2485_v0  ;;  %v2486_v19 = vld [vmem:[#allocation4 + $0x430] sm:$0xff]  ;;  %v2509_v35 = vld [vmem:[#allocation4 + $0x4e8] sm:$0xff] }
 0x7d6   : > { %v3704_v14 = vpack.c.bf16 %v2511_v9, %v2509_v35 }
 0x7d7   : > { %3663 = vmatpush1.bf16.msra.mxu0 %v3662_v18  ;;  %v2269_v42 = vadd.f32 0.2548296, %v2261_v26  ;;  %v2484_v18 = vld [vmem:[#allocation4 + $0x420] sm:$0xff]  ;;  %v2495_v26 = vld [vmem:[#allocation4 + $0x478] sm:$0xff] }
 0x7d8   : > { %3665 = vmatprep.subr.bf16.mxu0 %v3664_v45  ;;  %v2489_v45 = vld [vmem:[#allocation4 + $0x448] sm:$0xff]  ;;  %v3682_v20 = vpack.c.bf16 %v2486_v19, %v2484_v18  ;;  %v3688_v32 = vpack.c.bf16 %v2495_v26, %v2493_v37  ;;  %v5336_v43 = vpop.eup %3880  ;;  %v2515_v18 = vld [vmem:[#allocation4 + $0x518] sm:$0xff] }
 0x7d9   : > { %v2277_v49 = vmul.f32 %v5296_v47, %v2269_v42  ;;  %v3684_v13 = vpack.c.bf16 %v2491_v34, %v2489_v45  ;;  %v2494_v42 = vld [vmem:[#allocation4 + $0x470] sm:$0xff]  ;;  %v2517_v37 = vld [vmem:[#allocation4 + $0x528] sm:$0xff]  ;;  %v2519_v26 = vld [vmem:[#allocation4 + $0x538] sm:$0xff] }
 0x7db   : > { %3667 = vmatpush1.bf16.msra.mxu0 %v3666_v29  ;;  %v2317_v23 = vmul.f32 %v3879_v51, %v2277_v49  ;;  %v3686_v29 = vpack.c.bf16 %v2490_v25, %v2488_v22  ;;  %v5338_v36 = vpop.eup %3882  ;;  %v3690_v49 = vpack.c.bf16 %v2494_v42, %v2492_v41  ;;  %v2212_v51 = vmul.f32 1.0614054, %v5336_v43  ;;  %v2514_v22 = vld [vmem:[#allocation4 + $0x510] sm:$0xff] }
 0x7dc   : > { %3669 = vmatprep.subr.bf16.mxu0 %v3668_v48  ;;  %v2497_v48 = vld [vmem:[#allocation4 + $0x488] sm:$0xff]  ;;  %v2215_v60 = vmul.f32 1.0614054, %v5338_v36 }
 0x7dd   : > { %v2325_v47 = vsub.f32 1.0, %v2317_v23  ;;  %v2501_v23 = vld [vmem:[#allocation4 + $0x4a8] sm:$0xff]  ;;  %v2220_v62 = vadd.f32 -1.4531521, %v2212_v51 }
 0x7de   : > { %v3696_v38 = vpack.c.bf16 %v2503_v55, %v2501_v23  ;;  %v2223_v17 = vadd.f32 -1.4531521, %v2215_v60 }
 0x7df   : > { %3671 = vmatpush1.bf16.msra.mxu0 %v3670_v52  ;;  %v2333_v40 = vmul.f32 %v2325_v47, %v2165_v63  ;;  %v3692_v52 = vpack.c.bf16 %v2499_v31, %v2497_v48  ;;  %v2505_v47 = vld [vmem:[#allocation4 + $0x4c8] sm:$0xff]  ;;  %v2507_v63 = vld [vmem:[#allocation4 + $0x4d8] sm:$0xff]  ;;  %v3712_v48 = vpack.c.bf16 %v2519_v26, %v2517_v37  ;;  %v2516_v31 = vld [vmem:[#allocation4 + $0x520] sm:$0xff] }
 0x7e0   : > { %3673 = vmatprep.subr.bf16.mxu0 %v3672_v61  ;;  %v3694_v61 = vpack.c.bf16 %v2498_v54, %v2496_v53  ;;  %v3700_v6 = vpack.c.bf16 %v2507_v63, %v2505_v47  ;;  %v2523_v53 = vld [vmem:[#allocation4 + $0x558] sm:$0xff]  ;;  %v2536_v26 = vld [vmem:[#allocation4 + $0x5c0] sm:$0xff] }
 0x7e1   : > { %v2341_v10 = vadd.f32 1.0, %v2333_v40  ;;  %v2228_v40 = vmul.f32 %v5336_v43, %v2220_v62  ;;  %v2522_v62 = vld [vmem:[#allocation4 + $0x550] sm:$0xff] }
 0x7e3   : > { %3675 = vmatpush1.bf16.msra.mxu0 %v3674_v3  ;;  %v2349_v27 = vmul.f32 %v2341_v10, %v2141_v15  ;;  %v3698_v3 = vpack.c.bf16 %v2502_v2, %v2500_v59  ;;  %v2231_v10 = vmul.f32 %v5338_v36, %v2223_v17  ;;  %v2236_v12 = vadd.f32 1.4214138, %v2228_v40  ;;  %v2508_v15 = vld [vmem:[#allocation4 + $0x4e0] sm:$0xff]  ;;  %v2527_v59 = vld [vmem:[#allocation4 + $0x578] sm:$0xff]  ;;  %v2526_v40 = vld [vmem:[#allocation4 + $0x570] sm:$0xff] }
 0x7e4   : > { %3677 = vmatprep.subr.bf16.mxu0 %v3676_v7  ;;  %v2506_v7 = vld [vmem:[#allocation4 + $0x4d0] sm:$0xff] }
 0x7e5   : > { %v3702_v0 = vpack.c.bf16 %v2506_v7, %v2504_v50  ;;  %v2239_v19 = vadd.f32 1.4214138, %v2231_v10  ;;  %v2244_v34 = vmul.f32 %v5336_v43, %v2236_v12  ;;  %v2531_v50 = vld [vmem:[#allocation4 + $0x598] sm:$0xff]  ;;  %v2530_v12 = vld [vmem:[#allocation4 + $0x590] sm:$0xff] }
 0x7e6   : > { %2744 = vmatmul.mubr.f32.vlgmr.msra.gmra.mrb[8].mxu0 %v2346_v16  ;;  %v2284_v16 = vsub.f32 0.0, %v5322_v28 }
 0x7e7   : > { %3679 = vmatpush1.bf16.msra.mxu0 %v3678_v33  ;;  %2814 = vmatprep.mubr.f32.mxu0 %v2349_v27  ;;  %v2510_v33 = vld [vmem:[#allocation4 + $0x4f0] sm:$0xff]  ;;  %v2287_v27 = vsub.f32 0.0, %v5326_v46  ;;  %v2252_v42 = vadd.f32 -0.28449672, %v2244_v34  ;;  %v2537_v34 = vld [vmem:[#allocation4 + $0x5c8] sm:$0xff] }
 0x7e8   : > { %3681 = vmatprep.subr.bf16.mxu0 %v3680_v30  ;;  %v2513_v30 = vld [vmem:[#allocation4 + $0x508] sm:$0xff]  ;;  %v3706_v45 = vpack.c.bf16 %v2510_v33, %v2508_v15  ;;  %v2292_v25 = vmul.f32 %v2284_v16, %v5322_v28  ;;  %v1838_v28 = vsub.s32 6, %v4155_v56  ;;  %v2535_v15 = vld [vmem:[#allocation4 + $0x5b8] sm:$0xff] }
 0x7e9   : > { %v2260_v60 = vmul.f32 %v5336_v43, %v2252_v42 }
 0x7ea   : > { %v2304_v51 = vmul.f32 1.442695, %v2292_v25  ;;  %v1839_v47 = vrot.slane %v5226_v1, %v1838_v28  ;;  %v2528_v1 = vld [vmem:[#allocation4 + $0x580] sm:$0xff]  ;;  %v2547_v28 = vld [vmem:[#allocation4 + $0x618] sm:$0xff] }
 0x7eb   : > { %3683 = vmatpush1.bf16.msra.mxu0 %v3682_v20  ;;  %v3708_v20 = vpack.c.bf16 %v2515_v18, %v2513_v30  ;;  %v2268_v17 = vadd.f32 0.2548296, %v2260_v60  ;;  %v3726_v18 = vpack.c.bf16 %v2530_v12, %v2528_v1  ;;  %v2554_v12 = vld [vmem:[#allocation4 + $0x650] sm:$0xff] }
 0x7ec   : > { %3685 = vmatprep.subr.bf16.mxu0 %v3684_v13  ;;  %v2512_v13 = vld [vmem:[#allocation4 + $0x500] sm:$0xff]  ;;  %3884 = vpow2.f32 %v2304_v51  ;;  %v5355_v35 = vadd.f32 %v5281_v24, %v1839_v47  ;;  %v2551_v47 = vld [vmem:[#allocation4 + $0x638] sm:$0xff] }
 0x7ed   : > { %v3710_v41 = vpack.c.bf16 %v2514_v22, %v2512_v13  ;;  %v2276_v10 = vmul.f32 %v5336_v43, %v2268_v17  ;;  %v2534_v43 = vld [vmem:[#allocation4 + $0x5b0] sm:$0xff]  ;;  %v2143_v17 = vmul.f32 0.5, %v5311_v11  ;;  %v2559_v11 = vld [vmem:[#allocation4 + $0x678] sm:$0xff] }
 0x7ee   : > { %v5360_v30 = vmul.f32 0.70710677, %v5355_v35 }
 0x7ef   : > { %3687 = vmatpush1.bf16.msra.mxu0 %v3686_v29  ;;  %v2247_v29 = vmul.f32 %v5338_v36, %v2239_v19 }
 0x7f0   : > { %3689 = vmatprep.subr.bf16.mxu0 %v3688_v32  ;;  %v2295_v32 = vmul.f32 %v2287_v27, %v5326_v46  ;;  %v5363_v22 = vand.u32 2147483647, %v5360_v30  ;;  %vm2158_vm11 = vcmp.ge.f32.partialorder %v5360_v30, 0.0 }
 0x7f1   : > { %v2255_v54 = vadd.f32 -0.28449672, %v2247_v29  ;;  %v2538_v29 = vld [vmem:[#allocation4 + $0x5d0] sm:$0xff] }
 0x7f2   : > { %v2310_v23 = vmul.f32 1.442695, %v2295_v32  ;;  %v2541_v32 = vld [vmem:[#allocation4 + $0x5e8] sm:$0xff] }
 0x7f3   : > { %3691 = vmatpush1.bf16.msra.mxu0 %v3690_v49  ;;  %v2518_v49 = vld [vmem:[#allocation4 + $0x530] sm:$0xff]  ;;  %v2263_v2 = vmul.f32 %v5338_v36, %v2255_v54 }
 0x7f4   : > { %3693 = vmatprep.subr.bf16.mxu0 %v3692_v52  ;;  %v2521_v52 = vld [vmem:[#allocation4 + $0x548] sm:$0xff]  ;;  %v3714_v55 = vpack.c.bf16 %v2518_v49, %v2516_v31  ;;  %3886 = vpow2.f32 %v2310_v23  ;;  %v2182_v31 = vmul.f32 0.3275911, %v5363_v22  ;;  %v3734_v49 = vpack.c.bf16 %v2538_v29, %v2536_v26  ;;  %v2542_v54 = vld [vmem:[#allocation4 + $0x5f0] sm:$0xff] }
 0x7f5   : > { %v3716_v46 = vpack.c.bf16 %v2523_v53, %v2521_v52  ;;  %v2271_v7 = vadd.f32 0.2548296, %v2263_v2  ;;  %v2167_v52 = vsel %vm2159_vm10, 1.0, %v3974_v44  ;;  %v2540_v53 = vld [vmem:[#allocation4 + $0x5e0] sm:$0xff]  ;;  %v2545_v23 = vld [vmem:[#allocation4 + $0x608] sm:$0xff] }
 0x7f6   : > { %v3885_v16 = vpop.eup %3884  ;;  %v2190_v21 = vadd.f32 1.0, %v2182_v31  ;;  %v3738_v60 = vpack.c.bf16 %v2542_v54, %v2540_v53  ;;  %v2549_v2 = vld [vmem:[#allocation4 + $0x628] sm:$0xff]  ;;  %v2575_v54 = vld [vmem:[#allocation4 + $0x6f8] sm:$0xff] }
 0x7f7   : > { %3695 = vmatpush1.bf16.msra.mxu0 %v3694_v61  ;;  %v2520_v61 = vld [vmem:[#allocation4 + $0x540] sm:$0xff]  ;;  %v2279_v33 = vmul.f32 %v5338_v36, %v2271_v7  ;;  %v2316_v19 = vmul.f32 %v3885_v16, %v2276_v10  ;;  %v2555_v10 = vld [vmem:[#allocation4 + $0x658] sm:$0xff]  ;;  %v2573_v53 = vld [vmem:[#allocation4 + $0x6e8] sm:$0xff] }
 0x7f8   : > { %3697 = vmatprep.subr.bf16.mxu0 %v3696_v38  ;;  %v2525_v38 = vld [vmem:[#allocation4 + $0x568] sm:$0xff]  ;;  %v3718_v63 = vpack.c.bf16 %v2522_v62, %v2520_v61  ;;  %v3740_v61 = vpack.c.bf16 %v2547_v28, %v2545_v23  ;;  %v2544_v62 = vld [vmem:[#allocation4 + $0x600] sm:$0xff]  ;;  %3888 = vrcp.f32 %v2190_v21 }
 0x7f9   : > { %v3720_v56 = vpack.c.bf16 %v2527_v59, %v2525_v38  ;;  %v2324_v25 = vsub.f32 1.0, %v2316_v19  ;;  %v2546_v38 = vld [vmem:[#allocation4 + $0x610] sm:$0xff]  ;;  %v2556_v16 = vld [vmem:[#allocation4 + $0x660] sm:$0xff]  ;;  %v2561_v19 = vld [vmem:[#allocation4 + $0x688] sm:$0xff] }
 0x7fa   : > { %v2572_v21 = vld [vmem:[#allocation4 + $0x6e0] sm:$0xff] }
 0x7fb   : > { %3699 = vmatpush1.bf16.msra.mxu0 %v3698_v3  ;;  %v2524_v3 = vld [vmem:[#allocation4 + $0x560] sm:$0xff] }
 0x7fc   : > { %3701 = vmatprep.subr.bf16.mxu0 %v3700_v6  ;;  %v2529_v6 = vld [vmem:[#allocation4 + $0x588] sm:$0xff]  ;;  %v3722_v9 = vpack.c.bf16 %v2526_v40, %v2524_v3  ;;  %v3744_v40 = vpack.c.bf16 %v2551_v47, %v2549_v2  ;;  %v2576_v47 = vld [vmem:[#allocation4 + $0x700] sm:$0xff] }
 0x7fe   : > { %v3887_v24 = vpop.eup %3886 }
 0x7ff   : > { %3703 = vmatpush1.bf16.msra.mxu0 %v3702_v0  ;;  %v3724_v0 = vpack.c.bf16 %v2531_v50, %v2529_v6  ;;  %v2319_v13 = vmul.f32 %v3887_v24, %v2279_v33  ;;  %v2548_v6 = vld [vmem:[#allocation4 + $0x620] sm:$0xff]  ;;  %v2550_v50 = vld [vmem:[#allocation4 + $0x630] sm:$0xff] }
 0x800   : > { %3705 = vmatprep.subr.bf16.mxu0 %v3704_v14  ;;  %v2533_v14 = vld [vmem:[#allocation4 + $0x5a8] sm:$0xff] }
 0x801   : > { %v3728_v27 = vpack.c.bf16 %v2535_v15, %v2533_v14  ;;  %v2327_v42 = vsub.f32 1.0, %v2319_v13  ;;  %v2557_v14 = vld [vmem:[#allocation4 + $0x668] sm:$0xff]  ;;  %v2562_v13 = vld [vmem:[#allocation4 + $0x690] sm:$0xff] }
 0x802   : > { %v3752_v33 = vpack.c.bf16 %v2559_v11, %v2557_v14  ;;  %v5372_v24 = vpop.eup %3888  ;;  %v2584_v11 = vld [vmem:[#allocation4 + $0x740] sm:$0xff] }
 0x803   : > { %3707 = vmatpush1.bf16.msra.mxu0 %v3706_v45  ;;  %v2532_v45 = vld [vmem:[#allocation4 + $0x5a0] sm:$0xff] }
 0x804   : > { %3709 = vmatprep.subr.bf16.mxu0 %v3708_v20  ;;  %v2539_v20 = vld [vmem:[#allocation4 + $0x5d8] sm:$0xff]  ;;  %v3730_v36 = vpack.c.bf16 %v2534_v43, %v2532_v45  ;;  %v2214_v43 = vmul.f32 1.0614054, %v5372_v24 }
 0x805   : > { %v3732_v37 = vpack.c.bf16 %v2539_v20, %v2537_v34  ;;  %v2560_v20 = vld [vmem:[#allocation4 + $0x680] sm:$0xff] }
 0x806   : > { %v2222_v26 = vadd.f32 -1.4531521, %v2214_v43  ;;  %v2593_v43 = vld [vmem:[#allocation4 + $0x788] sm:$0xff] }
 0x807   : > { %3711 = vmatpush1.bf16.msra.mxu0 %v3710_v41  ;;  %v2543_v41 = vld [vmem:[#allocation4 + $0x5f8] sm:$0xff] }
 0x808   : > { %3713 = vmatprep.subr.bf16.mxu0 %v3712_v48  ;;  %v2164_v48 = vsel %vm2156_vm9, 1.0, %v3974_v44  ;;  %v3736_v39 = vpack.c.bf16 %v2543_v41, %v2541_v32  ;;  %v2564_v32 = vld [vmem:[#allocation4 + $0x6a0] sm:$0xff]  ;;  %v2566_v41 = vld [vmem:[#allocation4 + $0x6b0] sm:$0xff] }
 0x809   : > { %v2332_v51 = vmul.f32 %v2324_v25, %v2164_v48  ;;  %v2567_v25 = vld [vmem:[#allocation4 + $0x6b8] sm:$0xff]  ;;  %v3762_v31 = vpack.c.bf16 %v2566_v41, %v2564_v32 }
 0x80a   : > { %v2571_v48 = vld [vmem:[#allocation4 + $0x6d8] sm:$0xff] }
 0x80b   : > { %3715 = vmatpush1.bf16.msra.mxu0 %v3714_v55  ;;  %v2335_v55 = vmul.f32 %v2327_v42, %v2167_v52  ;;  %v2569_v42 = vld [vmem:[#allocation4 + $0x6c8] sm:$0xff]  ;;  %v2568_v52 = vld [vmem:[#allocation4 + $0x6c0] sm:$0xff] }
 0x80c   : > { %3717 = vmatprep.subr.bf16.mxu0 %v3716_v46  ;;  %v2340_v46 = vadd.f32 1.0, %v2332_v51  ;;  %v3764_v51 = vpack.c.bf16 %v2571_v48, %v2569_v42 }
 0x80d   : > { %v2343_v59 = vadd.f32 1.0, %v2335_v55  ;;  %v3768_v55 = vpack.c.bf16 %v2575_v54, %v2573_v53  ;;  %v2600_v54 = vld [vmem:[#allocation4 + $0x7c0] sm:$0xff] }
 0x80f   : > { %3719 = vmatpush1.bf16.msra.mxu0 %v3718_v63  ;;  %v2140_v63 = vmul.f32 0.5, %v5307_v8  ;;  %v2351_v7 = vmul.f32 %v2343_v59, %v2143_v17  ;;  %v2552_v8 = vld [vmem:[#allocation4 + $0x640] sm:$0xff] }
 0x810   : > { %3721 = vmatprep.subr.bf16.mxu0 %v3720_v56  ;;  %v3742_v56 = vpack.c.bf16 %v2546_v38, %v2544_v62  ;;  %v3750_v15 = vpack.c.bf16 %v2554_v12, %v2552_v8  ;;  %v2579_v62 = vld [vmem:[#allocation4 + $0x718] sm:$0xff] }
 0x811   : > { %v2348_v3 = vmul.f32 %v2340_v46, %v2140_v63  ;;  %v2286_v46 = vsub.f32 0.0, %v5363_v22  ;;  %v2578_v63 = vld [vmem:[#allocation4 + $0x710] sm:$0xff] }
 0x813   : > { %3723 = vmatpush1.bf16.msra.mxu0 %v3722_v9  ;;  %v2553_v9 = vld [vmem:[#allocation4 + $0x648] sm:$0xff]  ;;  %v2294_v17 = vmul.f32 %v2286_v46, %v5363_v22  ;;  %v2586_v22 = vld [vmem:[#allocation4 + $0x750] sm:$0xff] }
 0x814   : > { %3725 = vmatprep.subr.bf16.mxu0 %v3724_v0  ;;  %v3746_v0 = vpack.c.bf16 %v2550_v50, %v2548_v6  ;;  %v3748_v1 = vpack.c.bf16 %v2555_v10, %v2553_v9  ;;  %v2582_v9 = vld [vmem:[#allocation4 + $0x730] sm:$0xff] }
 0x815   : > { %v2308_v10 = vmul.f32 1.442695, %v2294_v17 }
 0x817   : > { %3727 = vmatpush1.bf16.msra.mxu0 %v3726_v18  ;;  %v2558_v18 = vld [vmem:[#allocation4 + $0x670] sm:$0xff]  ;;  %3890 = vpow2.f32 %v2308_v10 }
 0x818   : > { %3729 = vmatprep.subr.bf16.mxu0 %v3728_v27  ;;  %v2563_v27 = vld [vmem:[#allocation4 + $0x698] sm:$0xff]  ;;  %v3754_v45 = vpack.c.bf16 %v2558_v18, %v2556_v16  ;;  %v3782_v16 = vpack.c.bf16 %v2586_v22, %v2584_v11 }
 0x819   : > { %v3756_v34 = vpack.c.bf16 %v2563_v27, %v2561_v19  ;;  %v2588_v27 = vld [vmem:[#allocation4 + $0x760] sm:$0xff] }
 0x81b   : > { %3731 = vmatpush1.bf16.msra.mxu0 %v3730_v36  ;;  %v2565_v36 = vld [vmem:[#allocation4 + $0x6a8] sm:$0xff] }
 0x81c   : > { %3733 = vmatprep.subr.bf16.mxu0 %v3732_v37  ;;  %v3758_v37 = vpack.c.bf16 %v2562_v13, %v2560_v20  ;;  %v3760_v29 = vpack.c.bf16 %v2567_v25, %v2565_v36  ;;  %v2592_v25 = vld [vmem:[#allocation4 + $0x780] sm:$0xff] }
 0x81f   : > { %3735 = vmatpush1.bf16.msra.mxu0 %v3734_v49  ;;  %v2230_v49 = vmul.f32 %v5372_v24, %v2222_v26  ;;  %v2597_v26 = vld [vmem:[#allocation4 + $0x7a8] sm:$0xff] }
 0x820   : > { %3737 = vmatprep.subr.bf16.mxu0 %v3736_v39  ;;  %v2570_v39 = vld [vmem:[#allocation4 + $0x6d0] sm:$0xff] }
 0x821   : > { %v3766_v23 = vpack.c.bf16 %v2570_v39, %v2568_v52  ;;  %v2238_v28 = vadd.f32 1.4214138, %v2230_v49  ;;  %v3891_v32 = vpop.eup %3890  ;;  %v2598_v49 = vld [vmem:[#allocation4 + $0x7b0] sm:$0xff]  ;;  %v2603_v52 = vld [vmem:[#allocation4 + $0x7d8] sm:$0xff] }
 0x823   : > { %3739 = vmatpush1.bf16.msra.mxu0 %v3738_v60  ;;  %v2574_v60 = vld [vmem:[#allocation4 + $0x6f0] sm:$0xff]  ;;  %v2246_v59 = vmul.f32 %v5372_v24, %v2238_v28  ;;  %v2605_v28 = vld [vmem:[#allocation4 + $0x7e8] sm:$0xff] }
 0x824   : > { %3741 = vmatprep.subr.bf16.mxu0 %v3740_v61  ;;  %v2577_v61 = vld [vmem:[#allocation4 + $0x708] sm:$0xff]  ;;  %v3770_v38 = vpack.c.bf16 %v2574_v60, %v2572_v21  ;;  %v2166_v21 = vsel %vm2158_vm11, 1.0, %v3974_v44  ;;  %v2894_v44 = vld [vmem:[%s5411_s12] sm:$0x3] }
 0x825   : > { %v3772_v2 = vpack.c.bf16 %v2579_v62, %v2577_v61  ;;  %v2254_v6 = vadd.f32 -0.28449672, %v2246_v59  ;;  %v2604_v62 = vld [vmem:[#allocation4 + $0x7e0] sm:$0xff] }
 0x826   : > { %2815 = vmatmul.mubr.f32.vlgmr.msra.gmra.mrb[8].mxu0 %v2348_v3  ;;  %v2583_v3 = vld [vmem:[#allocation4 + $0x738] sm:$0xff] }
 0x827   : > { %3743 = vmatpush1.bf16.msra.mxu0 %v3742_v56  ;;  %2885 = vmatprep.mubr.f32.mxu0 %v2351_v7  ;;  %v2581_v56 = vld [vmem:[#allocation4 + $0x728] sm:$0xff]  ;;  %v2580_v7 = vld [vmem:[#allocation4 + $0x720] sm:$0xff]  ;;  %v2262_v12 = vmul.f32 %v5372_v24, %v2254_v6 }
 0x828   : > { %3745 = vmatprep.subr.bf16.mxu0 %v3744_v40  ;;  %v3774_v40 = vpack.c.bf16 %v2578_v63, %v2576_v47  ;;  %v3776_v50 = vpack.c.bf16 %v2583_v3, %v2581_v56  ;;  %v3778_v8 = vpack.c.bf16 %v2582_v9, %v2580_v7  ;;  %v2899_v63 = vrot.slane %v2894_v44, %v4161_v58 }
 0x829   : > { %v2270_v18 = vadd.f32 0.2548296, %v2262_v12  ;;  %v2903_v56 = vrot.slane %v2894_v44, %v4158_v57 }
 0x82b   : > { %3747 = vmatpush1.bf16.msra.mxu0 %v3746_v0  ;;  %v2585_v0 = vld [vmem:[#allocation4 + $0x748] sm:$0xff]  ;;  %v2278_v13 = vmul.f32 %v5372_v24, %v2270_v18 }
 0x82c   : > { %3749 = vmatprep.subr.bf16.mxu0 %v3748_v1  ;;  %v2587_v1 = vld [vmem:[#allocation4 + $0x758] sm:$0xff] }
 0x82d   : > { %v3780_v14 = vpack.c.bf16 %v2587_v1, %v2585_v0  ;;  %v2318_v42 = vmul.f32 %v3891_v32, %v2278_v13 }
 0x82f   : > { %3751 = vmatpush1.bf16.msra.mxu0 %v3750_v15  ;;  %v2589_v15 = vld [vmem:[#allocation4 + $0x768] sm:$0xff]  ;;  %v2326_v24 = vsub.f32 1.0, %v2318_v42 }
 0x830   : > { %3753 = vmatprep.subr.bf16.mxu0 %v3752_v33  ;;  %v2591_v33 = vld [vmem:[#allocation4 + $0x778] sm:$0xff] }
 0x831   : > { %v3784_v19 = vpack.c.bf16 %v2591_v33, %v2589_v15  ;;  %v2334_v46 = vmul.f32 %v2326_v24, %v2166_v21 }
 0x833   : > { %3755 = vmatpush1.bf16.msra.mxu0 %v3754_v45  ;;  %v2590_v45 = vld [vmem:[#allocation4 + $0x770] sm:$0xff]  ;;  %v2342_v30 = vadd.f32 1.0, %v2334_v46 }
 0x834   : > { %3757 = vmatprep.subr.bf16.mxu0 %v3756_v34  ;;  %v2595_v34 = vld [vmem:[#allocation4 + $0x798] sm:$0xff]  ;;  %v3786_v20 = vpack.c.bf16 %v2590_v45, %v2588_v27 }
 0x835   : > { %v3788_v36 = vpack.c.bf16 %v2595_v34, %v2593_v43 }
 0x837   : > { %3759 = vmatpush1.bf16.msra.mxu0 %v3758_v37  ;;  %v2594_v37 = vld [vmem:[#allocation4 + $0x790] sm:$0xff] }
 0x838   : > { %3761 = vmatprep.subr.bf16.mxu0 %v3760_v29  ;;  %v2599_v29 = vld [vmem:[#allocation4 + $0x7b8] sm:$0xff]  ;;  %v3790_v41 = vpack.c.bf16 %v2594_v37, %v2592_v25 }
 0x839   : > { %v3792_v48 = vpack.c.bf16 %v2599_v29, %v2597_v26 }
 0x83b   : > { %3763 = vmatpush1.bf16.msra.mxu0 %v3762_v31  ;;  %v2596_v31 = vld [vmem:[#allocation4 + $0x7a0] sm:$0xff] }
 0x83c   : > { %3765 = vmatprep.subr.bf16.mxu0 %v3764_v51  ;;  %v2601_v51 = vld [vmem:[#allocation4 + $0x7c8] sm:$0xff]  ;;  %v3794_v39 = vpack.c.bf16 %v2598_v49, %v2596_v31 }
 0x83d   : > { %v3796_v53 = vpack.c.bf16 %v2603_v52, %v2601_v51 }
 0x83f   : > { %3767 = vmatpush1.bf16.msra.mxu0 %v3766_v23  ;;  %v2602_v23 = vld [vmem:[#allocation4 + $0x7d0] sm:$0xff] }
 0x840   : > { %3769 = vmatprep.subr.bf16.mxu0 %v3768_v55  ;;  %v2607_v55 = vld [vmem:[#allocation4 + $0x7f8] sm:$0xff]  ;;  %v3798_v60 = vpack.c.bf16 %v2602_v23, %v2600_v54 }
 0x841   : > { %v3800_v61 = vpack.c.bf16 %v2607_v55, %v2605_v28 }
 0x843   : > { %3771 = vmatpush1.bf16.msra.mxu0 %v3770_v38  ;;  %v2606_v38 = vld [vmem:[#allocation4 + $0x7f0] sm:$0xff] }
 0x844   : > { %3773 = vmatprep.subr.bf16.mxu0 %v3772_v2  ;;  %v3802_v59 = vpack.c.bf16 %v2606_v38, %v2604_v62  ;;  %v2142_v2 = vmul.f32 0.5, %v5355_v35 }
 0x846   : > { %v2350_v47 = vmul.f32 %v2342_v30, %v2142_v2 }
 0x847   : > { %3775 = vmatpush1.bf16.msra.mxu0 %v3774_v40 }
 0x848   : > { %3777 = vmatprep.subr.bf16.mxu0 %v3776_v50 }
 0x84b   : > { %3779 = vmatpush1.bf16.msra.mxu0 %v3778_v8 }
 0x84c   : > { %3781 = vmatprep.subr.bf16.mxu0 %v3780_v14 }
 0x84f   : > { %3783 = vmatpush1.bf16.msra.mxu0 %v3782_v16 }
 0x850   : > { %3785 = vmatprep.subr.bf16.mxu0 %v3784_v19 }
 0x853   : > { %3787 = vmatpush1.bf16.msra.mxu0 %v3786_v20 }
 0x854   : > { %3789 = vmatprep.subr.bf16.mxu0 %v3788_v36 }
 0x857   : > { %3791 = vmatpush1.bf16.msra.mxu0 %v3790_v41 }
 0x858   : > { %3793 = vmatprep.subr.bf16.mxu0 %v3792_v48 }
 0x85b   : > { %3795 = vmatpush1.bf16.msra.mxu0 %v3794_v39 }
 0x85c   : > { %3797 = vmatprep.subr.bf16.mxu0 %v3796_v53 }
 0x85f   : > { %3799 = vmatpush1.bf16.msra.mxu0 %v3798_v60 }
 0x860   : > { %3801 = vmatprep.subr.bf16.mxu0 %v3800_v61 }
 0x863   : > { %3803 = vmatpush1.bf16.msra.mxu0 %v3802_v59 }
 0x866   : > { %2886 = vmatmul.mubr.f32.vlgmr.msra.gmra.mrb[8].mxu0 %v2350_v47 }
 0x939   : > { %v2887_v17 = vpop.f32.mrb[8].mxu0 }
 0x93a   : > { %v2892_v3 = vadd.f32 %v2887_v17, %v4651_v4  ;;  %v2889_v40 = vpop.f32.mrb[9].mxu0 }
 0x93b   : > { %v2893_v35 = vadd.f32 %v2889_v40, %v4653_v5 }
 0x93c   : > { %v2906_v6 = vadd.f32 %v2899_v63, %v2892_v3 }
 0x93d   : > { %v2907_v50 = vadd.f32 %v2903_v56, %v2893_v35 }
 0x93e   : > { %2908 = vst [vmem:[%s470_s24] sm:$0x1f] %v2906_v6 }
 0x93f   : > { %2909 = vst [vmem:[%s470_s24 + $0x8] sm:$0x1f] %v2907_v50 }
 0x940 PF: > { %s25_s25 = sadd.s32 1, %s3964_s25  }
 0x941   : > { %p22_p5 = scmp.ge.s32.totalorder %s25_s25, 4  }
 0x943   :  { %24 = sbr.rel (!%p22_p5) target bundleno = 2 (0x2), region = 111 }
 0x94a   :  { %2931 = vsyncpa [#allocation3], 1 }
 0x94b   :  { %2933 = vsyncpa [#allocation3 + $0x1], 1 }
 0x94c   :  { %2934 = vsyncpa [#allocation5], 1 }

// kernel: attribute_transformer13_forward.7
= control target key start
LH: loop header
LB: loop body
LE: loop exit
PB: predicated region body
PF: predicated region fallthrough
CT: control target
= control target key end

     0   :  { %s3894_s25 = smov 0   ;;  %s6516_s0 = inlined_call_operand.vmem [shape: f32[2,5,256], index: 0, kind: input, shape index: {}]   ;;  %s6517_s1 = inlined_call_operand.vmem [shape: f32[1,256], index: 1, kind: input, shape index: {}]   ;;  %s6518_s2 = inlined_call_operand.vmem [shape: f32[1,256], index: 2, kind: input, shape index: {}]   ;;  %s6519_s3 = inlined_call_operand.vmem [shape: f32[256,768], index: 3, kind: input, shape index: {}]   ;;  %s6520_s4 = inlined_call_operand.vmem [shape: f32[1,768], index: 4, kind: input, shape index: {}]   ;;  %s6521_s5 = inlined_call_operand.vmem [shape: f32[256,256], index: 5, kind: input, shape index: {}]   ;;  %s6522_s6 = inlined_call_operand.vmem [shape: f32[1,256], index: 6, kind: input, shape index: {}]   ;;  %s6523_s7 = inlined_call_operand.vmem [shape: f32[1,256], index: 7, kind: input, shape index: {}]   ;;  %s6524_s8 = inlined_call_operand.vmem [shape: f32[1,256], index: 8, kind: input, shape index: {}]   ;;  %s6525_s9 = inlined_call_operand.vmem [shape: f32[256,1024], index: 9, kind: input, shape index: {}]   ;;  %s6526_s10 = inlined_call_operand.vmem [shape: f32[1,1024], index: 10, kind: input, shape index: {}]   ;;  %s6527_s11 = inlined_call_operand.vmem [shape: f32[1024,256], index: 11, kind: input, shape index: {}]   ;;  %s6528_s12 = inlined_call_operand.vmem [shape: f32[1,256], index: 12, kind: input, shape index: {}]   ;;  %s6529_s13 = inlined_call_operand.vmem [shape: f32[2,5,256], index: 13, kind: output, shape index: {}]  }
   0x1 LB: > { %s2935_s26 = sadd.s32 4294967295, %s3819_s25   ;;  %p2939_p0 = scmp.ge.s32.totalorder %s3819_s25, 1  ;;  %s3819_s25 = sphi %s3894_s25, %s23_s25  }
   0x2   : > { %p387_p1 = scmp.lt.s32.totalorder %s3819_s25, 3 }
   0x4   : > { %p388_p2 = pnand %p2939_p0, %p387_p1 }
   0x5   : > { %p431_p3 = scmp.lt.s32.totalorder (!%p388_p2), %s2935_s26, 1  ;;  %v497_v0 = vld [vmem:[%s6519_s3 + $0x8] sm:$0xff] (!%p388_p2)  ;;  %v503_v1 = vld [vmem:[%s6519_s3 + $0x38] sm:$0xff] (!%p388_p2)  ;;  %v496_v2 = vld [vmem:[%s6519_s3] sm:$0xff] (!%p388_p2)  ;;  %vm445_vm0 = vcmask (!%p388_p2), 1044480   ;;  %vm3822_vm1 = vmmov (!%p388_p2), 0  }
   0x6   : > { %391 = sbr.rel (%p388_p2) target bundleno = 2309 (0x905), region = 72  ;;  %v2980_v3 = vpack.c.bf16 (!%p388_p2), %v503_v1, %v497_v0  ;;  %v502_v4 = vld [vmem:[%s6519_s3 + $0x30] sm:$0xff] (!%p388_p2)  ;;  %v509_v5 = vld [vmem:[%s6519_s3 + $0x68] sm:$0xff] (!%p388_p2)  ;;  %v515_v6 = vld [vmem:[%s6519_s3 + $0x98] sm:$0xff] (!%p388_p2)  ;;  %vm1004_vm2 = vcmask (!%p388_p2), 36864   ;;  %vm1016_vm3 = vcmask (!%p388_p2), 39936  }
   0x7   : > { %v2982_v7 = vpack.c.bf16 (!%p388_p2), %v502_v4, %v496_v2  ;;  %v2984_v8 = vpack.c.bf16 (!%p388_p2), %v515_v6, %v509_v5  ;;  %v508_v9 = vld [vmem:[%s6519_s3 + $0x60] sm:$0xff] (!%p388_p2)  ;;  %v514_v10 = vld [vmem:[%s6519_s3 + $0x90] sm:$0xff] (!%p388_p2)  ;;  %v521_v11 = vld [vmem:[%s6519_s3 + $0xc8] sm:$0xff] (!%p388_p2) }
   0x8   : > { %2981 = vmatprep.subr.bf16.mxu1 (!%p388_p2), %v2980_v3  ;;  %v527_v12 = vld [vmem:[%s6519_s3 + $0xf8] sm:$0xff] (!%p388_p2)  ;;  %v2986_v13 = vpack.c.bf16 (!%p388_p2), %v514_v10, %v508_v9  ;;  %v520_v15 = vld [vmem:[%s6519_s3 + $0xc0] sm:$0xff] (!%p388_p2)  ;;  %v526_v16 = vld [vmem:[%s6519_s3 + $0xf0] sm:$0xff] (!%p388_p2) }
   0x9   : > { %2983 = vmatpush1.bf16.msra.mxu1 (!%p388_p2), %v2982_v7  ;;  %v2988_v14 = vpack.c.bf16 (!%p388_p2), %v527_v12, %v521_v11  ;;  %v533_v17 = vld [vmem:[%s6519_s3 + $0x128] sm:$0xff] (!%p388_p2)  ;;  %v539_v20 = vld [vmem:[%s6519_s3 + $0x158] sm:$0xff] (!%p388_p2)  ;;  %v2990_v26 = vpack.c.bf16 (!%p388_p2), %v526_v16, %v520_v15  ;;  %v532_v30 = vld [vmem:[%s6519_s3 + $0x120] sm:$0xff] (!%p388_p2) }
   0xa   : > { %2985 = vmatprep.subr.bf16.mxu1 (!%p388_p2), %v2984_v8  ;;  %v2992_v29 = vpack.c.bf16 (!%p388_p2), %v539_v20, %v533_v17  ;;  %v538_v31 = vld [vmem:[%s6519_s3 + $0x150] sm:$0xff] (!%p388_p2)  ;;  %v545_v33 = vld [vmem:[%s6519_s3 + $0x188] sm:$0xff] (!%p388_p2)  ;;  %v551_v34 = vld [vmem:[%s6519_s3 + $0x1b8] sm:$0xff] (!%p388_p2) }
   0xb   : > { %v2994_v35 = vpack.c.bf16 (!%p388_p2), %v538_v31, %v532_v30  ;;  %v2996_v36 = vpack.c.bf16 (!%p388_p2), %v551_v34, %v545_v33  ;;  %v544_v37 = vld [vmem:[%s6519_s3 + $0x180] sm:$0xff] (!%p388_p2)  ;;  %v550_v38 = vld [vmem:[%s6519_s3 + $0x1b0] sm:$0xff] (!%p388_p2)  ;;  %v557_v39 = vld [vmem:[%s6519_s3 + $0x1e8] sm:$0xff] (!%p388_p2) }
   0xc   : > { %v563_v40 = vld [vmem:[%s6519_s3 + $0x218] sm:$0xff] (!%p388_p2)  ;;  %v2998_v41 = vpack.c.bf16 (!%p388_p2), %v550_v38, %v544_v37  ;;  %v556_v43 = vld [vmem:[%s6519_s3 + $0x1e0] sm:$0xff] (!%p388_p2)  ;;  %v562_v44 = vld [vmem:[%s6519_s3 + $0x210] sm:$0xff] (!%p388_p2) }
   0xd   : > { %s6531_s26 = smov (!%p431_p3, %s2935_s26), 1  ;;  %2987 = vmatpush1.bf16.msra.mxu1 %v2986_v13  ;;  %v3000_v42 = vpack.c.bf16 %v563_v40, %v557_v39  ;;  %v569_v45 = vld [vmem:[%s6519_s3 + $0x248] sm:$0xff]  ;;  %v575_v46 = vld [vmem:[%s6519_s3 + $0x278] sm:$0xff]  ;;  %v3002_v47 = vpack.c.bf16 %v562_v44, %v556_v43  ;;  %v568_v49 = vld [vmem:[%s6519_s3 + $0x240] sm:$0xff] }
   0xe   : > { %s2950_s15 = sshll.u32 %s6531_s26, 4  ;;  %2989 = vmatprep.subr.bf16.mxu1 %v2988_v14  ;;  %v3004_v48 = vpack.c.bf16 %v575_v46, %v569_v45  ;;  %v574_v50 = vld [vmem:[%s6519_s3 + $0x270] sm:$0xff]  ;;  %v581_v51 = vld [vmem:[%s6519_s3 + $0x2a8] sm:$0xff]  ;;  %v587_v52 = vld [vmem:[%s6519_s3 + $0x2d8] sm:$0xff] }
   0xf   : > { %s3940_s18 = scalar_lea.vmem %s6516_s0, %s2950_s15  ;;  %v3006_v53 = vpack.c.bf16 %v574_v50, %v568_v49  ;;  %v3008_v54 = vpack.c.bf16 %v587_v52, %v581_v51  ;;  %v580_v55 = vld [vmem:[%s6519_s3 + $0x2a0] sm:$0xff]  ;;  %v586_v56 = vld [vmem:[%s6519_s3 + $0x2d0] sm:$0xff]  ;;  %v593_v57 = vld [vmem:[%s6519_s3 + $0x308] sm:$0xff] }
  0x10   : > { %v3952_v18 = vld [vmem:[%s3940_s18] sm:$0x1f]  ;;  %v3955_v19 = vld [vmem:[%s3940_s18 + $0x8] sm:$0x1f]  ;;  %v599_v58 = vld [vmem:[%s6519_s3 + $0x338] sm:$0xff]  ;;  %v3010_v59 = vpack.c.bf16 %v586_v56, %v580_v55 }
  0x11   : > { %v446_v21 = vsel %vm445_vm0, %v3952_v18, 0.0  ;;  %v447_v22 = vsel %vm445_vm0, %v3955_v19, 0.0  ;;  %v453_v23 = vmul.f32 %v3952_v18, %v3952_v18  ;;  %v454_v24 = vmul.f32 %v3955_v19, %v3955_v19  ;;  %2991 = vmatpush1.bf16.msra.mxu1 %v2990_v26  ;;  %v592_v61 = vld [vmem:[%s6519_s3 + $0x300] sm:$0xff]  ;;  %v598_v62 = vld [vmem:[%s6519_s3 + $0x330] sm:$0xff]  ;;  %v605_v63 = vld [vmem:[%s6519_s3 + $0x368] sm:$0xff] }
  0x12   : > { %v448_v25 = vadd.f32 %v447_v22, %v446_v21  ;;  %2993 = vmatprep.subr.bf16.mxu1 %v2992_v29  ;;  %v3012_v60 = vpack.c.bf16 %v599_v58, %v593_v57  ;;  %v611_v0 = vld [vmem:[%s6519_s3 + $0x398] sm:$0xff]  ;;  %v3014_v1 = vpack.c.bf16 %v598_v62, %v592_v61  ;;  %v604_v3 = vld [vmem:[%s6519_s3 + $0x360] sm:$0xff]  ;;  %v610_v4 = vld [vmem:[%s6519_s3 + $0x390] sm:$0xff] }
  0x13   : > { %v455_v27 = vsel %vm445_vm0, %v453_v23, 0.0  ;;  %v456_v28 = vsel %vm445_vm0, %v454_v24, 0.0  ;;  %v3016_v2 = vpack.c.bf16 %v611_v0, %v605_v63  ;;  %v617_v5 = vld [vmem:[%s6519_s3 + $0x3c8] sm:$0xff]  ;;  %v623_v6 = vld [vmem:[%s6519_s3 + $0x3f8] sm:$0xff]  ;;  %v3018_v7 = vpack.c.bf16 %v610_v4, %v604_v3  ;;  %v616_v9 = vld [vmem:[%s6519_s3 + $0x3c0] sm:$0xff] }
  0x14   : > { %449 = vadd.xlane.f32.xlu0 %v448_v25  ;;  %v457_v32 = vadd.f32 %v456_v28, %v455_v27  ;;  %v3020_v8 = vpack.c.bf16 %v623_v6, %v617_v5  ;;  %v622_v10 = vld [vmem:[%s6519_s3 + $0x3f0] sm:$0xff]  ;;  %v629_v11 = vld [vmem:[%s6519_s3 + $0x428] sm:$0xff]  ;;  %v635_v12 = vld [vmem:[%s6519_s3 + $0x458] sm:$0xff] }
  0x15   : > { %2995 = vmatpush1.bf16.msra.mxu1 %v2994_v35  ;;  %v3022_v13 = vpack.c.bf16 %v622_v10, %v616_v9  ;;  %v3024_v14 = vpack.c.bf16 %v635_v12, %v629_v11  ;;  %v628_v15 = vld [vmem:[%s6519_s3 + $0x420] sm:$0xff]  ;;  %v634_v16 = vld [vmem:[%s6519_s3 + $0x450] sm:$0xff]  ;;  %v641_v17 = vld [vmem:[%s6519_s3 + $0x488] sm:$0xff] }
  0x16   : > { %2997 = vmatprep.subr.bf16.mxu1 %v2996_v36  ;;  %v647_v20 = vld [vmem:[%s6519_s3 + $0x4b8] sm:$0xff]  ;;  %v3026_v21 = vpack.c.bf16 %v634_v16, %v628_v15  ;;  %v640_v23 = vld [vmem:[%s6519_s3 + $0x480] sm:$0xff]  ;;  %v646_v24 = vld [vmem:[%s6519_s3 + $0x4b0] sm:$0xff] }
  0x17   : > { %v3028_v22 = vpack.c.bf16 %v647_v20, %v641_v17  ;;  %v653_v25 = vld [vmem:[%s6519_s3 + $0x4e8] sm:$0xff]  ;;  %v659_v26 = vld [vmem:[%s6519_s3 + $0x518] sm:$0xff]  ;;  %v3030_v27 = vpack.c.bf16 %v646_v24, %v640_v23  ;;  %v652_v29 = vld [vmem:[%s6519_s3 + $0x4e0] sm:$0xff] }
  0x18   : > { %458 = vadd.xlane.f32.xlu0 %v457_v32  ;;  %v3032_v28 = vpack.c.bf16 %v659_v26, %v653_v25  ;;  %v658_v30 = vld [vmem:[%s6519_s3 + $0x510] sm:$0xff]  ;;  %v665_v31 = vld [vmem:[%s6519_s3 + $0x548] sm:$0xff]  ;;  %v671_v32 = vld [vmem:[%s6519_s3 + $0x578] sm:$0xff] }
  0x19   : > { %2999 = vmatpush1.bf16.msra.mxu1 %v2998_v41  ;;  %v3034_v33 = vpack.c.bf16 %v658_v30, %v652_v29  ;;  %v3036_v34 = vpack.c.bf16 %v671_v32, %v665_v31  ;;  %v664_v35 = vld [vmem:[%s6519_s3 + $0x540] sm:$0xff]  ;;  %v670_v36 = vld [vmem:[%s6519_s3 + $0x570] sm:$0xff]  ;;  %v677_v37 = vld [vmem:[%s6519_s3 + $0x5a8] sm:$0xff] }
  0x1a   : > { %3001 = vmatprep.subr.bf16.mxu1 %v3000_v42  ;;  %v683_v38 = vld [vmem:[%s6519_s3 + $0x5d8] sm:$0xff]  ;;  %v3038_v39 = vpack.c.bf16 %v670_v36, %v664_v35  ;;  %v676_v41 = vld [vmem:[%s6519_s3 + $0x5a0] sm:$0xff]  ;;  %v682_v42 = vld [vmem:[%s6519_s3 + $0x5d0] sm:$0xff] }
  0x1b   : > { %v3040_v40 = vpack.c.bf16 %v683_v38, %v677_v37  ;;  %v499_v43 = vld [vmem:[%s6519_s3 + $0x18] sm:$0xff]  ;;  %v505_v44 = vld [vmem:[%s6519_s3 + $0x48] sm:$0xff]  ;;  %v3042_v45 = vpack.c.bf16 %v682_v42, %v676_v41  ;;  %v498_v6 = vld [vmem:[%s6519_s3 + $0x10] sm:$0xff] }
  0x1c   : > { %v3044_v46 = vpack.c.bf16 %v505_v44, %v499_v43  ;;  %v517_v9 = vld [vmem:[%s6519_s3 + $0xa8] sm:$0xff]  ;;  %v516_v15 = vld [vmem:[%s6519_s3 + $0xa0] sm:$0xff]  ;;  %v523_v16 = vld [vmem:[%s6519_s3 + $0xd8] sm:$0xff] }
  0x1d   : > { %3003 = vmatpush1.bf16.msra.mxu1 %v3002_v47  ;;  %v529_v17 = vld [vmem:[%s6519_s3 + $0x108] sm:$0xff]  ;;  %v528_v23 = vld [vmem:[%s6519_s3 + $0x100] sm:$0xff]  ;;  %v535_v24 = vld [vmem:[%s6519_s3 + $0x138] sm:$0xff] }
  0x1e   : > { %3005 = vmatprep.subr.bf16.mxu1 %v3004_v48  ;;  %v541_v25 = vld [vmem:[%s6519_s3 + $0x168] sm:$0xff]  ;;  %v540_v29 = vld [vmem:[%s6519_s3 + $0x160] sm:$0xff]  ;;  %v547_v30 = vld [vmem:[%s6519_s3 + $0x198] sm:$0xff] }
  0x1f   : > { %v553_v31 = vld [vmem:[%s6519_s3 + $0x1c8] sm:$0xff]  ;;  %v552_v35 = vld [vmem:[%s6519_s3 + $0x1c0] sm:$0xff]  ;;  %v559_v36 = vld [vmem:[%s6519_s3 + $0x1f8] sm:$0xff] }
  0x20   : > { %v565_v37 = vld [vmem:[%s6519_s3 + $0x228] sm:$0xff]  ;;  %v564_v41 = vld [vmem:[%s6519_s3 + $0x220] sm:$0xff]  ;;  %v571_v42 = vld [vmem:[%s6519_s3 + $0x258] sm:$0xff] }
  0x21   : > { %3007 = vmatpush1.bf16.msra.mxu1 %v3006_v53  ;;  %v577_v43 = vld [vmem:[%s6519_s3 + $0x288] sm:$0xff] }
  0x22   : > { %3009 = vmatprep.subr.bf16.mxu1 %v3008_v54  ;;  %v471_v54 = vlaneseq }
  0x24   : > { %v4126_v56 = vshrl.u32 %v471_v54, 7  ;;  %v595_v54 = vld [vmem:[%s6519_s3 + $0x318] sm:$0xff] }
  0x25   : > { %3011 = vmatpush1.bf16.msra.mxu1 %v3010_v59  ;;  %v443_v59 = vld [vmem:[%s6517_s1] sm:$0x3] }
  0x26   : > { %3013 = vmatprep.subr.bf16.mxu1 %v3012_v60  ;;  %v4129_v57 = vsub.s32 1, %v4126_v56  ;;  %v4132_v58 = vsub.s32 0, %v4126_v56  ;;  %v444_v60 = vld [vmem:[%s6518_s2] sm:$0x3] }
  0x28   : > { %v478_v63 = vrot.slane %v443_v59, %v4129_v57  ;;  %v474_v0 = vrot.slane %v443_v59, %v4132_v58  ;;  %v491_v3 = vrot.slane %v444_v60, %v4129_v57  ;;  %v487_v5 = vrot.slane %v444_v60, %v4132_v58 }
  0x29   : > { %3015 = vmatpush1.bf16.msra.mxu1 %v3014_v1 }
  0x2a   : > { %3017 = vmatprep.subr.bf16.mxu1 %v3016_v2 }
  0x2d   : > { %3019 = vmatpush1.bf16.msra.mxu1 %v3018_v7 }
  0x2e   : > { %3021 = vmatprep.subr.bf16.mxu1 %v3020_v8  ;;  %v511_v8 = vld [vmem:[%s6519_s3 + $0x78] sm:$0xff] }
  0x31   : > { %3023 = vmatpush1.bf16.msra.mxu1 %v3022_v13  ;;  %v3048_v13 = vpack.c.bf16 %v517_v9, %v511_v8  ;;  %v624_v8 = vld [vmem:[%s6519_s3 + $0x400] sm:$0xff]  ;;  %v631_v9 = vld [vmem:[%s6519_s3 + $0x438] sm:$0xff] }
  0x32   : > { %3025 = vmatprep.subr.bf16.mxu1 %v3024_v14  ;;  %v510_v14 = vld [vmem:[%s6519_s3 + $0x70] sm:$0xff] }
  0x33   : > { %v3050_v20 = vpack.c.bf16 %v516_v15, %v510_v14  ;;  %v630_v15 = vld [vmem:[%s6519_s3 + $0x430] sm:$0xff] }
  0x35   : > { %3027 = vmatpush1.bf16.msra.mxu1 %v3026_v21  ;;  %v3052_v21 = vpack.c.bf16 %v529_v17, %v523_v16  ;;  %v636_v16 = vld [vmem:[%s6519_s3 + $0x460] sm:$0xff]  ;;  %v643_v17 = vld [vmem:[%s6519_s3 + $0x498] sm:$0xff] }
  0x36   : > { %3029 = vmatprep.subr.bf16.mxu1 %v3028_v22  ;;  %v522_v22 = vld [vmem:[%s6519_s3 + $0xd0] sm:$0xff] }
  0x37   : > { %v3054_v26 = vpack.c.bf16 %v528_v23, %v522_v22  ;;  %v642_v23 = vld [vmem:[%s6519_s3 + $0x490] sm:$0xff] }
  0x39   : > { %3031 = vmatpush1.bf16.msra.mxu1 %v3030_v27  ;;  %v3056_v27 = vpack.c.bf16 %v541_v25, %v535_v24  ;;  %v648_v24 = vld [vmem:[%s6519_s3 + $0x4c0] sm:$0xff]  ;;  %v655_v25 = vld [vmem:[%s6519_s3 + $0x4f8] sm:$0xff] }
  0x3a   : > { %3033 = vmatprep.subr.bf16.mxu1 %v3032_v28  ;;  %v534_v28 = vld [vmem:[%s6519_s3 + $0x130] sm:$0xff] }
  0x3b   : > { %v3058_v32 = vpack.c.bf16 %v540_v29, %v534_v28  ;;  %v654_v29 = vld [vmem:[%s6519_s3 + $0x4f0] sm:$0xff] }
  0x3d   : > { %3035 = vmatpush1.bf16.msra.mxu1 %v3034_v33  ;;  %v3060_v33 = vpack.c.bf16 %v553_v31, %v547_v30  ;;  %v660_v30 = vld [vmem:[%s6519_s3 + $0x520] sm:$0xff]  ;;  %v667_v31 = vld [vmem:[%s6519_s3 + $0x558] sm:$0xff] }
  0x3e   : > { %3037 = vmatprep.subr.bf16.mxu1 %v3036_v34  ;;  %v546_v34 = vld [vmem:[%s6519_s3 + $0x190] sm:$0xff] }
  0x3f   : > { %v3062_v38 = vpack.c.bf16 %v552_v35, %v546_v34  ;;  %v666_v35 = vld [vmem:[%s6519_s3 + $0x550] sm:$0xff] }
  0x41   : > { %3039 = vmatpush1.bf16.msra.mxu1 %v3038_v39  ;;  %v3064_v39 = vpack.c.bf16 %v565_v37, %v559_v36  ;;  %v672_v36 = vld [vmem:[%s6519_s3 + $0x580] sm:$0xff]  ;;  %v679_v37 = vld [vmem:[%s6519_s3 + $0x5b8] sm:$0xff] }
  0x42   : > { %3041 = vmatprep.subr.bf16.mxu1 %v3040_v40  ;;  %v558_v40 = vld [vmem:[%s6519_s3 + $0x1f0] sm:$0xff] }
  0x43   : > { %v3066_v44 = vpack.c.bf16 %v564_v41, %v558_v40  ;;  %v678_v41 = vld [vmem:[%s6519_s3 + $0x5b0] sm:$0xff] }
  0x45   : > { %3043 = vmatpush1.bf16.msra.mxu1 %v3042_v45  ;;  %v3068_v45 = vpack.c.bf16 %v577_v43, %v571_v42  ;;  %v684_v42 = vld [vmem:[%s6519_s3 + $0x5e0] sm:$0xff]  ;;  %v501_v43 = vld [vmem:[%s6519_s3 + $0x28] sm:$0xff] }
  0x46   : > { %3045 = vmatprep.subr.bf16.mxu1 %v3044_v46  ;;  %v570_v46 = vld [vmem:[%s6519_s3 + $0x250] sm:$0xff] }
  0xa1   : > { %v450_v47 = vpop.xlane.xlu0 %449 }
  0xa2   : > { %v452_v48 = vmul.f32 0.00390625, %v450_v47  ;;  %v576_v47 = vld [vmem:[%s6519_s3 + $0x280] sm:$0xff] }
  0xa4   : > { %v461_v50 = vmul.f32 %v452_v48, %v452_v48  ;;  %v464_v61 = vsub.f32 %v3952_v18, %v452_v48  ;;  %v465_v62 = vsub.f32 %v3955_v19, %v452_v48  ;;  %v504_v18 = vld [vmem:[%s6519_s3 + $0x40] sm:$0xff]  ;;  %v583_v48 = vld [vmem:[%s6519_s3 + $0x2b8] sm:$0xff] }
  0xa5   : > { %v459_v49 = vpop.xlane.xlu0 %458  ;;  %v3046_v12 = vpack.c.bf16 %v504_v18, %v498_v6  ;;  %v625_v6 = vld [vmem:[%s6519_s3 + $0x408] sm:$0xff] }
  0xa6   : > { %v460_v51 = vmul.f32 0.00390625, %v459_v49  ;;  %v589_v49 = vld [vmem:[%s6519_s3 + $0x2e8] sm:$0xff] }
  0xa8   : > { %v462_v52 = vsub.f32 %v460_v51, %v461_v50  ;;  %v3070_v50 = vpack.c.bf16 %v576_v47, %v570_v46  ;;  %v3072_v51 = vpack.c.bf16 %v589_v49, %v583_v48  ;;  %v500_v47 = vld [vmem:[%s6519_s3 + $0x20] sm:$0xff]  ;;  %v506_v48 = vld [vmem:[%s6519_s3 + $0x50] sm:$0xff]  ;;  %v513_v49 = vld [vmem:[%s6519_s3 + $0x88] sm:$0xff] }
  0xaa   : > { %v463_v53 = vmax.f32 %v462_v52, 0.0  ;;  %v582_v52 = vld [vmem:[%s6519_s3 + $0x2b0] sm:$0xff] }
  0xac   : > { %v466_v55 = vadd.f32 1e-06, %v463_v53  ;;  %v588_v53 = vld [vmem:[%s6519_s3 + $0x2e0] sm:$0xff] }
  0xad   : > { %v3074_v59 = vpack.c.bf16 %v588_v53, %v582_v52  ;;  %v512_v53 = vld [vmem:[%s6519_s3 + $0x80] sm:$0xff] }
  0xae   : > { %3767 = vrsqrt.f32 %v466_v55  ;;  %v601_v55 = vld [vmem:[%s6519_s3 + $0x348] sm:$0xff] }
  0xaf   : > { %v3076_v60 = vpack.c.bf16 %v601_v55, %v595_v54  ;;  %v518_v54 = vld [vmem:[%s6519_s3 + $0xb0] sm:$0xff]  ;;  %v525_v55 = vld [vmem:[%s6519_s3 + $0xe8] sm:$0xff] }
  0xb8   : > { %v3768_v1 = vpop.eup %3767 }
  0xb9   : > { %v469_v2 = vmul.f32 %v3768_v1, %v465_v62  ;;  %v468_v4 = vmul.f32 %v3768_v1, %v464_v61  ;;  %v594_v61 = vld [vmem:[%s6519_s3 + $0x310] sm:$0xff]  ;;  %v600_v62 = vld [vmem:[%s6519_s3 + $0x340] sm:$0xff] }
  0xba   : > { %v3078_v1 = vpack.c.bf16 %v600_v62, %v594_v61  ;;  %v524_v62 = vld [vmem:[%s6519_s3 + $0xe0] sm:$0xff] }
  0xbb   : > { %v482_v19 = vmul.f32 %v478_v63, %v469_v2  ;;  %v481_v7 = vmul.f32 %v474_v0, %v468_v4  ;;  %v607_v63 = vld [vmem:[%s6519_s3 + $0x378] sm:$0xff]  ;;  %v613_v0 = vld [vmem:[%s6519_s3 + $0x3a8] sm:$0xff]  ;;  %v612_v4 = vld [vmem:[%s6519_s3 + $0x3a0] sm:$0xff] }
  0xbc   : > { %v3080_v2 = vpack.c.bf16 %v613_v0, %v607_v63  ;;  %v530_v63 = vld [vmem:[%s6519_s3 + $0x110] sm:$0xff]  ;;  %v537_v0 = vld [vmem:[%s6519_s3 + $0x148] sm:$0xff] }
  0xbd   : > { %v4158_v10 = vadd.f32 %v491_v3, %v482_v19  ;;  %v4160_v11 = vadd.f32 %v487_v5, %v481_v7  ;;  %v606_v3 = vld [vmem:[%s6519_s3 + $0x370] sm:$0xff]  ;;  %v619_v5 = vld [vmem:[%s6519_s3 + $0x3d8] sm:$0xff] }
  0xbe   : > { %v3082_v18 = vpack.c.bf16 %v612_v4, %v606_v3  ;;  %v3084_v19 = vpack.c.bf16 %v625_v6, %v619_v5  ;;  %v618_v7 = vld [vmem:[%s6519_s3 + $0x3d0] sm:$0xff]  ;;  %v536_v3 = vld [vmem:[%s6519_s3 + $0x140] sm:$0xff]  ;;  %v549_v5 = vld [vmem:[%s6519_s3 + $0x1a8] sm:$0xff] }
  0xbf   : > { %784 = vmatprep.mubr.f32.mxu1 %v4158_v10  ;;  %v542_v4 = vld [vmem:[%s6519_s3 + $0x170] sm:$0xff]  ;;  %v555_v6 = vld [vmem:[%s6519_s3 + $0x1d8] sm:$0xff] }
  0xc0   : > { %785 = vmatmul.mubr.f32.vlgmr.msra.gmra.mrb[0].mxu1 %v4160_v11 }
  0xc1   : > { %3047 = vmatpush1.bf16.msra.mxu1 %v3046_v12  ;;  %855 = vmatprep.mubr.f32.mxu1 %v4158_v10  ;;  %v637_v12 = vld [vmem:[%s6519_s3 + $0x468] sm:$0xff] }
  0xc2   : > { %3049 = vmatprep.subr.bf16.mxu1 %v3048_v13  ;;  %v3086_v13 = vpack.c.bf16 %v624_v8, %v618_v7  ;;  %v3088_v14 = vpack.c.bf16 %v637_v12, %v631_v9  ;;  %v548_v7 = vld [vmem:[%s6519_s3 + $0x1a0] sm:$0xff]  ;;  %v554_v8 = vld [vmem:[%s6519_s3 + $0x1d0] sm:$0xff]  ;;  %v561_v9 = vld [vmem:[%s6519_s3 + $0x208] sm:$0xff] }
  0xc3   : > { %v567_v12 = vld [vmem:[%s6519_s3 + $0x238] sm:$0xff] }
  0xc5   : > { %3051 = vmatpush1.bf16.msra.mxu1 %v3050_v20  ;;  %v649_v20 = vld [vmem:[%s6519_s3 + $0x4c8] sm:$0xff] }
  0xc6   : > { %3053 = vmatprep.subr.bf16.mxu1 %v3052_v21  ;;  %v3090_v21 = vpack.c.bf16 %v636_v16, %v630_v15  ;;  %v3092_v22 = vpack.c.bf16 %v649_v20, %v643_v17  ;;  %v560_v15 = vld [vmem:[%s6519_s3 + $0x200] sm:$0xff]  ;;  %v566_v16 = vld [vmem:[%s6519_s3 + $0x230] sm:$0xff]  ;;  %v573_v17 = vld [vmem:[%s6519_s3 + $0x268] sm:$0xff] }
  0xc7   : > { %v579_v20 = vld [vmem:[%s6519_s3 + $0x298] sm:$0xff] }
  0xc9   : > { %3055 = vmatpush1.bf16.msra.mxu1 %v3054_v26  ;;  %v661_v26 = vld [vmem:[%s6519_s3 + $0x528] sm:$0xff] }
  0xca   : > { %3057 = vmatprep.subr.bf16.mxu1 %v3056_v27  ;;  %v3094_v27 = vpack.c.bf16 %v648_v24, %v642_v23  ;;  %v3096_v28 = vpack.c.bf16 %v661_v26, %v655_v25  ;;  %v572_v23 = vld [vmem:[%s6519_s3 + $0x260] sm:$0xff]  ;;  %v578_v24 = vld [vmem:[%s6519_s3 + $0x290] sm:$0xff]  ;;  %v585_v25 = vld [vmem:[%s6519_s3 + $0x2c8] sm:$0xff] }
  0xcb   : > { %v591_v26 = vld [vmem:[%s6519_s3 + $0x2f8] sm:$0xff] }
  0xcd   : > { %3059 = vmatpush1.bf16.msra.mxu1 %v3058_v32  ;;  %v673_v32 = vld [vmem:[%s6519_s3 + $0x588] sm:$0xff] }
  0xce   : > { %3061 = vmatprep.subr.bf16.mxu1 %v3060_v33  ;;  %v3098_v33 = vpack.c.bf16 %v660_v30, %v654_v29  ;;  %v3100_v34 = vpack.c.bf16 %v673_v32, %v667_v31  ;;  %v584_v29 = vld [vmem:[%s6519_s3 + $0x2c0] sm:$0xff]  ;;  %v590_v30 = vld [vmem:[%s6519_s3 + $0x2f0] sm:$0xff]  ;;  %v597_v31 = vld [vmem:[%s6519_s3 + $0x328] sm:$0xff] }
  0xcf   : > { %v603_v32 = vld [vmem:[%s6519_s3 + $0x358] sm:$0xff] }
  0xd1   : > { %3063 = vmatpush1.bf16.msra.mxu1 %v3062_v38  ;;  %v685_v38 = vld [vmem:[%s6519_s3 + $0x5e8] sm:$0xff] }
  0xd2   : > { %3065 = vmatprep.subr.bf16.mxu1 %v3064_v39  ;;  %v3102_v39 = vpack.c.bf16 %v672_v36, %v666_v35  ;;  %v3104_v40 = vpack.c.bf16 %v685_v38, %v679_v37  ;;  %v596_v35 = vld [vmem:[%s6519_s3 + $0x320] sm:$0xff]  ;;  %v602_v36 = vld [vmem:[%s6519_s3 + $0x350] sm:$0xff]  ;;  %v609_v37 = vld [vmem:[%s6519_s3 + $0x388] sm:$0xff] }
  0xd3   : > { %v615_v38 = vld [vmem:[%s6519_s3 + $0x3b8] sm:$0xff] }
  0xd5   : > { %3067 = vmatpush1.bf16.msra.mxu1 %v3066_v44  ;;  %v507_v44 = vld [vmem:[%s6519_s3 + $0x58] sm:$0xff] }
  0xd6   : > { %3069 = vmatprep.subr.bf16.mxu1 %v3068_v45  ;;  %v3106_v45 = vpack.c.bf16 %v684_v42, %v678_v41  ;;  %v3108_v46 = vpack.c.bf16 %v507_v44, %v501_v43  ;;  %v608_v41 = vld [vmem:[%s6519_s3 + $0x380] sm:$0xff]  ;;  %v614_v42 = vld [vmem:[%s6519_s3 + $0x3b0] sm:$0xff]  ;;  %v621_v43 = vld [vmem:[%s6519_s3 + $0x3e8] sm:$0xff] }
  0xd7   : > { %v627_v44 = vld [vmem:[%s6519_s3 + $0x418] sm:$0xff] }
  0xd9   : > { %3071 = vmatpush1.bf16.msra.mxu1 %v3070_v50  ;;  %v519_v50 = vld [vmem:[%s6519_s3 + $0xb8] sm:$0xff] }
  0xda   : > { %3073 = vmatprep.subr.bf16.mxu1 %v3072_v51  ;;  %v3110_v51 = vpack.c.bf16 %v506_v48, %v500_v47  ;;  %v3112_v52 = vpack.c.bf16 %v519_v50, %v513_v49  ;;  %v620_v47 = vld [vmem:[%s6519_s3 + $0x3e0] sm:$0xff]  ;;  %v626_v48 = vld [vmem:[%s6519_s3 + $0x410] sm:$0xff]  ;;  %v633_v49 = vld [vmem:[%s6519_s3 + $0x448] sm:$0xff] }
  0xdb   : > { %v639_v50 = vld [vmem:[%s6519_s3 + $0x478] sm:$0xff] }
  0xdd   : > { %3075 = vmatpush1.bf16.msra.mxu1 %v3074_v59  ;;  %v531_v59 = vld [vmem:[%s6519_s3 + $0x118] sm:$0xff] }
  0xde   : > { %3077 = vmatprep.subr.bf16.mxu1 %v3076_v60  ;;  %v3114_v60 = vpack.c.bf16 %v518_v54, %v512_v53  ;;  %v3116_v61 = vpack.c.bf16 %v531_v59, %v525_v55  ;;  %v632_v53 = vld [vmem:[%s6519_s3 + $0x440] sm:$0xff]  ;;  %v638_v54 = vld [vmem:[%s6519_s3 + $0x470] sm:$0xff]  ;;  %v645_v55 = vld [vmem:[%s6519_s3 + $0x4a8] sm:$0xff] }
  0xdf   : > { %v651_v59 = vld [vmem:[%s6519_s3 + $0x4d8] sm:$0xff] }
  0xe1   : > { %3079 = vmatpush1.bf16.msra.mxu1 %v3078_v1  ;;  %v543_v1 = vld [vmem:[%s6519_s3 + $0x178] sm:$0xff] }
  0xe2   : > { %3081 = vmatprep.subr.bf16.mxu1 %v3080_v2  ;;  %v3120_v2 = vpack.c.bf16 %v543_v1, %v537_v0  ;;  %v657_v0 = vld [vmem:[%s6519_s3 + $0x508] sm:$0xff]  ;;  %v663_v1 = vld [vmem:[%s6519_s3 + $0x538] sm:$0xff] }
  0xe5   : > { %3083 = vmatpush1.bf16.msra.mxu1 %v3082_v18  ;;  %v3122_v18 = vpack.c.bf16 %v542_v4, %v536_v3  ;;  %v656_v3 = vld [vmem:[%s6519_s3 + $0x500] sm:$0xff]  ;;  %v662_v4 = vld [vmem:[%s6519_s3 + $0x530] sm:$0xff] }
  0xe6   : > { %3085 = vmatprep.subr.bf16.mxu1 %v3084_v19  ;;  %v3124_v19 = vpack.c.bf16 %v555_v6, %v549_v5  ;;  %v669_v5 = vld [vmem:[%s6519_s3 + $0x568] sm:$0xff]  ;;  %v675_v6 = vld [vmem:[%s6519_s3 + $0x598] sm:$0xff] }
  0xe9   : > { %3087 = vmatpush1.bf16.msra.mxu1 %v3086_v13  ;;  %v3126_v13 = vpack.c.bf16 %v554_v8, %v548_v7  ;;  %v668_v7 = vld [vmem:[%s6519_s3 + $0x560] sm:$0xff]  ;;  %v674_v8 = vld [vmem:[%s6519_s3 + $0x590] sm:$0xff] }
  0xea   : > { %3089 = vmatprep.subr.bf16.mxu1 %v3088_v14  ;;  %v3128_v14 = vpack.c.bf16 %v567_v12, %v561_v9  ;;  %v681_v9 = vld [vmem:[%s6519_s3 + $0x5c8] sm:$0xff]  ;;  %v687_v12 = vld [vmem:[%s6519_s3 + $0x5f8] sm:$0xff] }
  0xed   : > { %3091 = vmatpush1.bf16.msra.mxu1 %v3090_v21  ;;  %v3130_v21 = vpack.c.bf16 %v566_v16, %v560_v15  ;;  %v680_v15 = vld [vmem:[%s6519_s3 + $0x5c0] sm:$0xff]  ;;  %v686_v16 = vld [vmem:[%s6519_s3 + $0x5f0] sm:$0xff] }
  0xee   : > { %3093 = vmatprep.subr.bf16.mxu1 %v3092_v22  ;;  %v3132_v22 = vpack.c.bf16 %v579_v20, %v573_v17  ;;  %v3170_v17 = vpack.c.bf16 %v686_v16, %v680_v15  ;;  %v3821_v20 = vmov 0.0   ;;  %v1294_v15 = vld [vmem:[%s6521_s5 + $0x158] sm:$0xff] }
  0xef   : > { %2960 = vmatprep.subr.mxu0 %v3821_v20  ;;  %2962 = vmatprep.mubr.msk.f32.mxu0 %vm3822_vm1, %v3821_v20 }
  0xf1   : > { %3095 = vmatpush1.bf16.msra.mxu1 %v3094_v27  ;;  %v3134_v27 = vpack.c.bf16 %v578_v24, %v572_v23  ;;  %v700_v23 = vsub.s32 2, %v4126_v56  ;;  %v704_v24 = vsub.s32 3, %v4126_v56 }
  0xf2   : > { %3097 = vmatprep.subr.bf16.mxu1 %v3096_v28  ;;  %v3136_v28 = vpack.c.bf16 %v591_v26, %v585_v25 }
  0xf5   : > { %3099 = vmatpush1.bf16.msra.mxu1 %v3098_v33  ;;  %v3138_v33 = vpack.c.bf16 %v590_v30, %v584_v29 }
  0xf6   : > { %3101 = vmatprep.subr.bf16.mxu1 %v3100_v34  ;;  %v3140_v34 = vpack.c.bf16 %v603_v32, %v597_v31 }
  0xf9   : > { %3103 = vmatpush1.bf16.msra.mxu1 %v3102_v39  ;;  %v3142_v39 = vpack.c.bf16 %v602_v36, %v596_v35  ;;  %v708_v35 = vsub.s32 4, %v4126_v56  ;;  %v712_v36 = vsub.s32 5, %v4126_v56 }
  0xfa   : > { %3105 = vmatprep.subr.bf16.mxu1 %v3104_v40  ;;  %v3144_v40 = vpack.c.bf16 %v615_v38, %v609_v37 }
  0xfd   : > { %3107 = vmatpush1.bf16.msra.mxu1 %v3106_v45  ;;  %v3146_v45 = vpack.c.bf16 %v614_v42, %v608_v41 }
  0xfe   : > { %3109 = vmatprep.subr.bf16.mxu1 %v3108_v46  ;;  %v3148_v46 = vpack.c.bf16 %v627_v44, %v621_v43 }
 0x100   : > { %856 = vmatmul.mubr.f32.vlgmr.msra.gmra.mrb[2].mxu1 %v4160_v11 }
 0x101   : > { %3111 = vmatpush1.bf16.msra.mxu1 %v3110_v51  ;;  %926 = vmatprep.mubr.f32.mxu1 %v4158_v10  ;;  %v3118_v10 = vpack.c.bf16 %v530_v63, %v524_v62  ;;  %v3150_v51 = vpack.c.bf16 %v626_v48, %v620_v47  ;;  %v644_v62 = vld [vmem:[%s6519_s3 + $0x4a0] sm:$0xff]  ;;  %v650_v63 = vld [vmem:[%s6519_s3 + $0x4d0] sm:$0xff] }
 0x102   : > { %3113 = vmatprep.subr.bf16.mxu1 %v3112_v52  ;;  %v3152_v52 = vpack.c.bf16 %v639_v50, %v633_v49 }
 0x105   : > { %3115 = vmatpush1.bf16.msra.mxu1 %v3114_v60  ;;  %v3154_v60 = vpack.c.bf16 %v638_v54, %v632_v53 }
 0x106   : > { %3117 = vmatprep.subr.bf16.mxu1 %v3116_v61  ;;  %v3156_v61 = vpack.c.bf16 %v651_v59, %v645_v55 }
 0x109   : > { %3119 = vmatpush1.bf16.msra.mxu1 %v3118_v10  ;;  %v3158_v10 = vpack.c.bf16 %v650_v63, %v644_v62 }
 0x10a   : > { %3121 = vmatprep.subr.bf16.mxu1 %v3120_v2  ;;  %v3160_v2 = vpack.c.bf16 %v663_v1, %v657_v0  ;;  %v1284_v0 = vld [vmem:[%s6521_s5 + $0x108] sm:$0xff]  ;;  %v1286_v1 = vld [vmem:[%s6521_s5 + $0x118] sm:$0xff] }
 0x10d   : > { %3123 = vmatpush1.bf16.msra.mxu1 %v3122_v18  ;;  %v3162_v18 = vpack.c.bf16 %v662_v4, %v656_v3  ;;  %v1283_v4 = vld [vmem:[%s6521_s5 + $0x100] sm:$0xff] }
 0x10e   : > { %3125 = vmatprep.subr.bf16.mxu1 %v3124_v19  ;;  %v3164_v19 = vpack.c.bf16 %v675_v6, %v669_v5  ;;  %v1285_v5 = vld [vmem:[%s6521_s5 + $0x110] sm:$0xff]  ;;  %v1288_v6 = vld [vmem:[%s6521_s5 + $0x128] sm:$0xff] }
 0x111   : > { %3127 = vmatpush1.bf16.msra.mxu1 %v3126_v13  ;;  %v3166_v13 = vpack.c.bf16 %v674_v8, %v668_v7  ;;  %v3174_v7 = vpack.c.bf16 %v1285_v5, %v1283_v4 }
 0x112   : > { %3129 = vmatprep.subr.bf16.mxu1 %v3128_v14  ;;  %v3168_v14 = vpack.c.bf16 %v687_v12, %v681_v9  ;;  %v1287_v12 = vld [vmem:[%s6521_s5 + $0x120] sm:$0xff] }
 0x115   : > { %3131 = vmatpush1.bf16.msra.mxu1 %v3130_v21 }
 0x116   : > { %3133 = vmatprep.subr.bf16.mxu1 %v3132_v22 }
 0x119   : > { %3135 = vmatpush1.bf16.msra.mxu1 %v3134_v27 }
 0x11a   : > { %3137 = vmatprep.subr.bf16.mxu1 %v3136_v28 }
 0x11d   : > { %3139 = vmatpush1.bf16.msra.mxu1 %v3138_v33 }
 0x11e   : > { %3141 = vmatprep.subr.bf16.mxu1 %v3140_v34 }
 0x121   : > { %3143 = vmatpush1.bf16.msra.mxu1 %v3142_v39 }
 0x122   : > { %3145 = vmatprep.subr.bf16.mxu1 %v3144_v40 }
 0x125   : > { %3147 = vmatpush1.bf16.msra.mxu1 %v3146_v45 }
 0x126   : > { %3149 = vmatprep.subr.bf16.mxu1 %v3148_v46 }
 0x129   : > { %3151 = vmatpush1.bf16.msra.mxu1 %v3150_v51 }
 0x12a   : > { %3153 = vmatprep.subr.bf16.mxu1 %v3152_v52 }
 0x12d   : > { %3155 = vmatpush1.bf16.msra.mxu1 %v3154_v60 }
 0x12e   : > { %3157 = vmatprep.subr.bf16.mxu1 %v3156_v61 }
 0x131   : > { %3159 = vmatpush1.bf16.msra.mxu1 %v3158_v10  ;;  %v3172_v10 = vpack.c.bf16 %v1286_v1, %v1284_v0  ;;  %v1093_v1 = vld [vmem:[%s6521_s5] sm:$0xff] }
 0x132   : > { %3161 = vmatprep.subr.bf16.mxu1 %v3160_v2 }
 0x135   : > { %3163 = vmatpush1.bf16.msra.mxu1 %v3162_v18  ;;  %v1290_v18 = vld [vmem:[%s6521_s5 + $0x138] sm:$0xff] }
 0x136   : > { %3165 = vmatprep.subr.bf16.mxu1 %v3164_v19  ;;  %v3176_v9 = vpack.c.bf16 %v1290_v18, %v1288_v6  ;;  %v1097_v6 = vld [vmem:[%s6521_s5 + $0x20] sm:$0xff]  ;;  %v1099_v18 = vld [vmem:[%s6521_s5 + $0x30] sm:$0xff] }
 0x139   : > { %3167 = vmatpush1.bf16.msra.mxu1 %v3166_v13  ;;  %v1289_v13 = vld [vmem:[%s6521_s5 + $0x130] sm:$0xff] }
 0x13a   : > { %3169 = vmatprep.subr.bf16.mxu1 %v3168_v14  ;;  %v1292_v14 = vld [vmem:[%s6521_s5 + $0x148] sm:$0xff] }
 0x13d   : > { %3171 = vmatpush1.bf16.msra.mxu1 %v3170_v17  ;;  %v3178_v17 = vpack.c.bf16 %v1289_v13, %v1287_v12  ;;  %v3210_v12 = vpack.c.bf16 %v1099_v18, %v1097_v6  ;;  %v1543_v6 = vld [vmem:[%s6525_s9 + $0x98] sm:$0xff] }
 0x13e   : > { %2970 = vmatprep.subr.mxu1 %v3821_v20  ;;  %v1551_v18 = vld [vmem:[%s6525_s9 + $0xd8] sm:$0xff] }
 0x140   : > { %927 = vmatmul.mubr.f32.vlgmr.msra.gmra.mrb[4].mxu1 %v4160_v11  ;;  %v688_v11 = vld [vmem:[%s6520_s4] sm:$0x3f] }
 0x141   : > { %2972 = vmatprep.mubr.msk.f32.mxu1 %vm3822_vm1, %v3821_v20  ;;  %v701_v25 = vrot.slane %v688_v11, %v700_v23  ;;  %v705_v26 = vrot.slane %v688_v11, %v704_v24  ;;  %v693_v27 = vrot.slane %v688_v11, %v4132_v58  ;;  %v697_v29 = vrot.slane %v688_v11, %v4129_v57 }
 0x142   : > { %v709_v37 = vrot.slane %v688_v11, %v708_v35  ;;  %v713_v38 = vrot.slane %v688_v11, %v712_v36  ;;  %v1291_v11 = vld [vmem:[%s6521_s5 + $0x140] sm:$0xff] }
 0x193   : > { %v786_v21 = vpop.f32.mrb[0].mxu1 }
 0x194   : > { %v788_v22 = vpop.f32.mrb[1].mxu1  ;;  %v787_v33 = vadd.f32 %v786_v21, %v693_v27  ;;  %v1298_v27 = vld [vmem:[%s6521_s5 + $0x178] sm:$0xff] }
 0x195   : > { %v789_v34 = vadd.f32 %v788_v22, %v697_v29  ;;  %v3180_v22 = vpack.c.bf16 %v1294_v15, %v1292_v14  ;;  %v1101_v14 = vld [vmem:[%s6521_s5 + $0x40] sm:$0xff]  ;;  %v1103_v15 = vld [vmem:[%s6521_s5 + $0x50] sm:$0xff] }
 0x1d3   : > { %v857_v28 = vpop.f32.mrb[2].mxu1 }
 0x1d4   : > { %v858_v30 = vadd.f32 %v857_v28, %v701_v25  ;;  %v859_v31 = vpop.f32.mrb[3].mxu1  ;;  %v1293_v25 = vld [vmem:[%s6521_s5 + $0x150] sm:$0xff] }
 0x1d5   : > { %v860_v32 = vadd.f32 %v859_v31, %v705_v26  ;;  %v1296_v26 = vld [vmem:[%s6521_s5 + $0x168] sm:$0xff]  ;;  %v3182_v28 = vpack.c.bf16 %v1293_v25, %v1291_v11  ;;  %v1297_v31 = vld [vmem:[%s6521_s5 + $0x170] sm:$0xff]  ;;  %v1105_v25 = vld [vmem:[%s6521_s5 + $0x60] sm:$0xff] }
 0x1d6   : > { %2961 = vmatpush3.xpose.msra.mxu0 %v858_v30  ;;  %v3184_v29 = vpack.c.bf16 %v1298_v27, %v1296_v26  ;;  %v1295_v30 = vld [vmem:[%s6521_s5 + $0x160] sm:$0xff]  ;;  %v1107_v26 = vld [vmem:[%s6521_s5 + $0x70] sm:$0xff]  ;;  %v1110_v27 = vld [vmem:[%s6521_s5 + $0x88] sm:$0xff] }
 0x1d7   : > { %2971 = vmatpush3.xpose.msra.mxu1 %v860_v32  ;;  %2965 = vmatprep.subr.mxu0 %v3821_v20  ;;  %v1300_v32 = vld [vmem:[%s6521_s5 + $0x188] sm:$0xff] }
 0x1d8   : > { %2975 = vmatprep.subr.mxu1 %v3821_v20 }
 0x1d9   : > { %2963 = vmatmul.mubr.f32.vlgmr.msra.gmra.mrb[0].mxu0 %v787_v33  ;;  %v1302_v33 = vld [vmem:[%s6521_s5 + $0x198] sm:$0xff] }
 0x1da   : > { %2973 = vmatmul.mubr.f32.vlgmr.msra.gmra.mrb[6].mxu1 %v789_v34  ;;  %2967 = vmatprep.mubr.msk.f32.mxu0 %vm3822_vm1, %v3821_v20  ;;  %v3186_v34 = vpack.c.bf16 %v1297_v31, %v1295_v30  ;;  %v1109_v31 = vld [vmem:[%s6521_s5 + $0x80] sm:$0xff] }
 0x1db   : > { %2977 = vmatprep.mubr.msk.f32.mxu1 %vm3822_vm1, %v3821_v20 }
 0x213   : > { %v928_v39 = vpop.f32.mrb[4].mxu1 }
 0x214   : > { %v929_v40 = vadd.f32 %v928_v39, %v709_v37  ;;  %v930_v41 = vpop.f32.mrb[5].mxu1  ;;  %v3188_v37 = vpack.c.bf16 %v1302_v33, %v1300_v32  ;;  %v1301_v39 = vld [vmem:[%s6521_s5 + $0x190] sm:$0xff]  ;;  %v1114_v33 = vld [vmem:[%s6521_s5 + $0xa8] sm:$0xff] }
 0x215   : > { %v931_v42 = vadd.f32 %v930_v41, %v713_v38  ;;  %v1299_v38 = vld [vmem:[%s6521_s5 + $0x180] sm:$0xff]  ;;  %v1306_v41 = vld [vmem:[%s6521_s5 + $0x1b8] sm:$0xff]  ;;  %v1111_v32 = vld [vmem:[%s6521_s5 + $0x90] sm:$0xff] }
 0x216   : > { %2966 = vmatpush3.msk.msra.mxu0 %vm445_vm0, %v929_v40  ;;  %v1304_v40 = vld [vmem:[%s6521_s5 + $0x1a8] sm:$0xff] }
 0x217   : > { %2976 = vmatpush3.msk.msra.mxu1 %vm445_vm0, %v931_v42  ;;  %v3190_v42 = vpack.c.bf16 %v1301_v39, %v1299_v38  ;;  %v1113_v39 = vld [vmem:[%s6521_s5 + $0xa0] sm:$0xff] }
 0x218   : > { %3173 = vmatprep.subr.bf16.mxu1 %v3172_v10  ;;  %v1095_v10 = vld [vmem:[%s6521_s5 + $0x10] sm:$0xff] }
 0x219   : > { %v3206_v4 = vpack.c.bf16 %v1095_v10, %v1093_v1  ;;  %v1526_v10 = vld [vmem:[%s6525_s9 + $0x10] sm:$0xff] }
 0x2ac   : > { %v999_v43 = vpop.f32.mrb[0].mxu0 }
 0x2ad   : > { %v2964_v44 = vpop.f32.mrb[1].mxu0  ;;  %v1191_v45 = vpop.f32.mrb[6].mxu1  ;;  %v1003_v48 = vmul.f32 0.088388346, %v999_v43  ;;  %v3192_v43 = vpack.c.bf16 %v1306_v41, %v1304_v40  ;;  %v1115_v40 = vld [vmem:[%s6521_s5 + $0xb0] sm:$0xff]  ;;  %v1118_v41 = vld [vmem:[%s6521_s5 + $0xc8] sm:$0xff] }
 0x2ae   : > { %v1195_v46 = vmul.f32 0.088388346, %v1191_v45  ;;  %v2974_v47 = vpop.f32.mrb[7].mxu1  ;;  %v1303_v44 = vld [vmem:[%s6521_s5 + $0x1a0] sm:$0xff]  ;;  %v1305_v45 = vld [vmem:[%s6521_s5 + $0x1b0] sm:$0xff] }
 0x2af   : > { %v1005_v50 = vsel %vm1004_vm2, %v1003_v48, -inf  ;;  %v1310_v47 = vld [vmem:[%s6521_s5 + $0x1d8] sm:$0xff] }
 0x2b0   : > { %v1196_v49 = vsel %vm1004_vm2, %v1195_v46, -inf }
 0x2b1   : > { %1197 = vmax.xlane.f32.xlu1 %v1196_v49 }
 0x2b5   : > { %1006 = vmax.xlane.f32.xlu1 %v1005_v50  ;;  %v1307_v50 = vld [vmem:[%s6521_s5 + $0x1c0] sm:$0xff] }
 0x33e   : > { %v1198_v51 = vpop.xlane.xlu1 %1197 }
 0x33f   : > { %v1199_v52 = vsub.f32 %v1195_v46, %v1198_v51  ;;  %v1308_v46 = vld [vmem:[%s6521_s5 + $0x1c8] sm:$0xff]  ;;  %v1309_v51 = vld [vmem:[%s6521_s5 + $0x1d0] sm:$0xff] }
 0x340   : > { %v3196_v49 = vpack.c.bf16 %v1310_v47, %v1308_v46  ;;  %v1119_v46 = vld [vmem:[%s6521_s5 + $0xd0] sm:$0xff]  ;;  %v1122_v47 = vld [vmem:[%s6521_s5 + $0xe8] sm:$0xff] }
 0x341   : > { %v1200_v53 = vmul.f32 1.442695, %v1199_v52  ;;  %v1312_v52 = vld [vmem:[%s6521_s5 + $0x1e8] sm:$0xff] }
 0x342   : > { %v1007_v54 = vpop.xlane.xlu1 %1006 }
 0x343   : > { %3769 = vpow2.f32 %v1200_v53  ;;  %v1008_v55 = vsub.f32 %v1003_v48, %v1007_v54  ;;  %v3194_v48 = vpack.c.bf16 %v1305_v45, %v1303_v44  ;;  %v1314_v53 = vld [vmem:[%s6521_s5 + $0x1f8] sm:$0xff]  ;;  %v3198_v54 = vpack.c.bf16 %v1309_v51, %v1307_v50  ;;  %v1117_v45 = vld [vmem:[%s6521_s5 + $0xc0] sm:$0xff] }
 0x344   : > { %v1121_v51 = vld [vmem:[%s6521_s5 + $0xe0] sm:$0xff] }
 0x345   : > { %v1009_v59 = vmul.f32 1.442695, %v1008_v55  ;;  %v3200_v55 = vpack.c.bf16 %v1314_v53, %v1312_v52  ;;  %v1123_v52 = vld [vmem:[%s6521_s5 + $0xf0] sm:$0xff] }
 0x346   : > { %v3234_v53 = vpack.c.bf16 %v1123_v52, %v1121_v51  ;;  %v1596_v51 = vld [vmem:[%s6525_s9 + $0x240] sm:$0xff]  ;;  %v1590_v52 = vld [vmem:[%s6525_s9 + $0x210] sm:$0xff] }
 0x347   : > { %3771 = vpow2.f32 %v1009_v59  ;;  %v1311_v59 = vld [vmem:[%s6521_s5 + $0x1e0] sm:$0xff] }
 0x34d   : > { %v3770_v60 = vpop.eup %3769 }
 0x34e   : > { %v1202_v61 = vsel %vm1004_vm2, %v3770_v60, 0.0 }
 0x34f   : > { %1203 = vadd.xlane.f32.xlu0 %v1202_v61 }
 0x351   : > { %v3772_v62 = vpop.eup %3771 }
 0x352   : > { %v1011_v63 = vsel %vm1004_vm2, %v3772_v62, 0.0 }
 0x353   : > { %1012 = vadd.xlane.f32.xlu1 %v1011_v63  ;;  %v1096_v63 = vld [vmem:[%s6521_s5 + $0x18] sm:$0xff] }
 0x3dc   : > { %v1204_v2 = vpop.xlane.xlu0 %1203 }
 0x3dd   : > { %3773 = vrcp.f32 %v1204_v2  ;;  %v1098_v2 = vld [vmem:[%s6521_s5 + $0x28] sm:$0xff] }
 0x3e0   : > { %v1013_v3 = vpop.xlane.xlu1 %1012 }
 0x3e1   : > { %3775 = vrcp.f32 %v1013_v3  ;;  %v1100_v3 = vld [vmem:[%s6521_s5 + $0x38] sm:$0xff] }
 0x3e2   : > { %v3208_v5 = vpack.c.bf16 %v1100_v3, %v1098_v2  ;;  %v1534_v2 = vld [vmem:[%s6525_s9 + $0x50] sm:$0xff]  ;;  %v1541_v3 = vld [vmem:[%s6525_s9 + $0x88] sm:$0xff] }
 0x3e7   : > { %v3774_v19 = vpop.eup %3773 }
 0x3e8   : > { %v1206_v8 = vmul.f32 %v3774_v19, %v3770_v60  ;;  %v1313_v60 = vld [vmem:[%s6521_s5 + $0x1f0] sm:$0xff] }
 0x3e9   : > { %v3202_v61 = vpack.c.bf16 %v1313_v60, %v1311_v59  ;;  %v1527_v59 = vld [vmem:[%s6525_s9 + $0x18] sm:$0xff] }
 0x3ea   : > { %2978 = vmatmul.mubr.msk.f32.vlgmr.msra.gmra.mrb[8].mxu1 %vm1016_vm3, %v1206_v8  ;;  %v1104_v8 = vld [vmem:[%s6521_s5 + $0x58] sm:$0xff] }
 0x3eb   : > { %v3776_v16 = vpop.eup %3775  ;;  %3175 = vmatpush1.bf16.msra.mxu1 %v3174_v7  ;;  %1379 = vmatprep.mubr.f32.mxu1 %v3821_v20  ;;  %v1102_v7 = vld [vmem:[%s6521_s5 + $0x48] sm:$0xff] }
 0x3ec   : > { %v1015_v21 = vmul.f32 %v3776_v16, %v3772_v62  ;;  %3177 = vmatprep.subr.bf16.mxu1 %v3176_v9  ;;  %v1094_v62 = vld [vmem:[%s6521_s5 + $0x8] sm:$0xff]  ;;  %v3212_v13 = vpack.c.bf16 %v1104_v8, %v1102_v7  ;;  %v3304_v7 = vpack.c.bf16 %v1551_v18, %v1543_v6  ;;  %v1540_v8 = vld [vmem:[%s6525_s9 + $0x80] sm:$0xff]  ;;  %v1623_v18 = vld [vmem:[%s6525_s9 + $0x318] sm:$0xff] }
 0x3ed   : > { %v3204_v0 = vpack.c.bf16 %v1096_v63, %v1094_v62  ;;  %v1524_v62 = vld [vmem:[%s6525_s9] sm:$0xff]  ;;  %v1629_v6 = vld [vmem:[%s6525_s9 + $0x348] sm:$0xff] }
 0x3ee   : > { %2968 = vmatmul.mubr.msk.f32.vlgmr.msra.gmra.mrb[2].mxu0 %vm1016_vm3, %v1015_v21  ;;  %v1108_v21 = vld [vmem:[%s6521_s5 + $0x78] sm:$0xff]  ;;  %v1532_v63 = vld [vmem:[%s6525_s9 + $0x40] sm:$0xff] }
 0x3ef   : > { %3179 = vmatpush1.bf16.msra.mxu1 %v3178_v17  ;;  %v1106_v17 = vld [vmem:[%s6521_s5 + $0x68] sm:$0xff]  ;;  %v3238_v1 = vpack.c.bf16 %v1532_v63, %v1524_v62 }
 0x3f0   : > { %3181 = vmatprep.subr.bf16.mxu1 %v3180_v22  ;;  %v3214_v22 = vpack.c.bf16 %v1103_v15, %v1101_v14  ;;  %v3216_v11 = vpack.c.bf16 %v1108_v21, %v1106_v17  ;;  %v1550_v14 = vld [vmem:[%s6525_s9 + $0xd0] sm:$0xff]  ;;  %v1557_v15 = vld [vmem:[%s6525_s9 + $0x108] sm:$0xff] }
 0x3f3   : > { %3183 = vmatpush1.bf16.msra.mxu1 %v3182_v28  ;;  %v1112_v28 = vld [vmem:[%s6521_s5 + $0x98] sm:$0xff] }
 0x3f4   : > { %3185 = vmatprep.subr.bf16.mxu1 %v3184_v29  ;;  %v3218_v29 = vpack.c.bf16 %v1107_v26, %v1105_v25  ;;  %v3220_v30 = vpack.c.bf16 %v1112_v28, %v1110_v27  ;;  %v1564_v26 = vld [vmem:[%s6525_s9 + $0x140] sm:$0xff]  ;;  %v1558_v27 = vld [vmem:[%s6525_s9 + $0x110] sm:$0xff] }
 0x3f5   : > { %v1566_v28 = vld [vmem:[%s6525_s9 + $0x150] sm:$0xff] }
 0x3f7   : > { %3187 = vmatpush1.bf16.msra.mxu1 %v3186_v34  ;;  %v1116_v34 = vld [vmem:[%s6521_s5 + $0xb8] sm:$0xff] }
 0x3f8   : > { %3189 = vmatprep.subr.bf16.mxu1 %v3188_v37  ;;  %v3222_v37 = vpack.c.bf16 %v1111_v32, %v1109_v31  ;;  %v3224_v38 = vpack.c.bf16 %v1116_v34, %v1114_v33  ;;  %v1581_v31 = vld [vmem:[%s6525_s9 + $0x1c8] sm:$0xff]  ;;  %v1575_v32 = vld [vmem:[%s6525_s9 + $0x198] sm:$0xff]  ;;  %v3310_v33 = vpack.c.bf16 %v1566_v28, %v1558_v27  ;;  %v1636_v27 = vld [vmem:[%s6525_s9 + $0x380] sm:$0xff] }
 0x3f9   : > { %v1644_v28 = vld [vmem:[%s6525_s9 + $0x3c0] sm:$0xff] }
 0x3fb   : > { %3191 = vmatpush1.bf16.msra.mxu1 %v3190_v42  ;;  %v1120_v42 = vld [vmem:[%s6521_s5 + $0xd8] sm:$0xff] }
 0x3fc   : > { %3193 = vmatprep.subr.bf16.mxu1 %v3192_v43  ;;  %v3226_v43 = vpack.c.bf16 %v1115_v40, %v1113_v39  ;;  %v3228_v44 = vpack.c.bf16 %v1120_v42, %v1118_v41  ;;  %v1580_v39 = vld [vmem:[%s6525_s9 + $0x1c0] sm:$0xff]  ;;  %v1574_v41 = vld [vmem:[%s6525_s9 + $0x190] sm:$0xff] }
 0x3fd   : > { %v1582_v42 = vld [vmem:[%s6525_s9 + $0x1d0] sm:$0xff] }
 0x3ff   : > { %3195 = vmatpush1.bf16.msra.mxu1 %v3194_v48  ;;  %v1124_v48 = vld [vmem:[%s6521_s5 + $0xf8] sm:$0xff] }
 0x400   : > { %3197 = vmatprep.subr.bf16.mxu1 %v3196_v49  ;;  %v3230_v49 = vpack.c.bf16 %v1119_v46, %v1117_v45  ;;  %v3232_v50 = vpack.c.bf16 %v1124_v48, %v1122_v47  ;;  %v1591_v45 = vld [vmem:[%s6525_s9 + $0x218] sm:$0xff]  ;;  %v3314_v48 = vpack.c.bf16 %v1582_v42, %v1574_v41  ;;  %v1652_v41 = vld [vmem:[%s6525_s9 + $0x400] sm:$0xff] }
 0x401   : > { %v1599_v46 = vld [vmem:[%s6525_s9 + $0x258] sm:$0xff]  ;;  %v1660_v42 = vld [vmem:[%s6525_s9 + $0x440] sm:$0xff] }
 0x403   : > { %3199 = vmatpush1.bf16.msra.mxu1 %v3198_v54  ;;  %v1525_v54 = vld [vmem:[%s6525_s9 + $0x8] sm:$0xff] }
 0x404   : > { %3201 = vmatprep.subr.bf16.mxu1 %v3200_v55  ;;  %v1533_v55 = vld [vmem:[%s6525_s9 + $0x48] sm:$0xff] }
 0x405   : > { %v3236_v60 = vpack.c.bf16 %v1533_v55, %v1525_v54  ;;  %v1598_v54 = vld [vmem:[%s6525_s9 + $0x250] sm:$0xff]  ;;  %v1605_v55 = vld [vmem:[%s6525_s9 + $0x288] sm:$0xff] }
 0x406   : > { %v3318_v63 = vpack.c.bf16 %v1598_v54, %v1590_v52  ;;  %v1459_v54 = vld [vmem:[%s6522_s6] sm:$0x3] }
 0x407   : > { %3203 = vmatpush1.bf16.msra.mxu1 %v3202_v61  ;;  %v1535_v61 = vld [vmem:[%s6525_s9 + $0x58] sm:$0xff]  ;;  %3237 = vmatprep.subr.bf16.mxu0 %v3236_v60 }
 0x408   : > { %3205 = vmatprep.subr.bf16.mxu1 %v3204_v0  ;;  %v3300_v0 = vpack.c.bf16 %v1535_v61, %v1527_v59  ;;  %3239 = vmatpush1.bf16.msra.mxu0 %v3238_v1  ;;  %v1613_v59 = vld [vmem:[%s6525_s9 + $0x2c8] sm:$0xff]  ;;  %v1607_v60 = vld [vmem:[%s6525_s9 + $0x298] sm:$0xff]  ;;  %v1604_v1 = vld [vmem:[%s6525_s9 + $0x280] sm:$0xff] }
 0x409   : > { %v1615_v61 = vld [vmem:[%s6525_s9 + $0x2d8] sm:$0xff] }
 0x4bd   : > { %v1279_v19 = vpop.f32.mrb[8].mxu1 }
 0x4be   : > { %v2979_v9 = vpop.f32.mrb[9].mxu1  ;;  %1380 = vmatmul.mubr.f32.vlgmr.msra.gmra.mrb[10].mxu1 %v1279_v19 }
 0x4bf   : > { %3207 = vmatpush1.bf16.msra.mxu1 %v3206_v4  ;;  %1450 = vmatprep.mubr.f32.mxu1 %v3821_v20  ;;  %v3302_v4 = vpack.c.bf16 %v1534_v2, %v1526_v10  ;;  %v1548_v9 = vld [vmem:[%s6525_s9 + $0xc0] sm:$0xff]  ;;  %v1606_v2 = vld [vmem:[%s6525_s9 + $0x290] sm:$0xff] }
 0x4c0   : > { %3209 = vmatprep.subr.bf16.mxu1 %v3208_v5  ;;  %v1549_v5 = vld [vmem:[%s6525_s9 + $0xc8] sm:$0xff]  ;;  %v1612_v10 = vld [vmem:[%s6525_s9 + $0x2c0] sm:$0xff] }
 0x4c1   : > { %v1089_v16 = vpop.f32.mrb[2].mxu0  ;;  %v3240_v19 = vpack.c.bf16 %v1549_v5, %v1541_v3  ;;  %v3320_v3 = vpack.c.bf16 %v1615_v61, %v1607_v60  ;;  %v1621_v5 = vld [vmem:[%s6525_s9 + $0x308] sm:$0xff]  ;;  %v1468_v60 = vrot.slane %v1459_v54, %v4129_v57  ;;  %v3811_v61 = vld [vmem:[%s3940_s18] sm:$0x1f] }
 0x4c2   : > { %v2969_v20 = vpop.f32.mrb[3].mxu0 }
 0x4c3   : > { %3211 = vmatpush1.bf16.msra.mxu1 %v3210_v12  ;;  %v1542_v12 = vld [vmem:[%s6525_s9 + $0x90] sm:$0xff]  ;;  %3241 = vmatprep.subr.bf16.mxu0 %v3240_v19  ;;  %v1559_v20 = vld [vmem:[%s6525_s9 + $0x118] sm:$0xff] }
 0x4c4   : > { %3213 = vmatprep.subr.bf16.mxu1 %v3212_v13  ;;  %v3242_v13 = vpack.c.bf16 %v1548_v9, %v1540_v8  ;;  %v3306_v17 = vpack.c.bf16 %v1550_v14, %v1542_v12  ;;  %v1631_v19 = vld [vmem:[%s6525_s9 + $0x358] sm:$0xff]  ;;  %v3260_v9 = vpack.c.bf16 %v1629_v6, %v1621_v5  ;;  %v1620_v12 = vld [vmem:[%s6525_s9 + $0x300] sm:$0xff]  ;;  %v1622_v14 = vld [vmem:[%s6525_s9 + $0x310] sm:$0xff] }
 0x4c6   : > { %3243 = vmatpush1.bf16.msra.mxu0 %v3242_v13  ;;  %v1628_v13 = vld [vmem:[%s6525_s9 + $0x340] sm:$0xff] }
 0x4c7   : > { %3215 = vmatpush1.bf16.msra.mxu1 %v3214_v22  ;;  %v1567_v22 = vld [vmem:[%s6525_s9 + $0x158] sm:$0xff] }
 0x4c8   : > { %3217 = vmatprep.subr.bf16.mxu1 %v3216_v11  ;;  %v1556_v11 = vld [vmem:[%s6525_s9 + $0x100] sm:$0xff]  ;;  %v3308_v25 = vpack.c.bf16 %v1567_v22, %v1559_v20  ;;  %v1639_v20 = vld [vmem:[%s6525_s9 + $0x398] sm:$0xff] }
 0x4c9   : > { %v1647_v22 = vld [vmem:[%s6525_s9 + $0x3d8] sm:$0xff] }
 0x4cb   : > { %3219 = vmatpush1.bf16.msra.mxu1 %v3218_v29  ;;  %v3246_v29 = vpack.c.bf16 %v1564_v26, %v1556_v11  ;;  %v3262_v11 = vpack.c.bf16 %v1628_v13, %v1620_v12  ;;  %v1676_v12 = vld [vmem:[%s6525_s9 + $0x4c0] sm:$0xff]  ;;  %v1670_v13 = vld [vmem:[%s6525_s9 + $0x490] sm:$0xff] }
 0x4cc   : > { %3221 = vmatprep.subr.bf16.mxu1 %v3220_v30  ;;  %v1573_v30 = vld [vmem:[%s6525_s9 + $0x188] sm:$0xff] }
 0x4cd   : > { %v3248_v34 = vpack.c.bf16 %v1581_v31, %v1573_v30  ;;  %v3328_v30 = vpack.c.bf16 %v1647_v22, %v1639_v20  ;;  %v1646_v31 = vld [vmem:[%s6525_s9 + $0x3d0] sm:$0xff]  ;;  %v1687_v20 = vld [vmem:[%s6525_s9 + $0x518] sm:$0xff] }
 0x4cf   : > { %3223 = vmatpush1.bf16.msra.mxu1 %v3222_v37  ;;  %v1583_v37 = vld [vmem:[%s6525_s9 + $0x1d8] sm:$0xff] }
 0x4d0   : > { %3225 = vmatprep.subr.bf16.mxu1 %v3224_v38  ;;  %v1572_v38 = vld [vmem:[%s6525_s9 + $0x180] sm:$0xff]  ;;  %v3312_v40 = vpack.c.bf16 %v1583_v37, %v1575_v32  ;;  %v1653_v32 = vld [vmem:[%s6525_s9 + $0x408] sm:$0xff]  ;;  %v1663_v37 = vld [vmem:[%s6525_s9 + $0x458] sm:$0xff] }
 0x4d1   : > { %v3250_v47 = vpack.c.bf16 %v1580_v39, %v1572_v38  ;;  %v3266_v38 = vpack.c.bf16 %v1644_v28, %v1636_v27 }
 0x4d3   : > { %3227 = vmatpush1.bf16.msra.mxu1 %v3226_v43  ;;  %v1589_v43 = vld [vmem:[%s6525_s9 + $0x208] sm:$0xff] }
 0x4d4   : > { %3229 = vmatprep.subr.bf16.mxu1 %v3228_v44  ;;  %v1597_v44 = vld [vmem:[%s6525_s9 + $0x248] sm:$0xff] }
 0x4d7   : > { %3231 = vmatpush1.bf16.msra.mxu1 %v3230_v49  ;;  %v3252_v49 = vpack.c.bf16 %v1597_v44, %v1589_v43  ;;  %v1654_v43 = vld [vmem:[%s6525_s9 + $0x410] sm:$0xff] }
 0x4d8   : > { %3233 = vmatprep.subr.bf16.mxu1 %v3232_v50  ;;  %v1588_v50 = vld [vmem:[%s6525_s9 + $0x200] sm:$0xff] }
 0x4d9   : > { %v3254_v62 = vpack.c.bf16 %v1596_v51, %v1588_v50  ;;  %v3270_v50 = vpack.c.bf16 %v1660_v42, %v1652_v41 }
 0x4db   : > { %3235 = vmatpush1.bf16.msra.mxu1 %v3234_v53  ;;  %v3316_v53 = vpack.c.bf16 %v1599_v46, %v1591_v45  ;;  %v1662_v45 = vld [vmem:[%s6525_s9 + $0x450] sm:$0xff]  ;;  %v1669_v46 = vld [vmem:[%s6525_s9 + $0x488] sm:$0xff] }
 0x4dc   : > { %3301 = vmatprep.subr.bf16.mxu1 %v3300_v0  ;;  %v3256_v0 = vpack.c.bf16 %v1613_v59, %v1605_v55  ;;  %v3334_v51 = vpack.c.bf16 %v1662_v45, %v1654_v43  ;;  %v1464_v55 = vrot.slane %v1459_v54, %v4132_v58  ;;  %v1702_v43 = vld [vmem:[%s6525_s9 + $0x590] sm:$0xff] }
 0x4de   : > { %1451 = vmatmul.mubr.f32.vlgmr.msra.gmra.mrb[10].mxu1 %v1089_v16  ;;  %v1565_v16 = vld [vmem:[%s6525_s9 + $0x148] sm:$0xff] }
 0x4df   : > { %3303 = vmatpush1.bf16.msra.mxu1 %v3302_v4  ;;  %v3244_v21 = vpack.c.bf16 %v1565_v16, %v1557_v15  ;;  %v1614_v4 = vld [vmem:[%s6525_s9 + $0x2d0] sm:$0xff]  ;;  %v3324_v15 = vpack.c.bf16 %v1631_v19, %v1623_v18 }
 0x4e0   : > { %3305 = vmatprep.subr.bf16.mxu1 %v3304_v7  ;;  %v3258_v7 = vpack.c.bf16 %v1612_v10, %v1604_v1  ;;  %v3322_v8 = vpack.c.bf16 %v1614_v4, %v1606_v2  ;;  %v1630_v16 = vld [vmem:[%s6525_s9 + $0x350] sm:$0xff] }
 0x4e1   : > { %3245 = vmatprep.subr.bf16.mxu0 %v3244_v21  ;;  %v1645_v21 = vld [vmem:[%s6525_s9 + $0x3c8] sm:$0xff] }
 0x4e2   : > { %3247 = vmatpush1.bf16.msra.mxu0 %v3246_v29  ;;  %v1638_v29 = vld [vmem:[%s6525_s9 + $0x390] sm:$0xff] }
 0x4e3   : > { %3307 = vmatpush1.bf16.msra.mxu1 %v3306_v17  ;;  %3249 = vmatprep.subr.bf16.mxu0 %v3248_v34  ;;  %v1637_v17 = vld [vmem:[%s6525_s9 + $0x388] sm:$0xff]  ;;  %v1655_v34 = vld [vmem:[%s6525_s9 + $0x418] sm:$0xff]  ;;  %v3330_v39 = vpack.c.bf16 %v1646_v31, %v1638_v29  ;;  %v1686_v29 = vld [vmem:[%s6525_s9 + $0x510] sm:$0xff] }
 0x4e4   : > { %3309 = vmatprep.subr.bf16.mxu1 %v3308_v25  ;;  %v3326_v25 = vpack.c.bf16 %v1630_v16, %v1622_v14  ;;  %v3264_v26 = vpack.c.bf16 %v1645_v21, %v1637_v17  ;;  %v3332_v44 = vpack.c.bf16 %v1663_v37, %v1655_v34  ;;  %v1685_v17 = vld [vmem:[%s6525_s9 + $0x508] sm:$0xff]  ;;  %v1703_v34 = vld [vmem:[%s6525_s9 + $0x598] sm:$0xff] }
 0x4e5   : > { %v1693_v21 = vld [vmem:[%s6525_s9 + $0x548] sm:$0xff] }
 0x4e6   : > { %3251 = vmatpush1.bf16.msra.mxu0 %v3250_v47  ;;  %v1677_v47 = vld [vmem:[%s6525_s9 + $0x4c8] sm:$0xff]  ;;  %v3276_v22 = vpack.c.bf16 %v1693_v21, %v1685_v17  ;;  %v1756_v17 = vld [vmem:[%s6525_s9 + $0x740] sm:$0xff]  ;;  %v1750_v21 = vld [vmem:[%s6525_s9 + $0x710] sm:$0xff] }
 0x4e7   : > { %3311 = vmatpush1.bf16.msra.mxu1 %v3310_v33  ;;  %3253 = vmatprep.subr.bf16.mxu0 %v3252_v49  ;;  %v1661_v33 = vld [vmem:[%s6525_s9 + $0x448] sm:$0xff]  ;;  %v1679_v49 = vld [vmem:[%s6525_s9 + $0x4d8] sm:$0xff]  ;;  %v3272_v52 = vpack.c.bf16 %v1677_v47, %v1669_v46 }
 0x4e8   : > { %3313 = vmatprep.subr.bf16.mxu1 %v3312_v40  ;;  %v3268_v40 = vpack.c.bf16 %v1661_v33, %v1653_v32  ;;  %v1701_v32 = vld [vmem:[%s6525_s9 + $0x588] sm:$0xff] }
 0x4e9   : > { %v1709_v33 = vld [vmem:[%s6525_s9 + $0x5c8] sm:$0xff] }
 0x4ea   : > { %3255 = vmatpush1.bf16.msra.mxu0 %v3254_v62  ;;  %v3280_v37 = vpack.c.bf16 %v1709_v33, %v1701_v32  ;;  %v1717_v46 = vld [vmem:[%s6525_s9 + $0x608] sm:$0xff]  ;;  %v1766_v33 = vld [vmem:[%s6525_s9 + $0x790] sm:$0xff] }
 0x4eb   : > { %3315 = vmatpush1.bf16.msra.mxu1 %v3314_v48  ;;  %3257 = vmatprep.subr.bf16.mxu0 %v3256_v0  ;;  %v1671_v48 = vld [vmem:[%s6525_s9 + $0x498] sm:$0xff]  ;;  %v3812_v0 = vld [vmem:[%s3940_s18 + $0x8] sm:$0x1f]  ;;  %s440_s18 = scalar_lea.vmem %s6529_s13, %s2950_s15 }
 0x4ec   : > { %3317 = vmatprep.subr.bf16.mxu1 %v3316_v53  ;;  %v3336_v53 = vpack.c.bf16 %v1679_v49, %v1671_v48  ;;  %v1725_v47 = vld [vmem:[%s6525_s9 + $0x648] sm:$0xff]  ;;  %v1719_v48 = vld [vmem:[%s6525_s9 + $0x618] sm:$0xff] }
 0x4ed   : > { %v3284_v49 = vpack.c.bf16 %v1725_v47, %v1717_v46 }
 0x4ee   : > { %3259 = vmatpush1.bf16.msra.mxu0 %v3258_v7 }
 0x4ef   : > { %3319 = vmatpush1.bf16.msra.mxu1 %v3318_v63  ;;  %3261 = vmatprep.subr.bf16.mxu0 %v3260_v9  ;;  %v1668_v9 = vld [vmem:[%s6525_s9 + $0x480] sm:$0xff] }
 0x4f0   : > { %3321 = vmatprep.subr.bf16.mxu1 %v3320_v3  ;;  %v3274_v14 = vpack.c.bf16 %v1676_v12, %v1668_v9 }
 0x4f2   : > { %3263 = vmatpush1.bf16.msra.mxu0 %v3262_v11  ;;  %v1695_v11 = vld [vmem:[%s6525_s9 + $0x558] sm:$0xff] }
 0x4f3   : > { %3323 = vmatpush1.bf16.msra.mxu1 %v3322_v8  ;;  %3265 = vmatprep.subr.bf16.mxu0 %v3264_v26  ;;  %v1692_v26 = vld [vmem:[%s6525_s9 + $0x540] sm:$0xff]  ;;  %v3340_v27 = vpack.c.bf16 %v1695_v11, %v1687_v20  ;;  %v1758_v20 = vld [vmem:[%s6525_s9 + $0x750] sm:$0xff]  ;;  %v1765_v11 = vld [vmem:[%s6525_s9 + $0x788] sm:$0xff] }
 0x4f4   : > { %3325 = vmatprep.subr.bf16.mxu1 %v3324_v15  ;;  %v1678_v15 = vld [vmem:[%s6525_s9 + $0x4d0] sm:$0xff] }
 0x4f5   : > { %v3338_v16 = vpack.c.bf16 %v1678_v15, %v1670_v13  ;;  %v1751_v13 = vld [vmem:[%s6525_s9 + $0x718] sm:$0xff]  ;;  %v1748_v15 = vld [vmem:[%s6525_s9 + $0x700] sm:$0xff] }
 0x4f6   : > { %3267 = vmatpush1.bf16.msra.mxu0 %v3266_v38  ;;  %v1711_v38 = vld [vmem:[%s6525_s9 + $0x5d8] sm:$0xff] }
 0x4f7   : > { %3327 = vmatpush1.bf16.msra.mxu1 %v3326_v25  ;;  %3269 = vmatprep.subr.bf16.mxu0 %v3268_v40  ;;  %v1684_v25 = vld [vmem:[%s6525_s9 + $0x500] sm:$0xff]  ;;  %v3344_v41 = vpack.c.bf16 %v1711_v38, %v1703_v34  ;;  %v1774_v34 = vld [vmem:[%s6525_s9 + $0x7d0] sm:$0xff] }
 0x4f8   : > { %3329 = vmatprep.subr.bf16.mxu1 %v3328_v30  ;;  %v3278_v28 = vpack.c.bf16 %v1692_v26, %v1684_v25  ;;  %v1694_v30 = vld [vmem:[%s6525_s9 + $0x550] sm:$0xff]  ;;  %v1708_v40 = vld [vmem:[%s6525_s9 + $0x5c0] sm:$0xff]  ;;  %v1773_v25 = vld [vmem:[%s6525_s9 + $0x7c8] sm:$0xff]  ;;  %v3362_v38 = vpack.c.bf16 %v1774_v34, %v1766_v33 }
 0x4f9   : > { %v3342_v31 = vpack.c.bf16 %v1694_v30, %v1686_v29  ;;  %v1767_v26 = vld [vmem:[%s6525_s9 + $0x798] sm:$0xff]  ;;  %v1764_v30 = vld [vmem:[%s6525_s9 + $0x780] sm:$0xff] }
 0x4fa   : > { %3271 = vmatpush1.bf16.msra.mxu0 %v3270_v50  ;;  %v1727_v50 = vld [vmem:[%s6525_s9 + $0x658] sm:$0xff]  ;;  %v1560_v33 = vld [vmem:[%s6525_s9 + $0x120] sm:$0xff] }
 0x4fb   : > { %3331 = vmatpush1.bf16.msra.mxu1 %v3330_v39  ;;  %3273 = vmatprep.subr.bf16.mxu0 %v3272_v52  ;;  %v1700_v39 = vld [vmem:[%s6525_s9 + $0x580] sm:$0xff]  ;;  %v1775_v29 = vld [vmem:[%s6525_s9 + $0x7d8] sm:$0xff] }
 0x4fc   : > { %3333 = vmatprep.subr.bf16.mxu1 %v3332_v44  ;;  %v3282_v42 = vpack.c.bf16 %v1708_v40, %v1700_v39  ;;  %v1710_v44 = vld [vmem:[%s6525_s9 + $0x5d0] sm:$0xff]  ;;  %v1724_v52 = vld [vmem:[%s6525_s9 + $0x640] sm:$0xff]  ;;  %v3360_v32 = vpack.c.bf16 %v1775_v29, %v1767_v26  ;;  %v1529_v39 = vld [vmem:[%s6525_s9 + $0x28] sm:$0xff] }
 0x4fd   : > { %v3346_v45 = vpack.c.bf16 %v1710_v44, %v1702_v43  ;;  %v1537_v40 = vld [vmem:[%s6525_s9 + $0x68] sm:$0xff]  ;;  %v1539_v43 = vld [vmem:[%s6525_s9 + $0x78] sm:$0xff]  ;;  %v1568_v34 = vld [vmem:[%s6525_s9 + $0x160] sm:$0xff] }
 0x4fe   : > { %3275 = vmatpush1.bf16.msra.mxu0 %v3274_v14  ;;  %v1759_v14 = vld [vmem:[%s6525_s9 + $0x758] sm:$0xff] }
 0x4ff   : > { %3335 = vmatpush1.bf16.msra.mxu1 %v3334_v51  ;;  %3277 = vmatprep.subr.bf16.mxu0 %v3276_v22  ;;  %v1716_v51 = vld [vmem:[%s6525_s9 + $0x600] sm:$0xff]  ;;  %v3294_v22 = vpack.c.bf16 %v1756_v17, %v1748_v15  ;;  %v1563_v29 = vld [vmem:[%s6525_s9 + $0x138] sm:$0xff] }
 0x500   : > { %3337 = vmatprep.subr.bf16.mxu1 %v3336_v53  ;;  %v3348_v53 = vpack.c.bf16 %v1727_v50, %v1719_v48  ;;  %v3286_v54 = vpack.c.bf16 %v1724_v52, %v1716_v51 }
 0x502   : > { %3279 = vmatpush1.bf16.msra.mxu0 %v3278_v28  ;;  %v3296_v28 = vpack.c.bf16 %v1773_v25, %v1765_v11  ;;  %v1554_v11 = vld [vmem:[%s6525_s9 + $0xf0] sm:$0xff]  ;;  %v1561_v25 = vld [vmem:[%s6525_s9 + $0x128] sm:$0xff] }
 0x503   : > { %3339 = vmatpush1.bf16.msra.mxu1 %v3338_v16  ;;  %3281 = vmatprep.subr.bf16.mxu0 %v3280_v37  ;;  %v3356_v16 = vpack.c.bf16 %v1759_v14, %v1751_v13  ;;  %v1555_v13 = vld [vmem:[%s6525_s9 + $0xf8] sm:$0xff] }
 0x504   : > { %3341 = vmatprep.subr.bf16.mxu1 %v3340_v27  ;;  %v3358_v27 = vpack.c.bf16 %v1758_v20, %v1750_v21  ;;  %v1544_v21 = vld [vmem:[%s6525_s9 + $0xa0] sm:$0xff] }
 0x505   : > { %v1552_v20 = vld [vmem:[%s6525_s9 + $0xe0] sm:$0xff] }
 0x506   : > { %3283 = vmatpush1.bf16.msra.mxu0 %v3282_v42  ;;  %v3364_v42 = vpack.c.bf16 %v1537_v40, %v1529_v39  ;;  %v1562_v39 = vld [vmem:[%s6525_s9 + $0x130] sm:$0xff] }
 0x507   : > { %3343 = vmatpush1.bf16.msra.mxu1 %v3342_v31  ;;  %3285 = vmatprep.subr.bf16.mxu0 %v3284_v49  ;;  %v1772_v31 = vld [vmem:[%s6525_s9 + $0x7c0] sm:$0xff]  ;;  %v1570_v40 = vld [vmem:[%s6525_s9 + $0x170] sm:$0xff] }
 0x508   : > { %3345 = vmatprep.subr.bf16.mxu1 %v3344_v41  ;;  %v3298_v37 = vpack.c.bf16 %v1772_v31, %v1764_v30  ;;  %v1531_v41 = vld [vmem:[%s6525_s9 + $0x38] sm:$0xff]  ;;  %v3370_v31 = vpack.c.bf16 %v1552_v20, %v1544_v21  ;;  %v1625_v21 = vld [vmem:[%s6525_s9 + $0x328] sm:$0xff] }
 0x509   : > { %v3428_v44 = vpack.c.bf16 %v1539_v43, %v1531_v41  ;;  %v1571_v30 = vld [vmem:[%s6525_s9 + $0x178] sm:$0xff]  ;;  %v1577_v41 = vld [vmem:[%s6525_s9 + $0x1a8] sm:$0xff] }
 0x50a   : > { %3287 = vmatpush1.bf16.msra.mxu0 %v3286_v54  ;;  %v1474_v54 = vld [vmem:[%s6524_s8] sm:$0x3]  ;;  %v1579_v43 = vld [vmem:[%s6525_s9 + $0x1b8] sm:$0xff]  ;;  %v1633_v20 = vld [vmem:[%s6525_s9 + $0x368] sm:$0xff] }
 0x50b   : > { %3347 = vmatpush1.bf16.msra.mxu1 %v3346_v45 }
 0x50c   : > { %3349 = vmatprep.subr.bf16.mxu1 %v3348_v53  ;;  %v1473_v53 = vld [vmem:[%s6523_s7] sm:$0x3] }
 0x5b1   : > { %v1452_v59 = vpop.f32.mrb[10].mxu1 }
 0x5b2   : > { %v1457_v62 = vadd.f32 %v3811_v61, %v1452_v59  ;;  %v1454_v63 = vpop.f32.mrb[11].mxu1  ;;  %v1726_v59 = vld [vmem:[%s6525_s9 + $0x650] sm:$0xff] }
 0x5b3   : > { %v1458_v1 = vadd.f32 %v3812_v0, %v1454_v63  ;;  %v1735_v63 = vld [vmem:[%s6525_s9 + $0x698] sm:$0xff] }
 0x5b4   : > { %v5000_v10 = vadd.f32 %v1464_v55, %v1457_v62  ;;  %v1718_v55 = vld [vmem:[%s6525_s9 + $0x610] sm:$0xff]  ;;  %v1741_v62 = vld [vmem:[%s6525_s9 + $0x6c8] sm:$0xff]  ;;  %v1743_v0 = vld [vmem:[%s6525_s9 + $0x6d8] sm:$0xff] }
 0x5b5   : > { %v5002_v2 = vadd.f32 %v1468_v60, %v1458_v1  ;;  %v1733_v60 = vld [vmem:[%s6525_s9 + $0x688] sm:$0xff]  ;;  %v3350_v61 = vpack.c.bf16 %v1726_v59, %v1718_v55 }
 0x5b6   : > { %v1475_v3 = vsel %vm445_vm0, %v5000_v10, 0.0  ;;  %v1481_v4 = vmul.f32 %v5000_v10, %v5000_v10  ;;  %v3288_v1 = vpack.c.bf16 %v1741_v62, %v1733_v60  ;;  %v1506_v60 = vrot.slane %v1473_v53, %v4129_v57 }
 0x5b7   : > { %v1476_v5 = vsel %vm445_vm0, %v5002_v2, 0.0  ;;  %v1482_v6 = vmul.f32 %v5002_v2, %v5002_v2  ;;  %3351 = vmatpush1.bf16.msra.mxu1 %v3350_v61  ;;  %v1502_v61 = vrot.slane %v1473_v53, %v4132_v58  ;;  %v1593_v53 = vld [vmem:[%s6525_s9 + $0x228] sm:$0xff] }
 0x5b8   : > { %v1477_v18 = vadd.f32 %v1476_v5, %v1475_v3  ;;  %v1483_v19 = vsel %vm445_vm0, %v1481_v4, 0.0  ;;  %v3352_v3 = vpack.c.bf16 %v1743_v0, %v1735_v63  ;;  %v1732_v4 = vld [vmem:[%s6525_s9 + $0x680] sm:$0xff]  ;;  %3289 = vmatprep.subr.bf16.mxu0 %v3288_v1  ;;  %v1519_v0 = vrot.slane %v1474_v54, %v4129_v57 }
 0x5b9   : > { %v1484_v7 = vsel %vm445_vm0, %v1482_v6, 0.0  ;;  %v1740_v5 = vld [vmem:[%s6525_s9 + $0x6c0] sm:$0xff]  ;;  %v1734_v6 = vld [vmem:[%s6525_s9 + $0x690] sm:$0xff] }
 0x5ba   : > { %1478 = vadd.xlane.f32.xlu0 %v1477_v18  ;;  %v1485_v8 = vadd.f32 %v1484_v7, %v1483_v19  ;;  %v3290_v18 = vpack.c.bf16 %v1740_v5, %v1732_v4  ;;  %v1742_v19 = vld [vmem:[%s6525_s9 + $0x6d0] sm:$0xff]  ;;  %v1749_v7 = vld [vmem:[%s6525_s9 + $0x708] sm:$0xff]  ;;  %3353 = vmatprep.subr.bf16.mxu1 %v3352_v3  ;;  %v1515_v3 = vrot.slane %v1474_v54, %v4132_v58  ;;  %v1528_v4 = vld [vmem:[%s6525_s9 + $0x20] sm:$0xff] }
 0x5bb   : > { %v3354_v9 = vpack.c.bf16 %v1742_v19, %v1734_v6  ;;  %v1536_v5 = vld [vmem:[%s6525_s9 + $0x60] sm:$0xff]  ;;  %v1530_v6 = vld [vmem:[%s6525_s9 + $0x30] sm:$0xff]  ;;  %v1601_v54 = vld [vmem:[%s6525_s9 + $0x268] sm:$0xff] }
 0x5bc   : > { %1486 = vadd.xlane.f32.xlu1 %v1485_v8  ;;  %v1757_v8 = vld [vmem:[%s6525_s9 + $0x748] sm:$0xff]  ;;  %3291 = vmatpush1.bf16.msra.mxu0 %v3290_v18  ;;  %v1538_v18 = vld [vmem:[%s6525_s9 + $0x70] sm:$0xff] }
 0x5bd   : > { %v3292_v12 = vpack.c.bf16 %v1757_v8, %v1749_v7  ;;  %3355 = vmatpush1.bf16.msra.mxu1 %v3354_v9  ;;  %v1545_v8 = vld [vmem:[%s6525_s9 + $0xa8] sm:$0xff]  ;;  %v3430_v17 = vpack.c.bf16 %v1538_v18, %v1530_v6  ;;  %v1611_v18 = vld [vmem:[%s6525_s9 + $0x2b8] sm:$0xff] }
 0x5be   : > { %3357 = vmatprep.subr.bf16.mxu1 %v3356_v16  ;;  %v1553_v9 = vld [vmem:[%s6525_s9 + $0xe8] sm:$0xff]  ;;  %v3366_v16 = vpack.c.bf16 %v1536_v5, %v1528_v4  ;;  %v1602_v4 = vld [vmem:[%s6525_s9 + $0x270] sm:$0xff] }
 0x5bf   : > { %3293 = vmatprep.subr.bf16.mxu0 %v3292_v12  ;;  %v1547_v12 = vld [vmem:[%s6525_s9 + $0xb8] sm:$0xff]  ;;  %v3368_v26 = vpack.c.bf16 %v1553_v9, %v1545_v8  ;;  %v1609_v5 = vld [vmem:[%s6525_s9 + $0x2a8] sm:$0xff]  ;;  %v1608_v9 = vld [vmem:[%s6525_s9 + $0x2a0] sm:$0xff] }
 0x5c0   : > { %3295 = vmatpush1.bf16.msra.mxu0 %v3294_v22  ;;  %v1546_v22 = vld [vmem:[%s6525_s9 + $0xb0] sm:$0xff]  ;;  %v1617_v6 = vld [vmem:[%s6525_s9 + $0x2e8] sm:$0xff] }
 0x5c1   : > { %3359 = vmatpush1.bf16.msra.mxu1 %v3358_v27  ;;  %3297 = vmatprep.subr.bf16.mxu0 %v3296_v28  ;;  %v3432_v27 = vpack.c.bf16 %v1555_v13, %v1547_v12  ;;  %v1569_v28 = vld [vmem:[%s6525_s9 + $0x168] sm:$0xff]  ;;  %v1616_v12 = vld [vmem:[%s6525_s9 + $0x2e0] sm:$0xff]  ;;  %v3384_v13 = vpack.c.bf16 %v1617_v6, %v1609_v5 }
 0x5c2   : > { %3361 = vmatprep.subr.bf16.mxu1 %v3360_v32  ;;  %v3434_v32 = vpack.c.bf16 %v1554_v11, %v1546_v22  ;;  %v1627_v22 = vld [vmem:[%s6525_s9 + $0x338] sm:$0xff]  ;;  %v1672_v5 = vld [vmem:[%s6525_s9 + $0x4a0] sm:$0xff] }
 0x5c3   : > { %v1635_v11 = vld [vmem:[%s6525_s9 + $0x378] sm:$0xff]  ;;  %v1680_v6 = vld [vmem:[%s6525_s9 + $0x4e0] sm:$0xff] }
 0x5c4   : > { %3299 = vmatpush1.bf16.msra.mxu0 %v3298_v37  ;;  %v3372_v37 = vpack.c.bf16 %v1569_v28, %v1561_v25  ;;  %v3386_v25 = vpack.c.bf16 %v1616_v12, %v1608_v9  ;;  %v1632_v28 = vld [vmem:[%s6525_s9 + $0x360] sm:$0xff]  ;;  %v1689_v9 = vld [vmem:[%s6525_s9 + $0x528] sm:$0xff] }
 0x5c5   : > { %3363 = vmatpush1.bf16.msra.mxu1 %v3362_v38  ;;  %3365 = vmatprep.subr.bf16.mxu0 %v3364_v42  ;;  %v3436_v38 = vpack.c.bf16 %v1571_v30, %v1563_v29  ;;  %v1585_v42 = vld [vmem:[%s6525_s9 + $0x1e8] sm:$0xff]  ;;  %v3388_v29 = vpack.c.bf16 %v1633_v20, %v1625_v21  ;;  %v3452_v30 = vpack.c.bf16 %v1635_v11, %v1627_v22  ;;  %v1688_v21 = vld [vmem:[%s6525_s9 + $0x520] sm:$0xff] }
 0x5c6   : > { %3429 = vmatprep.subr.bf16.mxu1 %v3428_v44  ;;  %v1587_v44 = vld [vmem:[%s6525_s9 + $0x1f8] sm:$0xff]  ;;  %v1697_v12 = vld [vmem:[%s6525_s9 + $0x568] sm:$0xff]  ;;  %v1696_v20 = vld [vmem:[%s6525_s9 + $0x560] sm:$0xff] }
 0x5c7   : > { %v3404_v22 = vpack.c.bf16 %v1697_v12, %v1689_v9  ;;  %v1752_v9 = vld [vmem:[%s6525_s9 + $0x720] sm:$0xff] }
 0x5c8   : > { %v1760_v12 = vld [vmem:[%s6525_s9 + $0x760] sm:$0xff] }
 0x647   : > { %v1479_v45 = vpop.xlane.xlu0 %1478 }
 0x648   : > { %v1480_v46 = vmul.f32 0.00390625, %v1479_v45  ;;  %v3374_v45 = vpack.c.bf16 %v1568_v34, %v1560_v33  ;;  %v1641_v33 = vld [vmem:[%s6525_s9 + $0x3a8] sm:$0xff] }
 0x649   : > { %v1487_v47 = vpop.xlane.xlu1 %1486  ;;  %v1649_v34 = vld [vmem:[%s6525_s9 + $0x3e8] sm:$0xff] }
 0x64a   : > { %v1488_v48 = vmul.f32 0.00390625, %v1487_v47  ;;  %v1489_v49 = vmul.f32 %v1480_v46, %v1480_v46  ;;  %v1492_v55 = vsub.f32 %v5000_v10, %v1480_v46  ;;  %v1493_v59 = vsub.f32 %v5002_v2, %v1480_v46  ;;  %v1576_v47 = vld [vmem:[%s6525_s9 + $0x1a0] sm:$0xff] }
 0x64b   : > { %v3438_v46 = vpack.c.bf16 %v1570_v40, %v1562_v39 }
 0x64c   : > { %v1490_v50 = vsub.f32 %v1488_v48, %v1489_v49  ;;  %v1584_v48 = vld [vmem:[%s6525_s9 + $0x1e0] sm:$0xff]  ;;  %v3376_v49 = vpack.c.bf16 %v1585_v42, %v1577_v41 }
 0x64d   : > { %v1640_v41 = vld [vmem:[%s6525_s9 + $0x3a0] sm:$0xff] }
 0x64e   : > { %v1491_v51 = vmax.f32 %v1490_v50, 0.0  ;;  %v3440_v50 = vpack.c.bf16 %v1587_v44, %v1579_v43  ;;  %v1648_v42 = vld [vmem:[%s6525_s9 + $0x3e0] sm:$0xff]  ;;  %v3392_v43 = vpack.c.bf16 %v1649_v34, %v1641_v33 }
 0x64f   : > { %v1704_v33 = vld [vmem:[%s6525_s9 + $0x5a0] sm:$0xff] }
 0x650   : > { %v1494_v52 = vadd.f32 1e-06, %v1491_v51  ;;  %v1578_v51 = vld [vmem:[%s6525_s9 + $0x1b0] sm:$0xff]  ;;  %v1712_v34 = vld [vmem:[%s6525_s9 + $0x5e0] sm:$0xff] }
 0x652   : > { %3777 = vrsqrt.f32 %v1494_v52  ;;  %v1586_v52 = vld [vmem:[%s6525_s9 + $0x1f0] sm:$0xff] }
 0x65c   : > { %v3778_v62 = vpop.eup %3777 }
 0x65d   : > { %v1497_v63 = vmul.f32 %v3778_v62, %v1493_v59  ;;  %v1496_v1 = vmul.f32 %v3778_v62, %v1492_v55  ;;  %v1595_v55 = vld [vmem:[%s6525_s9 + $0x238] sm:$0xff]  ;;  %v1592_v62 = vld [vmem:[%s6525_s9 + $0x220] sm:$0xff] }
 0x65e   : > { %v1603_v59 = vld [vmem:[%s6525_s9 + $0x278] sm:$0xff] }
 0x65f   : > { %v1510_v19 = vmul.f32 %v1506_v60, %v1497_v63  ;;  %v1509_v7 = vmul.f32 %v1502_v61, %v1496_v1  ;;  %v3378_v60 = vpack.c.bf16 %v1584_v48, %v1576_v47  ;;  %v3442_v61 = vpack.c.bf16 %v1586_v52, %v1578_v51  ;;  %v1600_v63 = vld [vmem:[%s6525_s9 + $0x260] sm:$0xff]  ;;  %v1657_v47 = vld [vmem:[%s6525_s9 + $0x428] sm:$0xff] }
 0x660   : > { %v3444_v1 = vpack.c.bf16 %v1603_v59, %v1595_v55  ;;  %v1665_v48 = vld [vmem:[%s6525_s9 + $0x468] sm:$0xff]  ;;  %v3394_v51 = vpack.c.bf16 %v1648_v42, %v1640_v41 }
 0x661   : > { %v1523_v14 = vadd.f32 %v1519_v0, %v1510_v19  ;;  %v5218_v15 = vadd.f32 %v1515_v3, %v1509_v7  ;;  %v3380_v0 = vpack.c.bf16 %v1601_v54, %v1593_v53  ;;  %v1594_v3 = vld [vmem:[%s6525_s9 + $0x230] sm:$0xff]  ;;  %v1619_v19 = vld [vmem:[%s6525_s9 + $0x2f8] sm:$0xff]  ;;  %v3382_v7 = vpack.c.bf16 %v1600_v63, %v1592_v62  ;;  %v1656_v53 = vld [vmem:[%s6525_s9 + $0x420] sm:$0xff] }
 0x662   : > { %v3446_v8 = vpack.c.bf16 %v1602_v4, %v1594_v3  ;;  %v1664_v54 = vld [vmem:[%s6525_s9 + $0x460] sm:$0xff]  ;;  %v3396_v55 = vpack.c.bf16 %v1665_v48, %v1657_v47  ;;  %v1673_v62 = vld [vmem:[%s6525_s9 + $0x4a8] sm:$0xff] }
 0x663   : > { %1886 = vmatprep.mubr.f32.mxu0 %v1523_v14  ;;  %1957 = vmatprep.mubr.f32.mxu1 %v1523_v14  ;;  %v1681_v63 = vld [vmem:[%s6525_s9 + $0x4e8] sm:$0xff]  ;;  %v3398_v3 = vpack.c.bf16 %v1664_v54, %v1656_v53  ;;  %v1720_v47 = vld [vmem:[%s6525_s9 + $0x620] sm:$0xff] }
 0x664   : > { %1887 = vmatmul.mubr.f32.vlgmr.msra.gmra.mrb[4].mxu0 %v5218_v15  ;;  %1958 = vmatmul.mubr.f32.vlgmr.msra.gmra.mrb[12].mxu1 %v5218_v15  ;;  %v1721_v41 = vld [vmem:[%s6525_s9 + $0x628] sm:$0xff]  ;;  %v1728_v48 = vld [vmem:[%s6525_s9 + $0x660] sm:$0xff] }
 0x665   : > { %3367 = vmatpush1.bf16.msra.mxu0 %v3366_v16  ;;  %3431 = vmatpush1.bf16.msra.mxu1 %v3430_v17  ;;  %v1610_v16 = vld [vmem:[%s6525_s9 + $0x2b0] sm:$0xff]  ;;  %v1729_v42 = vld [vmem:[%s6525_s9 + $0x668] sm:$0xff] }
 0x666   : > { %2028 = vmatprep.mubr.f32.mxu0 %v1523_v14  ;;  %2099 = vmatprep.mubr.f32.mxu1 %v1523_v14  ;;  %v3448_v14 = vpack.c.bf16 %v1619_v19, %v1611_v18  ;;  %v1618_v17 = vld [vmem:[%s6525_s9 + $0x2f0] sm:$0xff]  ;;  %v3400_v18 = vpack.c.bf16 %v1681_v63, %v1673_v62  ;;  %v1737_v53 = vld [vmem:[%s6525_s9 + $0x6a8] sm:$0xff]  ;;  %v1736_v62 = vld [vmem:[%s6525_s9 + $0x6a0] sm:$0xff] }
 0x667   : > { %3369 = vmatprep.subr.bf16.mxu0 %v3368_v26  ;;  %3433 = vmatprep.subr.bf16.mxu1 %v3432_v27  ;;  %v3450_v26 = vpack.c.bf16 %v1618_v17, %v1610_v16  ;;  %v1624_v27 = vld [vmem:[%s6525_s9 + $0x320] sm:$0xff]  ;;  %v3402_v16 = vpack.c.bf16 %v1680_v6, %v1672_v5  ;;  %v1745_v54 = vld [vmem:[%s6525_s9 + $0x6e8] sm:$0xff] }
 0x668   : > { %v3390_v39 = vpack.c.bf16 %v1632_v28, %v1624_v27  ;;  %v1705_v27 = vld [vmem:[%s6525_s9 + $0x5a8] sm:$0xff]  ;;  %v1744_v63 = vld [vmem:[%s6525_s9 + $0x6e0] sm:$0xff] }
 0x669   : > { %3371 = vmatpush1.bf16.msra.mxu0 %v3370_v31  ;;  %3435 = vmatpush1.bf16.msra.mxu1 %v3434_v32  ;;  %v1626_v31 = vld [vmem:[%s6525_s9 + $0x330] sm:$0xff]  ;;  %v1713_v28 = vld [vmem:[%s6525_s9 + $0x5e8] sm:$0xff] }
 0x66a   : > { %3373 = vmatprep.subr.bf16.mxu0 %v3372_v37  ;;  %3437 = vmatprep.subr.bf16.mxu1 %v3436_v38  ;;  %v1634_v32 = vld [vmem:[%s6525_s9 + $0x370] sm:$0xff]  ;;  %v1643_v37 = vld [vmem:[%s6525_s9 + $0x3b8] sm:$0xff]  ;;  %v1753_v5 = vld [vmem:[%s6525_s9 + $0x728] sm:$0xff] }
 0x66b   : > { %v1651_v38 = vld [vmem:[%s6525_s9 + $0x3f8] sm:$0xff]  ;;  %v3454_v40 = vpack.c.bf16 %v1634_v32, %v1626_v31  ;;  %v3406_v31 = vpack.c.bf16 %v1696_v20, %v1688_v21  ;;  %v1761_v6 = vld [vmem:[%s6525_s9 + $0x768] sm:$0xff] }
 0x66c   : > { %v3456_v44 = vpack.c.bf16 %v1651_v38, %v1643_v37  ;;  %v3408_v37 = vpack.c.bf16 %v1713_v28, %v1705_v27  ;;  %v1769_v21 = vld [vmem:[%s6525_s9 + $0x7a8] sm:$0xff]  ;;  %v1768_v27 = vld [vmem:[%s6525_s9 + $0x7a0] sm:$0xff] }
 0x66d   : > { %3375 = vmatpush1.bf16.msra.mxu0 %v3374_v45  ;;  %3439 = vmatpush1.bf16.msra.mxu1 %v3438_v46  ;;  %v1642_v45 = vld [vmem:[%s6525_s9 + $0x3b0] sm:$0xff]  ;;  %v1777_v20 = vld [vmem:[%s6525_s9 + $0x7e8] sm:$0xff] }
 0x66e   : > { %3377 = vmatprep.subr.bf16.mxu0 %v3376_v49  ;;  %3441 = vmatprep.subr.bf16.mxu1 %v3440_v50  ;;  %v1650_v46 = vld [vmem:[%s6525_s9 + $0x3f0] sm:$0xff]  ;;  %v1659_v49 = vld [vmem:[%s6525_s9 + $0x438] sm:$0xff]  ;;  %v3424_v28 = vpack.c.bf16 %v1777_v20, %v1769_v21  ;;  %v2351_v20 = vld [vmem:[%s6527_s11 + $0xe8] sm:$0xff] }
 0x66f   : > { %v1667_v50 = vld [vmem:[%s6525_s9 + $0x478] sm:$0xff]  ;;  %v3458_v52 = vpack.c.bf16 %v1650_v46, %v1642_v45  ;;  %v3410_v45 = vpack.c.bf16 %v1712_v34, %v1704_v33  ;;  %v2323_v33 = vld [vmem:[%s6527_s11 + $0x8] sm:$0xff] }
 0x670   : > { %v3460_v59 = vpack.c.bf16 %v1667_v50, %v1659_v49  ;;  %v3412_v49 = vpack.c.bf16 %v1729_v42, %v1721_v41  ;;  %v2325_v34 = vld [vmem:[%s6527_s11 + $0x18] sm:$0xff]  ;;  %v2324_v41 = vld [vmem:[%s6527_s11 + $0x10] sm:$0xff]  ;;  %v2327_v42 = vld [vmem:[%s6527_s11 + $0x28] sm:$0xff] }
 0x671   : > { %3379 = vmatpush1.bf16.msra.mxu0 %v3378_v60  ;;  %3443 = vmatpush1.bf16.msra.mxu1 %v3442_v61  ;;  %v1658_v60 = vld [vmem:[%s6525_s9 + $0x430] sm:$0xff] }
 0x672   : > { %3381 = vmatprep.subr.bf16.mxu0 %v3380_v0  ;;  %3445 = vmatprep.subr.bf16.mxu1 %v3444_v1  ;;  %v1666_v61 = vld [vmem:[%s6525_s9 + $0x470] sm:$0xff]  ;;  %v1675_v0 = vld [vmem:[%s6525_s9 + $0x4b8] sm:$0xff] }
 0x673   : > { %v1683_v1 = vld [vmem:[%s6525_s9 + $0x4f8] sm:$0xff]  ;;  %v3462_v4 = vpack.c.bf16 %v1666_v61, %v1658_v60  ;;  %v3414_v60 = vpack.c.bf16 %v1728_v48, %v1720_v47  ;;  %v2328_v47 = vld [vmem:[%s6527_s11 + $0x30] sm:$0xff]  ;;  %v2331_v48 = vld [vmem:[%s6527_s11 + $0x48] sm:$0xff] }
 0x674   : > { %v3464_v19 = vpack.c.bf16 %v1683_v1, %v1675_v0  ;;  %v3416_v0 = vpack.c.bf16 %v1745_v54, %v1737_v53  ;;  %v2332_v53 = vld [vmem:[%s6527_s11 + $0x50] sm:$0xff]  ;;  %v2335_v54 = vld [vmem:[%s6527_s11 + $0x68] sm:$0xff] }
 0x675   : > { %3383 = vmatpush1.bf16.msra.mxu0 %v3382_v7  ;;  %3447 = vmatpush1.bf16.msra.mxu1 %v3446_v8  ;;  %v1674_v7 = vld [vmem:[%s6525_s9 + $0x4b0] sm:$0xff] }
 0x676   : > { %3385 = vmatprep.subr.bf16.mxu0 %v3384_v13  ;;  %3449 = vmatprep.subr.bf16.mxu1 %v3448_v14  ;;  %v1682_v8 = vld [vmem:[%s6525_s9 + $0x4f0] sm:$0xff]  ;;  %v1691_v13 = vld [vmem:[%s6525_s9 + $0x538] sm:$0xff] }
 0x677   : > { %v1699_v14 = vld [vmem:[%s6525_s9 + $0x578] sm:$0xff]  ;;  %v3466_v17 = vpack.c.bf16 %v1682_v8, %v1674_v7  ;;  %v3418_v7 = vpack.c.bf16 %v1744_v63, %v1736_v62  ;;  %v2339_v63 = vld [vmem:[%s6527_s11 + $0x88] sm:$0xff] }
 0x678   : > { %v3468_v11 = vpack.c.bf16 %v1699_v14, %v1691_v13  ;;  %v3420_v13 = vpack.c.bf16 %v1761_v6, %v1753_v5  ;;  %v2343_v6 = vld [vmem:[%s6527_s11 + $0xa8] sm:$0xff] }
 0x679   : > { %3387 = vmatpush1.bf16.msra.mxu0 %v3386_v25  ;;  %3451 = vmatpush1.bf16.msra.mxu1 %v3450_v26  ;;  %v1690_v25 = vld [vmem:[%s6525_s9 + $0x530] sm:$0xff] }
 0x67a   : > { %3389 = vmatprep.subr.bf16.mxu0 %v3388_v29  ;;  %3453 = vmatprep.subr.bf16.mxu1 %v3452_v30  ;;  %v1698_v26 = vld [vmem:[%s6525_s9 + $0x570] sm:$0xff]  ;;  %v1707_v29 = vld [vmem:[%s6525_s9 + $0x5b8] sm:$0xff] }
 0x67b   : > { %v1715_v30 = vld [vmem:[%s6525_s9 + $0x5f8] sm:$0xff]  ;;  %v3470_v32 = vpack.c.bf16 %v1698_v26, %v1690_v25  ;;  %v3422_v25 = vpack.c.bf16 %v1760_v12, %v1752_v9  ;;  %v2347_v12 = vld [vmem:[%s6527_s11 + $0xc8] sm:$0xff] }
 0x67c   : > { %v3472_v38 = vpack.c.bf16 %v1715_v30, %v1707_v29  ;;  %v1776_v30 = vld [vmem:[%s6525_s9 + $0x7e0] sm:$0xff] }
 0x67d   : > { %3391 = vmatpush1.bf16.msra.mxu0 %v3390_v39  ;;  %3455 = vmatpush1.bf16.msra.mxu1 %v3454_v40  ;;  %v1706_v39 = vld [vmem:[%s6525_s9 + $0x5b0] sm:$0xff] }
 0x67e   : > { %3393 = vmatprep.subr.bf16.mxu0 %v3392_v43  ;;  %3457 = vmatprep.subr.bf16.mxu1 %v3456_v44  ;;  %v1714_v40 = vld [vmem:[%s6525_s9 + $0x5f0] sm:$0xff]  ;;  %v1723_v43 = vld [vmem:[%s6525_s9 + $0x638] sm:$0xff] }
 0x67f   : > { %v1731_v44 = vld [vmem:[%s6525_s9 + $0x678] sm:$0xff]  ;;  %v3474_v46 = vpack.c.bf16 %v1714_v40, %v1706_v39  ;;  %v3492_v39 = vpack.c.bf16 %v2325_v34, %v2323_v33  ;;  %v2322_v40 = vld [vmem:[%s6527_s11] sm:$0xff]  ;;  %v2359_v34 = vld [vmem:[%s6527_s11 + $0x128] sm:$0xff] }
 0x680   : > { %v3476_v50 = vpack.c.bf16 %v1731_v44, %v1723_v43  ;;  %v2329_v43 = vld [vmem:[%s6527_s11 + $0x38] sm:$0xff]  ;;  %v3494_v44 = vpack.c.bf16 %v2324_v41, %v2322_v40  ;;  %v2360_v40 = vld [vmem:[%s6527_s11 + $0x130] sm:$0xff] }
 0x681   : > { %3395 = vmatpush1.bf16.msra.mxu0 %v3394_v51  ;;  %3459 = vmatpush1.bf16.msra.mxu1 %v3458_v52  ;;  %v1722_v51 = vld [vmem:[%s6525_s9 + $0x630] sm:$0xff] }
 0x682   : > { %3397 = vmatprep.subr.bf16.mxu0 %v3396_v55  ;;  %3461 = vmatprep.subr.bf16.mxu1 %v3460_v59  ;;  %v1730_v52 = vld [vmem:[%s6525_s9 + $0x670] sm:$0xff]  ;;  %v1739_v55 = vld [vmem:[%s6525_s9 + $0x6b8] sm:$0xff] }
 0x683   : > { %v1747_v59 = vld [vmem:[%s6525_s9 + $0x6f8] sm:$0xff]  ;;  %v3478_v61 = vpack.c.bf16 %v1730_v52, %v1722_v51  ;;  %v2330_v52 = vld [vmem:[%s6527_s11 + $0x40] sm:$0xff] }
 0x684   : > { %v3480_v1 = vpack.c.bf16 %v1747_v59, %v1739_v55  ;;  %v3502_v55 = vpack.c.bf16 %v2332_v53, %v2330_v52  ;;  %v2368_v52 = vld [vmem:[%s6527_s11 + $0x170] sm:$0xff] }
 0x685   : > { %3399 = vmatpush1.bf16.msra.mxu0 %v3398_v3  ;;  %3463 = vmatpush1.bf16.msra.mxu1 %v3462_v4  ;;  %v1738_v3 = vld [vmem:[%s6525_s9 + $0x6b0] sm:$0xff] }
 0x686   : > { %3401 = vmatprep.subr.bf16.mxu0 %v3400_v18  ;;  %3465 = vmatprep.subr.bf16.mxu1 %v3464_v19  ;;  %v1746_v4 = vld [vmem:[%s6525_s9 + $0x6f0] sm:$0xff]  ;;  %v1755_v18 = vld [vmem:[%s6525_s9 + $0x738] sm:$0xff] }
 0x687   : > { %v1763_v19 = vld [vmem:[%s6525_s9 + $0x778] sm:$0xff]  ;;  %v3482_v8 = vpack.c.bf16 %v1746_v4, %v1738_v3  ;;  %v2338_v3 = vld [vmem:[%s6527_s11 + $0x80] sm:$0xff]  ;;  %v2340_v4 = vld [vmem:[%s6527_s11 + $0x90] sm:$0xff] }
 0x688   : > { %v3484_v14 = vpack.c.bf16 %v1763_v19, %v1755_v18  ;;  %v3510_v5 = vpack.c.bf16 %v2340_v4, %v2338_v3  ;;  %v2345_v18 = vld [vmem:[%s6527_s11 + $0xb8] sm:$0xff]  ;;  %v2376_v3 = vld [vmem:[%s6527_s11 + $0x1b0] sm:$0xff] }
 0x689   : > { %3403 = vmatpush1.bf16.msra.mxu0 %v3402_v16  ;;  %3467 = vmatpush1.bf16.msra.mxu1 %v3466_v17  ;;  %v1754_v16 = vld [vmem:[%s6525_s9 + $0x730] sm:$0xff]  ;;  %v3512_v19 = vpack.c.bf16 %v2345_v18, %v2343_v6  ;;  %v2381_v6 = vld [vmem:[%s6527_s11 + $0x1d8] sm:$0xff] }
 0x68a   : > { %3405 = vmatprep.subr.bf16.mxu0 %v3404_v22  ;;  %3469 = vmatprep.subr.bf16.mxu1 %v3468_v11  ;;  %v1762_v17 = vld [vmem:[%s6525_s9 + $0x770] sm:$0xff]  ;;  %v1771_v22 = vld [vmem:[%s6525_s9 + $0x7b8] sm:$0xff] }
 0x68b   : > { %v1779_v11 = vld [vmem:[%s6525_s9 + $0x7f8] sm:$0xff]  ;;  %v3486_v26 = vpack.c.bf16 %v1762_v17, %v1754_v16  ;;  %v2346_v16 = vld [vmem:[%s6527_s11 + $0xc0] sm:$0xff]  ;;  %v2348_v17 = vld [vmem:[%s6527_s11 + $0xd0] sm:$0xff] }
 0x68c   : > { %v3488_v29 = vpack.c.bf16 %v1779_v11, %v1771_v22  ;;  %v3518_v21 = vpack.c.bf16 %v2348_v17, %v2346_v16  ;;  %v2353_v22 = vld [vmem:[%s6527_s11 + $0xf8] sm:$0xff]  ;;  %v2384_v16 = vld [vmem:[%s6527_s11 + $0x1f0] sm:$0xff] }
 0x68d   : > { %3407 = vmatpush1.bf16.msra.mxu0 %v3406_v31  ;;  %3471 = vmatpush1.bf16.msra.mxu1 %v3470_v32  ;;  %v1770_v31 = vld [vmem:[%s6525_s9 + $0x7b0] sm:$0xff]  ;;  %v3520_v11 = vpack.c.bf16 %v2353_v22, %v2351_v20  ;;  %v2389_v20 = vld [vmem:[%s6527_s11 + $0x218] sm:$0xff] }
 0x68e   : > { %3409 = vmatprep.subr.bf16.mxu0 %v3408_v37  ;;  %3473 = vmatprep.subr.bf16.mxu1 %v3472_v38  ;;  %v1778_v32 = vld [vmem:[%s6525_s9 + $0x7f0] sm:$0xff]  ;;  %v3426_v37 = vpack.c.bf16 %v1776_v30, %v1768_v27 }
 0x68f   : > { %v3490_v38 = vpack.c.bf16 %v1778_v32, %v1770_v31  ;;  %v2354_v31 = vld [vmem:[%s6527_s11 + $0x100] sm:$0xff]  ;;  %v2356_v32 = vld [vmem:[%s6527_s11 + $0x110] sm:$0xff] }
 0x690   : > { %v3526_v33 = vpack.c.bf16 %v2356_v32, %v2354_v31 }
 0x691   : > { %3411 = vmatpush1.bf16.msra.mxu0 %v3410_v45  ;;  %3475 = vmatpush1.bf16.msra.mxu1 %v3474_v46  ;;  %v3496_v45 = vpack.c.bf16 %v2329_v43, %v2327_v42  ;;  %v2326_v46 = vld [vmem:[%s6527_s11 + $0x20] sm:$0xff]  ;;  %v2363_v42 = vld [vmem:[%s6527_s11 + $0x148] sm:$0xff]  ;;  %v2365_v43 = vld [vmem:[%s6527_s11 + $0x158] sm:$0xff] }
 0x692   : > { %3413 = vmatprep.subr.bf16.mxu0 %v3412_v49  ;;  %3477 = vmatprep.subr.bf16.mxu1 %v3476_v50  ;;  %v2333_v49 = vld [vmem:[%s6527_s11 + $0x58] sm:$0xff]  ;;  %v3498_v50 = vpack.c.bf16 %v2328_v47, %v2326_v46  ;;  %v2364_v46 = vld [vmem:[%s6527_s11 + $0x150] sm:$0xff] }
 0x693   : > { %v3500_v51 = vpack.c.bf16 %v2333_v49, %v2331_v48  ;;  %v2367_v48 = vld [vmem:[%s6527_s11 + $0x168] sm:$0xff]  ;;  %v2369_v49 = vld [vmem:[%s6527_s11 + $0x178] sm:$0xff] }
 0x695   : > { %3415 = vmatpush1.bf16.msra.mxu0 %v3414_v60  ;;  %3479 = vmatpush1.bf16.msra.mxu1 %v3478_v61  ;;  %v2334_v60 = vld [vmem:[%s6527_s11 + $0x60] sm:$0xff]  ;;  %v2336_v61 = vld [vmem:[%s6527_s11 + $0x70] sm:$0xff] }
 0x696   : > { %3417 = vmatprep.subr.bf16.mxu0 %v3416_v0  ;;  %3481 = vmatprep.subr.bf16.mxu1 %v3480_v1  ;;  %v3506_v62 = vpack.c.bf16 %v2336_v61, %v2334_v60  ;;  %v2341_v0 = vld [vmem:[%s6527_s11 + $0x98] sm:$0xff]  ;;  %v2372_v60 = vld [vmem:[%s6527_s11 + $0x190] sm:$0xff] }
 0x697   : > { %v3508_v1 = vpack.c.bf16 %v2341_v0, %v2339_v63  ;;  %v2377_v63 = vld [vmem:[%s6527_s11 + $0x1b8] sm:$0xff] }
 0x699   : > { %3419 = vmatpush1.bf16.msra.mxu0 %v3418_v7  ;;  %3483 = vmatpush1.bf16.msra.mxu1 %v3482_v8  ;;  %v2342_v7 = vld [vmem:[%s6527_s11 + $0xa0] sm:$0xff]  ;;  %v2344_v8 = vld [vmem:[%s6527_s11 + $0xb0] sm:$0xff] }
 0x69a   : > { %3421 = vmatprep.subr.bf16.mxu0 %v3420_v13  ;;  %3485 = vmatprep.subr.bf16.mxu1 %v3484_v14  ;;  %v3514_v9 = vpack.c.bf16 %v2344_v8, %v2342_v7  ;;  %v2349_v13 = vld [vmem:[%s6527_s11 + $0xd8] sm:$0xff]  ;;  %v2380_v7 = vld [vmem:[%s6527_s11 + $0x1d0] sm:$0xff] }
 0x69b   : > { %v3516_v14 = vpack.c.bf16 %v2349_v13, %v2347_v12  ;;  %v2385_v12 = vld [vmem:[%s6527_s11 + $0x1f8] sm:$0xff]  ;;  %v2382_v13 = vld [vmem:[%s6527_s11 + $0x1e0] sm:$0xff] }
 0x69c   : > { %v3554_v17 = vpack.c.bf16 %v2384_v16, %v2382_v13 }
 0x69d   : > { %3423 = vmatpush1.bf16.msra.mxu0 %v3422_v25  ;;  %3487 = vmatpush1.bf16.msra.mxu1 %v3486_v26  ;;  %v2350_v25 = vld [vmem:[%s6527_s11 + $0xe0] sm:$0xff]  ;;  %v2352_v26 = vld [vmem:[%s6527_s11 + $0xf0] sm:$0xff] }
 0x69e   : > { %3425 = vmatprep.subr.bf16.mxu0 %v3424_v28  ;;  %3489 = vmatprep.subr.bf16.mxu1 %v3488_v29  ;;  %v3522_v27 = vpack.c.bf16 %v2352_v26, %v2350_v25  ;;  %v2355_v28 = vld [vmem:[%s6527_s11 + $0x108] sm:$0xff]  ;;  %v2357_v29 = vld [vmem:[%s6527_s11 + $0x118] sm:$0xff] }
 0x69f   : > { %v3524_v30 = vpack.c.bf16 %v2357_v29, %v2355_v28 }
 0x6a1   : > { %3427 = vmatpush1.bf16.msra.mxu0 %v3426_v37  ;;  %3491 = vmatpush1.bf16.msra.mxu1 %v3490_v38  ;;  %v2361_v37 = vld [vmem:[%s6527_s11 + $0x138] sm:$0xff] }
 0x6a2   : > { %3493 = vmatprep.subr.bf16.mxu0 %v3492_v39  ;;  %v3528_v38 = vpack.c.bf16 %v2361_v37, %v2359_v34  ;;  %v2358_v39 = vld [vmem:[%s6527_s11 + $0x120] sm:$0xff] }
 0x6a3   : > { %v3530_v41 = vpack.c.bf16 %v2360_v40, %v2358_v39 }
 0x6a4   : > { %2029 = vmatmul.mubr.f32.vlgmr.msra.gmra.mrb[6].mxu0 %v5218_v15  ;;  %2100 = vmatmul.mubr.f32.vlgmr.msra.gmra.mrb[14].mxu1 %v5218_v15  ;;  %v2337_v15 = vld [vmem:[%s6527_s11 + $0x78] sm:$0xff] }
 0x6a5   : > { %3495 = vmatpush1.bf16.msra.mxu0 %v3494_v44  ;;  %v3504_v59 = vpack.c.bf16 %v2337_v15, %v2335_v54  ;;  %v3532_v44 = vpack.c.bf16 %v2365_v43, %v2363_v42  ;;  %v2371_v54 = vld [vmem:[%s6527_s11 + $0x188] sm:$0xff]  ;;  %v2373_v15 = vld [vmem:[%s6527_s11 + $0x198] sm:$0xff] }
 0x6a6   : > { %3497 = vmatprep.subr.bf16.mxu0 %v3496_v45  ;;  %v2362_v45 = vld [vmem:[%s6527_s11 + $0x140] sm:$0xff] }
 0x6a7   : > { %v3534_v47 = vpack.c.bf16 %v2364_v46, %v2362_v45 }
 0x6a9   : > { %3499 = vmatpush1.bf16.msra.mxu0 %v3498_v50  ;;  %v3536_v50 = vpack.c.bf16 %v2369_v49, %v2367_v48 }
 0x6aa   : > { %3501 = vmatprep.subr.bf16.mxu0 %v3500_v51  ;;  %v2366_v51 = vld [vmem:[%s6527_s11 + $0x160] sm:$0xff] }
 0x6ab   : > { %v3538_v53 = vpack.c.bf16 %v2368_v52, %v2366_v51 }
 0x6ad   : > { %3503 = vmatpush1.bf16.msra.mxu0 %v3502_v55  ;;  %v3540_v55 = vpack.c.bf16 %v2373_v15, %v2371_v54 }
 0x6ae   : > { %3505 = vmatprep.subr.bf16.mxu0 %v3504_v59  ;;  %v2370_v59 = vld [vmem:[%s6527_s11 + $0x180] sm:$0xff] }
 0x6af   : > { %v3542_v61 = vpack.c.bf16 %v2372_v60, %v2370_v59 }
 0x6b1   : > { %3507 = vmatpush1.bf16.msra.mxu0 %v3506_v62  ;;  %v2375_v62 = vld [vmem:[%s6527_s11 + $0x1a8] sm:$0xff] }
 0x6b2   : > { %3509 = vmatprep.subr.bf16.mxu0 %v3508_v1  ;;  %v3544_v0 = vpack.c.bf16 %v2377_v63, %v2375_v62  ;;  %v2374_v1 = vld [vmem:[%s6527_s11 + $0x1a0] sm:$0xff] }
 0x6b3   : > { %v3546_v4 = vpack.c.bf16 %v2376_v3, %v2374_v1 }
 0x6b5   : > { %3511 = vmatpush1.bf16.msra.mxu0 %v3510_v5  ;;  %v2379_v5 = vld [vmem:[%s6527_s11 + $0x1c8] sm:$0xff] }
 0x6b6   : > { %3513 = vmatprep.subr.bf16.mxu0 %v3512_v19  ;;  %v3548_v18 = vpack.c.bf16 %v2381_v6, %v2379_v5  ;;  %v2378_v19 = vld [vmem:[%s6527_s11 + $0x1c0] sm:$0xff] }
 0x6b7   : > { %v3550_v8 = vpack.c.bf16 %v2380_v7, %v2378_v19 }
 0x6b9   : > { %3515 = vmatpush1.bf16.msra.mxu0 %v3514_v9  ;;  %v2383_v9 = vld [vmem:[%s6527_s11 + $0x1e8] sm:$0xff] }
 0x6ba   : > { %3517 = vmatprep.subr.bf16.mxu0 %v3516_v14  ;;  %v3552_v14 = vpack.c.bf16 %v2385_v12, %v2383_v9 }
 0x6bd   : > { %3519 = vmatpush1.bf16.msra.mxu0 %v3518_v21  ;;  %v2387_v21 = vld [vmem:[%s6527_s11 + $0x208] sm:$0xff] }
 0x6be   : > { %3521 = vmatprep.subr.bf16.mxu0 %v3520_v11  ;;  %v3556_v22 = vpack.c.bf16 %v2389_v20, %v2387_v21  ;;  %v5773_v11 = vld [vmem:[%s6526_s10] sm:$0xff] }
 0x6bf   : > { %v1785_v25 = vrot.slane %v5773_v11, %v4132_v58  ;;  %v1789_v26 = vrot.slane %v5773_v11, %v4129_v57  ;;  %v1793_v1 = vrot.slane %v5773_v11, %v700_v23 }
 0x6c1   : > { %3523 = vmatpush1.bf16.msra.mxu0 %v3522_v27  ;;  %v1797_v27 = vrot.slane %v5773_v11, %v704_v24 }
 0x6c2   : > { %3525 = vmatprep.subr.bf16.mxu0 %v3524_v30 }
 0x6c5   : > { %3527 = vmatpush1.bf16.msra.mxu0 %v3526_v33 }
 0x6c6   : > { %3529 = vmatprep.subr.bf16.mxu0 %v3528_v38 }
 0x6c9   : > { %3531 = vmatpush1.bf16.msra.mxu0 %v3530_v41 }
 0x6ca   : > { %3533 = vmatprep.subr.bf16.mxu0 %v3532_v44 }
 0x6cd   : > { %3535 = vmatpush1.bf16.msra.mxu0 %v3534_v47 }
 0x6ce   : > { %3537 = vmatprep.subr.bf16.mxu0 %v3536_v50 }
 0x6d1   : > { %3539 = vmatpush1.bf16.msra.mxu0 %v3538_v53 }
 0x6d2   : > { %3541 = vmatprep.subr.bf16.mxu0 %v3540_v55 }
 0x6d5   : > { %3543 = vmatpush1.bf16.msra.mxu0 %v3542_v61 }
 0x6d6   : > { %3545 = vmatprep.subr.bf16.mxu0 %v3544_v0 }
 0x6d9   : > { %3547 = vmatpush1.bf16.msra.mxu0 %v3546_v4 }
 0x6da   : > { %3549 = vmatprep.subr.bf16.mxu0 %v3548_v18 }
 0x6dd   : > { %3551 = vmatpush1.bf16.msra.mxu0 %v3550_v8 }
 0x6de   : > { %3553 = vmatprep.subr.bf16.mxu0 %v3552_v14 }
 0x6e1   : > { %3555 = vmatpush1.bf16.msra.mxu0 %v3554_v17 }
 0x6e2   : > { %3557 = vmatprep.subr.bf16.mxu0 %v3556_v22 }
 0x737   : > { %v1888_v28 = vpop.f32.mrb[4].mxu0  ;;  %v1959_v29 = vpop.f32.mrb[12].mxu1 }
 0x738   : > { %v5782_v30 = vadd.f32 %v1888_v28, %v1785_v25  ;;  %v1890_v31 = vpop.f32.mrb[5].mxu0  ;;  %v1961_v32 = vpop.f32.mrb[13].mxu1  ;;  %v5803_v9 = vadd.f32 %v1959_v29, %v1793_v1 }
 0x739   : > { %v5784_v33 = vadd.f32 %v1890_v31, %v1789_v26  ;;  %v5786_v34 = vadd.f32 %v1961_v32, %v1797_v27 }
 0x73a   : > { %v5789_v37 = vmul.f32 0.70710677, %v5782_v30  ;;  %v5806_v23 = vmul.f32 0.70710677, %v5803_v9  ;;  %v2106_v1 = vmul.f32 0.5, %v5782_v30  ;;  %v2395_v30 = vld [vmem:[%s6527_s11 + $0x248] sm:$0xff] }
 0x73b   : > { %v5792_v38 = vmul.f32 0.70710677, %v5784_v33  ;;  %v5797_v40 = vmul.f32 0.70710677, %v5786_v34 }
 0x73c   : > { %v2138_v39 = vand.u32 2147483647, %v5789_v37  ;;  %vm2122_vm4 = vcmp.ge.f32.partialorder %v5789_v37, 0.0  ;;  %v5810_v31 = vand.u32 2147483647, %v5806_v23  ;;  %vm2124_vm7 = vcmp.ge.f32.partialorder %v5806_v23, 0.0 }
 0x73d   : > { %v2139_v24 = vand.u32 2147483647, %v5792_v38  ;;  %v2141_v44 = vand.u32 2147483647, %v5797_v40  ;;  %vm2123_vm5 = vcmp.ge.f32.partialorder %v5792_v38, 0.0  ;;  %vm2125_vm6 = vcmp.ge.f32.partialorder %v5797_v40, 0.0 }
 0x73e   : > { %v2146_v41 = vmul.f32 0.3275911, %v2138_v39  ;;  %v2250_v48 = vsub.f32 0.0, %v2138_v39  ;;  %v2388_v38 = vld [vmem:[%s6527_s11 + $0x210] sm:$0xff]  ;;  %v2107_v40 = vmul.f32 0.5, %v5784_v33 }
 0x73f   : > { %v2147_v42 = vmul.f32 0.3275911, %v2139_v24  ;;  %v2149_v46 = vmul.f32 0.3275911, %v2141_v44  ;;  %v2251_v51 = vsub.f32 0.0, %v2139_v24  ;;  %v2253_v53 = vsub.f32 0.0, %v2141_v44 }
 0x740   : > { %v2154_v43 = vadd.f32 1.0, %v2146_v41  ;;  %v2258_v50 = vmul.f32 %v2250_v48, %v2138_v39 }
 0x741   : > { %v2155_v45 = vadd.f32 1.0, %v2147_v42  ;;  %v2157_v47 = vadd.f32 1.0, %v2149_v46  ;;  %v2259_v59 = vmul.f32 %v2251_v51, %v2139_v24  ;;  %v2261_v63 = vmul.f32 %v2253_v53, %v2141_v44 }
 0x742   : > { %3779 = vrcp.f32 %v2154_v43  ;;  %v2266_v55 = vmul.f32 1.442695, %v2258_v50  ;;  %v3823_v44 = vmov -1.0   ;;  %v2148_v46 = vmul.f32 0.3275911, %v5810_v31 }
 0x743   : > { %3781 = vrcp.f32 %v2155_v45  ;;  %v2268_v5 = vmul.f32 1.442695, %v2259_v59  ;;  %v2272_v7 = vmul.f32 1.442695, %v2261_v63  ;;  %v2130_v45 = vsel %vm2122_vm4, 1.0, %v3823_v44  ;;  %v2391_v63 = vld [vmem:[%s6527_s11 + $0x228] sm:$0xff] }
 0x744   : > { %3783 = vrcp.f32 %v2157_v47  ;;  %v2156_v53 = vadd.f32 1.0, %v2148_v46  ;;  %v2402_v46 = vld [vmem:[%s6527_s11 + $0x280] sm:$0xff]  ;;  %v2132_v23 = vsel %vm2124_vm7, 1.0, %v3823_v44 }
 0x745   : > { %3785 = vpow2.f32 %v2266_v55 }
 0x746   : > { %3787 = vpow2.f32 %v2268_v5 }
 0x747   : > { %3789 = vpow2.f32 %v2272_v7  ;;  %v2392_v7 = vld [vmem:[%s6527_s11 + $0x230] sm:$0xff] }
 0x748   : > { %3791 = vrcp.f32 %v2156_v53 }
 0x74c   : > { %v3780_v49 = vpop.eup %3779 }
 0x74d   : > { %v2178_v52 = vmul.f32 1.0614054, %v3780_v49  ;;  %v3782_v15 = vpop.eup %3781 }
 0x74e   : > { %v2179_v61 = vmul.f32 1.0614054, %v3782_v15  ;;  %v3784_v62 = vpop.eup %3783 }
 0x74f   : > { %v2186_v54 = vadd.f32 -1.4531521, %v2178_v52  ;;  %v2181_v4 = vmul.f32 1.0614054, %v3784_v62  ;;  %v3786_v28 = vpop.eup %3785  ;;  %v2131_v52 = vsel %vm2123_vm5, 1.0, %v3823_v44 }
 0x750   : > { %v2187_v3 = vadd.f32 -1.4531521, %v2179_v61  ;;  %v3788_v43 = vpop.eup %3787 }
 0x751   : > { %v2194_v60 = vmul.f32 %v3780_v49, %v2186_v54  ;;  %v2189_v19 = vadd.f32 -1.4531521, %v2181_v4  ;;  %v3790_v37 = vpop.eup %3789  ;;  %v2109_v4 = vmul.f32 0.5, %v5786_v34  ;;  %v2397_v34 = vld [vmem:[%s6527_s11 + $0x258] sm:$0xff] }
 0x752   : > { %v2195_v18 = vmul.f32 %v3782_v15, %v2187_v3 }
 0x753   : > { %v2202_v0 = vadd.f32 1.4214138, %v2194_v60  ;;  %v2197_v13 = vmul.f32 %v3784_v62, %v2189_v19  ;;  %v2133_v60 = vsel %vm2125_vm6, 1.0, %v3823_v44  ;;  %v2390_v19 = vld [vmem:[%s6527_s11 + $0x220] sm:$0xff] }
 0x754   : > { %v2203_v12 = vadd.f32 1.4214138, %v2195_v18 }
 0x755   : > { %v2210_v6 = vmul.f32 %v3780_v49, %v2202_v0  ;;  %v2205_v17 = vadd.f32 1.4214138, %v2197_v13  ;;  %v2393_v0 = vld [vmem:[%s6527_s11 + $0x238] sm:$0xff]  ;;  %v3564_v13 = vpack.c.bf16 %v2397_v34, %v2395_v30 }
 0x756   : > { %v2211_v16 = vmul.f32 %v3782_v15, %v2203_v12  ;;  %v3560_v33 = vpack.c.bf16 %v2393_v0, %v2391_v63  ;;  %v3562_v12 = vpack.c.bf16 %v2392_v7, %v2390_v19  ;;  %v2410_v63 = vld [vmem:[%s6527_s11 + $0x2c0] sm:$0xff]  ;;  %v2412_v0 = vld [vmem:[%s6527_s11 + $0x2d0] sm:$0xff]  ;;  %v2252_v7 = vsub.f32 0.0, %v5810_v31  ;;  %v2421_v30 = vld [vmem:[%s6527_s11 + $0x318] sm:$0xff] }
 0x757   : > { %v2218_v8 = vadd.f32 -0.28449672, %v2210_v6  ;;  %v2213_v22 = vmul.f32 %v3784_v62, %v2205_v17  ;;  %v2399_v17 = vld [vmem:[%s6527_s11 + $0x268] sm:$0xff]  ;;  %v2416_v19 = vld [vmem:[%s6527_s11 + $0x2f0] sm:$0xff] }
 0x758   : > { %v2219_v20 = vadd.f32 -0.28449672, %v2211_v16  ;;  %v2396_v16 = vld [vmem:[%s6527_s11 + $0x250] sm:$0xff] }
 0x759   : > { %v2226_v14 = vmul.f32 %v3780_v49, %v2218_v8  ;;  %v2221_v27 = vadd.f32 -0.28449672, %v2213_v22 }
 0x75a   : > { %v2227_v26 = vmul.f32 %v3782_v15, %v2219_v20 }
 0x75b   : > { %v2234_v21 = vadd.f32 0.2548296, %v2226_v14  ;;  %v2229_v39 = vmul.f32 %v3784_v62, %v2221_v27  ;;  %v2394_v14 = vld [vmem:[%s6527_s11 + $0x240] sm:$0xff]  ;;  %v5863_v27 = vpop.eup %3791 }
 0x75c   : > { %v2235_v32 = vadd.f32 0.2548296, %v2227_v26  ;;  %v3566_v20 = vpack.c.bf16 %v2396_v16, %v2394_v14  ;;  %v2400_v26 = vld [vmem:[%s6527_s11 + $0x270] sm:$0xff]  ;;  %v2418_v14 = vld [vmem:[%s6527_s11 + $0x300] sm:$0xff] }
 0x75d   : > { %v2242_v25 = vmul.f32 %v3780_v49, %v2234_v21  ;;  %v2237_v42 = vadd.f32 0.2548296, %v2229_v39  ;;  %v2401_v21 = vld [vmem:[%s6527_s11 + $0x278] sm:$0xff]  ;;  %v2420_v16 = vld [vmem:[%s6527_s11 + $0x310] sm:$0xff] }
 0x75e   : > { %v2243_v41 = vmul.f32 %v3782_v15, %v2235_v32  ;;  %v2386_v15 = vld [vmem:[%s6527_s11 + $0x200] sm:$0xff]  ;;  %v3568_v22 = vpack.c.bf16 %v2401_v21, %v2399_v17  ;;  %v2405_v32 = vld [vmem:[%s6527_s11 + $0x298] sm:$0xff]  ;;  %v2260_v17 = vmul.f32 %v2252_v7, %v5810_v31  ;;  %v2423_v21 = vld [vmem:[%s6527_s11 + $0x328] sm:$0xff] }
 0x75f   : > { %v2282_v29 = vmul.f32 %v3786_v28, %v2242_v25  ;;  %v2245_v48 = vmul.f32 %v3784_v62, %v2237_v42  ;;  %v3558_v3 = vpack.c.bf16 %v2388_v38, %v2386_v15  ;;  %v2398_v25 = vld [vmem:[%s6527_s11 + $0x260] sm:$0xff]  ;;  %v1805_v28 = vrot.slane %v5773_v11, %v712_v36  ;;  %v2408_v15 = vld [vmem:[%s6527_s11 + $0x2b0] sm:$0xff] }
 0x760   : > { %v2283_v47 = vmul.f32 %v3788_v43, %v2243_v41  ;;  %v3570_v41 = vpack.c.bf16 %v2400_v26, %v2398_v25  ;;  %v2180_v42 = vmul.f32 1.0614054, %v5863_v27  ;;  %v2424_v31 = vld [vmem:[%s6527_s11 + $0x330] sm:$0xff]  ;;  %v2434_v7 = vld [vmem:[%s6527_s11 + $0x380] sm:$0xff] }
 0x761   : > { %v2290_v24 = vsub.f32 1.0, %v2282_v29  ;;  %v2285_v51 = vmul.f32 %v3790_v37, %v2245_v48  ;;  %v2403_v29 = vld [vmem:[%s6527_s11 + $0x288] sm:$0xff] }
 0x762   : > { %v2291_v50 = vsub.f32 1.0, %v2283_v47  ;;  %v3572_v36 = vpack.c.bf16 %v2405_v32, %v2403_v29  ;;  %v2404_v47 = vld [vmem:[%s6527_s11 + $0x290] sm:$0xff]  ;;  %v2407_v37 = vld [vmem:[%s6527_s11 + $0x2a8] sm:$0xff]  ;;  %v2422_v29 = vld [vmem:[%s6527_s11 + $0x320] sm:$0xff]  ;;  %v2270_v32 = vmul.f32 1.442695, %v2260_v17 }
 0x763   : > { %v2298_v49 = vmul.f32 %v2290_v24, %v2130_v45  ;;  %v2293_v55 = vsub.f32 1.0, %v2285_v51  ;;  %v3574_v51 = vpack.c.bf16 %v2404_v47, %v2402_v46 }
 0x764   : > { %v2299_v54 = vmul.f32 %v2291_v50, %v2131_v52  ;;  %v2188_v52 = vadd.f32 -1.4531521, %v2180_v42  ;;  %v2429_v42 = vld [vmem:[%s6527_s11 + $0x358] sm:$0xff] }
 0x765   : > { %v2306_v59 = vadd.f32 1.0, %v2298_v49  ;;  %v2301_v62 = vmul.f32 %v2293_v55, %v2133_v60  ;;  %v2409_v49 = vld [vmem:[%s6527_s11 + $0x2b8] sm:$0xff]  ;;  %v2411_v55 = vld [vmem:[%s6527_s11 + $0x2c8] sm:$0xff] }
 0x766   : > { %v2307_v61 = vadd.f32 1.0, %v2299_v54  ;;  %v3576_v53 = vpack.c.bf16 %v2409_v49, %v2407_v37  ;;  %v2406_v54 = vld [vmem:[%s6527_s11 + $0x2a0] sm:$0xff]  ;;  %v1812_v37 = vsub.s32 7, %v4126_v56 }
 0x767   : > { %v2309_v6 = vadd.f32 1.0, %v2301_v62  ;;  %v2314_v18 = vmul.f32 %v2306_v59, %v2106_v1  ;;  %v2413_v59 = vld [vmem:[%s6527_s11 + $0x2d8] sm:$0xff]  ;;  %v2415_v1 = vld [vmem:[%s6527_s11 + $0x2e8] sm:$0xff] }
 0x768   : > { %v2315_v5 = vmul.f32 %v2307_v61, %v2107_v40  ;;  %v3578_v40 = vpack.c.bf16 %v2408_v15, %v2406_v54  ;;  %v2196_v61 = vmul.f32 %v5863_v27, %v2188_v52  ;;  %v3580_v62 = vpack.c.bf16 %v2413_v59, %v2411_v55  ;;  %v2428_v52 = vld [vmem:[%s6527_s11 + $0x350] sm:$0xff]  ;;  %v2433_v54 = vld [vmem:[%s6527_s11 + $0x378] sm:$0xff] }
 0x769   : > { %v2317_v8 = vmul.f32 %v2309_v6, %v2109_v4 }
 0x76a   : > { %2642 = vmatprep.mubr.f32.mxu0 %v2315_v5  ;;  %v3582_v5 = vpack.c.bf16 %v2412_v0, %v2410_v63  ;;  %v2204_v6 = vadd.f32 1.4214138, %v2196_v61  ;;  %v1813_v61 = vrot.slane %v5773_v11, %v1812_v37  ;;  %v2430_v63 = vld [vmem:[%s6527_s11 + $0x360] sm:$0xff]  ;;  %v2432_v0 = vld [vmem:[%s6527_s11 + $0x370] sm:$0xff]  ;;  %v2449_v37 = vld [vmem:[%s6527_s11 + $0x3f8] sm:$0xff] }
 0x76b   : > { %2643 = vmatmul.mubr.f32.vlgmr.msra.gmra.mrb[8].mxu0 %v2314_v18 }
 0x76c   : > { %3559 = vmatpush1.bf16.msra.mxu0 %v3558_v3  ;;  %2713 = vmatprep.mubr.f32.mxu0 %v2317_v8  ;;  %v2417_v3 = vld [vmem:[%s6527_s11 + $0x2f8] sm:$0xff]  ;;  %v2419_v8 = vld [vmem:[%s6527_s11 + $0x308] sm:$0xff] }
 0x76d   : > { %3561 = vmatprep.subr.bf16.mxu0 %v3560_v33  ;;  %v3584_v18 = vpack.c.bf16 %v2417_v3, %v2415_v1  ;;  %v2414_v33 = vld [vmem:[%s6527_s11 + $0x2e0] sm:$0xff]  ;;  %v2437_v1 = vld [vmem:[%s6527_s11 + $0x398] sm:$0xff] }
 0x76e   : > { %v3586_v34 = vpack.c.bf16 %v2416_v19, %v2414_v33 }
 0x770   : > { %3563 = vmatpush1.bf16.msra.mxu0 %v3562_v12  ;;  %v2212_v12 = vmul.f32 %v5863_v27, %v2204_v6 }
 0x771   : > { %3565 = vmatprep.subr.bf16.mxu0 %v3564_v13  ;;  %v3588_v13 = vpack.c.bf16 %v2421_v30, %v2419_v8  ;;  %v2439_v8 = vld [vmem:[%s6527_s11 + $0x3a8] sm:$0xff] }
 0x772   : > { %v2220_v25 = vadd.f32 -0.28449672, %v2212_v12 }
 0x774   : > { %3567 = vmatpush1.bf16.msra.mxu0 %v3566_v20  ;;  %v2425_v20 = vld [vmem:[%s6527_s11 + $0x338] sm:$0xff]  ;;  %v2228_v46 = vmul.f32 %v5863_v27, %v2220_v25 }
 0x775   : > { %3569 = vmatprep.subr.bf16.mxu0 %v3568_v22  ;;  %v3590_v22 = vpack.c.bf16 %v2420_v16, %v2418_v14  ;;  %v2445_v25 = vld [vmem:[%s6527_s11 + $0x3d8] sm:$0xff] }
 0x777   : > { %v5874_v39 = vpop.f32.mrb[6].mxu0  ;;  %v5876_v24 = vpop.f32.mrb[14].mxu1 }
 0x778   : > { %v2032_v43 = vpop.f32.mrb[7].mxu0  ;;  %v5879_v45 = vpop.f32.mrb[15].mxu1  ;;  %3571 = vmatpush1.bf16.msra.mxu0 %v3570_v41  ;;  %v2427_v41 = vld [vmem:[%s6527_s11 + $0x348] sm:$0xff] }
 0x779   : > { %v5887_v48 = vadd.f32 %v2032_v43, %v1805_v28  ;;  %3573 = vmatprep.subr.bf16.mxu0 %v3572_v36  ;;  %v3592_v28 = vpack.c.bf16 %v2425_v20, %v2423_v21  ;;  %v3594_v43 = vpack.c.bf16 %v2424_v31, %v2422_v29  ;;  %v3596_v49 = vpack.c.bf16 %v2429_v42, %v2427_v41  ;;  %v2438_v21 = vld [vmem:[%s6527_s11 + $0x3a0] sm:$0xff]  ;;  %v2440_v20 = vld [vmem:[%s6527_s11 + $0x3b0] sm:$0xff] }
 0x77a   : > { %v6002_v33 = vadd.f32 %v5879_v45, %v1813_v61  ;;  %v3610_v29 = vpack.c.bf16 %v2440_v20, %v2438_v21  ;;  %v2442_v31 = vld [vmem:[%s6527_s11 + $0x3c0] sm:$0xff] }
 0x77b   : > { %v5896_v50 = vmul.f32 0.70710677, %v5887_v48  ;;  %v2458_v20 = vld [vmem:[%s6527_s11 + $0x440] sm:$0xff] }
 0x77c   : > { %3575 = vmatpush1.bf16.msra.mxu0 %v3574_v51  ;;  %v2426_v51 = vld [vmem:[%s6527_s11 + $0x340] sm:$0xff]  ;;  %v6021_v16 = vmul.f32 0.70710677, %v6002_v33 }
 0x77d   : > { %v2143_v38 = vand.u32 2147483647, %v5896_v50  ;;  %3577 = vmatprep.subr.bf16.mxu0 %v3576_v53  ;;  %v2431_v53 = vld [vmem:[%s6527_s11 + $0x368] sm:$0xff]  ;;  %v3598_v55 = vpack.c.bf16 %v2428_v52, %v2426_v51  ;;  %vm2127_vm8 = vcmp.ge.f32.partialorder %v5896_v50, 0.0  ;;  %v2453_v50 = vld [vmem:[%s6527_s11 + $0x418] sm:$0xff] }
 0x77e   : > { %v2135_v61 = vsel %vm2127_vm8, 1.0, %v3823_v44  ;;  %vm2129_vm10 = vcmp.ge.f32.partialorder %v6021_v16, 0.0 }
 0x77f   : > { %v2151_v60 = vmul.f32 0.3275911, %v2143_v38  ;;  %v2255_v26 = vsub.f32 0.0, %v2143_v38 }
 0x780   : > { %3579 = vmatpush1.bf16.msra.mxu0 %v3578_v40 }
 0x781   : > { %v2159_v4 = vadd.f32 1.0, %v2151_v60  ;;  %3581 = vmatprep.subr.bf16.mxu0 %v3580_v62  ;;  %v2263_v47 = vmul.f32 %v2255_v26, %v2143_v38  ;;  %v1801_v38 = vrot.slane %v5773_v11, %v708_v35  ;;  %v2236_v60 = vadd.f32 0.2548296, %v2228_v46  ;;  %v2435_v35 = vld [vmem:[%s6527_s11 + $0x388] sm:$0xff] }
 0x782   : > { %v3600_v62 = vpack.c.bf16 %v2433_v54, %v2431_v53  ;;  %v3604_v19 = vpack.c.bf16 %v2437_v1, %v2435_v35 }
 0x783   : > { %3793 = vrcp.f32 %v2159_v4  ;;  %v2276_v40 = vmul.f32 1.442695, %v2263_v47  ;;  %v5998_v4 = vadd.f32 %v5874_v39, %v1801_v38  ;;  %v2436_v39 = vld [vmem:[%s6527_s11 + $0x390] sm:$0xff]  ;;  %v2447_v47 = vld [vmem:[%s6527_s11 + $0x3e8] sm:$0xff] }
 0x784   : > { %3583 = vmatpush1.bf16.msra.mxu0 %v3582_v5  ;;  %3795 = vpow2.f32 %v2270_v32  ;;  %v3602_v5 = vpack.c.bf16 %v2432_v0, %v2430_v63  ;;  %v3606_v12 = vpack.c.bf16 %v2436_v39, %v2434_v7  ;;  %v2444_v32 = vld [vmem:[%s6527_s11 + $0x3d0] sm:$0xff]  ;;  %v2457_v7 = vld [vmem:[%s6527_s11 + $0x438] sm:$0xff]  ;;  %v2108_v39 = vmul.f32 0.5, %v5803_v9  ;;  %v2459_v9 = vld [vmem:[%s6527_s11 + $0x448] sm:$0xff] }
 0x785   : > { %3585 = vmatprep.subr.bf16.mxu0 %v3584_v18  ;;  %v2244_v18 = vmul.f32 %v5863_v27, %v2236_v60  ;;  %3797 = vpow2.f32 %v2276_v40  ;;  %v2441_v27 = vld [vmem:[%s6527_s11 + $0x3b8] sm:$0xff]  ;;  %v3614_v52 = vpack.c.bf16 %v2444_v32, %v2442_v31  ;;  %v2451_v60 = vld [vmem:[%s6527_s11 + $0x408] sm:$0xff]  ;;  %v2462_v32 = vld [vmem:[%s6527_s11 + $0x460] sm:$0xff] }
 0x786   : > { %v3608_v17 = vpack.c.bf16 %v2441_v27, %v2439_v8  ;;  %v2111_v8 = vmul.f32 0.5, %v5887_v48  ;;  %v2461_v48 = vld [vmem:[%s6527_s11 + $0x458] sm:$0xff] }
 0x787   : > { %v3628_v21 = vpack.c.bf16 %v2461_v48, %v2459_v9 }
 0x788   : > { %3587 = vmatpush1.bf16.msra.mxu0 %v3586_v34  ;;  %v6018_v34 = vmul.f32 0.70710677, %v5998_v4 }
 0x789   : > { %3589 = vmatprep.subr.bf16.mxu0 %v3588_v13 }
 0x78a   : > { %vm2126_vm9 = vcmp.ge.f32.partialorder %v6018_v34, 0.0 }
 0x78c   : > { %3591 = vmatpush1.bf16.msra.mxu0 %v3590_v22  ;;  %v2443_v22 = vld [vmem:[%s6527_s11 + $0x3c8] sm:$0xff] }
 0x78d   : > { %v5963_v36 = vpop.eup %3793  ;;  %3593 = vmatprep.subr.bf16.mxu0 %v3592_v28  ;;  %v6037_v28 = vand.u32 2147483647, %v6018_v34  ;;  %v3612_v46 = vpack.c.bf16 %v2445_v25, %v2443_v22  ;;  %v2460_v22 = vld [vmem:[%s6527_s11 + $0x450] sm:$0xff]  ;;  %v2463_v25 = vld [vmem:[%s6527_s11 + $0x468] sm:$0xff]  ;;  %v2513_v34 = vld [vmem:[%s6527_s11 + $0x5f8] sm:$0xff] }
 0x78e   : > { %v2183_v15 = vmul.f32 1.0614054, %v5963_v36  ;;  %v3796_v30 = vpop.eup %3795 }
 0x78f   : > { %v2284_v14 = vmul.f32 %v3796_v30, %v2244_v18  ;;  %v3798_v51 = vpop.eup %3797  ;;  %v2150_v53 = vmul.f32 0.3275911, %v6037_v28 }
 0x790   : > { %3595 = vmatpush1.bf16.msra.mxu0 %v3594_v43  ;;  %v2191_v59 = vadd.f32 -1.4531521, %v2183_v15  ;;  %v6047_v43 = vand.u32 2147483647, %v6021_v16 }
 0x791   : > { %3597 = vmatprep.subr.bf16.mxu0 %v3596_v49  ;;  %v2292_v42 = vsub.f32 1.0, %v2284_v14 }
 0x792   : > { %v2199_v3 = vmul.f32 %v5963_v36, %v2191_v59  ;;  %v2153_v38 = vmul.f32 0.3275911, %v6047_v43  ;;  %v2446_v59 = vld [vmem:[%s6527_s11 + $0x3e0] sm:$0xff] }
 0x793   : > { %v2300_v15 = vmul.f32 %v2292_v42, %v2132_v23  ;;  %v2466_v23 = vld [vmem:[%s6527_s11 + $0x480] sm:$0xff] }
 0x794   : > { %3599 = vmatpush1.bf16.msra.mxu0 %v3598_v55  ;;  %v2207_v6 = vadd.f32 1.4214138, %v2199_v3  ;;  %v3616_v55 = vpack.c.bf16 %v2449_v37, %v2447_v47  ;;  %v2161_v1 = vadd.f32 1.0, %v2153_v38  ;;  %v3620_v3 = vpack.c.bf16 %v2453_v50, %v2451_v60  ;;  %v2469_v47 = vld [vmem:[%s6527_s11 + $0x498] sm:$0xff]  ;;  %v2470_v60 = vld [vmem:[%s6527_s11 + $0x4a0] sm:$0xff]  ;;  %v2472_v50 = vld [vmem:[%s6527_s11 + $0x4b0] sm:$0xff] }
 0x795   : > { %3601 = vmatprep.subr.bf16.mxu0 %v3600_v62  ;;  %v2158_v62 = vadd.f32 1.0, %v2150_v53  ;;  %v2308_v35 = vadd.f32 1.0, %v2300_v15  ;;  %v2468_v53 = vld [vmem:[%s6527_s11 + $0x490] sm:$0xff]  ;;  %v2473_v15 = vld [vmem:[%s6527_s11 + $0x4b8] sm:$0xff] }
 0x796   : > { %v2215_v45 = vmul.f32 %v5963_v36, %v2207_v6  ;;  %v2452_v6 = vld [vmem:[%s6527_s11 + $0x410] sm:$0xff] }
 0x797   : > { %3799 = vrcp.f32 %v2158_v62 }
 0x798   : > { %3603 = vmatpush1.bf16.msra.mxu0 %v3602_v5  ;;  %v2223_v13 = vadd.f32 -0.28449672, %v2215_v45  ;;  %v2450_v5 = vld [vmem:[%s6527_s11 + $0x400] sm:$0xff]  ;;  %v2316_v45 = vmul.f32 %v2308_v35, %v2108_v39  ;;  %3801 = vrcp.f32 %v2161_v1 }
 0x799   : > { %3605 = vmatprep.subr.bf16.mxu0 %v3604_v19  ;;  %v2455_v19 = vld [vmem:[%s6527_s11 + $0x428] sm:$0xff]  ;;  %v3622_v27 = vpack.c.bf16 %v2452_v6, %v2450_v5  ;;  %v2474_v1 = vld [vmem:[%s6527_s11 + $0x4c0] sm:$0xff]  ;;  %v2481_v6 = vld [vmem:[%s6527_s11 + $0x4f8] sm:$0xff] }
 0x79a   : > { %v2231_v26 = vmul.f32 %v5963_v36, %v2223_v13  ;;  %v3624_v30 = vpack.c.bf16 %v2457_v7, %v2455_v19  ;;  %v2456_v13 = vld [vmem:[%s6527_s11 + $0x430] sm:$0xff]  ;;  %v2479_v5 = vld [vmem:[%s6527_s11 + $0x4e8] sm:$0xff] }
 0x79b   : > { %v3648_v39 = vpack.c.bf16 %v2481_v6, %v2479_v5 }
 0x79c   : > { %3607 = vmatpush1.bf16.msra.mxu0 %v3606_v12  ;;  %v2239_v41 = vadd.f32 0.2548296, %v2231_v26  ;;  %v2454_v12 = vld [vmem:[%s6527_s11 + $0x420] sm:$0xff]  ;;  %v2465_v26 = vld [vmem:[%s6527_s11 + $0x478] sm:$0xff] }
 0x79d   : > { %3609 = vmatprep.subr.bf16.mxu0 %v3608_v17  ;;  %v3626_v17 = vpack.c.bf16 %v2456_v13, %v2454_v12  ;;  %v3632_v31 = vpack.c.bf16 %v2465_v26, %v2463_v25  ;;  %v2485_v12 = vld [vmem:[%s6527_s11 + $0x518] sm:$0xff]  ;;  %v2487_v25 = vld [vmem:[%s6527_s11 + $0x528] sm:$0xff] }
 0x79e   : > { %v2247_v49 = vmul.f32 %v5963_v36, %v2239_v41  ;;  %v2448_v36 = vld [vmem:[%s6527_s11 + $0x3f0] sm:$0xff]  ;;  %v2489_v26 = vld [vmem:[%s6527_s11 + $0x538] sm:$0xff] }
 0x79f   : > { %v3618_v63 = vpack.c.bf16 %v2448_v36, %v2446_v59  ;;  %v2464_v41 = vld [vmem:[%s6527_s11 + $0x470] sm:$0xff] }
 0x7a0   : > { %3611 = vmatpush1.bf16.msra.mxu0 %v3610_v29  ;;  %v2287_v54 = vmul.f32 %v3798_v51, %v2247_v49  ;;  %v3630_v29 = vpack.c.bf16 %v2460_v22, %v2458_v20  ;;  %v3634_v49 = vpack.c.bf16 %v2464_v41, %v2462_v32  ;;  %v2484_v20 = vld [vmem:[%s6527_s11 + $0x510] sm:$0xff] }
 0x7a1   : > { %3613 = vmatprep.subr.bf16.mxu0 %v3612_v46  ;;  %v6117_v42 = vpop.eup %3799  ;;  %v2467_v46 = vld [vmem:[%s6527_s11 + $0x488] sm:$0xff] }
 0x7a2   : > { %v2295_v40 = vsub.f32 1.0, %v2287_v54  ;;  %v6125_v37 = vpop.eup %3801  ;;  %v2182_v51 = vmul.f32 1.0614054, %v6117_v42  ;;  %v2471_v54 = vld [vmem:[%s6527_s11 + $0x4a8] sm:$0xff] }
 0x7a3   : > { %v2185_v38 = vmul.f32 1.0614054, %v6125_v37  ;;  %v3640_v36 = vpack.c.bf16 %v2473_v15, %v2471_v54 }
 0x7a4   : > { %3615 = vmatpush1.bf16.msra.mxu0 %v3614_v52  ;;  %v2303_v0 = vmul.f32 %v2295_v40, %v2135_v61  ;;  %v3636_v52 = vpack.c.bf16 %v2469_v47, %v2467_v46  ;;  %v2190_v59 = vadd.f32 -1.4531521, %v2182_v51  ;;  %v2475_v40 = vld [vmem:[%s6527_s11 + $0x4c8] sm:$0xff]  ;;  %v2477_v61 = vld [vmem:[%s6527_s11 + $0x4d8] sm:$0xff]  ;;  %v3656_v46 = vpack.c.bf16 %v2489_v26, %v2487_v25  ;;  %v2488_v47 = vld [vmem:[%s6527_s11 + $0x530] sm:$0xff] }
 0x7a5   : > { %3617 = vmatprep.subr.bf16.mxu0 %v3616_v55  ;;  %v3638_v55 = vpack.c.bf16 %v2468_v53, %v2466_v23  ;;  %v2193_v62 = vadd.f32 -1.4531521, %v2185_v38  ;;  %v3644_v35 = vpack.c.bf16 %v2477_v61, %v2475_v40  ;;  %v2491_v51 = vld [vmem:[%s6527_s11 + $0x548] sm:$0xff]  ;;  %v1808_v53 = vsub.s32 6, %v4126_v56  ;;  %v2497_v56 = vld [vmem:[%s6527_s11 + $0x578] sm:$0xff]  ;;  %v2506_v26 = vld [vmem:[%s6527_s11 + $0x5c0] sm:$0xff] }
 0x7a6   : > { %v2311_v18 = vadd.f32 1.0, %v2303_v0  ;;  %v2198_v0 = vmul.f32 %v6117_v42, %v2190_v59  ;;  %v2492_v59 = vld [vmem:[%s6527_s11 + $0x550] sm:$0xff] }
 0x7a8   : > { %3619 = vmatpush1.bf16.msra.mxu0 %v3618_v63  ;;  %v2319_v14 = vmul.f32 %v2311_v18, %v2111_v8  ;;  %v3642_v63 = vpack.c.bf16 %v2472_v50, %v2470_v60  ;;  %v2201_v18 = vmul.f32 %v6125_v37, %v2193_v62  ;;  %v2206_v7 = vadd.f32 1.4214138, %v2198_v0  ;;  %v2478_v8 = vld [vmem:[%s6527_s11 + $0x4e0] sm:$0xff]  ;;  %v2496_v0 = vld [vmem:[%s6527_s11 + $0x570] sm:$0xff] }
 0x7a9   : > { %3621 = vmatprep.subr.bf16.mxu0 %v3620_v3  ;;  %v2476_v3 = vld [vmem:[%s6527_s11 + $0x4d0] sm:$0xff]  ;;  %v1809_v50 = vrot.slane %v5773_v11, %v1808_v53  ;;  %v2501_v11 = vld [vmem:[%s6527_s11 + $0x598] sm:$0xff] }
 0x7aa   : > { %v3646_v19 = vpack.c.bf16 %v2476_v3, %v2474_v1  ;;  %v2209_v13 = vadd.f32 1.4214138, %v2201_v18  ;;  %v2214_v48 = vmul.f32 %v6117_v42, %v2206_v7  ;;  %v2500_v7 = vld [vmem:[%s6527_s11 + $0x590] sm:$0xff] }
 0x7ab   : > { %2714 = vmatmul.mubr.f32.vlgmr.msra.gmra.mrb[8].mxu0 %v2316_v45  ;;  %v2254_v45 = vsub.f32 0.0, %v6037_v28  ;;  %v6238_v3 = vadd.f32 %v5876_v24, %v1809_v50  ;;  %v2505_v24 = vld [vmem:[%s6527_s11 + $0x5b8] sm:$0xff] }
 0x7ac   : > { %3623 = vmatpush1.bf16.msra.mxu0 %v3622_v27  ;;  %2784 = vmatprep.mubr.f32.mxu0 %v2319_v14  ;;  %v2480_v27 = vld [vmem:[%s6527_s11 + $0x4f0] sm:$0xff]  ;;  %v2257_v14 = vsub.f32 0.0, %v6047_v43  ;;  %v2222_v41 = vadd.f32 -0.28449672, %v2214_v48  ;;  %v2509_v48 = vld [vmem:[%s6527_s11 + $0x5d8] sm:$0xff] }
 0x7ad   : > { %3625 = vmatprep.subr.bf16.mxu0 %v3624_v30  ;;  %v2483_v30 = vld [vmem:[%s6527_s11 + $0x508] sm:$0xff]  ;;  %v3650_v9 = vpack.c.bf16 %v2480_v27, %v2478_v8  ;;  %v2262_v22 = vmul.f32 %v2254_v45, %v6037_v28  ;;  %v2486_v28 = vld [vmem:[%s6527_s11 + $0x520] sm:$0xff]  ;;  %v6255_v27 = vmul.f32 0.70710677, %v6238_v3  ;;  %v2521_v50 = vld [vmem:[%s6527_s11 + $0x638] sm:$0xff] }
 0x7ae   : > { %v3658_v54 = vpack.c.bf16 %v2488_v47, %v2486_v28  ;;  %v2230_v15 = vmul.f32 %v6117_v42, %v2222_v41  ;;  %v2134_v41 = vsel %vm2126_vm9, 1.0, %v3823_v44 }
 0x7af   : > { %vm2128_vm11 = vcmp.ge.f32.partialorder %v6255_v27, 0.0 }
 0x7b0   : > { %3627 = vmatpush1.bf16.msra.mxu0 %v3626_v17  ;;  %v3652_v17 = vpack.c.bf16 %v2485_v12, %v2483_v30  ;;  %v2238_v61 = vadd.f32 0.2548296, %v2230_v15 }
 0x7b1   : > { %3629 = vmatprep.subr.bf16.mxu0 %v3628_v21  ;;  %v2482_v21 = vld [vmem:[%s6527_s11 + $0x500] sm:$0xff] }
 0x7b2   : > { %v3654_v32 = vpack.c.bf16 %v2484_v20, %v2482_v21  ;;  %v2246_v6 = vmul.f32 %v6117_v42, %v2238_v61  ;;  %v6270_v21 = vand.u32 2147483647, %v6255_v27  ;;  %v2113_v61 = vmul.f32 0.5, %v6002_v33  ;;  %v2525_v33 = vld [vmem:[%s6527_s11 + $0x658] sm:$0xff] }
 0x7b3   : > { %v2136_v27 = vsel %vm2128_vm11, 1.0, %v3823_v44 }
 0x7b4   : > { %3631 = vmatpush1.bf16.msra.mxu0 %v3630_v29  ;;  %v2217_v29 = vmul.f32 %v6125_v37, %v2209_v13 }
 0x7b5   : > { %3633 = vmatprep.subr.bf16.mxu0 %v3632_v31  ;;  %v2265_v31 = vmul.f32 %v2257_v14, %v6047_v43  ;;  %v2493_v43 = vld [vmem:[%s6527_s11 + $0x558] sm:$0xff]  ;;  %v2502_v14 = vld [vmem:[%s6527_s11 + $0x5a0] sm:$0xff] }
 0x7b6   : > { %v3660_v38 = vpack.c.bf16 %v2493_v43, %v2491_v51  ;;  %v2510_v51 = vld [vmem:[%s6527_s11 + $0x5e0] sm:$0xff]  ;;  %v2512_v43 = vld [vmem:[%s6527_s11 + $0x5f0] sm:$0xff] }
 0x7b7   : > { %v2280_v23 = vmul.f32 1.442695, %v2265_v31  ;;  %v2511_v31 = vld [vmem:[%s6527_s11 + $0x5e8] sm:$0xff]  ;;  %v3682_v15 = vpack.c.bf16 %v2512_v43, %v2510_v51  ;;  %v2545_v43 = vld [vmem:[%s6527_s11 + $0x6f8] sm:$0xff] }
 0x7b8   : > { %3635 = vmatpush1.bf16.msra.mxu0 %v3634_v49  ;;  %v2274_v49 = vmul.f32 1.442695, %v2262_v22  ;;  %v3680_v16 = vpack.c.bf16 %v2513_v34, %v2511_v31  ;;  %v2534_v31 = vld [vmem:[%s6527_s11 + $0x6a0] sm:$0xff]  ;;  %v2536_v34 = vld [vmem:[%s6527_s11 + $0x6b0] sm:$0xff]  ;;  %v2543_v51 = vld [vmem:[%s6527_s11 + $0x6e8] sm:$0xff] }
 0x7b9   : > { %3637 = vmatprep.subr.bf16.mxu0 %v3636_v52  ;;  %v2225_v52 = vadd.f32 -0.28449672, %v2217_v29  ;;  %v2508_v29 = vld [vmem:[%s6527_s11 + $0x5d0] sm:$0xff] }
 0x7ba   : > { %3803 = vpow2.f32 %v2274_v49  ;;  %v3678_v28 = vpack.c.bf16 %v2508_v29, %v2506_v26  ;;  %v2137_v49 = vsel %vm2129_vm10, 1.0, %v3823_v44  ;;  %v2112_v44 = vmul.f32 0.5, %v6238_v3 }
 0x7bb   : > { %v2233_v60 = vmul.f32 %v6125_v37, %v2225_v52  ;;  %3805 = vpow2.f32 %v2280_v23  ;;  %v2515_v52 = vld [vmem:[%s6527_s11 + $0x608] sm:$0xff]  ;;  %v2517_v23 = vld [vmem:[%s6527_s11 + $0x618] sm:$0xff] }
 0x7bc   : > { %3639 = vmatpush1.bf16.msra.mxu0 %v3638_v55  ;;  %v2490_v55 = vld [vmem:[%s6527_s11 + $0x540] sm:$0xff] }
 0x7bd   : > { %3641 = vmatprep.subr.bf16.mxu0 %v3640_v36  ;;  %v2495_v36 = vld [vmem:[%s6527_s11 + $0x568] sm:$0xff]  ;;  %v3662_v40 = vpack.c.bf16 %v2492_v59, %v2490_v55  ;;  %v2241_v1 = vadd.f32 0.2548296, %v2233_v60  ;;  %v3684_v55 = vpack.c.bf16 %v2517_v23, %v2515_v52  ;;  %v2514_v59 = vld [vmem:[%s6527_s11 + $0x600] sm:$0xff] }
 0x7be   : > { %v3664_v62 = vpack.c.bf16 %v2497_v56, %v2495_v36  ;;  %v2516_v36 = vld [vmem:[%s6527_s11 + $0x610] sm:$0xff]  ;;  %v2519_v60 = vld [vmem:[%s6527_s11 + $0x628] sm:$0xff] }
 0x7bf   : > { %v2249_v42 = vmul.f32 %v6125_v37, %v2241_v1  ;;  %v2507_v37 = vld [vmem:[%s6527_s11 + $0x5c8] sm:$0xff] }
 0x7c0   : > { %3643 = vmatpush1.bf16.msra.mxu0 %v3642_v63  ;;  %v2494_v63 = vld [vmem:[%s6527_s11 + $0x560] sm:$0xff]  ;;  %v3676_v25 = vpack.c.bf16 %v2509_v48, %v2507_v37 }
 0x7c1   : > { %3645 = vmatprep.subr.bf16.mxu0 %v3644_v35  ;;  %v2499_v35 = vld [vmem:[%s6527_s11 + $0x588] sm:$0xff]  ;;  %v3666_v5 = vpack.c.bf16 %v2496_v0, %v2494_v63  ;;  %v3688_v0 = vpack.c.bf16 %v2521_v50, %v2519_v60  ;;  %v2530_v48 = vld [vmem:[%s6527_s11 + $0x680] sm:$0xff] }
 0x7c2   : > { %v3668_v18 = vpack.c.bf16 %v2501_v11, %v2499_v35  ;;  %v2518_v35 = vld [vmem:[%s6527_s11 + $0x620] sm:$0xff]  ;;  %v2520_v11 = vld [vmem:[%s6527_s11 + $0x630] sm:$0xff] }
 0x7c3   : > { %v2546_v50 = vld [vmem:[%s6527_s11 + $0x700] sm:$0xff] }
 0x7c4   : > { %3647 = vmatpush1.bf16.msra.mxu0 %v3646_v19  ;;  %v2498_v19 = vld [vmem:[%s6527_s11 + $0x580] sm:$0xff]  ;;  %v3804_v8 = vpop.eup %3803 }
 0x7c5   : > { %3649 = vmatprep.subr.bf16.mxu0 %v3648_v39  ;;  %v2503_v39 = vld [vmem:[%s6527_s11 + $0x5a8] sm:$0xff]  ;;  %v3670_v45 = vpack.c.bf16 %v2500_v7, %v2498_v19  ;;  %v3806_v30 = vpop.eup %3805  ;;  %v2286_v12 = vmul.f32 %v3804_v8, %v2246_v6  ;;  %v2524_v19 = vld [vmem:[%s6527_s11 + $0x650] sm:$0xff]  ;;  %v2526_v8 = vld [vmem:[%s6527_s11 + $0x660] sm:$0xff] }
 0x7c6   : > { %v3672_v13 = vpack.c.bf16 %v2505_v24, %v2503_v39  ;;  %v2527_v7 = vld [vmem:[%s6527_s11 + $0x668] sm:$0xff]  ;;  %v2529_v39 = vld [vmem:[%s6527_s11 + $0x678] sm:$0xff] }
 0x7c7   : > { %v2294_v22 = vsub.f32 1.0, %v2286_v12  ;;  %v2531_v12 = vld [vmem:[%s6527_s11 + $0x688] sm:$0xff] }
 0x7c8   : > { %3651 = vmatpush1.bf16.msra.mxu0 %v3650_v9  ;;  %v2504_v9 = vld [vmem:[%s6527_s11 + $0x5b0] sm:$0xff] }
 0x7c9   : > { %3653 = vmatprep.subr.bf16.mxu0 %v3652_v17  ;;  %v2289_v17 = vmul.f32 %v3806_v30, %v2249_v42  ;;  %v3674_v20 = vpack.c.bf16 %v2504_v9, %v2502_v14  ;;  %v2302_v47 = vmul.f32 %v2294_v22, %v2134_v41  ;;  %v3696_v42 = vpack.c.bf16 %v2529_v39, %v2527_v7  ;;  %v2537_v22 = vld [vmem:[%s6527_s11 + $0x6b8] sm:$0xff]  ;;  %v2554_v7 = vld [vmem:[%s6527_s11 + $0x740] sm:$0xff]  ;;  %v2556_v39 = vld [vmem:[%s6527_s11 + $0x750] sm:$0xff] }
 0x7ca   : > { %v2541_v41 = vld [vmem:[%s6527_s11 + $0x6d8] sm:$0xff] }
 0x7cc   : > { %3655 = vmatpush1.bf16.msra.mxu0 %v3654_v32  ;;  %v2297_v32 = vsub.f32 1.0, %v2289_v17  ;;  %v2532_v17 = vld [vmem:[%s6527_s11 + $0x690] sm:$0xff] }
 0x7cd   : > { %3657 = vmatprep.subr.bf16.mxu0 %v3656_v46  ;;  %v2152_v46 = vmul.f32 0.3275911, %v6270_v21 }
 0x7ce   : > { %v2305_v53 = vmul.f32 %v2297_v32, %v2137_v49  ;;  %v2539_v32 = vld [vmem:[%s6527_s11 + $0x6c8] sm:$0xff]  ;;  %v2538_v49 = vld [vmem:[%s6527_s11 + $0x6c0] sm:$0xff] }
 0x7d0   : > { %3659 = vmatpush1.bf16.msra.mxu0 %v3658_v54  ;;  %v2160_v54 = vadd.f32 1.0, %v2152_v46  ;;  %v2313_v56 = vadd.f32 1.0, %v2305_v53  ;;  %v3706_v46 = vpack.c.bf16 %v2536_v34, %v2534_v31  ;;  %v3712_v53 = vpack.c.bf16 %v2545_v43, %v2543_v51  ;;  %v2570_v43 = vld [vmem:[%s6527_s11 + $0x7c0] sm:$0xff] }
 0x7d1   : > { %3661 = vmatprep.subr.bf16.mxu0 %v3660_v38  ;;  %v2310_v38 = vadd.f32 1.0, %v2302_v47  ;;  %v3708_v47 = vpack.c.bf16 %v2541_v41, %v2539_v32  ;;  %v2566_v41 = vld [vmem:[%s6527_s11 + $0x7a0] sm:$0xff] }
 0x7d2   : > { %3807 = vrcp.f32 %v2160_v54  ;;  %v2321_v1 = vmul.f32 %v2313_v56, %v2113_v61  ;;  %v2542_v54 = vld [vmem:[%s6527_s11 + $0x6e0] sm:$0xff] }
 0x7d4   : > { %3663 = vmatpush1.bf16.msra.mxu0 %v3662_v40  ;;  %v2110_v40 = vmul.f32 0.5, %v5998_v4  ;;  %v2523_v4 = vld [vmem:[%s6527_s11 + $0x648] sm:$0xff] }
 0x7d5   : > { %3665 = vmatprep.subr.bf16.mxu0 %v3664_v62  ;;  %v3686_v62 = vpack.c.bf16 %v2516_v36, %v2514_v59  ;;  %v3692_v6 = vpack.c.bf16 %v2525_v33, %v2523_v4  ;;  %v2549_v59 = vld [vmem:[%s6527_s11 + $0x718] sm:$0xff]  ;;  %v2555_v33 = vld [vmem:[%s6527_s11 + $0x748] sm:$0xff] }
 0x7d6   : > { %v2318_v63 = vmul.f32 %v2310_v38, %v2110_v40  ;;  %v2256_v38 = vsub.f32 0.0, %v6270_v21  ;;  %v2548_v40 = vld [vmem:[%s6527_s11 + $0x710] sm:$0xff] }
 0x7d8   : > { %3667 = vmatpush1.bf16.msra.mxu0 %v3666_v5  ;;  %v3690_v5 = vpack.c.bf16 %v2520_v11, %v2518_v35  ;;  %v2264_v61 = vmul.f32 %v2256_v38, %v6270_v21  ;;  %v2552_v21 = vld [vmem:[%s6527_s11 + $0x730] sm:$0xff] }
 0x7d9   : > { %3669 = vmatprep.subr.bf16.mxu0 %v3668_v18  ;;  %v2522_v18 = vld [vmem:[%s6527_s11 + $0x640] sm:$0xff] }
 0x7da   : > { %v3694_v24 = vpack.c.bf16 %v2524_v19, %v2522_v18  ;;  %v2278_v4 = vmul.f32 1.442695, %v2264_v61 }
 0x7dc   : > { %3671 = vmatpush1.bf16.msra.mxu0 %v3670_v45  ;;  %v2528_v45 = vld [vmem:[%s6527_s11 + $0x670] sm:$0xff]  ;;  %v6345_v30 = vpop.eup %3807  ;;  %3809 = vpow2.f32 %v2278_v4 }
 0x7dd   : > { %3673 = vmatprep.subr.bf16.mxu0 %v3672_v13  ;;  %v2533_v13 = vld [vmem:[%s6527_s11 + $0x698] sm:$0xff]  ;;  %v3698_v14 = vpack.c.bf16 %v2528_v45, %v2526_v8  ;;  %v2184_v9 = vmul.f32 1.0614054, %v6345_v30  ;;  %v3726_v8 = vpack.c.bf16 %v2556_v39, %v2554_v7 }
 0x7de   : > { %v3700_v37 = vpack.c.bf16 %v2533_v13, %v2531_v12  ;;  %v2558_v13 = vld [vmem:[%s6527_s11 + $0x760] sm:$0xff] }
 0x7df   : > { %v2192_v26 = vadd.f32 -1.4531521, %v2184_v9  ;;  %v2563_v9 = vld [vmem:[%s6527_s11 + $0x788] sm:$0xff] }
 0x7e0   : > { %3675 = vmatpush1.bf16.msra.mxu0 %v3674_v20  ;;  %v2535_v20 = vld [vmem:[%s6527_s11 + $0x6a8] sm:$0xff] }
 0x7e1   : > { %3677 = vmatprep.subr.bf16.mxu0 %v3676_v25  ;;  %v3702_v25 = vpack.c.bf16 %v2532_v17, %v2530_v48  ;;  %v3704_v29 = vpack.c.bf16 %v2537_v22, %v2535_v20  ;;  %v2562_v22 = vld [vmem:[%s6527_s11 + $0x780] sm:$0xff] }
 0x7e4   : > { %3679 = vmatpush1.bf16.msra.mxu0 %v3678_v28  ;;  %v2200_v28 = vmul.f32 %v6345_v30, %v2192_v26  ;;  %v2567_v26 = vld [vmem:[%s6527_s11 + $0x7a8] sm:$0xff] }
 0x7e5   : > { %3681 = vmatprep.subr.bf16.mxu0 %v3680_v16  ;;  %v2540_v16 = vld [vmem:[%s6527_s11 + $0x6d0] sm:$0xff] }
 0x7e6   : > { %v3710_v52 = vpack.c.bf16 %v2540_v16, %v2538_v49  ;;  %v2208_v23 = vadd.f32 1.4214138, %v2200_v28  ;;  %v3810_v31 = vpop.eup %3809  ;;  %v2571_v28 = vld [vmem:[%s6527_s11 + $0x7c8] sm:$0xff] }
 0x7e8   : > { %3683 = vmatpush1.bf16.msra.mxu0 %v3682_v15  ;;  %v2544_v15 = vld [vmem:[%s6527_s11 + $0x6f0] sm:$0xff]  ;;  %v2216_v56 = vmul.f32 %v6345_v30, %v2208_v23  ;;  %v2575_v23 = vld [vmem:[%s6527_s11 + $0x7e8] sm:$0xff] }
 0x7e9   : > { %3685 = vmatprep.subr.bf16.mxu0 %v3684_v55  ;;  %v2547_v55 = vld [vmem:[%s6527_s11 + $0x708] sm:$0xff]  ;;  %v3714_v36 = vpack.c.bf16 %v2544_v15, %v2542_v54 }
 0x7ea   : > { %v3716_v60 = vpack.c.bf16 %v2549_v59, %v2547_v55  ;;  %v2224_v35 = vadd.f32 -0.28449672, %v2216_v56  ;;  %v2574_v55 = vld [vmem:[%s6527_s11 + $0x7e0] sm:$0xff]  ;;  %v2576_v59 = vld [vmem:[%s6527_s11 + $0x7f0] sm:$0xff] }
 0x7eb   : > { %2785 = vmatmul.mubr.f32.vlgmr.msra.gmra.mrb[8].mxu0 %v2318_v63  ;;  %v2553_v63 = vld [vmem:[%s6527_s11 + $0x738] sm:$0xff] }
 0x7ec   : > { %3687 = vmatpush1.bf16.msra.mxu0 %v3686_v62  ;;  %2855 = vmatprep.mubr.f32.mxu0 %v2321_v1  ;;  %v2551_v62 = vld [vmem:[%s6527_s11 + $0x728] sm:$0xff]  ;;  %v2550_v1 = vld [vmem:[%s6527_s11 + $0x720] sm:$0xff]  ;;  %v2232_v18 = vmul.f32 %v6345_v30, %v2224_v35 }
 0x7ed   : > { %3689 = vmatprep.subr.bf16.mxu0 %v3688_v0  ;;  %v3718_v0 = vpack.c.bf16 %v2548_v40, %v2546_v50  ;;  %v3720_v11 = vpack.c.bf16 %v2553_v63, %v2551_v62  ;;  %v2864_v50 = vld [vmem:[%s6528_s12] sm:$0x3] }
 0x7ee   : > { %v2240_v45 = vadd.f32 0.2548296, %v2232_v18  ;;  %v2869_v40 = vrot.slane %v2864_v50, %v4132_v58  ;;  %v2873_v62 = vrot.slane %v2864_v50, %v4129_v57 }
 0x7f0   : > { %3691 = vmatpush1.bf16.msra.mxu0 %v3690_v5  ;;  %v2557_v5 = vld [vmem:[%s6527_s11 + $0x758] sm:$0xff]  ;;  %v2248_v17 = vmul.f32 %v6345_v30, %v2240_v45 }
 0x7f1   : > { %3693 = vmatprep.subr.bf16.mxu0 %v3692_v6  ;;  %v3722_v6 = vpack.c.bf16 %v2552_v21, %v2550_v1  ;;  %v3724_v19 = vpack.c.bf16 %v2557_v5, %v2555_v33 }
 0x7f2   : > { %v2288_v34 = vmul.f32 %v3810_v31, %v2248_v17 }
 0x7f4   : > { %3695 = vmatpush1.bf16.msra.mxu0 %v3694_v24  ;;  %v2559_v24 = vld [vmem:[%s6527_s11 + $0x768] sm:$0xff]  ;;  %v2296_v16 = vsub.f32 1.0, %v2288_v34 }
 0x7f5   : > { %3697 = vmatprep.subr.bf16.mxu0 %v3696_v42  ;;  %v2561_v42 = vld [vmem:[%s6527_s11 + $0x778] sm:$0xff] }
 0x7f6   : > { %v3728_v12 = vpack.c.bf16 %v2561_v42, %v2559_v24  ;;  %v2304_v15 = vmul.f32 %v2296_v16, %v2136_v27 }
 0x7f8   : > { %3699 = vmatpush1.bf16.msra.mxu0 %v3698_v14  ;;  %v2560_v14 = vld [vmem:[%s6527_s11 + $0x770] sm:$0xff]  ;;  %v2312_v56 = vadd.f32 1.0, %v2304_v15 }
 0x7f9   : > { %3701 = vmatprep.subr.bf16.mxu0 %v3700_v37  ;;  %v2565_v37 = vld [vmem:[%s6527_s11 + $0x798] sm:$0xff]  ;;  %v3730_v48 = vpack.c.bf16 %v2560_v14, %v2558_v13 }
 0x7fa   : > { %v3732_v20 = vpack.c.bf16 %v2565_v37, %v2563_v9 }
 0x7fc   : > { %3703 = vmatpush1.bf16.msra.mxu0 %v3702_v25  ;;  %v2564_v25 = vld [vmem:[%s6527_s11 + $0x790] sm:$0xff] }
 0x7fd   : > { %3705 = vmatprep.subr.bf16.mxu0 %v3704_v29  ;;  %v2569_v29 = vld [vmem:[%s6527_s11 + $0x7b8] sm:$0xff]  ;;  %v3734_v30 = vpack.c.bf16 %v2564_v25, %v2562_v22 }
 0x7fe   : > { %v3736_v32 = vpack.c.bf16 %v2569_v29, %v2567_v26 }
 0x800   : > { %3707 = vmatpush1.bf16.msra.mxu0 %v3706_v46  ;;  %v2568_v46 = vld [vmem:[%s6527_s11 + $0x7b0] sm:$0xff] }
 0x801   : > { %3709 = vmatprep.subr.bf16.mxu0 %v3708_v47  ;;  %v2573_v47 = vld [vmem:[%s6527_s11 + $0x7d8] sm:$0xff]  ;;  %v3738_v49 = vpack.c.bf16 %v2568_v46, %v2566_v41 }
 0x802   : > { %v3740_v51 = vpack.c.bf16 %v2573_v47, %v2571_v28 }
 0x804   : > { %3711 = vmatpush1.bf16.msra.mxu0 %v3710_v52  ;;  %v2572_v52 = vld [vmem:[%s6527_s11 + $0x7d0] sm:$0xff] }
 0x805   : > { %3713 = vmatprep.subr.bf16.mxu0 %v3712_v53  ;;  %v2577_v53 = vld [vmem:[%s6527_s11 + $0x7f8] sm:$0xff]  ;;  %v3742_v54 = vpack.c.bf16 %v2572_v52, %v2570_v43 }
 0x806   : > { %v3744_v38 = vpack.c.bf16 %v2577_v53, %v2575_v23 }
 0x808   : > { %3715 = vmatpush1.bf16.msra.mxu0 %v3714_v36  ;;  %v3746_v36 = vpack.c.bf16 %v2576_v59, %v2574_v55 }
 0x809   : > { %3717 = vmatprep.subr.bf16.mxu0 %v3716_v60  ;;  %v2320_v60 = vmul.f32 %v2312_v56, %v2112_v44 }
 0x80c   : > { %3719 = vmatpush1.bf16.msra.mxu0 %v3718_v0 }
 0x80d   : > { %3721 = vmatprep.subr.bf16.mxu0 %v3720_v11 }
 0x810   : > { %3723 = vmatpush1.bf16.msra.mxu0 %v3722_v6 }
 0x811   : > { %3725 = vmatprep.subr.bf16.mxu0 %v3724_v19 }
 0x814   : > { %3727 = vmatpush1.bf16.msra.mxu0 %v3726_v8 }
 0x815   : > { %3729 = vmatprep.subr.bf16.mxu0 %v3728_v12 }
 0x818   : > { %3731 = vmatpush1.bf16.msra.mxu0 %v3730_v48 }
 0x819   : > { %3733 = vmatprep.subr.bf16.mxu0 %v3732_v20 }
 0x81c   : > { %3735 = vmatpush1.bf16.msra.mxu0 %v3734_v30 }
 0x81d   : > { %3737 = vmatprep.subr.bf16.mxu0 %v3736_v32 }
 0x820   : > { %3739 = vmatpush1.bf16.msra.mxu0 %v3738_v49 }
 0x821   : > { %3741 = vmatprep.subr.bf16.mxu0 %v3740_v51 }
 0x824   : > { %3743 = vmatpush1.bf16.msra.mxu0 %v3742_v54 }
 0x825   : > { %3745 = vmatprep.subr.bf16.mxu0 %v3744_v38 }
 0x828   : > { %3747 = vmatpush1.bf16.msra.mxu0 %v3746_v36 }
 0x82b   : > { %2856 = vmatmul.mubr.f32.vlgmr.msra.gmra.mrb[8].mxu0 %v2320_v60 }
 0x8fe   : > { %v2857_v61 = vpop.f32.mrb[8].mxu0 }
 0x8ff   : > { %v2862_v63 = vadd.f32 %v2857_v61, %v5000_v10  ;;  %v2859_v0 = vpop.f32.mrb[9].mxu0 }
 0x900   : > { %v2863_v3 = vadd.f32 %v2859_v0, %v5002_v2 }
 0x901   : > { %v2876_v35 = vadd.f32 %v2869_v40, %v2862_v63 }
 0x902   : > { %v2877_v11 = vadd.f32 %v2873_v62, %v2863_v3 }
 0x903   : > { %2878 = vst [vmem:[%s440_s18] sm:$0x1f] %v2876_v35 }
 0x904   : > { %2879 = vst [vmem:[%s440_s18 + $0x8] sm:$0x1f] %v2877_v11 }
 0x905 PF: > { %s23_s25 = sadd.s32 1, %s3819_s25  }
 0x906   : > { %p20_p4 = scmp.ge.s32.totalorder %s23_s25, 4  }
 0x908   :  { %22 = sbr.rel (!%p20_p4) target bundleno = 1 (0x1), region = 102 }

</bundles_post_ra>
